<compile_context>
chip_gen: v7x
topology: tpu7x:2x2x1
jax: 0.10.0
libtpu: 0.0.40
codegen_flags: <defaults>
</compile_context>

<pallas_src>
import jax
import jax.numpy as jnp
import numpy as np
from jax.experimental import pallas as pl
from jax.experimental.pallas import tpu as pltpu

KH = KW = 5
PAD = 2
C1 = 32          # both convs in Basic_Block produce 32 channels


def _basic_block_kernel(x_ref, w1_ref, b1_ref, w2_ref, b2_ref, o_ref,
                        xp_ref, col1_ref, y1p_ref, col2_ref, y2_ref, pw_ref):
    # x_ref  : (1, H, W, Cin)  f32   one image
    # w1_ref : (25*Cin, 32)    bf16  conv1 weights, (dy,dx,ci) flattened
    # b1_ref : (1, 32)         f32
    # w2_ref : (25*32, 32)     bf16  conv2 weights
    # b2_ref : (1, 32)         f32
    # o_ref  : (1, H/2, W/2, 32) f32
    # scratch: xp (padded input), col1/col2 (im2col), y1p (padded conv1 out),
    #          y2 (conv2 out), pw (W-pooled) -- all VMEM resident.
    _, H, W, Cin = x_ref.shape
    _, Ho, Wo, C = o_ref.shape
    HW = H * W

    # ---------------- conv1: pad -> im2col -> one MXU matmul -> bias+ReLU ----
    xp_ref[...] = jnp.zeros_like(xp_ref)                 # zero halo
    xp_ref[PAD:PAD + H, PAD:PAD + W, :] = x_ref[0]
    k = 0
    for dy in range(KH):
        for dx in range(KW):
            col1_ref[:, k * Cin:(k + 1) * Cin] = (
                xp_ref[dy:dy + H, dx:dx + W, :]
                .reshape(HW, Cin).astype(jnp.bfloat16))
            k += 1
    acc1 = jnp.dot(col1_ref[...], w1_ref[...],           # (HW, 100)@(100, 32)
                   preferred_element_type=jnp.float32)
    y1 = jnp.maximum(acc1 + b1_ref[...], 0.0)            # f32 (HW, 32)

    # TODO(synk): reg_func(drop) in the reference source is undefined; treated
    # as eval-mode dropout (identity).

    # ---------------- conv2: pad (in VMEM) -> im2col -> one matmul -----------
    y1p_ref[...] = jnp.zeros_like(y1p_ref)
    y1p_ref[PAD:PAD + H, PAD:PAD + W, :] = y1.reshape(H, W, C)
    k = 0
    for dy in range(KH):
        for dx in range(KW):
            col2_ref[:, k * C:(k + 1) * C] = (
                y1p_ref[dy:dy + H, dx:dx + W, :]
                .reshape(HW, C).astype(jnp.bfloat16))
            k += 1
    acc2 = jnp.dot(col2_ref[...], w2_ref[...],           # (HW, 800)@(800, 32)
                   preferred_element_type=jnp.float32)
    y2_ref[...] = jnp.maximum(acc2 + b2_ref[...], 0.0).reshape(H, W, C)

    # ---------------- 2x2 max pool, entirely in VMEM -------------------------
    # pool along W (stride-2 sublane reads), then along H (stride-2 outer reads)
    pw_ref[...] = jnp.maximum(y2_ref[:, pl.ds(0, Wo, stride=2), :],
                              y2_ref[:, pl.ds(1, Wo, stride=2), :])
    pooled = jnp.maximum(pw_ref[pl.ds(0, Ho, stride=2), :, :],
                         pw_ref[pl.ds(1, Ho, stride=2), :, :])      # (Ho,Wo,C)
    o_ref[...] = pooled.reshape(1, Ho, Wo, C)


@jax.jit
def basic_block_forward(x_nchw, params):
    N, Cin, H, W = x_nchw.shape
    Ho, Wo = H // 2, W // 2                               # assumes even H, W
    x = jnp.transpose(x_nchw, (0, 2, 3, 1))               # NCHW -> NHWC
    w1c = params["w1"].reshape(KH * KW * Cin, C1).astype(jnp.bfloat16)
    w2c = params["w2"].reshape(KH * KW * C1, C1).astype(jnp.bfloat16)
    b1 = params["b1"].reshape(1, C1)
    b2 = params["b2"].reshape(1, C1)

    out_nhwc = pl.pallas_call(
        _basic_block_kernel,
        out_shape=jax.ShapeDtypeStruct((N, Ho, Wo, C1), jnp.float32),
        grid_spec=pltpu.PrefetchScalarGridSpec(
            num_scalar_prefetch=0,
            grid=(N,),                                    # parallel over batch
            in_specs=[
                pl.BlockSpec((1, H, W, Cin), lambda n: (n, 0, 0, 0)),
                pl.BlockSpec((KH * KW * Cin, C1), lambda n: (0, 0)),
                pl.BlockSpec((1, C1), lambda n: (0, 0)),
                pl.BlockSpec((KH * KW * C1, C1), lambda n: (0, 0)),
                pl.BlockSpec((1, C1), lambda n: (0, 0)),
            ],
            out_specs=pl.BlockSpec((1, Ho, Wo, C1), lambda n: (n, 0, 0, 0)),
            scratch_shapes=[
                pltpu.VMEM((H + 2 * PAD, W + 2 * PAD, Cin), jnp.float32),
                pltpu.VMEM((H * W, KH * KW * Cin), jnp.bfloat16),
                pltpu.VMEM((H + 2 * PAD, W + 2 * PAD, C1), jnp.float32),
                pltpu.VMEM((H * W, KH * KW * C1), jnp.bfloat16),
                pltpu.VMEM((H, W, C1), jnp.float32),
                pltpu.VMEM((H, Wo, C1), jnp.float32),
            ],
        ),
        compiler_params=pltpu.CompilerParams(
            dimension_semantics=("parallel",)),           # 2 TCs on v7x
    )(x, w1c, b1, w2c, b2)
    return jnp.transpose(out_nhwc, (0, 3, 1, 2))          # NHWC -> NCHW


def init_params(key, inp):
    k1, k2, k3, k4 = jax.random.split(key, 4)
    return dict(
        w1=jax.random.normal(k1, (KH, KW, inp, C1), jnp.float32) * 0.1,
        b1=jax.random.normal(k2, (C1,), jnp.float32) * 0.01,
        w2=jax.random.normal(k3, (KH, KW, C1, C1), jnp.float32) * 0.05,
        b2=jax.random.normal(k4, (C1,), jnp.float32) * 0.01,
    )


def reference_forward(x_nchw, params):
    dn = ("NCHW", "HWIO", "NCHW")
    y = jax.lax.conv_general_dilated(
        x_nchw, params["w1"], (1, 1), ((PAD, PAD), (PAD, PAD)),
        dimension_numbers=dn)
    y = jax.nn.relu(y + params["b1"][None, :, None, None])
    y = jax.lax.conv_general_dilated(
        y, params["w2"], (1, 1), ((PAD, PAD), (PAD, PAD)),
        dimension_numbers=dn)
    y = jax.nn.relu(y + params["b2"][None, :, None, None])
    y = jax.lax.reduce_window(y, -jnp.inf, jax.lax.max,
                              (1, 1, 2, 2), (1, 1, 2, 2), "VALID")
    return y


if __name__ == "__main__":
    key = jax.random.PRNGKey(0)
    kx, kp = jax.random.split(key)
    N, Cin, H, W = 2, 4, 16, 16
    x = jax.random.normal(kx, (N, Cin, H, W), jnp.float32)
    params = init_params(kp, Cin)

    out = jax.block_until_ready(basic_block_forward(x, params))
    assert out.shape == (N, C1, H // 2, W // 2), out.shape

    ref = jax.block_until_ready(reference_forward(x, params))
    # bf16 MXU inputs with f32 accumulation -> expected max abs error ~1e-2.
    np.testing.assert_allclose(np.asarray(out), np.asarray(ref),
                               rtol=3e-2, atol=3e-2)
    print("KERNEL_OK")
</pallas_src>

<mosaic_0001>
module attributes {stable_mosaic.version = 11 : i64} {
  func.func @_basic_block_kernel(%arg0: i32, %arg1: memref<1x16x16x4xf32, #tpu.memory_space<vmem>>, %arg2: memref<100x32xbf16, #tpu.memory_space<vmem>>, %arg3: memref<1x32xf32, #tpu.memory_space<vmem>>, %arg4: memref<800x32xbf16, #tpu.memory_space<vmem>>, %arg5: memref<1x32xf32, #tpu.memory_space<vmem>>, %arg6: memref<1x8x8x32xf32, #tpu.memory_space<vmem>>, %arg7: memref<20x20x4xf32, #tpu.memory_space<vmem>>, %arg8: memref<256x100xbf16, #tpu.memory_space<vmem>>, %arg9: memref<20x20x32xf32, #tpu.memory_space<vmem>>, %arg10: memref<256x800xbf16, #tpu.memory_space<vmem>>, %arg11: memref<16x16x32xf32, #tpu.memory_space<vmem>>, %arg12: memref<16x8x32xf32, #tpu.memory_space<vmem>>) attributes {dimension_semantics = [#tpu.dimension_semantics<parallel>], iteration_bounds = array<i64: 2>, scalar_prefetch = 0 : i64, scratch_operands = 6 : i64, tpu.core_type = #tpu.core_type<tc>, window_params = [{transform_indices = @transform_0, window_bounds = array<i64: 1, 16, 16, 4>}, {pipeline_mode = #tpu.pipeline_mode<synchronous>, transform_indices = @transform_1, window_bounds = array<i64: 100, 32>}, {pipeline_mode = #tpu.pipeline_mode<synchronous>, transform_indices = @transform_2, window_bounds = array<i64: 1, 32>}, {pipeline_mode = #tpu.pipeline_mode<synchronous>, transform_indices = @transform_3, window_bounds = array<i64: 800, 32>}, {pipeline_mode = #tpu.pipeline_mode<synchronous>, transform_indices = @transform_4, window_bounds = array<i64: 1, 32>}, {transform_indices = @transform_5, window_bounds = array<i64: 1, 8, 8, 32>}]} {
    %cst = arith.constant 0.000000e+00 : f32
    %0 = vector.broadcast %cst : f32 to vector<20x20x4xf32>
    %c0 = arith.constant 0 : index
    %c0_0 = arith.constant 0 : index
    %c0_1 = arith.constant 0 : index
    %1 = vector.load %arg7[%c0, %c0_0, %c0_1] : memref<20x20x4xf32, #tpu.memory_space<vmem>>, vector<20x20x4xf32>
    tpu.vector_store %arg7[%c0, %c0_0, %c0_1], %0 {strides = array<i32>} : memref<20x20x4xf32, #tpu.memory_space<vmem>>, vector<20x20x4xf32>,
    %c0_2 = arith.constant 0 : index
    %c0_3 = arith.constant 0 : index
    %c0_4 = arith.constant 0 : index
    %c0_5 = arith.constant 0 : index
    %2 = vector.load %arg1[%c0_2, %c0_3, %c0_4, %c0_5] : memref<1x16x16x4xf32, #tpu.memory_space<vmem>>, vector<1x16x16x4xf32>
    %3 = vector.shape_cast %2 : vector<1x16x16x4xf32> to vector<16x16x4xf32>
    %c2 = arith.constant 2 : index
    %c2_6 = arith.constant 2 : index
    %c0_7 = arith.constant 0 : index
    %4 = vector.load %arg7[%c2, %c2_6, %c0_7] : memref<20x20x4xf32, #tpu.memory_space<vmem>>, vector<16x16x4xf32>
    tpu.vector_store %arg7[%c2, %c2_6, %c0_7], %3 {strides = array<i32>} : memref<20x20x4xf32, #tpu.memory_space<vmem>>, vector<16x16x4xf32>,
    %c0_8 = arith.constant 0 : index
    %c0_9 = arith.constant 0 : index
    %c0_10 = arith.constant 0 : index
    %5 = vector.load %arg7[%c0_8, %c0_9, %c0_10] : memref<20x20x4xf32, #tpu.memory_space<vmem>>, vector<16x16x4xf32>
    %6 = vector.shape_cast %5 : vector<16x16x4xf32> to vector<256x4xf32>
    %7 = arith.truncf %6 : vector<256x4xf32> to vector<256x4xbf16>
    %c0_11 = arith.constant 0 : index
    %c0_12 = arith.constant 0 : index
    %8 = vector.load %arg8[%c0_11, %c0_12] : memref<256x100xbf16, #tpu.memory_space<vmem>>, vector<256x4xbf16>
    tpu.vector_store %arg8[%c0_11, %c0_12], %7 {strides = array<i32>} : memref<256x100xbf16, #tpu.memory_space<vmem>>, vector<256x4xbf16>,
    %c0_13 = arith.constant 0 : index
    %c1 = arith.constant 1 : index
    %c0_14 = arith.constant 0 : index
    %9 = vector.load %arg7[%c0_13, %c1, %c0_14] : memref<20x20x4xf32, #tpu.memory_space<vmem>>, vector<16x16x4xf32>
    %10 = vector.shape_cast %9 : vector<16x16x4xf32> to vector<256x4xf32>
    %11 = arith.truncf %10 : vector<256x4xf32> to vector<256x4xbf16>
    %c0_15 = arith.constant 0 : index
    %c4 = arith.constant 4 : index
    %12 = vector.load %arg8[%c0_15, %c4] : memref<256x100xbf16, #tpu.memory_space<vmem>>, vector<256x4xbf16>
    tpu.vector_store %arg8[%c0_15, %c4], %11 {strides = array<i32>} : memref<256x100xbf16, #tpu.memory_space<vmem>>, vector<256x4xbf16>,
    %c0_16 = arith.constant 0 : index
    %c2_17 = arith.constant 2 : index
    %c0_18 = arith.constant 0 : index
    %13 = vector.load %arg7[%c0_16, %c2_17, %c0_18] : memref<20x20x4xf32, #tpu.memory_space<vmem>>, vector<16x16x4xf32>
    %14 = vector.shape_cast %13 : vector<16x16x4xf32> to vector<256x4xf32>
    %15 = arith.truncf %14 : vector<256x4xf32> to vector<256x4xbf16>
    %c0_19 = arith.constant 0 : index
    %c8 = arith.constant 8 : index
    %16 = vector.load %arg8[%c0_19, %c8] : memref<256x100xbf16, #tpu.memory_space<vmem>>, vector<256x4xbf16>
    tpu.vector_store %arg8[%c0_19, %c8], %15 {strides = array<i32>} : memref<256x100xbf16, #tpu.memory_space<vmem>>, vector<256x4xbf16>,
    %c0_20 = arith.constant 0 : index
    %c3 = arith.constant 3 : index
    %c0_21 = arith.constant 0 : index
    %17 = vector.load %arg7[%c0_20, %c3, %c0_21] : memref<20x20x4xf32, #tpu.memory_space<vmem>>, vector<16x16x4xf32>
    %18 = vector.shape_cast %17 : vector<16x16x4xf32> to vector<256x4xf32>
    %19 = arith.truncf %18 : vector<256x4xf32> to vector<256x4xbf16>
    %c0_22 = arith.constant 0 : index
    %c12 = arith.constant 12 : index
    %20 = vector.load %arg8[%c0_22, %c12] : memref<256x100xbf16, #tpu.memory_space<vmem>>, vector<256x4xbf16>
    tpu.vector_store %arg8[%c0_22, %c12], %19 {strides = array<i32>} : memref<256x100xbf16, #tpu.memory_space<vmem>>, vector<256x4xbf16>,
    %c0_23 = arith.constant 0 : index
    %c4_24 = arith.constant 4 : index
    %c0_25 = arith.constant 0 : index
    %21 = vector.load %arg7[%c0_23, %c4_24, %c0_25] : memref<20x20x4xf32, #tpu.memory_space<vmem>>, vector<16x16x4xf32>
    %22 = vector.shape_cast %21 : vector<16x16x4xf32> to vector<256x4xf32>
    %23 = arith.truncf %22 : vector<256x4xf32> to vector<256x4xbf16>
    %c0_26 = arith.constant 0 : index
    %c16 = arith.constant 16 : index
    %24 = vector.load %arg8[%c0_26, %c16] : memref<256x100xbf16, #tpu.memory_space<vmem>>, vector<256x4xbf16>
    tpu.vector_store %arg8[%c0_26, %c16], %23 {strides = array<i32>} : memref<256x100xbf16, #tpu.memory_space<vmem>>, vector<256x4xbf16>,
    %c1_27 = arith.constant 1 : index
    %c0_28 = arith.constant 0 : index
    %c0_29 = arith.constant 0 : index
    %25 = vector.load %arg7[%c1_27, %c0_28, %c0_29] : memref<20x20x4xf32, #tpu.memory_space<vmem>>, vector<16x16x4xf32>
    %26 = vector.shape_cast %25 : vector<16x16x4xf32> to vector<256x4xf32>
    %27 = arith.truncf %26 : vector<256x4xf32> to vector<256x4xbf16>
    %c0_30 = arith.constant 0 : index
    %c20 = arith.constant 20 : index
    %28 = vector.load %arg8[%c0_30, %c20] : memref<256x100xbf16, #tpu.memory_space<vmem>>, vector<256x4xbf16>
    tpu.vector_store %arg8[%c0_30, %c20], %27 {strides = array<i32>} : memref<256x100xbf16, #tpu.memory_space<vmem>>, vector<256x4xbf16>,
    %c1_31 = arith.constant 1 : index
    %c1_32 = arith.constant 1 : index
    %c0_33 = arith.constant 0 : index
    %29 = vector.load %arg7[%c1_31, %c1_32, %c0_33] : memref<20x20x4xf32, #tpu.memory_space<vmem>>, vector<16x16x4xf32>
    %30 = vector.shape_cast %29 : vector<16x16x4xf32> to vector<256x4xf32>
    %31 = arith.truncf %30 : vector<256x4xf32> to vector<256x4xbf16>
    %c0_34 = arith.constant 0 : index
    %c24 = arith.constant 24 : index
    %32 = vector.load %arg8[%c0_34, %c24] : memref<256x100xbf16, #tpu.memory_space<vmem>>, vector<256x4xbf16>
    tpu.vector_store %arg8[%c0_34, %c24], %31 {strides = array<i32>} : memref<256x100xbf16, #tpu.memory_space<vmem>>, vector<256x4xbf16>,
    %c1_35 = arith.constant 1 : index
    %c2_36 = arith.constant 2 : index
    %c0_37 = arith.constant 0 : index
    %33 = vector.load %arg7[%c1_35, %c2_36, %c0_37] : memref<20x20x4xf32, #tpu.memory_space<vmem>>, vector<16x16x4xf32>
    %34 = vector.shape_cast %33 : vector<16x16x4xf32> to vector<256x4xf32>
    %35 = arith.truncf %34 : vector<256x4xf32> to vector<256x4xbf16>
    %c0_38 = arith.constant 0 : index
    %c28 = arith.constant 28 : index
    %36 = vector.load %arg8[%c0_38, %c28] : memref<256x100xbf16, #tpu.memory_space<vmem>>, vector<256x4xbf16>
    tpu.vector_store %arg8[%c0_38, %c28], %35 {strides = array<i32>} : memref<256x100xbf16, #tpu.memory_space<vmem>>, vector<256x4xbf16>,
    %c1_39 = arith.constant 1 : index
    %c3_40 = arith.constant 3 : index
    %c0_41 = arith.constant 0 : index
    %37 = vector.load %arg7[%c1_39, %c3_40, %c0_41] : memref<20x20x4xf32, #tpu.memory_space<vmem>>, vector<16x16x4xf32>
    %38 = vector.shape_cast %37 : vector<16x16x4xf32> to vector<256x4xf32>
    %39 = arith.truncf %38 : vector<256x4xf32> to vector<256x4xbf16>
    %c0_42 = arith.constant 0 : index
    %c32 = arith.constant 32 : index
    %40 = vector.load %arg8[%c0_42, %c32] : memref<256x100xbf16, #tpu.memory_space<vmem>>, vector<256x4xbf16>
    tpu.vector_store %arg8[%c0_42, %c32], %39 {strides = array<i32>} : memref<256x100xbf16, #tpu.memory_space<vmem>>, vector<256x4xbf16>,
    %c1_43 = arith.constant 1 : index
    %c4_44 = arith.constant 4 : index
    %c0_45 = arith.constant 0 : index
    %41 = vector.load %arg7[%c1_43, %c4_44, %c0_45] : memref<20x20x4xf32, #tpu.memory_space<vmem>>, vector<16x16x4xf32>
    %42 = vector.shape_cast %41 : vector<16x16x4xf32> to vector<256x4xf32>
    %43 = arith.truncf %42 : vector<256x4xf32> to vector<256x4xbf16>
    %c0_46 = arith.constant 0 : index
    %c36 = arith.constant 36 : index
    %44 = vector.load %arg8[%c0_46, %c36] : memref<256x100xbf16, #tpu.memory_space<vmem>>, vector<256x4xbf16>
    tpu.vector_store %arg8[%c0_46, %c36], %43 {strides = array<i32>} : memref<256x100xbf16, #tpu.memory_space<vmem>>, vector<256x4xbf16>,
    %c2_47 = arith.constant 2 : index
    %c0_48 = arith.constant 0 : index
    %c0_49 = arith.constant 0 : index
    %45 = vector.load %arg7[%c2_47, %c0_48, %c0_49] : memref<20x20x4xf32, #tpu.memory_space<vmem>>, vector<16x16x4xf32>
    %46 = vector.shape_cast %45 : vector<16x16x4xf32> to vector<256x4xf32>
    %47 = arith.truncf %46 : vector<256x4xf32> to vector<256x4xbf16>
    %c0_50 = arith.constant 0 : index
    %c40 = arith.constant 40 : index
    %48 = vector.load %arg8[%c0_50, %c40] : memref<256x100xbf16, #tpu.memory_space<vmem>>, vector<256x4xbf16>
    tpu.vector_store %arg8[%c0_50, %c40], %47 {strides = array<i32>} : memref<256x100xbf16, #tpu.memory_space<vmem>>, vector<256x4xbf16>,
    %c2_51 = arith.constant 2 : index
    %c1_52 = arith.constant 1 : index
    %c0_53 = arith.constant 0 : index
    %49 = vector.load %arg7[%c2_51, %c1_52, %c0_53] : memref<20x20x4xf32, #tpu.memory_space<vmem>>, vector<16x16x4xf32>
    %50 = vector.shape_cast %49 : vector<16x16x4xf32> to vector<256x4xf32>
    %51 = arith.truncf %50 : vector<256x4xf32> to vector<256x4xbf16>
    %c0_54 = arith.constant 0 : index
    %c44 = arith.constant 44 : index
    %52 = vector.load %arg8[%c0_54, %c44] : memref<256x100xbf16, #tpu.memory_space<vmem>>, vector<256x4xbf16>
    tpu.vector_store %arg8[%c0_54, %c44], %51 {strides = array<i32>} : memref<256x100xbf16, #tpu.memory_space<vmem>>, vector<256x4xbf16>,
    %c2_55 = arith.constant 2 : index
    %c2_56 = arith.constant 2 : index
    %c0_57 = arith.constant 0 : index
    %53 = vector.load %arg7[%c2_55, %c2_56, %c0_57] : memref<20x20x4xf32, #tpu.memory_space<vmem>>, vector<16x16x4xf32>
    %54 = vector.shape_cast %53 : vector<16x16x4xf32> to vector<256x4xf32>
    %55 = arith.truncf %54 : vector<256x4xf32> to vector<256x4xbf16>
    %c0_58 = arith.constant 0 : index
    %c48 = arith.constant 48 : index
    %56 = vector.load %arg8[%c0_58, %c48] : memref<256x100xbf16, #tpu.memory_space<vmem>>, vector<256x4xbf16>
    tpu.vector_store %arg8[%c0_58, %c48], %55 {strides = array<i32>} : memref<256x100xbf16, #tpu.memory_space<vmem>>, vector<256x4xbf16>,
    %c2_59 = arith.constant 2 : index
    %c3_60 = arith.constant 3 : index
    %c0_61 = arith.constant 0 : index
    %57 = vector.load %arg7[%c2_59, %c3_60, %c0_61] : memref<20x20x4xf32, #tpu.memory_space<vmem>>, vector<16x16x4xf32>
    %58 = vector.shape_cast %57 : vector<16x16x4xf32> to vector<256x4xf32>
    %59 = arith.truncf %58 : vector<256x4xf32> to vector<256x4xbf16>
    %c0_62 = arith.constant 0 : index
    %c52 = arith.constant 52 : index
    %60 = vector.load %arg8[%c0_62, %c52] : memref<256x100xbf16, #tpu.memory_space<vmem>>, vector<256x4xbf16>
    tpu.vector_store %arg8[%c0_62, %c52], %59 {strides = array<i32>} : memref<256x100xbf16, #tpu.memory_space<vmem>>, vector<256x4xbf16>,
    %c2_63 = arith.constant 2 : index
    %c4_64 = arith.constant 4 : index
    %c0_65 = arith.constant 0 : index
    %61 = vector.load %arg7[%c2_63, %c4_64, %c0_65] : memref<20x20x4xf32, #tpu.memory_space<vmem>>, vector<16x16x4xf32>
    %62 = vector.shape_cast %61 : vector<16x16x4xf32> to vector<256x4xf32>
    %63 = arith.truncf %62 : vector<256x4xf32> to vector<256x4xbf16>
    %c0_66 = arith.constant 0 : index
    %c56 = arith.constant 56 : index
    %64 = vector.load %arg8[%c0_66, %c56] : memref<256x100xbf16, #tpu.memory_space<vmem>>, vector<256x4xbf16>
    tpu.vector_store %arg8[%c0_66, %c56], %63 {strides = array<i32>} : memref<256x100xbf16, #tpu.memory_space<vmem>>, vector<256x4xbf16>,
    %c3_67 = arith.constant 3 : index
    %c0_68 = arith.constant 0 : index
    %c0_69 = arith.constant 0 : index
    %65 = vector.load %arg7[%c3_67, %c0_68, %c0_69] : memref<20x20x4xf32, #tpu.memory_space<vmem>>, vector<16x16x4xf32>
    %66 = vector.shape_cast %65 : vector<16x16x4xf32> to vector<256x4xf32>
    %67 = arith.truncf %66 : vector<256x4xf32> to vector<256x4xbf16>
    %c0_70 = arith.constant 0 : index
    %c60 = arith.constant 60 : index
    %68 = vector.load %arg8[%c0_70, %c60] : memref<256x100xbf16, #tpu.memory_space<vmem>>, vector<256x4xbf16>
    tpu.vector_store %arg8[%c0_70, %c60], %67 {strides = array<i32>} : memref<256x100xbf16, #tpu.memory_space<vmem>>, vector<256x4xbf16>,
    %c3_71 = arith.constant 3 : index
    %c1_72 = arith.constant 1 : index
    %c0_73 = arith.constant 0 : index
    %69 = vector.load %arg7[%c3_71, %c1_72, %c0_73] : memref<20x20x4xf32, #tpu.memory_space<vmem>>, vector<16x16x4xf32>
    %70 = vector.shape_cast %69 : vector<16x16x4xf32> to vector<256x4xf32>
    %71 = arith.truncf %70 : vector<256x4xf32> to vector<256x4xbf16>
    %c0_74 = arith.constant 0 : index
    %c64 = arith.constant 64 : index
    %72 = vector.load %arg8[%c0_74, %c64] : memref<256x100xbf16, #tpu.memory_space<vmem>>, vector<256x4xbf16>
    tpu.vector_store %arg8[%c0_74, %c64], %71 {strides = array<i32>} : memref<256x100xbf16, #tpu.memory_space<vmem>>, vector<256x4xbf16>,
    %c3_75 = arith.constant 3 : index
    %c2_76 = arith.constant 2 : index
    %c0_77 = arith.constant 0 : index
    %73 = vector.load %arg7[%c3_75, %c2_76, %c0_77] : memref<20x20x4xf32, #tpu.memory_space<vmem>>, vector<16x16x4xf32>
    %74 = vector.shape_cast %73 : vector<16x16x4xf32> to vector<256x4xf32>
    %75 = arith.truncf %74 : vector<256x4xf32> to vector<256x4xbf16>
    %c0_78 = arith.constant 0 : index
    %c68 = arith.constant 68 : index
    %76 = vector.load %arg8[%c0_78, %c68] : memref<256x100xbf16, #tpu.memory_space<vmem>>, vector<256x4xbf16>
    tpu.vector_store %arg8[%c0_78, %c68], %75 {strides = array<i32>} : memref<256x100xbf16, #tpu.memory_space<vmem>>, vector<256x4xbf16>,
    %c3_79 = arith.constant 3 : index
    %c3_80 = arith.constant 3 : index
    %c0_81 = arith.constant 0 : index
    %77 = vector.load %arg7[%c3_79, %c3_80, %c0_81] : memref<20x20x4xf32, #tpu.memory_space<vmem>>, vector<16x16x4xf32>
    %78 = vector.shape_cast %77 : vector<16x16x4xf32> to vector<256x4xf32>
    %79 = arith.truncf %78 : vector<256x4xf32> to vector<256x4xbf16>
    %c0_82 = arith.constant 0 : index
    %c72 = arith.constant 72 : index
    %80 = vector.load %arg8[%c0_82, %c72] : memref<256x100xbf16, #tpu.memory_space<vmem>>, vector<256x4xbf16>
    tpu.vector_store %arg8[%c0_82, %c72], %79 {strides = array<i32>} : memref<256x100xbf16, #tpu.memory_space<vmem>>, vector<256x4xbf16>,
    %c3_83 = arith.constant 3 : index
    %c4_84 = arith.constant 4 : index
    %c0_85 = arith.constant 0 : index
    %81 = vector.load %arg7[%c3_83, %c4_84, %c0_85] : memref<20x20x4xf32, #tpu.memory_space<vmem>>, vector<16x16x4xf32>
    %82 = vector.shape_cast %81 : vector<16x16x4xf32> to vector<256x4xf32>
    %83 = arith.truncf %82 : vector<256x4xf32> to vector<256x4xbf16>
    %c0_86 = arith.constant 0 : index
    %c76 = arith.constant 76 : index
    %84 = vector.load %arg8[%c0_86, %c76] : memref<256x100xbf16, #tpu.memory_space<vmem>>, vector<256x4xbf16>
    tpu.vector_store %arg8[%c0_86, %c76], %83 {strides = array<i32>} : memref<256x100xbf16, #tpu.memory_space<vmem>>, vector<256x4xbf16>,
    %c4_87 = arith.constant 4 : index
    %c0_88 = arith.constant 0 : index
    %c0_89 = arith.constant 0 : index
    %85 = vector.load %arg7[%c4_87, %c0_88, %c0_89] : memref<20x20x4xf32, #tpu.memory_space<vmem>>, vector<16x16x4xf32>
    %86 = vector.shape_cast %85 : vector<16x16x4xf32> to vector<256x4xf32>
    %87 = arith.truncf %86 : vector<256x4xf32> to vector<256x4xbf16>
    %c0_90 = arith.constant 0 : index
    %c80 = arith.constant 80 : index
    %88 = vector.load %arg8[%c0_90, %c80] : memref<256x100xbf16, #tpu.memory_space<vmem>>, vector<256x4xbf16>
    tpu.vector_store %arg8[%c0_90, %c80], %87 {strides = array<i32>} : memref<256x100xbf16, #tpu.memory_space<vmem>>, vector<256x4xbf16>,
    %c4_91 = arith.constant 4 : index
    %c1_92 = arith.constant 1 : index
    %c0_93 = arith.constant 0 : index
    %89 = vector.load %arg7[%c4_91, %c1_92, %c0_93] : memref<20x20x4xf32, #tpu.memory_space<vmem>>, vector<16x16x4xf32>
    %90 = vector.shape_cast %89 : vector<16x16x4xf32> to vector<256x4xf32>
    %91 = arith.truncf %90 : vector<256x4xf32> to vector<256x4xbf16>
    %c0_94 = arith.constant 0 : index
    %c84 = arith.constant 84 : index
    %92 = vector.load %arg8[%c0_94, %c84] : memref<256x100xbf16, #tpu.memory_space<vmem>>, vector<256x4xbf16>
    tpu.vector_store %arg8[%c0_94, %c84], %91 {strides = array<i32>} : memref<256x100xbf16, #tpu.memory_space<vmem>>, vector<256x4xbf16>,
    %c4_95 = arith.constant 4 : index
    %c2_96 = arith.constant 2 : index
    %c0_97 = arith.constant 0 : index
    %93 = vector.load %arg7[%c4_95, %c2_96, %c0_97] : memref<20x20x4xf32, #tpu.memory_space<vmem>>, vector<16x16x4xf32>
    %94 = vector.shape_cast %93 : vector<16x16x4xf32> to vector<256x4xf32>
    %95 = arith.truncf %94 : vector<256x4xf32> to vector<256x4xbf16>
    %c0_98 = arith.constant 0 : index
    %c88 = arith.constant 88 : index
    %96 = vector.load %arg8[%c0_98, %c88] : memref<256x100xbf16, #tpu.memory_space<vmem>>, vector<256x4xbf16>
    tpu.vector_store %arg8[%c0_98, %c88], %95 {strides = array<i32>} : memref<256x100xbf16, #tpu.memory_space<vmem>>, vector<256x4xbf16>,
    %c4_99 = arith.constant 4 : index
    %c3_100 = arith.constant 3 : index
    %c0_101 = arith.constant 0 : index
    %97 = vector.load %arg7[%c4_99, %c3_100, %c0_101] : memref<20x20x4xf32, #tpu.memory_space<vmem>>, vector<16x16x4xf32>
    %98 = vector.shape_cast %97 : vector<16x16x4xf32> to vector<256x4xf32>
    %99 = arith.truncf %98 : vector<256x4xf32> to vector<256x4xbf16>
    %c0_102 = arith.constant 0 : index
    %c92 = arith.constant 92 : index
    %100 = vector.load %arg8[%c0_102, %c92] : memref<256x100xbf16, #tpu.memory_space<vmem>>, vector<256x4xbf16>
    tpu.vector_store %arg8[%c0_102, %c92], %99 {strides = array<i32>} : memref<256x100xbf16, #tpu.memory_space<vmem>>, vector<256x4xbf16>,
    %c4_103 = arith.constant 4 : index
    %c4_104 = arith.constant 4 : index
    %c0_105 = arith.constant 0 : index
    %101 = vector.load %arg7[%c4_103, %c4_104, %c0_105] : memref<20x20x4xf32, #tpu.memory_space<vmem>>, vector<16x16x4xf32>
    %102 = vector.shape_cast %101 : vector<16x16x4xf32> to vector<256x4xf32>
    %103 = arith.truncf %102 : vector<256x4xf32> to vector<256x4xbf16>
    %c0_106 = arith.constant 0 : index
    %c96 = arith.constant 96 : index
    %104 = vector.load %arg8[%c0_106, %c96] : memref<256x100xbf16, #tpu.memory_space<vmem>>, vector<256x4xbf16>
    tpu.vector_store %arg8[%c0_106, %c96], %103 {strides = array<i32>} : memref<256x100xbf16, #tpu.memory_space<vmem>>, vector<256x4xbf16>,
    %c0_107 = arith.constant 0 : index
    %c0_108 = arith.constant 0 : index
    %105 = vector.load %arg8[%c0_107, %c0_108] : memref<256x100xbf16, #tpu.memory_space<vmem>>, vector<256x100xbf16>
    %c0_109 = arith.constant 0 : index
    %c0_110 = arith.constant 0 : index
    %106 = vector.load %arg2[%c0_109, %c0_110] : memref<100x32xbf16, #tpu.memory_space<vmem>>, vector<100x32xbf16>
    %cst_111 = arith.constant dense<0.000000e+00> : vector<256x32xf32>
    %107 = tpu.matmul %105, %106, %cst_111 {dimension_numbers = #tpu.dot_dimension_numbers<[1], [0], [0], [1], [0, 0, 1, 1], [], []>} : vector<256x100xbf16>, vector<100x32xbf16>, vector<256x32xf32> -> vector<256x32xf32>
    %c0_112 = arith.constant 0 : index
    %c0_113 = arith.constant 0 : index
    %108 = vector.load %arg3[%c0_112, %c0_113] : memref<1x32xf32, #tpu.memory_space<vmem>>, vector<1x32xf32>
    %109 = vector.broadcast %108 : vector<1x32xf32> to vector<256x32xf32>
    %110 = arith.addf %107, %109 : vector<256x32xf32>
    %cst_114 = arith.constant 0.000000e+00 : f32
    %111 = vector.broadcast %cst_114 : f32 to vector<256x32xf32>
    %112 = arith.maximumf %110, %111 : vector<256x32xf32>
    %cst_115 = arith.constant 0.000000e+00 : f32
    %113 = vector.broadcast %cst_115 : f32 to vector<20x20x32xf32>
    %c0_116 = arith.constant 0 : index
    %c0_117 = arith.constant 0 : index
    %c0_118 = arith.constant 0 : index
    %114 = vector.load %arg9[%c0_116, %c0_117, %c0_118] : memref<20x20x32xf32, #tpu.memory_space<vmem>>, vector<20x20x32xf32>
    tpu.vector_store %arg9[%c0_116, %c0_117, %c0_118], %113 {strides = array<i32>} : memref<20x20x32xf32, #tpu.memory_space<vmem>>, vector<20x20x32xf32>,
    %115 = vector.shape_cast %112 : vector<256x32xf32> to vector<16x16x32xf32>
    %c2_119 = arith.constant 2 : index
    %c2_120 = arith.constant 2 : index
    %c0_121 = arith.constant 0 : index
    %116 = vector.load %arg9[%c2_119, %c2_120, %c0_121] : memref<20x20x32xf32, #tpu.memory_space<vmem>>, vector<16x16x32xf32>
    tpu.vector_store %arg9[%c2_119, %c2_120, %c0_121], %115 {strides = array<i32>} : memref<20x20x32xf32, #tpu.memory_space<vmem>>, vector<16x16x32xf32>,
    %c0_122 = arith.constant 0 : index
    %c0_123 = arith.constant 0 : index
    %c0_124 = arith.constant 0 : index
    %117 = vector.load %arg9[%c0_122, %c0_123, %c0_124] : memref<20x20x32xf32, #tpu.memory_space<vmem>>, vector<16x16x32xf32>
    %118 = vector.shape_cast %117 : vector<16x16x32xf32> to vector<256x32xf32>
    %119 = arith.truncf %118 : vector<256x32xf32> to vector<256x32xbf16>
    %c0_125 = arith.constant 0 : index
    %c0_126 = arith.constant 0 : index
    %120 = vector.load %arg10[%c0_125, %c0_126] : memref<256x800xbf16, #tpu.memory_space<vmem>>, vector<256x32xbf16>
    tpu.vector_store %arg10[%c0_125, %c0_126], %119 {strides = array<i32>} : memref<256x800xbf16, #tpu.memory_space<vmem>>, vector<256x32xbf16>,
    %c0_127 = arith.constant 0 : index
    %c1_128 = arith.constant 1 : index
    %c0_129 = arith.constant 0 : index
    %121 = vector.load %arg9[%c0_127, %c1_128, %c0_129] : memref<20x20x32xf32, #tpu.memory_space<vmem>>, vector<16x16x32xf32>
    %122 = vector.shape_cast %121 : vector<16x16x32xf32> to vector<256x32xf32>
    %123 = arith.truncf %122 : vector<256x32xf32> to vector<256x32xbf16>
    %c0_130 = arith.constant 0 : index
    %c32_131 = arith.constant 32 : index
    %124 = vector.load %arg10[%c0_130, %c32_131] : memref<256x800xbf16, #tpu.memory_space<vmem>>, vector<256x32xbf16>
    tpu.vector_store %arg10[%c0_130, %c32_131], %123 {strides = array<i32>} : memref<256x800xbf16, #tpu.memory_space<vmem>>, vector<256x32xbf16>,
    %c0_132 = arith.constant 0 : index
    %c2_133 = arith.constant 2 : index
    %c0_134 = arith.constant 0 : index
    %125 = vector.load %arg9[%c0_132, %c2_133, %c0_134] : memref<20x20x32xf32, #tpu.memory_space<vmem>>, vector<16x16x32xf32>
    %126 = vector.shape_cast %125 : vector<16x16x32xf32> to vector<256x32xf32>
    %127 = arith.truncf %126 : vector<256x32xf32> to vector<256x32xbf16>
    %c0_135 = arith.constant 0 : index
    %c64_136 = arith.constant 64 : index
    %128 = vector.load %arg10[%c0_135, %c64_136] : memref<256x800xbf16, #tpu.memory_space<vmem>>, vector<256x32xbf16>
    tpu.vector_store %arg10[%c0_135, %c64_136], %127 {strides = array<i32>} : memref<256x800xbf16, #tpu.memory_space<vmem>>, vector<256x32xbf16>,
    %c0_137 = arith.constant 0 : index
    %c3_138 = arith.constant 3 : index
    %c0_139 = arith.constant 0 : index
    %129 = vector.load %arg9[%c0_137, %c3_138, %c0_139] : memref<20x20x32xf32, #tpu.memory_space<vmem>>, vector<16x16x32xf32>
    %130 = vector.shape_cast %129 : vector<16x16x32xf32> to vector<256x32xf32>
    %131 = arith.truncf %130 : vector<256x32xf32> to vector<256x32xbf16>
    %c0_140 = arith.constant 0 : index
    %c96_141 = arith.constant 96 : index
    %132 = vector.load %arg10[%c0_140, %c96_141] : memref<256x800xbf16, #tpu.memory_space<vmem>>, vector<256x32xbf16>
    tpu.vector_store %arg10[%c0_140, %c96_141], %131 {strides = array<i32>} : memref<256x800xbf16, #tpu.memory_space<vmem>>, vector<256x32xbf16>,
    %c0_142 = arith.constant 0 : index
    %c4_143 = arith.constant 4 : index
    %c0_144 = arith.constant 0 : index
    %133 = vector.load %arg9[%c0_142, %c4_143, %c0_144] : memref<20x20x32xf32, #tpu.memory_space<vmem>>, vector<16x16x32xf32>
    %134 = vector.shape_cast %133 : vector<16x16x32xf32> to vector<256x32xf32>
    %135 = arith.truncf %134 : vector<256x32xf32> to vector<256x32xbf16>
    %c0_145 = arith.constant 0 : index
    %c128 = arith.constant 128 : index
    %136 = vector.load %arg10[%c0_145, %c128] : memref<256x800xbf16, #tpu.memory_space<vmem>>, vector<256x32xbf16>
    tpu.vector_store %arg10[%c0_145, %c128], %135 {strides = array<i32>} : memref<256x800xbf16, #tpu.memory_space<vmem>>, vector<256x32xbf16>,
    %c1_146 = arith.constant 1 : index
    %c0_147 = arith.constant 0 : index
    %c0_148 = arith.constant 0 : index
    %137 = vector.load %arg9[%c1_146, %c0_147, %c0_148] : memref<20x20x32xf32, #tpu.memory_space<vmem>>, vector<16x16x32xf32>
    %138 = vector.shape_cast %137 : vector<16x16x32xf32> to vector<256x32xf32>
    %139 = arith.truncf %138 : vector<256x32xf32> to vector<256x32xbf16>
    %c0_149 = arith.constant 0 : index
    %c160 = arith.constant 160 : index
    %140 = vector.load %arg10[%c0_149, %c160] : memref<256x800xbf16, #tpu.memory_space<vmem>>, vector<256x32xbf16>
    tpu.vector_store %arg10[%c0_149, %c160], %139 {strides = array<i32>} : memref<256x800xbf16, #tpu.memory_space<vmem>>, vector<256x32xbf16>,
    %c1_150 = arith.constant 1 : index
    %c1_151 = arith.constant 1 : index
    %c0_152 = arith.constant 0 : index
    %141 = vector.load %arg9[%c1_150, %c1_151, %c0_152] : memref<20x20x32xf32, #tpu.memory_space<vmem>>, vector<16x16x32xf32>
    %142 = vector.shape_cast %141 : vector<16x16x32xf32> to vector<256x32xf32>
    %143 = arith.truncf %142 : vector<256x32xf32> to vector<256x32xbf16>
    %c0_153 = arith.constant 0 : index
    %c192 = arith.constant 192 : index
    %144 = vector.load %arg10[%c0_153, %c192] : memref<256x800xbf16, #tpu.memory_space<vmem>>, vector<256x32xbf16>
    tpu.vector_store %arg10[%c0_153, %c192], %143 {strides = array<i32>} : memref<256x800xbf16, #tpu.memory_space<vmem>>, vector<256x32xbf16>,
    %c1_154 = arith.constant 1 : index
    %c2_155 = arith.constant 2 : index
    %c0_156 = arith.constant 0 : index
    %145 = vector.load %arg9[%c1_154, %c2_155, %c0_156] : memref<20x20x32xf32, #tpu.memory_space<vmem>>, vector<16x16x32xf32>
    %146 = vector.shape_cast %145 : vector<16x16x32xf32> to vector<256x32xf32>
    %147 = arith.truncf %146 : vector<256x32xf32> to vector<256x32xbf16>
    %c0_157 = arith.constant 0 : index
    %c224 = arith.constant 224 : index
    %148 = vector.load %arg10[%c0_157, %c224] : memref<256x800xbf16, #tpu.memory_space<vmem>>, vector<256x32xbf16>
    tpu.vector_store %arg10[%c0_157, %c224], %147 {strides = array<i32>} : memref<256x800xbf16, #tpu.memory_space<vmem>>, vector<256x32xbf16>,
    %c1_158 = arith.constant 1 : index
    %c3_159 = arith.constant 3 : index
    %c0_160 = arith.constant 0 : index
    %149 = vector.load %arg9[%c1_158, %c3_159, %c0_160] : memref<20x20x32xf32, #tpu.memory_space<vmem>>, vector<16x16x32xf32>
    %150 = vector.shape_cast %149 : vector<16x16x32xf32> to vector<256x32xf32>
    %151 = arith.truncf %150 : vector<256x32xf32> to vector<256x32xbf16>
    %c0_161 = arith.constant 0 : index
    %c256 = arith.constant 256 : index
    %152 = vector.load %arg10[%c0_161, %c256] : memref<256x800xbf16, #tpu.memory_space<vmem>>, vector<256x32xbf16>
    tpu.vector_store %arg10[%c0_161, %c256], %151 {strides = array<i32>} : memref<256x800xbf16, #tpu.memory_space<vmem>>, vector<256x32xbf16>,
    %c1_162 = arith.constant 1 : index
    %c4_163 = arith.constant 4 : index
    %c0_164 = arith.constant 0 : index
    %153 = vector.load %arg9[%c1_162, %c4_163, %c0_164] : memref<20x20x32xf32, #tpu.memory_space<vmem>>, vector<16x16x32xf32>
    %154 = vector.shape_cast %153 : vector<16x16x32xf32> to vector<256x32xf32>
    %155 = arith.truncf %154 : vector<256x32xf32> to vector<256x32xbf16>
    %c0_165 = arith.constant 0 : index
    %c288 = arith.constant 288 : index
    %156 = vector.load %arg10[%c0_165, %c288] : memref<256x800xbf16, #tpu.memory_space<vmem>>, vector<256x32xbf16>
    tpu.vector_store %arg10[%c0_165, %c288], %155 {strides = array<i32>} : memref<256x800xbf16, #tpu.memory_space<vmem>>, vector<256x32xbf16>,
    %c2_166 = arith.constant 2 : index
    %c0_167 = arith.constant 0 : index
    %c0_168 = arith.constant 0 : index
    %157 = vector.load %arg9[%c2_166, %c0_167, %c0_168] : memref<20x20x32xf32, #tpu.memory_space<vmem>>, vector<16x16x32xf32>
    %158 = vector.shape_cast %157 : vector<16x16x32xf32> to vector<256x32xf32>
    %159 = arith.truncf %158 : vector<256x32xf32> to vector<256x32xbf16>
    %c0_169 = arith.constant 0 : index
    %c320 = arith.constant 320 : index
    %160 = vector.load %arg10[%c0_169, %c320] : memref<256x800xbf16, #tpu.memory_space<vmem>>, vector<256x32xbf16>
    tpu.vector_store %arg10[%c0_169, %c320], %159 {strides = array<i32>} : memref<256x800xbf16, #tpu.memory_space<vmem>>, vector<256x32xbf16>,
    %c2_170 = arith.constant 2 : index
    %c1_171 = arith.constant 1 : index
    %c0_172 = arith.constant 0 : index
    %161 = vector.load %arg9[%c2_170, %c1_171, %c0_172] : memref<20x20x32xf32, #tpu.memory_space<vmem>>, vector<16x16x32xf32>
    %162 = vector.shape_cast %161 : vector<16x16x32xf32> to vector<256x32xf32>
    %163 = arith.truncf %162 : vector<256x32xf32> to vector<256x32xbf16>
    %c0_173 = arith.constant 0 : index
    %c352 = arith.constant 352 : index
    %164 = vector.load %arg10[%c0_173, %c352] : memref<256x800xbf16, #tpu.memory_space<vmem>>, vector<256x32xbf16>
    tpu.vector_store %arg10[%c0_173, %c352], %163 {strides = array<i32>} : memref<256x800xbf16, #tpu.memory_space<vmem>>, vector<256x32xbf16>,
    %c2_174 = arith.constant 2 : index
    %c2_175 = arith.constant 2 : index
    %c0_176 = arith.constant 0 : index
    %165 = vector.load %arg9[%c2_174, %c2_175, %c0_176] : memref<20x20x32xf32, #tpu.memory_space<vmem>>, vector<16x16x32xf32>
    %166 = vector.shape_cast %165 : vector<16x16x32xf32> to vector<256x32xf32>
    %167 = arith.truncf %166 : vector<256x32xf32> to vector<256x32xbf16>
    %c0_177 = arith.constant 0 : index
    %c384 = arith.constant 384 : index
    %168 = vector.load %arg10[%c0_177, %c384] : memref<256x800xbf16, #tpu.memory_space<vmem>>, vector<256x32xbf16>
    tpu.vector_store %arg10[%c0_177, %c384], %167 {strides = array<i32>} : memref<256x800xbf16, #tpu.memory_space<vmem>>, vector<256x32xbf16>,
    %c2_178 = arith.constant 2 : index
    %c3_179 = arith.constant 3 : index
    %c0_180 = arith.constant 0 : index
    %169 = vector.load %arg9[%c2_178, %c3_179, %c0_180] : memref<20x20x32xf32, #tpu.memory_space<vmem>>, vector<16x16x32xf32>
    %170 = vector.shape_cast %169 : vector<16x16x32xf32> to vector<256x32xf32>
    %171 = arith.truncf %170 : vector<256x32xf32> to vector<256x32xbf16>
    %c0_181 = arith.constant 0 : index
    %c416 = arith.constant 416 : index
    %172 = vector.load %arg10[%c0_181, %c416] : memref<256x800xbf16, #tpu.memory_space<vmem>>, vector<256x32xbf16>
    tpu.vector_store %arg10[%c0_181, %c416], %171 {strides = array<i32>} : memref<256x800xbf16, #tpu.memory_space<vmem>>, vector<256x32xbf16>,
    %c2_182 = arith.constant 2 : index
    %c4_183 = arith.constant 4 : index
    %c0_184 = arith.constant 0 : index
    %173 = vector.load %arg9[%c2_182, %c4_183, %c0_184] : memref<20x20x32xf32, #tpu.memory_space<vmem>>, vector<16x16x32xf32>
    %174 = vector.shape_cast %173 : vector<16x16x32xf32> to vector<256x32xf32>
    %175 = arith.truncf %174 : vector<256x32xf32> to vector<256x32xbf16>
    %c0_185 = arith.constant 0 : index
    %c448 = arith.constant 448 : index
    %176 = vector.load %arg10[%c0_185, %c448] : memref<256x800xbf16, #tpu.memory_space<vmem>>, vector<256x32xbf16>
    tpu.vector_store %arg10[%c0_185, %c448], %175 {strides = array<i32>} : memref<256x800xbf16, #tpu.memory_space<vmem>>, vector<256x32xbf16>,
    %c3_186 = arith.constant 3 : index
    %c0_187 = arith.constant 0 : index
    %c0_188 = arith.constant 0 : index
    %177 = vector.load %arg9[%c3_186, %c0_187, %c0_188] : memref<20x20x32xf32, #tpu.memory_space<vmem>>, vector<16x16x32xf32>
    %178 = vector.shape_cast %177 : vector<16x16x32xf32> to vector<256x32xf32>
    %179 = arith.truncf %178 : vector<256x32xf32> to vector<256x32xbf16>
    %c0_189 = arith.constant 0 : index
    %c480 = arith.constant 480 : index
    %180 = vector.load %arg10[%c0_189, %c480] : memref<256x800xbf16, #tpu.memory_space<vmem>>, vector<256x32xbf16>
    tpu.vector_store %arg10[%c0_189, %c480], %179 {strides = array<i32>} : memref<256x800xbf16, #tpu.memory_space<vmem>>, vector<256x32xbf16>,
    %c3_190 = arith.constant 3 : index
    %c1_191 = arith.constant 1 : index
    %c0_192 = arith.constant 0 : index
    %181 = vector.load %arg9[%c3_190, %c1_191, %c0_192] : memref<20x20x32xf32, #tpu.memory_space<vmem>>, vector<16x16x32xf32>
    %182 = vector.shape_cast %181 : vector<16x16x32xf32> to vector<256x32xf32>
    %183 = arith.truncf %182 : vector<256x32xf32> to vector<256x32xbf16>
    %c0_193 = arith.constant 0 : index
    %c512 = arith.constant 512 : index
    %184 = vector.load %arg10[%c0_193, %c512] : memref<256x800xbf16, #tpu.memory_space<vmem>>, vector<256x32xbf16>
    tpu.vector_store %arg10[%c0_193, %c512], %183 {strides = array<i32>} : memref<256x800xbf16, #tpu.memory_space<vmem>>, vector<256x32xbf16>,
    %c3_194 = arith.constant 3 : index
    %c2_195 = arith.constant 2 : index
    %c0_196 = arith.constant 0 : index
    %185 = vector.load %arg9[%c3_194, %c2_195, %c0_196] : memref<20x20x32xf32, #tpu.memory_space<vmem>>, vector<16x16x32xf32>
    %186 = vector.shape_cast %185 : vector<16x16x32xf32> to vector<256x32xf32>
    %187 = arith.truncf %186 : vector<256x32xf32> to vector<256x32xbf16>
    %c0_197 = arith.constant 0 : index
    %c544 = arith.constant 544 : index
    %188 = vector.load %arg10[%c0_197, %c544] : memref<256x800xbf16, #tpu.memory_space<vmem>>, vector<256x32xbf16>
    tpu.vector_store %arg10[%c0_197, %c544], %187 {strides = array<i32>} : memref<256x800xbf16, #tpu.memory_space<vmem>>, vector<256x32xbf16>,
    %c3_198 = arith.constant 3 : index
    %c3_199 = arith.constant 3 : index
    %c0_200 = arith.constant 0 : index
    %189 = vector.load %arg9[%c3_198, %c3_199, %c0_200] : memref<20x20x32xf32, #tpu.memory_space<vmem>>, vector<16x16x32xf32>
    %190 = vector.shape_cast %189 : vector<16x16x32xf32> to vector<256x32xf32>
    %191 = arith.truncf %190 : vector<256x32xf32> to vector<256x32xbf16>
    %c0_201 = arith.constant 0 : index
    %c576 = arith.constant 576 : index
    %192 = vector.load %arg10[%c0_201, %c576] : memref<256x800xbf16, #tpu.memory_space<vmem>>, vector<256x32xbf16>
    tpu.vector_store %arg10[%c0_201, %c576], %191 {strides = array<i32>} : memref<256x800xbf16, #tpu.memory_space<vmem>>, vector<256x32xbf16>,
    %c3_202 = arith.constant 3 : index
    %c4_203 = arith.constant 4 : index
    %c0_204 = arith.constant 0 : index
    %193 = vector.load %arg9[%c3_202, %c4_203, %c0_204] : memref<20x20x32xf32, #tpu.memory_space<vmem>>, vector<16x16x32xf32>
    %194 = vector.shape_cast %193 : vector<16x16x32xf32> to vector<256x32xf32>
    %195 = arith.truncf %194 : vector<256x32xf32> to vector<256x32xbf16>
    %c0_205 = arith.constant 0 : index
    %c608 = arith.constant 608 : index
    %196 = vector.load %arg10[%c0_205, %c608] : memref<256x800xbf16, #tpu.memory_space<vmem>>, vector<256x32xbf16>
    tpu.vector_store %arg10[%c0_205, %c608], %195 {strides = array<i32>} : memref<256x800xbf16, #tpu.memory_space<vmem>>, vector<256x32xbf16>,
    %c4_206 = arith.constant 4 : index
    %c0_207 = arith.constant 0 : index
    %c0_208 = arith.constant 0 : index
    %197 = vector.load %arg9[%c4_206, %c0_207, %c0_208] : memref<20x20x32xf32, #tpu.memory_space<vmem>>, vector<16x16x32xf32>
    %198 = vector.shape_cast %197 : vector<16x16x32xf32> to vector<256x32xf32>
    %199 = arith.truncf %198 : vector<256x32xf32> to vector<256x32xbf16>
    %c0_209 = arith.constant 0 : index
    %c640 = arith.constant 640 : index
    %200 = vector.load %arg10[%c0_209, %c640] : memref<256x800xbf16, #tpu.memory_space<vmem>>, vector<256x32xbf16>
    tpu.vector_store %arg10[%c0_209, %c640], %199 {strides = array<i32>} : memref<256x800xbf16, #tpu.memory_space<vmem>>, vector<256x32xbf16>,
    %c4_210 = arith.constant 4 : index
    %c1_211 = arith.constant 1 : index
    %c0_212 = arith.constant 0 : index
    %201 = vector.load %arg9[%c4_210, %c1_211, %c0_212] : memref<20x20x32xf32, #tpu.memory_space<vmem>>, vector<16x16x32xf32>
    %202 = vector.shape_cast %201 : vector<16x16x32xf32> to vector<256x32xf32>
    %203 = arith.truncf %202 : vector<256x32xf32> to vector<256x32xbf16>
    %c0_213 = arith.constant 0 : index
    %c672 = arith.constant 672 : index
    %204 = vector.load %arg10[%c0_213, %c672] : memref<256x800xbf16, #tpu.memory_space<vmem>>, vector<256x32xbf16>
    tpu.vector_store %arg10[%c0_213, %c672], %203 {strides = array<i32>} : memref<256x800xbf16, #tpu.memory_space<vmem>>, vector<256x32xbf16>,
    %c4_214 = arith.constant 4 : index
    %c2_215 = arith.constant 2 : index
    %c0_216 = arith.constant 0 : index
    %205 = vector.load %arg9[%c4_214, %c2_215, %c0_216] : memref<20x20x32xf32, #tpu.memory_space<vmem>>, vector<16x16x32xf32>
    %206 = vector.shape_cast %205 : vector<16x16x32xf32> to vector<256x32xf32>
    %207 = arith.truncf %206 : vector<256x32xf32> to vector<256x32xbf16>
    %c0_217 = arith.constant 0 : index
    %c704 = arith.constant 704 : index
    %208 = vector.load %arg10[%c0_217, %c704] : memref<256x800xbf16, #tpu.memory_space<vmem>>, vector<256x32xbf16>
    tpu.vector_store %arg10[%c0_217, %c704], %207 {strides = array<i32>} : memref<256x800xbf16, #tpu.memory_space<vmem>>, vector<256x32xbf16>,
    %c4_218 = arith.constant 4 : index
    %c3_219 = arith.constant 3 : index
    %c0_220 = arith.constant 0 : index
    %209 = vector.load %arg9[%c4_218, %c3_219, %c0_220] : memref<20x20x32xf32, #tpu.memory_space<vmem>>, vector<16x16x32xf32>
    %210 = vector.shape_cast %209 : vector<16x16x32xf32> to vector<256x32xf32>
    %211 = arith.truncf %210 : vector<256x32xf32> to vector<256x32xbf16>
    %c0_221 = arith.constant 0 : index
    %c736 = arith.constant 736 : index
    %212 = vector.load %arg10[%c0_221, %c736] : memref<256x800xbf16, #tpu.memory_space<vmem>>, vector<256x32xbf16>
    tpu.vector_store %arg10[%c0_221, %c736], %211 {strides = array<i32>} : memref<256x800xbf16, #tpu.memory_space<vmem>>, vector<256x32xbf16>,
    %c4_222 = arith.constant 4 : index
    %c4_223 = arith.constant 4 : index
    %c0_224 = arith.constant 0 : index
    %213 = vector.load %arg9[%c4_222, %c4_223, %c0_224] : memref<20x20x32xf32, #tpu.memory_space<vmem>>, vector<16x16x32xf32>
    %214 = vector.shape_cast %213 : vector<16x16x32xf32> to vector<256x32xf32>
    %215 = arith.truncf %214 : vector<256x32xf32> to vector<256x32xbf16>
    %c0_225 = arith.constant 0 : index
    %c768 = arith.constant 768 : index
    %216 = vector.load %arg10[%c0_225, %c768] : memref<256x800xbf16, #tpu.memory_space<vmem>>, vector<256x32xbf16>
    tpu.vector_store %arg10[%c0_225, %c768], %215 {strides = array<i32>} : memref<256x800xbf16, #tpu.memory_space<vmem>>, vector<256x32xbf16>,
    %c0_226 = arith.constant 0 : index
    %c0_227 = arith.constant 0 : index
    %217 = vector.load %arg10[%c0_226, %c0_227] : memref<256x800xbf16, #tpu.memory_space<vmem>>, vector<256x800xbf16>
    %c0_228 = arith.constant 0 : index
    %c0_229 = arith.constant 0 : index
    %218 = vector.load %arg4[%c0_228, %c0_229] : memref<800x32xbf16, #tpu.memory_space<vmem>>, vector<800x32xbf16>
    %cst_230 = arith.constant dense<0.000000e+00> : vector<256x32xf32>
    %219 = tpu.matmul %217, %218, %cst_230 {dimension_numbers = #tpu.dot_dimension_numbers<[1], [0], [0], [1], [0, 0, 1, 1], [], []>} : vector<256x800xbf16>, vector<800x32xbf16>, vector<256x32xf32> -> vector<256x32xf32>
    %c0_231 = arith.constant 0 : index
    %c0_232 = arith.constant 0 : index
    %220 = vector.load %arg5[%c0_231, %c0_232] : memref<1x32xf32, #tpu.memory_space<vmem>>, vector<1x32xf32>
    %221 = vector.broadcast %220 : vector<1x32xf32> to vector<256x32xf32>
    %222 = arith.addf %219, %221 : vector<256x32xf32>
    %cst_233 = arith.constant 0.000000e+00 : f32
    %223 = vector.broadcast %cst_233 : f32 to vector<256x32xf32>
    %224 = arith.maximumf %222, %223 : vector<256x32xf32>
    %225 = vector.shape_cast %224 : vector<256x32xf32> to vector<16x16x32xf32>
    %c0_234 = arith.constant 0 : index
    %c0_235 = arith.constant 0 : index
    %c0_236 = arith.constant 0 : index
    %226 = vector.load %arg11[%c0_234, %c0_235, %c0_236] : memref<16x16x32xf32, #tpu.memory_space<vmem>>, vector<16x16x32xf32>
    tpu.vector_store %arg11[%c0_234, %c0_235, %c0_236], %225 {strides = array<i32>} : memref<16x16x32xf32, #tpu.memory_space<vmem>>, vector<16x16x32xf32>,
    %c0_237 = arith.constant 0 : index
    %c0_238 = arith.constant 0 : index
    %c0_239 = arith.constant 0 : index
    %227 = tpu.strided_load %arg11[%c0_237, %c0_238, %c0_239] {strides = array<i32: 1, 2, 1>} : memref<16x16x32xf32, #tpu.memory_space<vmem>>, vector<16x8x32xf32>
    %c0_240 = arith.constant 0 : index
    %c1_241 = arith.constant 1 : index
    %c0_242 = arith.constant 0 : index
    %228 = tpu.strided_load %arg11[%c0_240, %c1_241, %c0_242] {strides = array<i32: 1, 2, 1>} : memref<16x16x32xf32, #tpu.memory_space<vmem>>, vector<16x8x32xf32>
    %229 = arith.maximumf %227, %228 : vector<16x8x32xf32>
    %c0_243 = arith.constant 0 : index
    %c0_244 = arith.constant 0 : index
    %c0_245 = arith.constant 0 : index
    %230 = vector.load %arg12[%c0_243, %c0_244, %c0_245] : memref<16x8x32xf32, #tpu.memory_space<vmem>>, vector<16x8x32xf32>
    tpu.vector_store %arg12[%c0_243, %c0_244, %c0_245], %229 {strides = array<i32>} : memref<16x8x32xf32, #tpu.memory_space<vmem>>, vector<16x8x32xf32>,
    %c0_246 = arith.constant 0 : index
    %c0_247 = arith.constant 0 : index
    %c0_248 = arith.constant 0 : index
    %231 = tpu.strided_load %arg12[%c0_246, %c0_247, %c0_248] {strides = array<i32: 2, 1, 1>} : memref<16x8x32xf32, #tpu.memory_space<vmem>>, vector<8x8x32xf32>
    %c1_249 = arith.constant 1 : index
    %c0_250 = arith.constant 0 : index
    %c0_251 = arith.constant 0 : index
    %232 = tpu.strided_load %arg12[%c1_249, %c0_250, %c0_251] {strides = array<i32: 2, 1, 1>} : memref<16x8x32xf32, #tpu.memory_space<vmem>>, vector<8x8x32xf32>
    %233 = arith.maximumf %231, %232 : vector<8x8x32xf32>
    %234 = vector.shape_cast %233 : vector<8x8x32xf32> to vector<1x8x8x32xf32>
    %c0_252 = arith.constant 0 : index
    %c0_253 = arith.constant 0 : index
    %c0_254 = arith.constant 0 : index
    %c0_255 = arith.constant 0 : index
    %235 = vector.load %arg6[%c0_252, %c0_253, %c0_254, %c0_255] : memref<1x8x8x32xf32, #tpu.memory_space<vmem>>, vector<1x8x8x32xf32>
    tpu.vector_store %arg6[%c0_252, %c0_253, %c0_254, %c0_255], %234 {strides = array<i32>} : memref<1x8x8x32xf32, #tpu.memory_space<vmem>>, vector<1x8x8x32xf32>,
    return
  }
  func.func @transform_0(%arg0: i32) -> (i32, i32, i32, i32) {
    %c0_i32 = arith.constant 0 : i32
    %c0_i32_0 = arith.constant 0 : i32
    %c0_i32_1 = arith.constant 0 : i32
    %c0_i32_2 = arith.constant 0 : i32
    return %arg0, %c0_i32, %c0_i32_0, %c0_i32_1 : i32, i32, i32, i32
  }
  func.func @transform_1(%arg0: i32) -> (i32, i32) {
    %c0_i32 = arith.constant 0 : i32
    %c0_i32_0 = arith.constant 0 : i32
    %c0_i32_1 = arith.constant 0 : i32
    return %c0_i32, %c0_i32_0 : i32, i32
  }
  func.func @transform_2(%arg0: i32) -> (i32, i32) {
    %c0_i32 = arith.constant 0 : i32
    %c0_i32_0 = arith.constant 0 : i32
    %c0_i32_1 = arith.constant 0 : i32
    return %c0_i32, %c0_i32_0 : i32, i32
  }
  func.func @transform_3(%arg0: i32) -> (i32, i32) {
    %c0_i32 = arith.constant 0 : i32
    %c0_i32_0 = arith.constant 0 : i32
    %c0_i32_1 = arith.constant 0 : i32
    return %c0_i32, %c0_i32_0 : i32, i32
  }
  func.func @transform_4(%arg0: i32) -> (i32, i32) {
    %c0_i32 = arith.constant 0 : i32
    %c0_i32_0 = arith.constant 0 : i32
    %c0_i32_1 = arith.constant 0 : i32
    return %c0_i32, %c0_i32_0 : i32, i32
  }
  func.func @transform_5(%arg0: i32) -> (i32, i32, i32, i32) {
    %c0_i32 = arith.constant 0 : i32
    %c0_i32_0 = arith.constant 0 : i32
    %c0_i32_1 = arith.constant 0 : i32
    %c0_i32_2 = arith.constant 0 : i32
    return %arg0, %c0_i32, %c0_i32_0, %c0_i32_1 : i32, i32, i32, i32
  }
}

</mosaic_0001>

<bundles_post_ra>
// kernel: basic_block_forward.1
= control target key start
LH: loop header
LB: loop body
LE: loop exit
PB: predicated region body
PF: predicated region fallthrough
CT: control target
= control target key end

     0   :  { %10 = vsyncpa [#allocation9], 0  ;;  %s12379_s0 = inlined_call_operand.vmem [shape: f32[2,16,16,4], index: 0, kind: input, shape index: {}]   ;;  %s12380_s1 = inlined_call_operand.vmem [shape: bf16[100,32], index: 1, kind: input, shape index: {}]   ;;  %s12381_s2 = inlined_call_operand.vmem [shape: f32[1,32], index: 2, kind: input, shape index: {}]   ;;  %s12382_s3 = inlined_call_operand.vmem [shape: bf16[800,32], index: 3, kind: input, shape index: {}]   ;;  %s12383_s4 = inlined_call_operand.vmem [shape: f32[1,32], index: 4, kind: input, shape index: {}]   ;;  %s12384_s5 = inlined_call_operand.hbm [shape: f32[2,8,8,32], index: 5, kind: output, shape index: {}]  }
   0x1   :  { %12 = vsyncpa [#allocation9 + $0x1], 0  ;;  %s8977_s18 = smov 0   ;;  %s8979_s19 = smov 0  }
   0x2   :  { %s8981_s20 = smov 0   ;;  %s8983_s21 = smov 0  }
   0x3 LB: > { %s8998_s22 = sadd.s32 4294967295, %s8918_s21   ;;  %s8167_s23 = sadd.s32 4294967294, %s8918_s21   ;;  %s8918_s21 = sphi %s8983_s21, %s12446_s21   ;;  %s8914_s20 = sphi %s8981_s20, %s12445_s20   ;;  %s8910_s19 = sphi %s8979_s19, %s12444_s19   ;;  %s8906_s18 = sphi %s8977_s18, %s12443_s18  }
   0x4   : > { %s9002_s24 = sadd.s32 1, %s8918_s21   ;;  %s135_s25 = sadd.s32 1, %s8914_s20 }
   0x5   : > { %s132_s26 = ssub.s32 %s8918_s21, %s9002_s24  ;;  %p145_p0 = scmp.ne.s32.totalorder %s8914_s20, %s8910_s19 }
   0x6   : > { %p133_p1 = scmp.eq.s32.totalorder %s132_s26, 0  ;;  %p146_p2 = scmp.eq.s32.totalorder %s8998_s22, 1 }
   0x7   : > { %p151_p3 = scmp.ne.s32.totalorder %s8910_s19, %s8906_s18  ;;  %p152_p4 = scmp.eq.s32.totalorder %s8167_s23, 1 }
   0x8   : > { %s9013_s27 = scalar_select %p133_p1, %s8914_s20, %s135_s25  }
   0x9   : > { %p9015_p5 = por %p146_p2, %p145_p0  ;;  %p9019_p6 = por %p152_p4, %p151_p3 }
   0xa   : > { %p8170_p7 = scmp.ge.s32.totalorder %s8918_s21, 1  ;;  %p190_p8 = scmp.lt.s32.totalorder %s8918_s21, 3 }
   0xc   : > { %p191_p9 = pnand %p8170_p7, %p190_p8 }
   0xe   : > { %194 = sbr.rel (%p191_p9) target bundleno = 1940 (0x794), region = 40 }
  0x15   : > { %vm224_vm0 = vcmask 31744   ;;  %vm227_vm1 = vcmask 27648   ;;  %p218_p10 = scmp.lt.s32.totalorder %s8998_s22, 1  ;;  %v12385_v0 = vmov 0.0   ;;  %s8921_s10 = smov 4   ;;  %vm527_vm2 = vcmask 64544  }
  0x16   : > { %225 = vst.msk [vmem:[#allocation2] sm:$0xff] %vm224_vm0, %v12385_v0  ;;  %226 = vst.msk [vmem:[#allocation2 + $0x8] sm:$0xff] %vm224_vm0, %v12385_v0  ;;  %s8922_s11 = smov 8   ;;  %s8923_s12 = smov 12   ;;  %vm656_vm3 = vcmask 97344   ;;  %vm785_vm4 = vcmask 130144  }
  0x17   : > { %228 = vst.msk [vmem:[#allocation2 + $0x10] sm:$0xf] %vm227_vm1, %v12385_v0  ;;  %231 = vst.msk [vmem:[#allocation2 + $0x28] sm:$0xf] %vm227_vm1, %v12385_v0  ;;  %s219_s30 = scalar_select %p218_p10, %s8998_s22, 1  ;;  %vm914_vm5 = vcmask 162944  }
  0x18   : > { %229 = vst.msk [vmem:[#allocation2 + $0x18] sm:$0xff] %vm224_vm0, %v12385_v0  ;;  %230 = vst.msk [vmem:[#allocation2 + $0x20] sm:$0xff] %vm224_vm0, %v12385_v0  ;;  %s8924_s13 = smov 16   ;;  %s8925_s14 = smov 20   ;;  %vm1044_vm6 = vcmask 195744   ;;  %vm1173_vm7 = vcmask 228544  }
  0x19   : > { %232 = vst.msk [vmem:[#allocation2 + $0x30] sm:$0xff] %vm224_vm0, %v12385_v0  ;;  %233 = vst.msk [vmem:[#allocation2 + $0x38] sm:$0xff] %vm224_vm0, %v12385_v0  ;;  %s8270_s6 = sshll.u32 %s219_s30, 8  ;;  %s8926_s15 = smov 24   ;;  %vm1302_vm8 = vcmask 261344   ;;  %vm1431_vm9 = vcmask 294144  }
  0x1a   : > { %234 = vst.msk [vmem:[#allocation2 + $0x40] sm:$0xf] %vm227_vm1, %v12385_v0  ;;  %237 = vst.msk [vmem:[#allocation2 + $0x58] sm:$0xf] %vm227_vm1, %v12385_v0  ;;  %s9152_s9 = scalar_lea.vmem %s12379_s0, %s8270_s6  ;;  %s8927_s16 = smov 28   ;;  %vm1560_vm10 = vcmask 326944  }
  0x1b   : > { %235 = vst.msk [vmem:[#allocation2 + $0x48] sm:$0xff] %vm224_vm0, %v12385_v0  ;;  %236 = vst.msk [vmem:[#allocation2 + $0x50] sm:$0xff] %vm224_vm0, %v12385_v0  ;;  %v286_v1 = vld [vmem:[%s9152_s9] sm:$0xff]  ;;  %v287_v2 = vld [vmem:[%s9152_s9 + $0x8] sm:$0xff]  ;;  %s8928_s17 = smov 32   ;;  %s8929_s23 = smov 36  }
  0x1c   : > { %238 = vst.msk [vmem:[#allocation2 + $0x60] sm:$0xff] %vm224_vm0, %v12385_v0  ;;  %239 = vst.msk [vmem:[#allocation2 + $0x68] sm:$0xff] %vm224_vm0, %v12385_v0  ;;  %v288_v3 = vld [vmem:[%s9152_s9 + $0x10] sm:$0xff]  ;;  %v289_v4 = vld [vmem:[%s9152_s9 + $0x18] sm:$0xff]  ;;  %s8930_s25 = smov 40   ;;  %s8931_s26 = smov 44  }
  0x1d   : > { %240 = vst.msk [vmem:[#allocation2 + $0x70] sm:$0xf] %vm227_vm1, %v12385_v0  ;;  %243 = vst.msk [vmem:[#allocation2 + $0x88] sm:$0xf] %vm227_vm1, %v12385_v0  ;;  %v290_v5 = vld [vmem:[%s9152_s9 + $0x20] sm:$0xff]  ;;  %v291_v6 = vld [vmem:[%s9152_s9 + $0x28] sm:$0xff] }
  0x1e   : > { %241 = vst.msk [vmem:[#allocation2 + $0x78] sm:$0xff] %vm224_vm0, %v12385_v0  ;;  %242 = vst.msk [vmem:[#allocation2 + $0x80] sm:$0xff] %vm224_vm0, %v12385_v0  ;;  %v415_v7 = vld [vmem:[#allocation2 + $0x1] sm:$0xff]  ;;  %v416_v8 = vld [vmem:[#allocation2 + $0x9] sm:$0xff]  ;;  %s8932_s30 = smov 48   ;;  %s8933_s6 = smov 52  }
  0x1f   : > { %244 = vst.msk [vmem:[#allocation2 + $0x90] sm:$0xff] %vm224_vm0, %v12385_v0  ;;  %245 = vst.msk [vmem:[#allocation2 + $0x98] sm:$0xff] %vm224_vm0, %v12385_v0  ;;  %v417_v9 = vld [vmem:[#allocation2 + $0x19] sm:$0xff]  ;;  %v447_v10 = vpack.c.bf16 %v416_v8, %v415_v7  ;;  %v418_v11 = vld [vmem:[#allocation2 + $0x21] sm:$0xff]  ;;  %vm1689_vm11 = vcmask 359744   ;;  %s8934_s7 = smov 56  }
  0x20   : > { %246 = vst.msk [vmem:[#allocation2 + $0xa0] sm:$0xf] %vm227_vm1, %v12385_v0  ;;  %249 = vst.msk [vmem:[#allocation2 + $0xb8] sm:$0xf] %vm227_vm1, %v12385_v0  ;;  %v292_v12 = vld [vmem:[%s9152_s9 + $0x30] sm:$0xff]  ;;  %v293_v13 = vld [vmem:[%s9152_s9 + $0x38] sm:$0xff]  ;;  %v9174_v17 = vpack.c.bf16 %v418_v11, %v417_v9 }
  0x21   : > { %247 = vst.msk [vmem:[#allocation2 + $0xa8] sm:$0xff] %vm224_vm0, %v12385_v0  ;;  %248 = vst.msk [vmem:[#allocation2 + $0xb0] sm:$0xff] %vm224_vm0, %v12385_v0  ;;  %v294_v14 = vld [vmem:[%s9152_s9 + $0x40] sm:$0xff]  ;;  %v295_v15 = vld [vmem:[%s9152_s9 + $0x48] sm:$0xff]  ;;  %479 = vrot.lane.b32.xlu0 %v447_v10, %s8921_s10  ;;  %vm1818_vm12 = vcmask 392544   ;;  %s8935_s8 = smov 60  }
  0x22   : > { %250 = vst.msk [vmem:[#allocation2 + $0xc0] sm:$0xff] %vm224_vm0, %v12385_v0  ;;  %251 = vst.msk [vmem:[#allocation2 + $0xc8] sm:$0xff] %vm224_vm0, %v12385_v0  ;;  %v296_v16 = vld [vmem:[%s9152_s9 + $0x50] sm:$0xff]  ;;  %v297_v18 = vld [vmem:[%s9152_s9 + $0x58] sm:$0xff]  ;;  %vm1947_vm13 = vcmask 425344   ;;  %vm2076_vm14 = vcmask 458144  }
  0x23   : > { %252 = vst.msk [vmem:[#allocation2 + $0xd0] sm:$0xf] %vm227_vm1, %v12385_v0  ;;  %255 = vst.msk [vmem:[#allocation2 + $0xe8] sm:$0xf] %vm227_vm1, %v12385_v0  ;;  %v298_v19 = vld [vmem:[%s9152_s9 + $0x60] sm:$0xff]  ;;  %v299_v20 = vld [vmem:[%s9152_s9 + $0x68] sm:$0xff] }
  0x24   : > { %253 = vst.msk [vmem:[#allocation2 + $0xd8] sm:$0xff] %vm224_vm0, %v12385_v0  ;;  %254 = vst.msk [vmem:[#allocation2 + $0xe0] sm:$0xff] %vm224_vm0, %v12385_v0  ;;  %v300_v21 = vld [vmem:[%s9152_s9 + $0x70] sm:$0xff]  ;;  %v301_v22 = vld [vmem:[%s9152_s9 + $0x78] sm:$0xff]  ;;  %vm3638_vm15 = vcmask 1041408  }
  0x25   : > { %256 = vst.msk [vmem:[#allocation2 + $0xf0] sm:$0xff] %vm224_vm0, %v12385_v0  ;;  %257 = vst.msk [vmem:[#allocation2 + $0xf8] sm:$0xff] %vm224_vm0, %v12385_v0  ;;  %v302_v23 = vld [vmem:[%s9152_s9 + $0x80] sm:$0xff]  ;;  %v303_v24 = vld [vmem:[%s9152_s9 + $0x88] sm:$0xff]  ;;  %481 = vrot.lane.b32.xlu0 %v9174_v17, %s8921_s10 }
  0x26   : > { %258 = vst.msk [vmem:[#allocation2 + $0x100] sm:$0xf] %vm227_vm1, %v12385_v0  ;;  %261 = vst.msk [vmem:[#allocation2 + $0x118] sm:$0xf] %vm227_vm1, %v12385_v0  ;;  %v304_v25 = vld [vmem:[%s9152_s9 + $0x90] sm:$0xff]  ;;  %v305_v26 = vld [vmem:[%s9152_s9 + $0x98] sm:$0xff] }
  0x27   : > { %259 = vst.msk [vmem:[#allocation2 + $0x108] sm:$0xff] %vm224_vm0, %v12385_v0  ;;  %260 = vst.msk [vmem:[#allocation2 + $0x110] sm:$0xff] %vm224_vm0, %v12385_v0  ;;  %v306_v35 = vld [vmem:[%s9152_s9 + $0xa0] sm:$0xff]  ;;  %v307_v36 = vld [vmem:[%s9152_s9 + $0xa8] sm:$0xff] }
  0x28   : > { %262 = vst.msk [vmem:[#allocation2 + $0x120] sm:$0xff] %vm224_vm0, %v12385_v0  ;;  %263 = vst.msk [vmem:[#allocation2 + $0x128] sm:$0xff] %vm224_vm0, %v12385_v0  ;;  %v308_v37 = vld [vmem:[%s9152_s9 + $0xb0] sm:$0xff]  ;;  %v309_v40 = vld [vmem:[%s9152_s9 + $0xb8] sm:$0xff] }
  0x29   : > { %264 = vst.msk [vmem:[#allocation2 + $0x130] sm:$0xf] %vm227_vm1, %v12385_v0  ;;  %267 = vst.msk [vmem:[#allocation2 + $0x148] sm:$0xf] %vm227_vm1, %v12385_v0  ;;  %v310_v50 = vld [vmem:[%s9152_s9 + $0xc0] sm:$0xff]  ;;  %v311_v51 = vld [vmem:[%s9152_s9 + $0xc8] sm:$0xff] }
  0x2a   : > { %265 = vst.msk [vmem:[#allocation2 + $0x138] sm:$0xff] %vm224_vm0, %v12385_v0  ;;  %266 = vst.msk [vmem:[#allocation2 + $0x140] sm:$0xff] %vm224_vm0, %v12385_v0  ;;  %v312_v52 = vld [vmem:[%s9152_s9 + $0xd0] sm:$0xff]  ;;  %v313_v54 = vld [vmem:[%s9152_s9 + $0xd8] sm:$0xff] }
  0x2b   : > { %268 = vst.msk [vmem:[#allocation2 + $0x150] sm:$0xff] %vm224_vm0, %v12385_v0  ;;  %269 = vst.msk [vmem:[#allocation2 + $0x158] sm:$0xff] %vm224_vm0, %v12385_v0  ;;  %v544_v10 = vld [vmem:[#allocation2 + $0x2] sm:$0xff]  ;;  %v545_v11 = vld [vmem:[#allocation2 + $0xa] sm:$0xff] }
  0x2c   : > { %270 = vst.msk [vmem:[#allocation2 + $0x160] sm:$0xf] %vm227_vm1, %v12385_v0  ;;  %273 = vst.msk [vmem:[#allocation2 + $0x178] sm:$0xf] %vm227_vm1, %v12385_v0 }
  0x2d   : > { %271 = vst.msk [vmem:[#allocation2 + $0x168] sm:$0xff] %vm224_vm0, %v12385_v0  ;;  %272 = vst.msk [vmem:[#allocation2 + $0x170] sm:$0xff] %vm224_vm0, %v12385_v0 }
  0x2e   : > { %274 = vst.msk [vmem:[#allocation2 + $0x180] sm:$0xff] %vm224_vm0, %v12385_v0  ;;  %275 = vst.msk [vmem:[#allocation2 + $0x188] sm:$0xff] %vm224_vm0, %v12385_v0 }
  0x2f   : > { %276 = vst.msk [vmem:[#allocation2 + $0x190] sm:$0xf] %vm227_vm1, %v12385_v0  ;;  %279 = vst.msk [vmem:[#allocation2 + $0x1a8] sm:$0xf] %vm227_vm1, %v12385_v0 }
  0x30   : > { %277 = vst.msk [vmem:[#allocation2 + $0x198] sm:$0xff] %vm224_vm0, %v12385_v0  ;;  %278 = vst.msk [vmem:[#allocation2 + $0x1a0] sm:$0xff] %vm224_vm0, %v12385_v0 }
  0x31   : > { %280 = vst.msk [vmem:[#allocation2 + $0x1b0] sm:$0xff] %vm224_vm0, %v12385_v0  ;;  %281 = vst.msk [vmem:[#allocation2 + $0x1b8] sm:$0xff] %vm224_vm0, %v12385_v0 }
  0x32   : > { %282 = vst.msk [vmem:[#allocation2 + $0x1c0] sm:$0xf] %vm227_vm1, %v12385_v0  ;;  %285 = vst.msk [vmem:[#allocation2 + $0x1d8] sm:$0xf] %vm227_vm1, %v12385_v0  ;;  %vm2335_vm1 = vcmask 523744  }
  0x33   : > { %283 = vst.msk [vmem:[#allocation2 + $0x1c8] sm:$0xff] %vm224_vm0, %v12385_v0  ;;  %284 = vst.msk [vmem:[#allocation2 + $0x1d0] sm:$0xff] %vm224_vm0, %v12385_v0 }
  0x34   : > { %319 = vst.msk [vmem:[#allocation2 + $0x32] sm:$0xff] %vm224_vm0, %v286_v1  ;;  %320 = vst.msk [vmem:[#allocation2 + $0x3a] sm:$0xff] %vm224_vm0, %v287_v2 }
  0x35   : > { %321 = vst.msk [vmem:[#allocation2 + $0x4a] sm:$0xff] %vm224_vm0, %v288_v3  ;;  %322 = vst.msk [vmem:[#allocation2 + $0x52] sm:$0xff] %vm224_vm0, %v289_v4 }
  0x36   : > { %323 = vst.msk [vmem:[#allocation2 + $0x62] sm:$0xff] %vm224_vm0, %v290_v5  ;;  %324 = vst.msk [vmem:[#allocation2 + $0x6a] sm:$0xff] %vm224_vm0, %v291_v6 }
  0x37   : > { %325 = vst.msk [vmem:[#allocation2 + $0x7a] sm:$0xff] %vm224_vm0, %v292_v12  ;;  %326 = vst.msk [vmem:[#allocation2 + $0x82] sm:$0xff] %vm224_vm0, %v293_v13 }
  0x38   : > { %327 = vst.msk [vmem:[#allocation2 + $0x92] sm:$0xff] %vm224_vm0, %v294_v14  ;;  %328 = vst.msk [vmem:[#allocation2 + $0x9a] sm:$0xff] %vm224_vm0, %v295_v15  ;;  %v576_v15 = vpack.c.bf16 %v545_v11, %v544_v10 }
  0x39   : > { %329 = vst.msk [vmem:[#allocation2 + $0xaa] sm:$0xff] %vm224_vm0, %v296_v16  ;;  %330 = vst.msk [vmem:[#allocation2 + $0xb2] sm:$0xff] %vm224_vm0, %v297_v18 }
  0x3a   : > { %331 = vst.msk [vmem:[#allocation2 + $0xc2] sm:$0xff] %vm224_vm0, %v298_v19  ;;  %332 = vst.msk [vmem:[#allocation2 + $0xca] sm:$0xff] %vm224_vm0, %v299_v20  ;;  %v546_v20 = vld [vmem:[#allocation2 + $0x1a] sm:$0xff] }
  0x3b   : > { %333 = vst.msk [vmem:[#allocation2 + $0xda] sm:$0xff] %vm224_vm0, %v300_v21  ;;  %334 = vst.msk [vmem:[#allocation2 + $0xe2] sm:$0xff] %vm224_vm0, %v301_v22  ;;  %v419_v27 = vld [vmem:[#allocation2 + $0x31] sm:$0xff]  ;;  %v420_v28 = vld [vmem:[#allocation2 + $0x39] sm:$0xff] }
  0x3c   : > { %335 = vst.msk [vmem:[#allocation2 + $0xf2] sm:$0xff] %vm224_vm0, %v302_v23  ;;  %v421_v29 = vld [vmem:[#allocation2 + $0x49] sm:$0xff]  ;;  %336 = vst.msk [vmem:[#allocation2 + $0xfa] sm:$0xff] %vm224_vm0, %v303_v24  ;;  %v9197_v30 = vpack.c.bf16 %v420_v28, %v419_v27  ;;  %v422_v31 = vld [vmem:[#allocation2 + $0x51] sm:$0xff] }
  0x3d   : > { %337 = vst.msk [vmem:[#allocation2 + $0x10a] sm:$0xff] %vm224_vm0, %v304_v25  ;;  %338 = vst.msk [vmem:[#allocation2 + $0x112] sm:$0xff] %vm224_vm0, %v305_v26  ;;  %v423_v32 = vld [vmem:[#allocation2 + $0x61] sm:$0xff]  ;;  %v424_v33 = vld [vmem:[#allocation2 + $0x69] sm:$0xff]  ;;  %v9208_v38 = vpack.c.bf16 %v422_v31, %v421_v29 }
  0x3e   : > { %v9201_v34 = vpack.c.bf16 %v424_v33, %v423_v32  ;;  %483 = vrot.lane.b32.xlu1 %v9197_v30, %s8921_s10  ;;  %v425_v39 = vld [vmem:[#allocation2 + $0x79] sm:$0xff]  ;;  %339 = vst.msk [vmem:[#allocation2 + $0x122] sm:$0xff] %vm224_vm0, %v306_v35  ;;  %340 = vst.msk [vmem:[#allocation2 + $0x12a] sm:$0xff] %vm224_vm0, %v307_v36  ;;  %v426_v41 = vld [vmem:[#allocation2 + $0x81] sm:$0xff] }
  0x3f   : > { %341 = vst.msk [vmem:[#allocation2 + $0x13a] sm:$0xff] %vm224_vm0, %v308_v37  ;;  %v427_v42 = vld [vmem:[#allocation2 + $0x91] sm:$0xff]  ;;  %v428_v43 = vld [vmem:[#allocation2 + $0x99] sm:$0xff]  ;;  %342 = vst.msk [vmem:[#allocation2 + $0x142] sm:$0xff] %vm224_vm0, %v309_v40  ;;  %v9221_v47 = vpack.c.bf16 %v426_v41, %v425_v39 }
  0x40   : > { %487 = vrot.lane.b32.xlu0 %v9201_v34, %s8921_s10  ;;  %v9217_v44 = vpack.c.bf16 %v428_v43, %v427_v42  ;;  %v429_v48 = vld [vmem:[#allocation2 + $0xa9] sm:$0xff]  ;;  %v430_v49 = vld [vmem:[#allocation2 + $0xb1] sm:$0xff]  ;;  %343 = vst.msk [vmem:[#allocation2 + $0x152] sm:$0xff] %vm224_vm0, %v310_v50  ;;  %344 = vst.msk [vmem:[#allocation2 + $0x15a] sm:$0xff] %vm224_vm0, %v311_v51 }
  0x41   : > { %v431_v45 = vld [vmem:[#allocation2 + $0xc1] sm:$0xff]  ;;  %v432_v46 = vld [vmem:[#allocation2 + $0xc9] sm:$0xff]  ;;  %345 = vst.msk [vmem:[#allocation2 + $0x16a] sm:$0xff] %vm224_vm0, %v312_v52  ;;  %346 = vst.msk [vmem:[#allocation2 + $0x172] sm:$0xff] %vm224_vm0, %v313_v54  ;;  %v9237_v57 = vpack.c.bf16 %v430_v49, %v429_v48 }
  0x42   : > { %485 = vrot.lane.b32.xlu1 %v9208_v38, %s8921_s10  ;;  %v9228_v53 = vpack.c.bf16 %v432_v46, %v431_v45  ;;  %v433_v58 = vld [vmem:[#allocation2 + $0xd9] sm:$0xff]  ;;  %v434_v59 = vld [vmem:[#allocation2 + $0xe1] sm:$0xff]  ;;  %v553_v24 = vld [vmem:[#allocation2 + $0x6a] sm:$0xff] }
  0x43   : > { %v435_v55 = vld [vmem:[#allocation2 + $0xf1] sm:$0xff]  ;;  %v436_v56 = vld [vmem:[#allocation2 + $0xf9] sm:$0xff]  ;;  %v9245_v63 = vpack.c.bf16 %v434_v59, %v433_v58  ;;  %v547_v21 = vld [vmem:[#allocation2 + $0x22] sm:$0xff] }
  0x44   : > { %491 = vrot.lane.b32.xlu0 %v9217_v44, %s8921_s10  ;;  %v9241_v60 = vpack.c.bf16 %v436_v56, %v435_v55  ;;  %v437_v1 = vld [vmem:[#allocation2 + $0x109] sm:$0xff]  ;;  %v438_v2 = vld [vmem:[#allocation2 + $0x111] sm:$0xff]  ;;  %v549_v18 = vld [vmem:[#allocation2 + $0x3a] sm:$0xff]  ;;  %v9274_v25 = vpack.c.bf16 %v547_v21, %v546_v20 }
  0x45   : > { %v439_v61 = vld [vmem:[#allocation2 + $0x121] sm:$0xff]  ;;  %v440_v62 = vld [vmem:[#allocation2 + $0x129] sm:$0xff]  ;;  %v9253_v6 = vpack.c.bf16 %v438_v2, %v437_v1  ;;  %v548_v16 = vld [vmem:[#allocation2 + $0x32] sm:$0xff] }
  0x46   : > { %489 = vrot.lane.b32.xlu1 %v9221_v47, %s8921_s10  ;;  %v9249_v3 = vpack.c.bf16 %v440_v62, %v439_v61  ;;  %v441_v7 = vld [vmem:[#allocation2 + $0x139] sm:$0xff]  ;;  %v442_v8 = vld [vmem:[#allocation2 + $0x141] sm:$0xff]  ;;  %v9270_v22 = vpack.c.bf16 %v549_v18, %v548_v16  ;;  %v550_v26 = vld [vmem:[#allocation2 + $0x4a] sm:$0xff] }
  0x47   : > { %v443_v4 = vld [vmem:[#allocation2 + $0x151] sm:$0xff]  ;;  %v444_v5 = vld [vmem:[#allocation2 + $0x159] sm:$0xff]  ;;  %v9261_v12 = vpack.c.bf16 %v442_v8, %v441_v7  ;;  %v552_v23 = vld [vmem:[#allocation2 + $0x62] sm:$0xff] }
  0x48   : > { %495 = vrot.lane.b32.xlu0 %v9228_v53, %s8921_s10  ;;  %v9257_v9 = vpack.c.bf16 %v444_v5, %v443_v4  ;;  %v445_v13 = vld [vmem:[#allocation2 + $0x169] sm:$0xff]  ;;  %v446_v14 = vld [vmem:[#allocation2 + $0x171] sm:$0xff]  ;;  %v9278_v28 = vpack.c.bf16 %v553_v24, %v552_v23  ;;  %v557_v31 = vld [vmem:[#allocation2 + $0x9a] sm:$0xff] }
  0x49   : > { %v9267_v19 = vpack.c.bf16 %v446_v14, %v445_v13  ;;  %v551_v27 = vld [vmem:[#allocation2 + $0x52] sm:$0xff]  ;;  %v554_v33 = vld [vmem:[#allocation2 + $0x7a] sm:$0xff]  ;;  %v555_v35 = vld [vmem:[#allocation2 + $0x82] sm:$0xff] }
  0x4a   : > { %493 = vrot.lane.b32.xlu1 %v9237_v57, %s8921_s10  ;;  %v556_v29 = vld [vmem:[#allocation2 + $0x92] sm:$0xff]  ;;  %v9282_v32 = vpack.c.bf16 %v551_v27, %v550_v26  ;;  %v560_v37 = vld [vmem:[#allocation2 + $0xc2] sm:$0xff]  ;;  %v561_v39 = vld [vmem:[#allocation2 + $0xca] sm:$0xff]  ;;  %v9290_v40 = vpack.c.bf16 %v555_v35, %v554_v33 }
  0x4b   : > { %v9286_v36 = vpack.c.bf16 %v557_v31, %v556_v29  ;;  %v558_v41 = vld [vmem:[#allocation2 + $0xaa] sm:$0xff]  ;;  %v559_v42 = vld [vmem:[#allocation2 + $0xb2] sm:$0xff]  ;;  %v351_v45 = vld [vmem:[#allocation2] sm:$0xff]  ;;  %v9294_v48 = vpack.c.bf16 %v561_v39, %v560_v37 }
  0x4c   : > { %499 = vrot.lane.b32.xlu0 %v9241_v60, %s8921_s10  ;;  %v352_v43 = vld [vmem:[#allocation2 + $0x8] sm:$0xff]  ;;  %v355_v46 = vld [vmem:[#allocation2 + $0x30] sm:$0xff]  ;;  %v356_v50 = vld [vmem:[#allocation2 + $0x38] sm:$0xff]  ;;  %v9300_v56 = vpack.c.bf16 %v559_v42, %v558_v41 }
  0x4d   : > { %v383_v49 = vpack.c.bf16 %v352_v43, %v351_v45  ;;  %v564_v51 = vld [vmem:[#allocation2 + $0xf2] sm:$0xff]  ;;  %v565_v52 = vld [vmem:[#allocation2 + $0xfa] sm:$0xff]  ;;  %v9296_v54 = vpack.c.bf16 %v356_v50, %v355_v46  ;;  %v357_v59 = vld [vmem:[#allocation2 + $0x48] sm:$0xff] }
  0x4e   : > { %497 = vrot.lane.b32.xlu1 %v9245_v63, %s8921_s10  ;;  %v353_v55 = vld [vmem:[#allocation2 + $0x18] sm:$0xff]  ;;  %v354_v58 = vld [vmem:[#allocation2 + $0x20] sm:$0xff]  ;;  %v358_v61 = vld [vmem:[#allocation2 + $0x50] sm:$0xff]  ;;  %v9311_v5 = vpack.c.bf16 %v565_v52, %v564_v51 }
  0x4f   : > { %399 = vst.msk [vmem:[#allocation3] sm:$0xff] %vm224_vm0, %v383_v49  ;;  %v562_v62 = vld [vmem:[#allocation2 + $0xda] sm:$0xff]  ;;  %v563_v1 = vld [vmem:[#allocation2 + $0xe2] sm:$0xff]  ;;  %401 = vst.msk [vmem:[#allocation3 + $0x10] sm:$0xff] %vm224_vm0, %v9296_v54  ;;  %v9305_v2 = vpack.c.bf16 %v354_v58, %v353_v55  ;;  %v9307_v4 = vpack.c.bf16 %v358_v61, %v357_v59 }
  0x50   : > { %503 = vrot.lane.b32.xlu0 %v9249_v3, %s8921_s10  ;;  %v568_v7 = vld [vmem:[#allocation2 + $0x122] sm:$0xff]  ;;  %v569_v11 = vld [vmem:[#allocation2 + $0x12a] sm:$0xff]  ;;  %v361_v14 = vld [vmem:[#allocation2 + $0x78] sm:$0xff]  ;;  %v9321_v16 = vpack.c.bf16 %v563_v1, %v562_v62 }
  0x51   : > { %v359_v8 = vld [vmem:[#allocation2 + $0x60] sm:$0xff]  ;;  %v360_v10 = vld [vmem:[#allocation2 + $0x68] sm:$0xff]  ;;  %400 = vst.msk [vmem:[#allocation3 + $0x8] sm:$0xff] %vm224_vm0, %v9305_v2  ;;  %402 = vst.msk [vmem:[#allocation3 + $0x18] sm:$0xff] %vm224_vm0, %v9307_v4  ;;  %v9329_v31 = vpack.c.bf16 %v569_v11, %v568_v7 }
  0x52   : > { %501 = vrot.lane.b32.xlu1 %v9253_v6, %s8921_s10  ;;  %v9317_v13 = vpack.c.bf16 %v360_v10, %v359_v8  ;;  %v566_v18 = vld [vmem:[#allocation2 + $0x10a] sm:$0xff]  ;;  %v567_v20 = vld [vmem:[#allocation2 + $0x112] sm:$0xff]  ;;  %v573_v24 = vld [vmem:[#allocation2 + $0x15a] sm:$0xff] }
  0x53   : > { %v572_v23 = vld [vmem:[#allocation2 + $0x152] sm:$0xff]  ;;  %v365_v29 = vld [vmem:[#allocation2 + $0xa8] sm:$0xff]  ;;  %v367_v37 = vld [vmem:[#allocation2 + $0xc0] sm:$0xff]  ;;  %v9341_v51 = vpack.c.bf16 %v567_v20, %v566_v18 }
  0x54   : > { %507 = vrot.lane.b32.xlu0 %v9257_v9, %s8921_s10  ;;  %403 = vst.msk [vmem:[#allocation3 + $0x20] sm:$0xff] %vm224_vm0, %v9317_v13  ;;  %v363_v26 = vld [vmem:[#allocation2 + $0x90] sm:$0xff]  ;;  %v364_v27 = vld [vmem:[#allocation2 + $0x98] sm:$0xff]  ;;  %v368_v39 = vld [vmem:[#allocation2 + $0xc8] sm:$0xff] }
  0x55   : > { %v9333_v33 = vpack.c.bf16 %v364_v27, %v363_v26  ;;  %v366_v35 = vld [vmem:[#allocation2 + $0xb0] sm:$0xff]  ;;  %v570_v41 = vld [vmem:[#allocation2 + $0x13a] sm:$0xff]  ;;  %v571_v42 = vld [vmem:[#allocation2 + $0x142] sm:$0xff]  ;;  %v9337_v45 = vpack.c.bf16 %v368_v39, %v367_v37 }
  0x56   : > { %505 = vrot.lane.b32.xlu1 %v9261_v12, %s8921_s10  ;;  %v9335_v43 = vpack.c.bf16 %v366_v35, %v365_v29  ;;  %v369_v46 = vld [vmem:[#allocation2 + $0xd8] sm:$0xff]  ;;  %v370_v49 = vld [vmem:[#allocation2 + $0xe0] sm:$0xff]  ;;  %v371_v50 = vld [vmem:[#allocation2 + $0xf0] sm:$0xff] }
  0x57   : > { %405 = vst.msk [vmem:[#allocation3 + $0x30] sm:$0xff] %vm224_vm0, %v9333_v33  ;;  %v9345_v52 = vpack.c.bf16 %v370_v49, %v369_v46  ;;  %v372_v55 = vld [vmem:[#allocation2 + $0xf8] sm:$0xff]  ;;  %v373_v58 = vld [vmem:[#allocation2 + $0x108] sm:$0xff]  ;;  %v374_v59 = vld [vmem:[#allocation2 + $0x110] sm:$0xff]  ;;  %v9374_v46 = vpack.c.bf16 %v571_v42, %v570_v41 }
  0x58   : > { %608 = vrot.lane.b32.xlu0 %v576_v15, %s8922_s11  ;;  %v362_v15 = vld [vmem:[#allocation2 + $0x80] sm:$0xff]  ;;  %v674_v62 = vld [vmem:[#allocation2 + $0xb] sm:$0xff]  ;;  %406 = vst.msk [vmem:[#allocation3 + $0x38] sm:$0xff] %vm224_vm0, %v9335_v43  ;;  %407 = vst.msk [vmem:[#allocation3 + $0x40] sm:$0xff] %vm224_vm0, %v9337_v45  ;;  %v9351_v1 = vpack.c.bf16 %v372_v55, %v371_v50  ;;  %v9353_v7 = vpack.c.bf16 %v374_v59, %v373_v58 }
  0x59   : > { %v9323_v21 = vpack.c.bf16 %v362_v15, %v361_v14  ;;  %v673_v61 = vld [vmem:[#allocation2 + $0x3] sm:$0xff]  ;;  %v377_v11 = vld [vmem:[#allocation2 + $0x138] sm:$0xff]  ;;  %v9357_v14 = vpack.c.bf16 %v573_v24, %v572_v23  ;;  %408 = vst.msk [vmem:[#allocation3 + $0x48] sm:$0xff] %vm224_vm0, %v9345_v52  ;;  %v379_v20 = vld [vmem:[#allocation2 + $0x150] sm:$0xff] }
  0x5a   : > { %509 = vrot.lane.b32.xlu1 %v9267_v19, %s8921_s10  ;;  %v375_v8 = vld [vmem:[#allocation2 + $0x120] sm:$0xff]  ;;  %v376_v10 = vld [vmem:[#allocation2 + $0x128] sm:$0xff]  ;;  %v380_v26 = vld [vmem:[#allocation2 + $0x158] sm:$0xff]  ;;  %409 = vst.msk [vmem:[#allocation3 + $0x50] sm:$0xff] %vm224_vm0, %v9351_v1  ;;  %v705_v41 = vpack.c.bf16 %v674_v62, %v673_v61 }
  0x5b   : > { %404 = vst.msk [vmem:[#allocation3 + $0x28] sm:$0xff] %vm224_vm0, %v9323_v21  ;;  %12412 = vst [vmem:[#allocation11_spill] sm:$0xff] %v9357_v14  ;;  %v9361_v15 = vpack.c.bf16 %v376_v10, %v375_v8  ;;  %v378_v18 = vld [vmem:[#allocation2 + $0x140] sm:$0xff]  ;;  %v574_v27 = vld [vmem:[#allocation2 + $0x16a] sm:$0xff]  ;;  %v9369_v23 = vpack.c.bf16 %v380_v26, %v379_v20 }
  0x5c   : > { %612 = vrot.lane.b32.xlu0 %v9270_v22, %s8922_s11  ;;  %v575_v29 = vld [vmem:[#allocation2 + $0x172] sm:$0xff]  ;;  %410 = vst.msk [vmem:[#allocation3 + $0x58] sm:$0xff] %vm224_vm0, %v9353_v7  ;;  %v9367_v35 = vpack.c.bf16 %v378_v18, %v377_v11  ;;  %v381_v24 = vld [vmem:[#allocation2 + $0x168] sm:$0xff]  ;;  %v314_v39 = vld [vmem:[%s9152_s9 + $0xe0] sm:$0xff] }
  0x5d   : > { %v382_v37 = vld [vmem:[#allocation2 + $0x170] sm:$0xff]  ;;  %411 = vst.msk [vmem:[#allocation3 + $0x60] sm:$0xff] %vm224_vm0, %v9361_v15  ;;  %v315_v50 = vld [vmem:[%s9152_s9 + $0xe8] sm:$0xff]  ;;  %347 = vst.msk [vmem:[#allocation2 + $0x182] sm:$0xff] %vm224_vm0, %v314_v39  ;;  %v9393_v8 = vpack.c.bf16 %v575_v29, %v574_v27 }
  0x5e   : > { %610 = vrot.lane.b32.xlu1 %v9274_v25, %s8922_s11  ;;  %v9378_v49 = vpack.c.bf16 %v382_v37, %v381_v24  ;;  %v677_v55 = vld [vmem:[#allocation2 + $0x33] sm:$0xff]  ;;  %v678_v58 = vld [vmem:[#allocation2 + $0x3b] sm:$0xff]  ;;  %412 = vst.msk [vmem:[#allocation3 + $0x68] sm:$0xff] %vm224_vm0, %v9367_v35  ;;  %413 = vst.msk [vmem:[#allocation3 + $0x70] sm:$0xff] %vm224_vm0, %v9369_v23 }
  0x5f   : > { %348 = vst.msk [vmem:[#allocation2 + $0x18a] sm:$0xff] %vm224_vm0, %v315_v50  ;;  %v675_v42 = vld [vmem:[#allocation2 + $0x1b] sm:$0xff]  ;;  %v676_v59 = vld [vmem:[#allocation2 + $0x23] sm:$0xff]  ;;  %v9396_v10 = vpack.c.bf16 %v678_v58, %v677_v55  ;;  %v682_v18 = vld [vmem:[#allocation2 + $0x6b] sm:$0xff] }
  0x60   : > { %616 = vrot.lane.b32.xlu0 %v9278_v28, %s8922_s11  ;;  %414 = vst.msk [vmem:[#allocation3 + $0x78] sm:$0xff] %vm224_vm0, %v9378_v49  ;;  %v681_v11 = vld [vmem:[#allocation2 + $0x63] sm:$0xff]  ;;  %v9400_v61 = vpack.c.bf16 %v676_v59, %v675_v42  ;;  %v679_v62 = vld [vmem:[#allocation2 + $0x4b] sm:$0xff]  ;;  %v680_v20 = vld [vmem:[#allocation2 + $0x53] sm:$0xff] }
  0x61   : > { %12413 = vst [vmem:[#allocation12_spill] sm:$0xff] %v9396_v10  ;;  %v685_v26 = vld [vmem:[#allocation2 + $0x93] sm:$0xff]  ;;  %v9404_v27 = vpack.c.bf16 %v682_v18, %v681_v11  ;;  %v686_v29 = vld [vmem:[#allocation2 + $0x9b] sm:$0xff]  ;;  %v684_v37 = vld [vmem:[#allocation2 + $0x83] sm:$0xff]  ;;  %v9408_v39 = vpack.c.bf16 %v680_v20, %v679_v62 }
  0x62   : > { %614 = vrot.lane.b32.xlu1 %v9282_v32, %s8922_s11  ;;  %12414 = vst [vmem:[#allocation13_spill] sm:$0xff] %v9400_v61  ;;  %v683_v24 = vld [vmem:[#allocation2 + $0x7b] sm:$0xff]  ;;  %v689_v50 = vld [vmem:[#allocation2 + $0xc3] sm:$0xff]  ;;  %v690_v55 = vld [vmem:[#allocation2 + $0xcb] sm:$0xff]  ;;  %v711_v58 = vpack.c.bf16 %v686_v29, %v685_v26 }
  0x63   : > { %12415 = vst [vmem:[#allocation14_spill] sm:$0xff] %v9404_v27  ;;  %12416 = vst [vmem:[#allocation15_spill] sm:$0xff] %v9408_v39  ;;  %v688_v42 = vld [vmem:[#allocation2 + $0xb3] sm:$0xff]  ;;  %v710_v59 = vpack.c.bf16 %v684_v37, %v683_v24  ;;  %v694_v18 = vld [vmem:[#allocation2 + $0xfb] sm:$0xff]  ;;  %v713_v0 = vpack.c.bf16 %v690_v55, %v689_v50 }
  0x64   : > { %620 = vrot.lane.b32.xlu0 %v9286_v36, %s8922_s11  ;;  %v693_v11 = vld [vmem:[#allocation2 + $0xf3] sm:$0xff]  ;;  %v692_v62 = vld [vmem:[#allocation2 + $0xe3] sm:$0xff]  ;;  %v695_v29 = vld [vmem:[#allocation2 + $0x10b] sm:$0xff] }
  0x65   : > { %v715_v26 = vpack.c.bf16 %v694_v18, %v693_v11  ;;  %v701_v37 = vld [vmem:[#allocation2 + $0x153] sm:$0xff]  ;;  %v699_v55 = vld [vmem:[#allocation2 + $0x13b] sm:$0xff]  ;;  %v703_v11 = vld [vmem:[#allocation2 + $0x16b] sm:$0xff] }
  0x66   : > { %618 = vrot.lane.b32.xlu1 %v9290_v40, %s8922_s11  ;;  %v704_v18 = vld [vmem:[#allocation2 + $0x173] sm:$0xff] }
  0x68   : > { %624 = vrot.lane.b32.xlu0 %v9294_v48, %s8922_s11 }
  0x6a   : > { %622 = vrot.lane.b32.xlu1 %v9300_v56, %s8922_s11 }
  0x6c   : > { %628 = vrot.lane.b32.xlu0 %v9311_v5, %s8922_s11 }
  0x6e   : > { %626 = vrot.lane.b32.xlu1 %v9321_v16, %s8922_s11 }
  0x70   : > { %632 = vrot.lane.b32.xlu0 %v9329_v31, %s8922_s11 }
  0x72   : > { %630 = vrot.lane.b32.xlu1 %v9341_v51, %s8922_s11 }
  0x74   : > { %636 = vrot.lane.b32.xlu0 %v9357_v14, %s8922_s11  ;;  %v698_v14 = vld [vmem:[#allocation2 + $0x12b] sm:$0xff] }
  0x76   : > { %634 = vrot.lane.b32.xlu1 %v9374_v46, %s8922_s11 }
  0x78   : > { %737 = vrot.lane.b32.xlu0 %v705_v41, %s8923_s12  ;;  %v687_v41 = vld [vmem:[#allocation2 + $0xab] sm:$0xff] }
  0x79   : > { %v712_v20 = vpack.c.bf16 %v688_v42, %v687_v41  ;;  %v700_v41 = vld [vmem:[#allocation2 + $0x143] sm:$0xff] }
  0x7a   : > { %638 = vrot.lane.b32.xlu1 %v9393_v8, %s8922_s11  ;;  %v802_v42 = vld [vmem:[#allocation2 + $0x4] sm:$0xff] }
  0x7c   : > { %741 = vrot.lane.b32.xlu0 %v9396_v10, %s8923_s12  ;;  %v691_v10 = vld [vmem:[#allocation2 + $0xdb] sm:$0xff] }
  0x7d   : > { %v714_v24 = vpack.c.bf16 %v692_v62, %v691_v10  ;;  %v718_v10 = vpack.c.bf16 %v700_v41, %v699_v55  ;;  %v806_v62 = vld [vmem:[#allocation2 + $0x34] sm:$0xff] }
  0x7e   : > { %739 = vrot.lane.b32.xlu1 %v9400_v61, %s8923_s12  ;;  %v697_v61 = vld [vmem:[#allocation2 + $0x123] sm:$0xff]  ;;  %v809_v55 = vld [vmem:[#allocation2 + $0x54] sm:$0xff] }
  0x7f   : > { %v717_v50 = vpack.c.bf16 %v698_v14, %v697_v61  ;;  %v720_v61 = vpack.c.bf16 %v704_v18, %v703_v11  ;;  %v814_v41 = vld [vmem:[#allocation2 + $0x94] sm:$0xff]  ;;  %v813_v11 = vld [vmem:[#allocation2 + $0x84] sm:$0xff] }
  0x80   : > { %745 = vrot.lane.b32.xlu0 %v9404_v27, %s8923_s12  ;;  %v696_v27 = vld [vmem:[#allocation2 + $0x113] sm:$0xff] }
  0x82   : > { %743 = vrot.lane.b32.xlu1 %v9408_v39, %s8923_s12  ;;  %v702_v39 = vld [vmem:[#allocation2 + $0x15b] sm:$0xff] }
  0x84   : > { %749 = vrot.lane.b32.xlu0 %v711_v58, %s8923_s12  ;;  %v716_v58 = vpack.c.bf16 %v696_v27, %v695_v29  ;;  %v804_v27 = vld [vmem:[#allocation2 + $0x1c] sm:$0xff] }
  0x86   : > { %747 = vrot.lane.b32.xlu1 %v710_v59, %s8923_s12  ;;  %v803_v59 = vld [vmem:[#allocation2 + $0xc] sm:$0xff] }
  0x87   : > { %v834_v14 = vpack.c.bf16 %v803_v59, %v802_v42  ;;  %v815_v42 = vld [vmem:[#allocation2 + $0x9c] sm:$0xff] }
  0x88   : > { %753 = vrot.lane.b32.xlu0 %v713_v0, %s8923_s12  ;;  %v719_v0 = vpack.c.bf16 %v702_v39, %v701_v37  ;;  %v810_v39 = vld [vmem:[#allocation2 + $0x64] sm:$0xff]  ;;  %v840_v18 = vpack.c.bf16 %v815_v42, %v814_v41 }
  0x8a   : > { %751 = vrot.lane.b32.xlu1 %v712_v20, %s8923_s12  ;;  %v807_v20 = vld [vmem:[#allocation2 + $0x3c] sm:$0xff] }
  0x8b   : > { %v836_v29 = vpack.c.bf16 %v807_v20, %v806_v62  ;;  %v819_v62 = vld [vmem:[#allocation2 + $0xcc] sm:$0xff] }
  0x8c   : > { %757 = vrot.lane.b32.xlu0 %v715_v26, %s8923_s12  ;;  %v805_v26 = vld [vmem:[#allocation2 + $0x24] sm:$0xff] }
  0x8d   : > { %v835_v37 = vpack.c.bf16 %v805_v26, %v804_v27  ;;  %v822_v26 = vld [vmem:[#allocation2 + $0xf4] sm:$0xff] }
  0x8e   : > { %755 = vrot.lane.b32.xlu1 %v714_v24, %s8923_s12  ;;  %v811_v24 = vld [vmem:[#allocation2 + $0x6c] sm:$0xff] }
  0x90   : > { %761 = vrot.lane.b32.xlu0 %v717_v50, %s8923_s12  ;;  %v808_v50 = vld [vmem:[#allocation2 + $0x4c] sm:$0xff] }
  0x91   : > { %v837_v59 = vpack.c.bf16 %v809_v55, %v808_v50  ;;  %v826_v55 = vld [vmem:[#allocation2 + $0x124] sm:$0xff] }
  0x92   : > { %759 = vrot.lane.b32.xlu1 %v716_v58, %s8923_s12  ;;  %v838_v58 = vpack.c.bf16 %v811_v24, %v810_v39  ;;  %v820_v24 = vld [vmem:[#allocation2 + $0xdc] sm:$0xff] }
  0x93   : > { %v480_v42 = vpop.permute.xlu0 %479 }
  0x94   : > { %765 = vrot.lane.b32.xlu0 %v719_v0, %s8923_s12  ;;  %v812_v0 = vld [vmem:[#allocation2 + $0x7c] sm:$0xff]  ;;  %528 = vst.msk [vmem:[#allocation3] sm:$0xff] %vm527_vm2, %v480_v42 }
  0x95   : > { %v839_v20 = vpack.c.bf16 %v813_v11, %v812_v0  ;;  %v825_v0 = vld [vmem:[#allocation2 + $0x114] sm:$0xff] }
  0x96   : > { %763 = vrot.lane.b32.xlu1 %v718_v10, %s8923_s12  ;;  %v818_v10 = vld [vmem:[#allocation2 + $0xc4] sm:$0xff] }
  0x97   : > { %v842_v27 = vpack.c.bf16 %v819_v62, %v818_v10  ;;  %v831_v10 = vld [vmem:[#allocation2 + $0x15c] sm:$0xff] }
  0x98   : > { %866 = vrot.lane.b32.xlu0 %v834_v14, %s8924_s13  ;;  %v816_v14 = vld [vmem:[#allocation2 + $0xac] sm:$0xff] }
  0x9a   : > { %767 = vrot.lane.b32.xlu1 %v720_v61, %s8923_s12  ;;  %v817_v61 = vld [vmem:[#allocation2 + $0xb4] sm:$0xff]  ;;  %s8941_s12 = smov 84  }
  0x9b   : > { %v841_v39 = vpack.c.bf16 %v817_v61, %v816_v14  ;;  %v828_v14 = vld [vmem:[#allocation2 + $0x13c] sm:$0xff]  ;;  %v829_v61 = vld [vmem:[#allocation2 + $0x144] sm:$0xff] }
  0x9c   : > { %870 = vrot.lane.b32.xlu0 %v836_v29, %s8924_s13  ;;  %v823_v29 = vld [vmem:[#allocation2 + $0xfc] sm:$0xff] }
  0x9d   : > { %v844_v50 = vpack.c.bf16 %v823_v29, %v822_v26  ;;  %v847_v29 = vpack.c.bf16 %v829_v61, %v828_v14  ;;  %v1092_v61 = vld [vmem:[#allocation2 + $0x189] sm:$0xff] }
  0x9e   : > { %868 = vrot.lane.b32.xlu1 %v835_v37, %s8924_s13  ;;  %v821_v37 = vld [vmem:[#allocation2 + $0xe4] sm:$0xff] }
  0x9f   : > { %v843_v41 = vpack.c.bf16 %v821_v37, %v820_v24  ;;  %v832_v24 = vld [vmem:[#allocation2 + $0x16c] sm:$0xff]  ;;  %v833_v37 = vld [vmem:[#allocation2 + $0x174] sm:$0xff] }
  0xa0   : > { %874 = vrot.lane.b32.xlu0 %v838_v58, %s8924_s13  ;;  %v827_v58 = vld [vmem:[#allocation2 + $0x12c] sm:$0xff] }
  0xa1   : > { %v846_v11 = vpack.c.bf16 %v827_v58, %v826_v55  ;;  %v849_v55 = vpack.c.bf16 %v833_v37, %v832_v24  ;;  %v1221_v24 = vld [vmem:[#allocation2 + $0x18a] sm:$0xff] }
  0xa2   : > { %872 = vrot.lane.b32.xlu1 %v837_v59, %s8924_s13  ;;  %v824_v59 = vld [vmem:[#allocation2 + $0x10c] sm:$0xff] }
  0xa3   : > { %v845_v62 = vpack.c.bf16 %v825_v0, %v824_v59 }
  0xa4   : > { %878 = vrot.lane.b32.xlu0 %v840_v18, %s8924_s13  ;;  %v830_v18 = vld [vmem:[#allocation2 + $0x154] sm:$0xff] }
  0xa5   : > { %v848_v26 = vpack.c.bf16 %v831_v10, %v830_v18  ;;  %v963_v18 = vld [vmem:[#allocation2 + $0x188] sm:$0xff] }
  0xa6   : > { %876 = vrot.lane.b32.xlu1 %v839_v20, %s8924_s13  ;;  %v482_v20 = vpop.permute.xlu0 %481 }
  0xa7   : > { %529 = vst.msk [vmem:[#allocation3 + $0x8] sm:$0xff] %vm527_vm2, %v482_v20 }
  0xa8   : > { %882 = vrot.lane.b32.xlu0 %v842_v27, %s8924_s13 }
  0xaa   : > { %880 = vrot.lane.b32.xlu1 %v841_v39, %s8924_s13 }
  0xac   : > { %886 = vrot.lane.b32.xlu0 %v844_v50, %s8924_s13 }
  0xae   : > { %884 = vrot.lane.b32.xlu1 %v843_v41, %s8924_s13 }
  0xb0   : > { %v484_v27 = vpop.permute.xlu1 %483  ;;  %890 = vrot.lane.b32.xlu0 %v846_v11, %s8924_s13 }
  0xb1   : > { %530 = vst.msk [vmem:[#allocation3 + $0x10] sm:$0xff] %vm527_vm2, %v484_v27 }
  0xb2   : > { %888 = vrot.lane.b32.xlu1 %v845_v62, %s8924_s13  ;;  %v488_v39 = vpop.permute.xlu0 %487 }
  0xb3   : > { %532 = vst.msk [vmem:[#allocation3 + $0x20] sm:$0xff] %vm527_vm2, %v488_v39 }
  0xb4   : > { %v486_v50 = vpop.permute.xlu1 %485  ;;  %894 = vrot.lane.b32.xlu0 %v848_v26, %s8924_s13 }
  0xb5   : > { %531 = vst.msk [vmem:[#allocation3 + $0x18] sm:$0xff] %vm527_vm2, %v486_v50 }
  0xb6   : > { %892 = vrot.lane.b32.xlu1 %v847_v29, %s8924_s13  ;;  %v492_v58 = vpop.permute.xlu0 %491 }
  0xb7   : > { %534 = vst.msk [vmem:[#allocation3 + $0x30] sm:$0xff] %vm527_vm2, %v492_v58  ;;  %v1327_v58 = vld [vmem:[#allocation2 + $0x7b] sm:$0xff] }
  0xb8   : > { %v490_v41 = vpop.permute.xlu1 %489  ;;  %996 = vrot.lane.b32.xlu0 %v9305_v2, %s8925_s14 }
  0xb9   : > { %533 = vst.msk [vmem:[#allocation3 + $0x28] sm:$0xff] %vm527_vm2, %v490_v41  ;;  %v1328_v41 = vld [vmem:[#allocation2 + $0x83] sm:$0xff] }
  0xba   : > { %896 = vrot.lane.b32.xlu1 %v849_v55, %s8924_s13  ;;  %v496_v42 = vpop.permute.xlu0 %495  ;;  %v12418_v55 = vld [vmem:[#allocation13_spill] sm:$0xff]  ;;  %s8937_s13 = smov 68  }
  0xbb   : > { %536 = vst.msk [vmem:[#allocation3 + $0x40] sm:$0xff] %vm527_vm2, %v496_v42 }
  0xbc   : > { %v494_v59 = vpop.permute.xlu1 %493  ;;  %1000 = vrot.lane.b32.xlu0 %v9307_v4, %s8925_s14 }
  0xbd   : > { %535 = vst.msk [vmem:[#allocation3 + $0x38] sm:$0xff] %vm527_vm2, %v494_v59  ;;  %v12419_v59 = vld [vmem:[#allocation15_spill] sm:$0xff] }
  0xbe   : > { %998 = vrot.lane.b32.xlu1 %v9296_v54, %s8925_s14  ;;  %v500_v0 = vpop.permute.xlu0 %499 }
  0xbf   : > { %538 = vst.msk [vmem:[#allocation3 + $0x50] sm:$0xff] %vm527_vm2, %v500_v0  ;;  %v9607_v0 = vpack.c.bf16 %v1328_v41, %v1327_v58 }
  0xc0   : > { %v498_v2 = vpop.permute.xlu1 %497  ;;  %1004 = vrot.lane.b32.xlu0 %v9323_v21, %s8925_s14 }
  0xc1   : > { %537 = vst.msk [vmem:[#allocation3 + $0x48] sm:$0xff] %vm527_vm2, %v498_v2  ;;  %v1331_v2 = vld [vmem:[#allocation2 + $0xab] sm:$0xff] }
  0xc2   : > { %1002 = vrot.lane.b32.xlu1 %v9317_v13, %s8925_s14  ;;  %v504_v11 = vpop.permute.xlu0 %503 }
  0xc3   : > { %540 = vst.msk [vmem:[#allocation3 + $0x60] sm:$0xff] %vm527_vm2, %v504_v11  ;;  %v1332_v11 = vld [vmem:[#allocation2 + $0xb3] sm:$0xff] }
  0xc4   : > { %v502_v4 = vpop.permute.xlu1 %501  ;;  %1008 = vrot.lane.b32.xlu0 %v9335_v43, %s8925_s14 }
  0xc5   : > { %539 = vst.msk [vmem:[#allocation3 + $0x58] sm:$0xff] %vm527_vm2, %v502_v4  ;;  %v12420_v4 = vld [vmem:[#allocation12_spill] sm:$0xff] }
  0xc6   : > { %1006 = vrot.lane.b32.xlu1 %v9333_v33, %s8925_s14  ;;  %v508_v54 = vpop.permute.xlu0 %507 }
  0xc7   : > { %542 = vst.msk [vmem:[#allocation3 + $0x70] sm:$0xff] %vm527_vm2, %v508_v54 }
  0xc8   : > { %v506_v21 = vpop.permute.xlu1 %505  ;;  %1012 = vrot.lane.b32.xlu0 %v9345_v52, %s8925_s14 }
  0xc9   : > { %541 = vst.msk [vmem:[#allocation3 + $0x68] sm:$0xff] %vm527_vm2, %v506_v21  ;;  %v1329_v21 = vld [vmem:[#allocation2 + $0x93] sm:$0xff] }
  0xca   : > { %1010 = vrot.lane.b32.xlu1 %v9337_v45, %s8925_s14  ;;  %v609_v13 = vpop.permute.xlu0 %608 }
  0xcb   : > { %657 = vst.msk [vmem:[#allocation3] sm:$0xff] %vm656_vm3, %v609_v13  ;;  %v1330_v13 = vld [vmem:[#allocation2 + $0x9b] sm:$0xff] }
  0xcc   : > { %v510_v43 = vpop.permute.xlu1 %509  ;;  %1016 = vrot.lane.b32.xlu0 %v9353_v7, %s8925_s14  ;;  %v962_v7 = vld [vmem:[#allocation2 + $0x180] sm:$0xff] }
  0xcd   : > { %543 = vst.msk [vmem:[#allocation3 + $0x78] sm:$0xff] %vm527_vm2, %v510_v43  ;;  %vm2464_vm2 = vcmask 556544  }
  0xce   : > { %1014 = vrot.lane.b32.xlu1 %v9351_v1, %s8925_s14  ;;  %v613_v33 = vpop.permute.xlu0 %612  ;;  %v9492_v1 = vpack.c.bf16 %v963_v18, %v962_v7  ;;  %v12421_v7 = vld [vmem:[#allocation14_spill] sm:$0xff]  ;;  %v9620_v18 = vpack.c.bf16 %v1330_v13, %v1329_v21  ;;  %v1460_v13 = vld [vmem:[#allocation2 + $0xac] sm:$0xff] }
  0xcf   : > { %659 = vst.msk [vmem:[#allocation3 + $0x10] sm:$0xff] %vm656_vm3, %v613_v33  ;;  %v9615_v33 = vpack.c.bf16 %v1332_v11, %v1331_v2  ;;  %v1454_v11 = vld [vmem:[#allocation2 + $0x64] sm:$0xff] }
  0xd0   : > { %v611_v52 = vpop.permute.xlu1 %610  ;;  %1020 = vrot.lane.b32.xlu0 %v9367_v35, %s8925_s14 }
  0xd1   : > { %658 = vst.msk [vmem:[#allocation3 + $0x8] sm:$0xff] %vm656_vm3, %v611_v52  ;;  %v1335_v52 = vld [vmem:[#allocation2 + $0xdb] sm:$0xff] }
  0xd2   : > { %1018 = vrot.lane.b32.xlu1 %v9361_v15, %s8925_s14  ;;  %v617_v45 = vpop.permute.xlu0 %616 }
  0xd3   : > { %661 = vst.msk [vmem:[#allocation3 + $0x20] sm:$0xff] %vm656_vm3, %v617_v45  ;;  %v1336_v45 = vld [vmem:[#allocation2 + $0xe3] sm:$0xff] }
  0xd4   : > { %v615_v10 = vpop.permute.xlu1 %614  ;;  %1024 = vrot.lane.b32.xlu0 %v9378_v49, %s8925_s14 }
  0xd5   : > { %660 = vst.msk [vmem:[#allocation3 + $0x18] sm:$0xff] %vm656_vm3, %v615_v10 }
  0xd6   : > { %1022 = vrot.lane.b32.xlu1 %v9369_v23, %s8925_s14  ;;  %v621_v35 = vpop.permute.xlu0 %620 }
  0xd7   : > { %663 = vst.msk [vmem:[#allocation3 + $0x30] sm:$0xff] %vm656_vm3, %v621_v35  ;;  %v1333_v35 = vld [vmem:[#allocation2 + $0xc3] sm:$0xff] }
  0xd8   : > { %v619_v15 = vpop.permute.xlu1 %618  ;;  %1125 = vrot.lane.b32.xlu0 %v9174_v17, %s8926_s15 }
  0xd9   : > { %662 = vst.msk [vmem:[#allocation3 + $0x28] sm:$0xff] %vm656_vm3, %v619_v15  ;;  %v1334_v15 = vld [vmem:[#allocation2 + $0xcb] sm:$0xff] }
  0xda   : > { %1026 = vrot.lane.b32.xlu1 %v9492_v1, %s8925_s14  ;;  %v625_v49 = vpop.permute.xlu0 %624  ;;  %s8945_s14 = smov [#allocation8]  }
  0xdb   : > { %665 = vst.msk [vmem:[#allocation3 + $0x40] sm:$0xff] %vm656_vm3, %v625_v49 }
  0xdc   : > { %v623_v62 = vpop.permute.xlu1 %622  ;;  %1129 = vrot.lane.b32.xlu0 %v9208_v38, %s8926_s15 }
  0xdd   : > { %664 = vst.msk [vmem:[#allocation3 + $0x38] sm:$0xff] %vm656_vm3, %v623_v62  ;;  %v9625_v62 = vpack.c.bf16 %v1336_v45, %v1335_v52 }
  0xde   : > { %1127 = vrot.lane.b32.xlu1 %v9197_v30, %s8926_s15  ;;  %v629_v23 = vpop.permute.xlu0 %628 }
  0xdf   : > { %667 = vst.msk [vmem:[#allocation3 + $0x50] sm:$0xff] %vm656_vm3, %v629_v23  ;;  %v1339_v23 = vld [vmem:[#allocation2 + $0x10b] sm:$0xff] }
  0xe0   : > { %v627_v17 = vpop.permute.xlu1 %626  ;;  %1133 = vrot.lane.b32.xlu0 %v9221_v47, %s8926_s15 }
  0xe1   : > { %666 = vst.msk [vmem:[#allocation3 + $0x48] sm:$0xff] %vm656_vm3, %v627_v17  ;;  %v1340_v17 = vld [vmem:[#allocation2 + $0x113] sm:$0xff] }
  0xe2   : > { %1131 = vrot.lane.b32.xlu1 %v9201_v34, %s8926_s15  ;;  %v633_v20 = vpop.permute.xlu0 %632 }
  0xe3   : > { %669 = vst.msk [vmem:[#allocation3 + $0x60] sm:$0xff] %vm656_vm3, %v633_v20  ;;  %v9630_v20 = vpack.c.bf16 %v1334_v15, %v1333_v35 }
  0xe4   : > { %v631_v38 = vpop.permute.xlu1 %630  ;;  %1137 = vrot.lane.b32.xlu0 %v9237_v57, %s8926_s15 }
  0xe5   : > { %668 = vst.msk [vmem:[#allocation3 + $0x58] sm:$0xff] %vm656_vm3, %v631_v38 }
  0xe6   : > { %1135 = vrot.lane.b32.xlu1 %v9217_v44, %s8926_s15  ;;  %v637_v30 = vpop.permute.xlu0 %636 }
  0xe7   : > { %671 = vst.msk [vmem:[#allocation3 + $0x70] sm:$0xff] %vm656_vm3, %v637_v30  ;;  %v1337_v30 = vld [vmem:[#allocation2 + $0xf3] sm:$0xff] }
  0xe8   : > { %v635_v47 = vpop.permute.xlu1 %634  ;;  %1141 = vrot.lane.b32.xlu0 %v9245_v63, %s8926_s15  ;;  %v316_v63 = vld [vmem:[%s9152_s9 + $0xf0] sm:$0xff] }
  0xe9   : > { %670 = vst.msk [vmem:[#allocation3 + $0x68] sm:$0xff] %vm656_vm3, %v635_v47  ;;  %v1338_v47 = vld [vmem:[#allocation2 + $0xfb] sm:$0xff] }
  0xea   : > { %1139 = vrot.lane.b32.xlu1 %v9228_v53, %s8926_s15  ;;  %v738_v34 = vpop.permute.xlu0 %737  ;;  %v317_v53 = vld [vmem:[%s9152_s9 + $0xf8] sm:$0xff]  ;;  %349 = vst.msk [vmem:[#allocation2 + $0x19a] sm:$0xff] %vm224_vm0, %v316_v63  ;;  %v1344_v63 = vld [vmem:[#allocation2 + $0x143] sm:$0xff]  ;;  %s8936_s9 = smov 64  }
  0xeb   : > { %786 = vst.msk [vmem:[#allocation3] sm:$0xff] %vm785_vm4, %v738_v34 }
  0xec   : > { %v639_v57 = vpop.permute.xlu1 %638  ;;  %1145 = vrot.lane.b32.xlu0 %v9253_v6, %s8926_s15  ;;  %350 = vst.msk [vmem:[#allocation2 + $0x1a2] sm:$0xff] %vm224_vm0, %v317_v53  ;;  %vm2205_vm0 = vcmask 490944  }
  0xed   : > { %672 = vst.msk [vmem:[#allocation3 + $0x78] sm:$0xff] %vm656_vm3, %v639_v57  ;;  %v9635_v57 = vpack.c.bf16 %v1340_v17, %v1339_v23  ;;  %v1465_v23 = vld [vmem:[#allocation2 + $0xe4] sm:$0xff]  ;;  %vm2593_vm3 = vcmask 589344  }
  0xee   : > { %1143 = vrot.lane.b32.xlu1 %v9241_v60, %s8926_s15  ;;  %v742_v44 = vpop.permute.xlu0 %741  ;;  %v1091_v60 = vld [vmem:[#allocation2 + $0x181] sm:$0xff] }
  0xef   : > { %788 = vst.msk [vmem:[#allocation3 + $0x10] sm:$0xff] %vm785_vm4, %v742_v44  ;;  %v1343_v44 = vld [vmem:[#allocation2 + $0x13b] sm:$0xff] }
  0xf0   : > { %v740_v14 = vpop.permute.xlu1 %739  ;;  %1149 = vrot.lane.b32.xlu0 %v9261_v12, %s8926_s15  ;;  %v9546_v12 = vpack.c.bf16 %v1092_v61, %v1091_v60  ;;  %v1342_v60 = vld [vmem:[#allocation2 + $0x12b] sm:$0xff] }
  0xf1   : > { %787 = vst.msk [vmem:[#allocation3 + $0x8] sm:$0xff] %vm785_vm4, %v740_v14  ;;  %v9640_v14 = vpack.c.bf16 %v1338_v47, %v1337_v30  ;;  %v1462_v30 = vld [vmem:[#allocation2 + $0xc4] sm:$0xff]  ;;  %v1463_v47 = vld [vmem:[#allocation2 + $0xcc] sm:$0xff] }
  0xf2   : > { %1147 = vrot.lane.b32.xlu1 %v9249_v3, %s8926_s15  ;;  %v746_v6 = vpop.permute.xlu0 %745 }
  0xf3   : > { %790 = vst.msk [vmem:[#allocation3 + $0x20] sm:$0xff] %vm785_vm4, %v746_v6  ;;  %v1341_v6 = vld [vmem:[#allocation2 + $0x123] sm:$0xff] }
  0xf4   : > { %v744_v27 = vpop.permute.xlu1 %743  ;;  %1153 = vrot.lane.b32.xlu0 %v9267_v19, %s8926_s15 }
  0xf5   : > { %789 = vst.msk [vmem:[#allocation3 + $0x18] sm:$0xff] %vm785_vm4, %v744_v27  ;;  %v9645_v27 = vpack.c.bf16 %v1344_v63, %v1343_v44  ;;  %v1468_v63 = vld [vmem:[#allocation2 + $0x10c] sm:$0xff] }
  0xf6   : > { %1151 = vrot.lane.b32.xlu1 %v9257_v9, %s8926_s15  ;;  %v750_v26 = vpop.permute.xlu0 %749 }
  0xf7   : > { %792 = vst.msk [vmem:[#allocation3 + $0x30] sm:$0xff] %vm785_vm4, %v750_v26  ;;  %v1347_v26 = vld [vmem:[#allocation2 + $0x16b] sm:$0xff] }
  0xf8   : > { %v748_v3 = vpop.permute.xlu1 %747  ;;  %1254 = vrot.lane.b32.xlu0 %v9274_v25, %s8927_s16 }
  0xf9   : > { %791 = vst.msk [vmem:[#allocation3 + $0x28] sm:$0xff] %vm785_vm4, %v748_v3  ;;  %v1348_v3 = vld [vmem:[#allocation2 + $0x173] sm:$0xff] }
  0xfa   : > { %1155 = vrot.lane.b32.xlu1 %v9546_v12, %s8926_s15  ;;  %v754_v19 = vpop.permute.xlu0 %753  ;;  %s8860_s15 = sshll.u32 %s8945_s14, 4  ;;  %s8861_s15 = int_to_ptr.vmem [resolvable:$false] %s8860_s15 }
  0xfb   : > { %794 = vst.msk [vmem:[#allocation3 + $0x40] sm:$0xff] %vm785_vm4, %v754_v19  ;;  %v9650_v19 = vpack.c.bf16 %v1342_v60, %v1341_v6  ;;  %v9707_v6 = vpack.c.bf16 %v1463_v47, %v1462_v30  ;;  %v1585_v47 = vld [vmem:[#allocation2 + $0x90] sm:$0xff] }
  0xfc   : > { %v752_v29 = vpop.permute.xlu1 %751  ;;  %1258 = vrot.lane.b32.xlu0 %v9282_v32, %s8927_s16 }
  0xfd   : > { %793 = vst.msk [vmem:[#allocation3 + $0x38] sm:$0xff] %vm785_vm4, %v752_v29 }
  0xfe   : > { %1256 = vrot.lane.b32.xlu1 %v9270_v22, %s8927_s16  ;;  %v758_v9 = vpop.permute.xlu0 %757 }
  0xff   : > { %796 = vst.msk [vmem:[#allocation3 + $0x50] sm:$0xff] %vm785_vm4, %v758_v9  ;;  %v1345_v9 = vld [vmem:[#allocation2 + $0x153] sm:$0xff] }
 0x100   : > { %v756_v25 = vpop.permute.xlu1 %755  ;;  %1262 = vrot.lane.b32.xlu0 %v9290_v40, %s8927_s16 }
 0x101   : > { %795 = vst.msk [vmem:[#allocation3 + $0x48] sm:$0xff] %vm785_vm4, %v756_v25  ;;  %v1346_v25 = vld [vmem:[#allocation2 + $0x15b] sm:$0xff] }
 0x102   : > { %1260 = vrot.lane.b32.xlu1 %v9278_v28, %s8927_s16  ;;  %v762_v39 = vpop.permute.xlu0 %761 }
 0x103   : > { %798 = vst.msk [vmem:[#allocation3 + $0x60] sm:$0xff] %vm785_vm4, %v762_v39 }
 0x104   : > { %v760_v32 = vpop.permute.xlu1 %759  ;;  %1266 = vrot.lane.b32.xlu0 %v9300_v56, %s8927_s16 }
 0x105   : > { %797 = vst.msk [vmem:[#allocation3 + $0x58] sm:$0xff] %vm785_vm4, %v760_v32  ;;  %v9655_v32 = vpack.c.bf16 %v1348_v3, %v1347_v26  ;;  %v1467_v26 = vld [vmem:[#allocation2 + $0xfc] sm:$0xff] }
 0x106   : > { %1264 = vrot.lane.b32.xlu1 %v9286_v36, %s8927_s16  ;;  %v766_v22 = vpop.permute.xlu0 %765 }
 0x107   : > { %800 = vst.msk [vmem:[#allocation3 + $0x70] sm:$0xff] %vm785_vm4, %v766_v22  ;;  %v1448_v22 = vld [vmem:[#allocation2 + $0x1c] sm:$0xff] }
 0x108   : > { %v764_v40 = vpop.permute.xlu1 %763  ;;  %1270 = vrot.lane.b32.xlu0 %v9321_v16, %s8927_s16 }
 0x109   : > { %799 = vst.msk [vmem:[#allocation3 + $0x68] sm:$0xff] %vm785_vm4, %v764_v40  ;;  %v1449_v40 = vld [vmem:[#allocation2 + $0x24] sm:$0xff] }
 0x10a   : > { %1268 = vrot.lane.b32.xlu1 %v9294_v48, %s8927_s16  ;;  %v867_v28 = vpop.permute.xlu0 %866 }
 0x10b   : > { %915 = vst.msk [vmem:[#allocation3] sm:$0xff] %vm914_vm5, %v867_v28  ;;  %v9660_v28 = vpack.c.bf16 %v1346_v25, %v1345_v9  ;;  %v1472_v9 = vld [vmem:[#allocation2 + $0x13c] sm:$0xff]  ;;  %v1473_v25 = vld [vmem:[#allocation2 + $0x144] sm:$0xff] }
 0x10c   : > { %v768_v56 = vpop.permute.xlu1 %767  ;;  %1274 = vrot.lane.b32.xlu0 %v9341_v51, %s8927_s16  ;;  %v1220_v51 = vld [vmem:[#allocation2 + $0x182] sm:$0xff] }
 0x10d   : > { %801 = vst.msk [vmem:[#allocation3 + $0x78] sm:$0xff] %vm785_vm4, %v768_v56  ;;  %vm2722_vm4 = vcmask 622144  }
 0x10e   : > { %1272 = vrot.lane.b32.xlu1 %v9311_v5, %s8927_s16  ;;  %v871_v36 = vpop.permute.xlu0 %870  ;;  %v12417_v5 = vld [vmem:[#allocation11_spill] sm:$0xff] }
 0x10f   : > { %917 = vst.msk [vmem:[#allocation3 + $0x10] sm:$0xff] %vm914_vm5, %v871_v36  ;;  %v1349_v36 = vld [vmem:[#allocation2 + $0x183] sm:$0xff] }
 0x110   : > { %v869_v16 = vpop.permute.xlu1 %868  ;;  %1278 = vrot.lane.b32.xlu0 %v9374_v46, %s8927_s16  ;;  %v9596_v46 = vpack.c.bf16 %v1221_v24, %v1220_v51  ;;  %v1480_v51 = vpack.c.bf16 %v1449_v40, %v1448_v22  ;;  %v1452_v24 = vld [vmem:[#allocation2 + $0x4c] sm:$0xff]  ;;  %v1470_v40 = vld [vmem:[#allocation2 + $0x124] sm:$0xff] }
 0x111   : > { %916 = vst.msk [vmem:[#allocation3 + $0x8] sm:$0xff] %vm914_vm5, %v869_v16  ;;  %v1350_v16 = vld [vmem:[#allocation2 + $0x18b] sm:$0xff] }
 0x112   : > { %1276 = vrot.lane.b32.xlu1 %v9329_v31, %s8927_s16  ;;  %v875_v48 = vpop.permute.xlu0 %874 }
 0x113   : > { %919 = vst.msk [vmem:[#allocation3 + $0x20] sm:$0xff] %vm914_vm5, %v875_v48 }
 0x114   : > { %v873_v37 = vpop.permute.xlu1 %872  ;;  %1282 = vrot.lane.b32.xlu0 %v9393_v8, %s8927_s16 }
 0x115   : > { %918 = vst.msk [vmem:[#allocation3 + $0x18] sm:$0xff] %vm914_vm5, %v873_v37  ;;  %v1453_v37 = vld [vmem:[#allocation2 + $0x54] sm:$0xff] }
 0x116   : > { %1280 = vrot.lane.b32.xlu1 %v12417_v5, %s8927_s16  ;;  %v879_v50 = vpop.permute.xlu0 %878  ;;  %v9668_v5 = vpack.c.bf16 %v1350_v16, %v1349_v36  ;;  %v9672_v41 = vpack.c.bf16 %v1453_v37, %v1452_v24  ;;  %v9722_v16 = vpack.c.bf16 %v1473_v25, %v1472_v9  ;;  %v1589_v9 = vld [vmem:[#allocation2 + $0xc0] sm:$0xff]  ;;  %v1590_v25 = vld [vmem:[#allocation2 + $0xc8] sm:$0xff] }
 0x117   : > { %921 = vst.msk [vmem:[#allocation3 + $0x30] sm:$0xff] %vm914_vm5, %v879_v50 }
 0x118   : > { %v877_v31 = vpop.permute.xlu1 %876  ;;  %1383 = vrot.lane.b32.xlu0 %v12418_v55, %s8928_s17  ;;  %v1451_v55 = vld [vmem:[#allocation2 + $0x3c] sm:$0xff] }
 0x119   : > { %920 = vst.msk [vmem:[#allocation3 + $0x28] sm:$0xff] %vm914_vm5, %v877_v31  ;;  %v1450_v31 = vld [vmem:[#allocation2 + $0x34] sm:$0xff] }
 0x11a   : > { %1284 = vrot.lane.b32.xlu1 %v9596_v46, %s8927_s16  ;;  %v883_v8 = vpop.permute.xlu0 %882  ;;  %s8938_s16 = smov 72  }
 0x11b   : > { %923 = vst.msk [vmem:[#allocation3 + $0x40] sm:$0xff] %vm914_vm5, %v883_v8  ;;  %v1456_v8 = vld [vmem:[#allocation2 + $0x7c] sm:$0xff] }
 0x11c   : > { %v881_v42 = vpop.permute.xlu1 %880  ;;  %1387 = vrot.lane.b32.xlu0 %v12419_v59, %s8928_s17  ;;  %v9677_v59 = vpack.c.bf16 %v1451_v55, %v1450_v31  ;;  %v1475_v31 = vld [vmem:[#allocation2 + $0x15c] sm:$0xff] }
 0x11d   : > { %922 = vst.msk [vmem:[#allocation3 + $0x38] sm:$0xff] %vm914_vm5, %v881_v42  ;;  %v1457_v42 = vld [vmem:[#allocation2 + $0x84] sm:$0xff] }
 0x11e   : > { %1385 = vrot.lane.b32.xlu1 %v12420_v4, %s8928_s17  ;;  %v887_v54 = vpop.permute.xlu0 %886  ;;  %v1455_v4 = vld [vmem:[#allocation2 + $0x6c] sm:$0xff]  ;;  %v9682_v21 = vpack.c.bf16 %v1457_v42, %v1456_v8  ;;  %v1578_v42 = vld [vmem:[#allocation2 + $0x38] sm:$0xff] }
 0x11f   : > { %925 = vst.msk [vmem:[#allocation3 + $0x50] sm:$0xff] %vm914_vm5, %v887_v54  ;;  %v9687_v52 = vpack.c.bf16 %v1455_v4, %v1454_v11  ;;  %v1577_v8 = vld [vmem:[#allocation2 + $0x30] sm:$0xff]  ;;  %v1478_v4 = vld [vmem:[#allocation2 + $0x184] sm:$0xff] }
 0x120   : > { %v885_v43 = vpop.permute.xlu1 %884  ;;  %1391 = vrot.lane.b32.xlu0 %v9607_v0, %s8928_s17 }
 0x121   : > { %924 = vst.msk [vmem:[#allocation3 + $0x48] sm:$0xff] %vm914_vm5, %v885_v43  ;;  %v1461_v43 = vld [vmem:[#allocation2 + $0xb4] sm:$0xff] }
 0x122   : > { %1389 = vrot.lane.b32.xlu1 %v12421_v7, %s8928_s17  ;;  %v891_v10 = vpop.permute.xlu0 %890  ;;  %v1458_v7 = vld [vmem:[#allocation2 + $0x94] sm:$0xff]  ;;  %v9692_v15 = vpack.c.bf16 %v1461_v43, %v1460_v13  ;;  %v1609_v43 = vpack.c.bf16 %v1578_v42, %v1577_v8  ;;  %v1592_v42 = vld [vmem:[#allocation2 + $0xe0] sm:$0xff] }
 0x123   : > { %927 = vst.msk [vmem:[#allocation3 + $0x60] sm:$0xff] %vm914_vm5, %v891_v10  ;;  %v1459_v10 = vld [vmem:[#allocation2 + $0x9c] sm:$0xff] }
 0x124   : > { %v889_v49 = vpop.permute.xlu1 %888  ;;  %1395 = vrot.lane.b32.xlu0 %v9615_v33, %s8928_s17  ;;  %v9697_v17 = vpack.c.bf16 %v1459_v10, %v1458_v7  ;;  %v1582_v7 = vld [vmem:[#allocation2 + $0x68] sm:$0xff]  ;;  %v1591_v8 = vld [vmem:[#allocation2 + $0xd8] sm:$0xff] }
 0x125   : > { %926 = vst.msk [vmem:[#allocation3 + $0x58] sm:$0xff] %vm914_vm5, %v889_v49  ;;  %v1464_v49 = vld [vmem:[#allocation2 + $0xdc] sm:$0xff] }
 0x126   : > { %1393 = vrot.lane.b32.xlu1 %v9620_v18, %s8928_s17  ;;  %v895_v38 = vpop.permute.xlu0 %894  ;;  %v9702_v44 = vpack.c.bf16 %v1465_v23, %v1464_v49  ;;  %v1579_v49 = vld [vmem:[#allocation2 + $0x48] sm:$0xff]  ;;  %v1580_v23 = vld [vmem:[#allocation2 + $0x50] sm:$0xff] }
 0x127   : > { %929 = vst.msk [vmem:[#allocation3 + $0x70] sm:$0xff] %vm914_vm5, %v895_v38 }
 0x128   : > { %v893_v34 = vpop.permute.xlu1 %892  ;;  %1399 = vrot.lane.b32.xlu0 %v9625_v62, %s8928_s17 }
 0x129   : > { %928 = vst.msk [vmem:[#allocation3 + $0x68] sm:$0xff] %vm914_vm5, %v893_v34 }
 0x12a   : > { %1397 = vrot.lane.b32.xlu1 %v9630_v20, %s8928_s17  ;;  %v997_v53 = vpop.permute.xlu0 %996 }
 0x12b   : > { %1045 = vst.msk [vmem:[#allocation3] sm:$0xff] %vm1044_vm6, %v997_v53  ;;  %v1469_v53 = vld [vmem:[#allocation2 + $0x114] sm:$0xff] }
 0x12c   : > { %v897_v61 = vpop.permute.xlu1 %896  ;;  %1403 = vrot.lane.b32.xlu0 %v9635_v57, %s8928_s17 }
 0x12d   : > { %930 = vst.msk [vmem:[#allocation3 + $0x78] sm:$0xff] %vm914_vm5, %v897_v61  ;;  %v1466_v61 = vld [vmem:[#allocation2 + $0xf4] sm:$0xff]  ;;  %vm2851_vm5 = vcmask 654944  }
 0x12e   : > { %1401 = vrot.lane.b32.xlu1 %v9640_v14, %s8928_s17  ;;  %v1001_v29 = vpop.permute.xlu0 %1000 }
 0x12f   : > { %1047 = vst.msk [vmem:[#allocation3 + $0x10] sm:$0xff] %vm1044_vm6, %v1001_v29  ;;  %v9712_v29 = vpack.c.bf16 %v1469_v53, %v1468_v63  ;;  %v9754_v63 = vpack.c.bf16 %v1580_v23, %v1579_v49 }
 0x130   : > { %v999_v39 = vpop.permute.xlu1 %998  ;;  %1407 = vrot.lane.b32.xlu0 %v9645_v27, %s8928_s17 }
 0x131   : > { %1046 = vst.msk [vmem:[#allocation3 + $0x8] sm:$0xff] %vm1044_vm6, %v999_v39  ;;  %v9717_v39 = vpack.c.bf16 %v1467_v26, %v1466_v61  ;;  %v1584_v61 = vld [vmem:[#allocation2 + $0x80] sm:$0xff] }
 0x132   : > { %1405 = vrot.lane.b32.xlu1 %v9650_v19, %s8928_s17  ;;  %v1005_v56 = vpop.permute.xlu0 %1004 }
 0x133   : > { %1049 = vst.msk [vmem:[#allocation3 + $0x20] sm:$0xff] %vm1044_vm6, %v1005_v56  ;;  %v1471_v56 = vld [vmem:[#allocation2 + $0x12c] sm:$0xff] }
 0x134   : > { %v1003_v48 = vpop.permute.xlu1 %1002  ;;  %1411 = vrot.lane.b32.xlu0 %v9655_v32, %s8928_s17  ;;  %v9727_v24 = vpack.c.bf16 %v1471_v56, %v1470_v40  ;;  %v1587_v56 = vld [vmem:[#allocation2 + $0xa8] sm:$0xff] }
 0x135   : > { %1048 = vst.msk [vmem:[#allocation3 + $0x18] sm:$0xff] %vm1044_vm6, %v1003_v48  ;;  %v1476_v48 = vld [vmem:[#allocation2 + $0x16c] sm:$0xff] }
 0x136   : > { %1409 = vrot.lane.b32.xlu1 %v9660_v28, %s8928_s17  ;;  %v1009_v50 = vpop.permute.xlu0 %1008 }
 0x137   : > { %1051 = vst.msk [vmem:[#allocation3 + $0x30] sm:$0xff] %vm1044_vm6, %v1009_v50  ;;  %v1474_v50 = vld [vmem:[#allocation2 + $0x154] sm:$0xff] }
 0x138   : > { %v1007_v58 = vpop.permute.xlu1 %1006  ;;  %1512 = vrot.lane.b32.xlu0 %v1480_v51, %s8929_s23  ;;  %v1477_v51 = vld [vmem:[#allocation2 + $0x174] sm:$0xff] }
 0x139   : > { %1050 = vst.msk [vmem:[#allocation3 + $0x28] sm:$0xff] %vm1044_vm6, %v1007_v58  ;;  %v9732_v58 = vpack.c.bf16 %v1477_v51, %v1476_v48  ;;  %v9769_v51 = vpack.c.bf16 %v1590_v25, %v1589_v9 }
 0x13a   : > { %1413 = vrot.lane.b32.xlu1 %v9668_v5, %s8928_s17  ;;  %v1013_v2 = vpop.permute.xlu0 %1012 }
 0x13b   : > { %1053 = vst.msk [vmem:[#allocation3 + $0x40] sm:$0xff] %vm1044_vm6, %v1013_v2  ;;  %v9737_v2 = vpack.c.bf16 %v1475_v31, %v1474_v50  ;;  %v1594_v50 = vld [vmem:[#allocation2 + $0xf8] sm:$0xff] }
 0x13c   : > { %v1011_v54 = vpop.permute.xlu1 %1010  ;;  %1516 = vrot.lane.b32.xlu0 %v9672_v41, %s8929_s23 }
 0x13d   : > { %1052 = vst.msk [vmem:[#allocation3 + $0x38] sm:$0xff] %vm1044_vm6, %v1011_v54  ;;  %v1479_v54 = vld [vmem:[#allocation2 + $0x18c] sm:$0xff] }
 0x13e   : > { %1514 = vrot.lane.b32.xlu1 %v9677_v59, %s8929_s23  ;;  %v1017_v45 = vpop.permute.xlu0 %1016  ;;  %v9745_v10 = vpack.c.bf16 %v1479_v54, %v1478_v4  ;;  %v1597_v54 = vld [vmem:[#allocation2 + $0x120] sm:$0xff] }
 0x13f   : > { %1055 = vst.msk [vmem:[#allocation3 + $0x50] sm:$0xff] %vm1044_vm6, %v1017_v45  ;;  %v1581_v45 = vld [vmem:[#allocation2 + $0x60] sm:$0xff] }
 0x140   : > { %v1015_v35 = vpop.permute.xlu1 %1014  ;;  %1520 = vrot.lane.b32.xlu0 %v9682_v21, %s8929_s23  ;;  %v9749_v30 = vpack.c.bf16 %v1582_v7, %v1581_v45  ;;  %v1595_v7 = vld [vmem:[#allocation2 + $0x108] sm:$0xff] }
 0x141   : > { %1054 = vst.msk [vmem:[#allocation3 + $0x48] sm:$0xff] %vm1044_vm6, %v1015_v35 }
 0x142   : > { %1518 = vrot.lane.b32.xlu1 %v9687_v52, %s8929_s23  ;;  %v1021_v38 = vpop.permute.xlu0 %1020 }
 0x143   : > { %1057 = vst.msk [vmem:[#allocation3 + $0x60] sm:$0xff] %vm1044_vm6, %v1021_v38 }
 0x144   : > { %v1019_v34 = vpop.permute.xlu1 %1018  ;;  %1524 = vrot.lane.b32.xlu0 %v9692_v15, %s8929_s23 }
 0x145   : > { %1056 = vst.msk [vmem:[#allocation3 + $0x58] sm:$0xff] %vm1044_vm6, %v1019_v34  ;;  %v1586_v34 = vld [vmem:[#allocation2 + $0x98] sm:$0xff] }
 0x146   : > { %1522 = vrot.lane.b32.xlu1 %v9697_v17, %s8929_s23  ;;  %v1025_v60 = vpop.permute.xlu0 %1024 }
 0x147   : > { %1059 = vst.msk [vmem:[#allocation3 + $0x70] sm:$0xff] %vm1044_vm6, %v1025_v60  ;;  %v1583_v60 = vld [vmem:[#allocation2 + $0x78] sm:$0xff] }
 0x148   : > { %v1023_v3 = vpop.permute.xlu1 %1022  ;;  %1528 = vrot.lane.b32.xlu0 %v9702_v44, %s8929_s23 }
 0x149   : > { %1058 = vst.msk [vmem:[#allocation3 + $0x68] sm:$0xff] %vm1044_vm6, %v1023_v3  ;;  %v9759_v3 = vpack.c.bf16 %v1586_v34, %v1585_v47  ;;  %v1602_v47 = vld [vmem:[#allocation2 + $0x158] sm:$0xff] }
 0x14a   : > { %1526 = vrot.lane.b32.xlu1 %v9707_v6, %s8929_s23  ;;  %v1126_v22 = vpop.permute.xlu0 %1125 }
 0x14b   : > { %1174 = vst.msk [vmem:[#allocation3] sm:$0xff] %vm1173_vm7, %v1126_v22  ;;  %v9764_v22 = vpack.c.bf16 %v1584_v61, %v1583_v60  ;;  %v1599_v60 = vld [vmem:[#allocation2 + $0x138] sm:$0xff]  ;;  %v1600_v61 = vld [vmem:[#allocation2 + $0x140] sm:$0xff] }
 0x14c   : > { %v1027_v36 = vpop.permute.xlu1 %1026  ;;  %1532 = vrot.lane.b32.xlu0 %v9712_v29, %s8929_s23  ;;  %v9804_v25 = vpack.c.bf16 %v1600_v61, %v1599_v60  ;;  %v1714_v60 = vld [vmem:[#allocation2 + $0x91] sm:$0xff]  ;;  %v1715_v61 = vld [vmem:[#allocation2 + $0x99] sm:$0xff] }
 0x14d   : > { %1060 = vst.msk [vmem:[#allocation3 + $0x78] sm:$0xff] %vm1044_vm6, %v1027_v36  ;;  %v1588_v36 = vld [vmem:[#allocation2 + $0xb0] sm:$0xff]  ;;  %vm2981_vm6 = vcmask 687744  }
 0x14e   : > { %1530 = vrot.lane.b32.xlu1 %v9717_v39, %s8929_s23  ;;  %v1130_v37 = vpop.permute.xlu0 %1129  ;;  %v9774_v31 = vpack.c.bf16 %v1588_v36, %v1587_v56  ;;  %v1603_v56 = vld [vmem:[#allocation2 + $0x168] sm:$0xff]  ;;  %v1604_v36 = vld [vmem:[#allocation2 + $0x170] sm:$0xff] }
 0x14f   : > { %1176 = vst.msk [vmem:[#allocation3 + $0x10] sm:$0xff] %vm1173_vm7, %v1130_v37  ;;  %v1593_v37 = vld [vmem:[#allocation2 + $0xf0] sm:$0xff] }
 0x150   : > { %v1128_v55 = vpop.permute.xlu1 %1127  ;;  %1536 = vrot.lane.b32.xlu0 %v9722_v16, %s8929_s23  ;;  %v9779_v4 = vpack.c.bf16 %v1594_v50, %v1593_v37  ;;  %v1706_v37 = vld [vmem:[#allocation2 + $0x31] sm:$0xff]  ;;  %v1707_v50 = vld [vmem:[#allocation2 + $0x39] sm:$0xff] }
 0x151   : > { %1175 = vst.msk [vmem:[#allocation3 + $0x8] sm:$0xff] %vm1173_vm7, %v1128_v55 }
 0x152   : > { %1534 = vrot.lane.b32.xlu1 %v9727_v24, %s8929_s23  ;;  %v1134_v11 = vpop.permute.xlu0 %1133 }
 0x153   : > { %1178 = vst.msk [vmem:[#allocation3 + $0x20] sm:$0xff] %vm1173_vm7, %v1134_v11 }
 0x154   : > { %v1132_v13 = vpop.permute.xlu1 %1131  ;;  %1540 = vrot.lane.b32.xlu0 %v9732_v58, %s8929_s23 }
 0x155   : > { %1177 = vst.msk [vmem:[#allocation3 + $0x18] sm:$0xff] %vm1173_vm7, %v1132_v13  ;;  %v1598_v13 = vld [vmem:[#allocation2 + $0x128] sm:$0xff] }
 0x156   : > { %1538 = vrot.lane.b32.xlu1 %v9737_v2, %s8929_s23  ;;  %v1138_v35 = vpop.permute.xlu0 %1137  ;;  %v9789_v23 = vpack.c.bf16 %v1598_v13, %v1597_v54  ;;  %v1738_v13 = vpack.c.bf16 %v1707_v50, %v1706_v37  ;;  %v9834_v37 = vpack.c.bf16 %v1715_v61, %v1714_v60  ;;  %v1718_v50 = vld [vmem:[#allocation2 + $0xc1] sm:$0xff]  ;;  %v1720_v60 = vld [vmem:[#allocation2 + $0xd9] sm:$0xff] }
 0x157   : > { %1180 = vst.msk [vmem:[#allocation3 + $0x30] sm:$0xff] %vm1173_vm7, %v1138_v35  ;;  %v1596_v35 = vld [vmem:[#allocation2 + $0x110] sm:$0xff]  ;;  %v1721_v61 = vld [vmem:[#allocation2 + $0xe1] sm:$0xff] }
 0x158   : > { %v1136_v38 = vpop.permute.xlu1 %1135  ;;  %1641 = vrot.lane.b32.xlu0 %v1609_v43, %s8930_s25  ;;  %v9784_v43 = vpack.c.bf16 %v1592_v42, %v1591_v8  ;;  %v9794_v34 = vpack.c.bf16 %v1596_v35, %v1595_v7  ;;  %v1607_v42 = vld [vmem:[#allocation2 + $0x198] sm:$0xff]  ;;  %v1711_v7 = vld [vmem:[#allocation2 + $0x69] sm:$0xff] }
 0x159   : > { %1179 = vst.msk [vmem:[#allocation3 + $0x28] sm:$0xff] %vm1173_vm7, %v1136_v38  ;;  %v1601_v38 = vld [vmem:[#allocation2 + $0x150] sm:$0xff] }
 0x15a   : > { %1542 = vrot.lane.b32.xlu1 %v9745_v10, %s8929_s23  ;;  %v1142_v53 = vpop.permute.xlu0 %1141  ;;  %v9799_v9 = vpack.c.bf16 %v1602_v47, %v1601_v38  ;;  %v1708_v38 = vld [vmem:[#allocation2 + $0x49] sm:$0xff]  ;;  %v1709_v47 = vld [vmem:[#allocation2 + $0x51] sm:$0xff]  ;;  %s8942_s23 = smov 88  }
 0x15b   : > { %1182 = vst.msk [vmem:[#allocation3 + $0x40] sm:$0xff] %vm1173_vm7, %v1142_v53 }
 0x15c   : > { %v1140_v26 = vpop.permute.xlu1 %1139  ;;  %1645 = vrot.lane.b32.xlu0 %v9749_v30, %s8930_s25 }
 0x15d   : > { %1181 = vst.msk [vmem:[#allocation3 + $0x38] sm:$0xff] %vm1173_vm7, %v1140_v26 }
 0x15e   : > { %1643 = vrot.lane.b32.xlu1 %v9754_v63, %s8930_s25  ;;  %v1146_v40 = vpop.permute.xlu0 %1145 }
 0x15f   : > { %1184 = vst.msk [vmem:[#allocation3 + $0x50] sm:$0xff] %vm1173_vm7, %v1146_v40 }
 0x160   : > { %v1144_v48 = vpop.permute.xlu1 %1143  ;;  %1649 = vrot.lane.b32.xlu0 %v9759_v3, %s8930_s25 }
 0x161   : > { %1183 = vst.msk [vmem:[#allocation3 + $0x48] sm:$0xff] %vm1173_vm7, %v1144_v48 }
 0x162   : > { %1647 = vrot.lane.b32.xlu1 %v9764_v22, %s8930_s25  ;;  %v1150_v55 = vpop.permute.xlu0 %1149 }
 0x163   : > { %1186 = vst.msk [vmem:[#allocation3 + $0x60] sm:$0xff] %vm1173_vm7, %v1150_v55  ;;  %v9812_v55 = vpack.c.bf16 %v1604_v36, %v1603_v56  ;;  %v1712_v56 = vld [vmem:[#allocation2 + $0x79] sm:$0xff]  ;;  %v1713_v36 = vld [vmem:[#allocation2 + $0x81] sm:$0xff] }
 0x164   : > { %v1148_v11 = vpop.permute.xlu1 %1147  ;;  %1653 = vrot.lane.b32.xlu0 %v9769_v51, %s8930_s25 }
 0x165   : > { %1185 = vst.msk [vmem:[#allocation3 + $0x58] sm:$0xff] %vm1173_vm7, %v1148_v11  ;;  %v1608_v11 = vld [vmem:[#allocation2 + $0x1a0] sm:$0xff] }
 0x166   : > { %1651 = vrot.lane.b32.xlu1 %v9774_v31, %s8930_s25  ;;  %v1154_v45 = vpop.permute.xlu0 %1153  ;;  %v9820_v35 = vpack.c.bf16 %v1608_v11, %v1607_v42  ;;  %v9839_v42 = vpack.c.bf16 %v1713_v36, %v1712_v56  ;;  %v1726_v36 = vld [vmem:[#allocation2 + $0x121] sm:$0xff] }
 0x167   : > { %1188 = vst.msk [vmem:[#allocation3 + $0x70] sm:$0xff] %vm1173_vm7, %v1154_v45  ;;  %v1710_v45 = vld [vmem:[#allocation2 + $0x61] sm:$0xff] }
 0x168   : > { %v1152_v49 = vpop.permute.xlu1 %1151  ;;  %1657 = vrot.lane.b32.xlu0 %v9779_v4, %s8930_s25 }
 0x169   : > { %1187 = vst.msk [vmem:[#allocation3 + $0x68] sm:$0xff] %vm1173_vm7, %v1152_v49 }
 0x16a   : > { %1655 = vrot.lane.b32.xlu1 %v9784_v43, %s8930_s25  ;;  %v1255_v53 = vpop.permute.xlu0 %1254 }
 0x16b   : > { %1303 = vst.msk [vmem:[#allocation3] sm:$0xff] %vm1302_vm8, %v1255_v53 }
 0x16c   : > { %v1156_v26 = vpop.permute.xlu1 %1155  ;;  %1661 = vrot.lane.b32.xlu0 %v9789_v23, %s8930_s25 }
 0x16d   : > { %1189 = vst.msk [vmem:[#allocation3 + $0x78] sm:$0xff] %vm1173_vm7, %v1156_v26  ;;  %v9829_v26 = vpack.c.bf16 %v1709_v47, %v1708_v38  ;;  %v1723_v38 = vld [vmem:[#allocation2 + $0xf9] sm:$0xff]  ;;  %vm3110_vm7 = vcmask 720544  }
 0x16e   : > { %1659 = vrot.lane.b32.xlu1 %v9794_v34, %s8930_s25  ;;  %v1259_v40 = vpop.permute.xlu0 %1258 }
 0x16f   : > { %1305 = vst.msk [vmem:[#allocation3 + $0x10] sm:$0xff] %vm1302_vm8, %v1259_v40 }
 0x170   : > { %v1257_v48 = vpop.permute.xlu1 %1256  ;;  %1665 = vrot.lane.b32.xlu0 %v9799_v9, %s8930_s25 }
 0x171   : > { %1304 = vst.msk [vmem:[#allocation3 + $0x8] sm:$0xff] %vm1302_vm8, %v1257_v48 }
 0x172   : > { %1663 = vrot.lane.b32.xlu1 %v9804_v25, %s8930_s25  ;;  %v1263_v8 = vpop.permute.xlu0 %1262 }
 0x173   : > { %1307 = vst.msk [vmem:[#allocation3 + $0x20] sm:$0xff] %vm1302_vm8, %v1263_v8  ;;  %v1719_v8 = vld [vmem:[#allocation2 + $0xc9] sm:$0xff] }
 0x174   : > { %v1261_v54 = vpop.permute.xlu1 %1260  ;;  %1669 = vrot.lane.b32.xlu0 %v9492_v1, %s8930_s25  ;;  %v9824_v1 = vpack.c.bf16 %v1711_v7, %v1710_v45  ;;  %v1744_v7 = vpack.c.bf16 %v1719_v8, %v1718_v50  ;;  %v1745_v50 = vpack.c.bf16 %v1721_v61, %v1720_v60  ;;  %v1729_v60 = vld [vmem:[#allocation2 + $0x141] sm:$0xff] }
 0x175   : > { %1306 = vst.msk [vmem:[#allocation3 + $0x18] sm:$0xff] %vm1302_vm8, %v1261_v54  ;;  %v1716_v54 = vld [vmem:[#allocation2 + $0xa9] sm:$0xff] }
 0x176   : > { %1667 = vrot.lane.b32.xlu1 %v9812_v55, %s8930_s25  ;;  %v1267_v49 = vpop.permute.xlu0 %1266 }
 0x177   : > { %1309 = vst.msk [vmem:[#allocation3 + $0x30] sm:$0xff] %vm1302_vm8, %v1267_v49  ;;  %v1722_v49 = vld [vmem:[#allocation2 + $0xf1] sm:$0xff] }
 0x178   : > { %v1265_v53 = vpop.permute.xlu1 %1264  ;;  %1770 = vrot.lane.b32.xlu0 %v1738_v13, %s8931_s26  ;;  %v1717_v13 = vld [vmem:[#allocation2 + $0xb1] sm:$0xff]  ;;  %v1746_v56 = vpack.c.bf16 %v1723_v38, %v1722_v49  ;;  %v1731_v49 = vld [vmem:[#allocation2 + $0x159] sm:$0xff] }
 0x179   : > { %1308 = vst.msk [vmem:[#allocation3 + $0x28] sm:$0xff] %vm1302_vm8, %v1265_v53  ;;  %v1743_v47 = vpack.c.bf16 %v1717_v13, %v1716_v54  ;;  %v1725_v54 = vld [vmem:[#allocation2 + $0x111] sm:$0xff] }
 0x17a   : > { %1671 = vrot.lane.b32.xlu1 %v9820_v35, %s8930_s25  ;;  %v1271_v40 = vpop.permute.xlu0 %1270 }
 0x17b   : > { %1311 = vst.msk [vmem:[#allocation3 + $0x40] sm:$0xff] %vm1302_vm8, %v1271_v40 }
 0x17c   : > { %v1269_v48 = vpop.permute.xlu1 %1268  ;;  %1774 = vrot.lane.b32.xlu0 %v9824_v1, %s8931_s26 }
 0x17d   : > { %1310 = vst.msk [vmem:[#allocation3 + $0x38] sm:$0xff] %vm1302_vm8, %v1269_v48  ;;  %v1727_v48 = vld [vmem:[#allocation2 + $0x129] sm:$0xff] }
 0x17e   : > { %1772 = vrot.lane.b32.xlu1 %v9829_v26, %s8931_s26  ;;  %v1275_v11 = vpop.permute.xlu0 %1274 }
 0x17f   : > { %1313 = vst.msk [vmem:[#allocation3 + $0x50] sm:$0xff] %vm1302_vm8, %v1275_v11  ;;  %v1724_v11 = vld [vmem:[#allocation2 + $0x109] sm:$0xff] }
 0x180   : > { %v1273_v45 = vpop.permute.xlu1 %1272  ;;  %1778 = vrot.lane.b32.xlu0 %v9834_v37, %s8931_s26  ;;  %v1747_v38 = vpack.c.bf16 %v1725_v54, %v1724_v11  ;;  %v1835_v11 = vld [vmem:[#allocation2 + $0x32] sm:$0xff]  ;;  %v1836_v54 = vld [vmem:[#allocation2 + $0x3a] sm:$0xff] }
 0x181   : > { %1312 = vst.msk [vmem:[#allocation3 + $0x48] sm:$0xff] %vm1302_vm8, %v1273_v45  ;;  %v1748_v45 = vpack.c.bf16 %v1727_v48, %v1726_v36  ;;  %v1732_v48 = vld [vmem:[#allocation2 + $0x169] sm:$0xff] }
 0x182   : > { %1776 = vrot.lane.b32.xlu1 %v9839_v42, %s8931_s26  ;;  %v1279_v53 = vpop.permute.xlu0 %1278 }
 0x183   : > { %1315 = vst.msk [vmem:[#allocation3 + $0x60] sm:$0xff] %vm1302_vm8, %v1279_v53 }
 0x184   : > { %v1277_v40 = vpop.permute.xlu1 %1276  ;;  %1782 = vrot.lane.b32.xlu0 %v1744_v7, %s8931_s26  ;;  %v1730_v7 = vld [vmem:[#allocation2 + $0x151] sm:$0xff] }
 0x185   : > { %1314 = vst.msk [vmem:[#allocation3 + $0x58] sm:$0xff] %vm1302_vm8, %v1277_v40  ;;  %v1750_v40 = vpack.c.bf16 %v1731_v49, %v1730_v7  ;;  %v1736_v7 = vld [vmem:[#allocation2 + $0x199] sm:$0xff]  ;;  %v1737_v49 = vld [vmem:[#allocation2 + $0x1a1] sm:$0xff] }
 0x186   : > { %1780 = vrot.lane.b32.xlu1 %v1743_v47, %s8931_s26  ;;  %v1283_v8 = vpop.permute.xlu0 %1282  ;;  %v1728_v47 = vld [vmem:[#allocation2 + $0x139] sm:$0xff] }
 0x187   : > { %1317 = vst.msk [vmem:[#allocation3 + $0x70] sm:$0xff] %vm1302_vm8, %v1283_v8 }
 0x188   : > { %v1281_v13 = vpop.permute.xlu1 %1280  ;;  %1786 = vrot.lane.b32.xlu0 %v1746_v56, %s8931_s26  ;;  %v1749_v56 = vpack.c.bf16 %v1729_v60, %v1728_v47  ;;  %v1839_v47 = vld [vmem:[#allocation2 + $0x62] sm:$0xff]  ;;  %v1840_v60 = vld [vmem:[#allocation2 + $0x6a] sm:$0xff] }
 0x189   : > { %1316 = vst.msk [vmem:[#allocation3 + $0x68] sm:$0xff] %vm1302_vm8, %v1281_v13 }
 0x18a   : > { %1784 = vrot.lane.b32.xlu1 %v1745_v50, %s8931_s26  ;;  %v1384_v53 = vpop.permute.xlu0 %1383  ;;  %v1733_v50 = vld [vmem:[#allocation2 + $0x171] sm:$0xff] }
 0x18b   : > { %1432 = vst.msk [vmem:[#allocation3] sm:$0xff] %vm1431_vm9, %v1384_v53  ;;  %v1751_v13 = vpack.c.bf16 %v1733_v50, %v1732_v48  ;;  %v1867_v53 = vpack.c.bf16 %v1836_v54, %v1835_v11  ;;  %v9870_v50 = vpack.c.bf16 %v1840_v60, %v1839_v47 }
 0x18c   : > { %v1285_v61 = vpop.permute.xlu1 %1284  ;;  %1790 = vrot.lane.b32.xlu0 %v1748_v45, %s8931_s26 }
 0x18d   : > { %1318 = vst.msk [vmem:[#allocation3 + $0x78] sm:$0xff] %vm1302_vm8, %v1285_v61  ;;  %v1753_v61 = vpack.c.bf16 %v1737_v49, %v1736_v7  ;;  %vm3239_vm8 = vcmask 753344  }
 0x18e   : > { %1788 = vrot.lane.b32.xlu1 %v1747_v38, %s8931_s26  ;;  %v1388_v36 = vpop.permute.xlu0 %1387 }
 0x18f   : > { %1434 = vst.msk [vmem:[#allocation3 + $0x10] sm:$0xff] %vm1431_vm9, %v1388_v36  ;;  %v1838_v36 = vld [vmem:[#allocation2 + $0x52] sm:$0xff] }
 0x190   : > { %v1386_v8 = vpop.permute.xlu1 %1385  ;;  %1794 = vrot.lane.b32.xlu0 %v1750_v40, %s8931_s26 }
 0x191   : > { %1433 = vst.msk [vmem:[#allocation3 + $0x8] sm:$0xff] %vm1431_vm9, %v1386_v8  ;;  %v1844_v8 = vld [vmem:[#allocation2 + $0x9a] sm:$0xff] }
 0x192   : > { %1792 = vrot.lane.b32.xlu1 %v1749_v56, %s8931_s26  ;;  %v1392_v45 = vpop.permute.xlu0 %1391  ;;  %v1837_v56 = vld [vmem:[#allocation2 + $0x4a] sm:$0xff] }
 0x193   : > { %1436 = vst.msk [vmem:[#allocation3 + $0x20] sm:$0xff] %vm1431_vm9, %v1392_v45  ;;  %v9874_v11 = vpack.c.bf16 %v1838_v36, %v1837_v56  ;;  %v1842_v45 = vld [vmem:[#allocation2 + $0x82] sm:$0xff] }
 0x194   : > { %v1390_v38 = vpop.permute.xlu1 %1389  ;;  %1798 = vrot.lane.b32.xlu0 %v9546_v12, %s8931_s26  ;;  %v1843_v12 = vld [vmem:[#allocation2 + $0x92] sm:$0xff] }
 0x195   : > { %1435 = vst.msk [vmem:[#allocation3 + $0x18] sm:$0xff] %vm1431_vm9, %v1390_v38  ;;  %v9879_v49 = vpack.c.bf16 %v1844_v8, %v1843_v12  ;;  %v1847_v38 = vld [vmem:[#allocation2 + $0xc2] sm:$0xff]  ;;  %v1852_v12 = vld [vmem:[#allocation2 + $0xfa] sm:$0xff] }
 0x196   : > { %1796 = vrot.lane.b32.xlu1 %v1751_v13, %s8931_s26  ;;  %v1396_v40 = vpop.permute.xlu0 %1395  ;;  %v1841_v13 = vld [vmem:[#allocation2 + $0x7a] sm:$0xff] }
 0x197   : > { %1438 = vst.msk [vmem:[#allocation3 + $0x30] sm:$0xff] %vm1431_vm9, %v1396_v40  ;;  %12422 = vst [vmem:[#allocation11_spill] sm:$0xff] %v9879_v49  ;;  %v9884_v47 = vpack.c.bf16 %v1842_v45, %v1841_v13  ;;  %v1846_v40 = vld [vmem:[#allocation2 + $0xb2] sm:$0xff]  ;;  %v1849_v13 = vld [vmem:[#allocation2 + $0xda] sm:$0xff] }
 0x198   : > { %v1394_v48 = vpop.permute.xlu1 %1393  ;;  %1899 = vrot.lane.b32.xlu0 %v1867_v53, %s8932_s30  ;;  %v1848_v53 = vld [vmem:[#allocation2 + $0xca] sm:$0xff]  ;;  %v1850_v45 = vld [vmem:[#allocation2 + $0xe2] sm:$0xff] }
 0x199   : > { %1437 = vst.msk [vmem:[#allocation3 + $0x28] sm:$0xff] %vm1431_vm9, %v1394_v48  ;;  %12423 = vst [vmem:[#allocation13_spill] sm:$0xff] %v9884_v47  ;;  %v1873_v36 = vpack.c.bf16 %v1848_v53, %v1847_v38  ;;  %v1851_v48 = vld [vmem:[#allocation2 + $0xf2] sm:$0xff]  ;;  %v1855_v38 = vld [vmem:[#allocation2 + $0x122] sm:$0xff] }
 0x19a   : > { %1800 = vrot.lane.b32.xlu1 %v1753_v61, %s8931_s26  ;;  %v1400_v54 = vpop.permute.xlu0 %1399  ;;  %v1845_v61 = vld [vmem:[#allocation2 + $0xaa] sm:$0xff]  ;;  %s8939_s26 = smov 76  }
 0x19b   : > { %1440 = vst.msk [vmem:[#allocation3 + $0x40] sm:$0xff] %vm1431_vm9, %v1400_v54  ;;  %v1872_v8 = vpack.c.bf16 %v1846_v40, %v1845_v61  ;;  %v1856_v53 = vld [vmem:[#allocation2 + $0x12a] sm:$0xff]  ;;  %v1854_v40 = vld [vmem:[#allocation2 + $0x112] sm:$0xff] }
 0x19c   : > { %v1398_v7 = vpop.permute.xlu1 %1397  ;;  %1903 = vrot.lane.b32.xlu0 %v9870_v50, %s8932_s30  ;;  %v1853_v61 = vld [vmem:[#allocation2 + $0x10a] sm:$0xff] }
 0x19d   : > { %1439 = vst.msk [vmem:[#allocation3 + $0x38] sm:$0xff] %vm1431_vm9, %v1398_v7 }
 0x19e   : > { %1901 = vrot.lane.b32.xlu1 %v9874_v11, %s8932_s30  ;;  %v1404_v60 = vpop.permute.xlu0 %1403 }
 0x19f   : > { %1442 = vst.msk [vmem:[#allocation3 + $0x50] sm:$0xff] %vm1431_vm9, %v1404_v60  ;;  %v1875_v60 = vpack.c.bf16 %v1852_v12, %v1851_v48  ;;  %v1860_v48 = vld [vmem:[#allocation2 + $0x15a] sm:$0xff]  ;;  %v1876_v12 = vpack.c.bf16 %v1854_v40, %v1853_v61 }
 0x1a0   : > { %v1402_v56 = vpop.permute.xlu1 %1401  ;;  %1907 = vrot.lane.b32.xlu0 %v9879_v49, %s8932_s30  ;;  %v1964_v61 = vld [vmem:[#allocation2 + $0x33] sm:$0xff]  ;;  %v1965_v40 = vld [vmem:[#allocation2 + $0x3b] sm:$0xff] }
 0x1a1   : > { %1441 = vst.msk [vmem:[#allocation3 + $0x48] sm:$0xff] %vm1431_vm9, %v1402_v56  ;;  %v1874_v56 = vpack.c.bf16 %v1850_v45, %v1849_v13  ;;  %v1858_v13 = vld [vmem:[#allocation2 + $0x142] sm:$0xff] }
 0x1a2   : > { %1905 = vrot.lane.b32.xlu1 %v9884_v47, %s8932_s30  ;;  %v1408_v54 = vpop.permute.xlu0 %1407 }
 0x1a3   : > { %1444 = vst.msk [vmem:[#allocation3 + $0x60] sm:$0xff] %vm1431_vm9, %v1408_v54  ;;  %v1877_v54 = vpack.c.bf16 %v1856_v53, %v1855_v38  ;;  %v1861_v38 = vld [vmem:[#allocation2 + $0x16a] sm:$0xff]  ;;  %v1862_v53 = vld [vmem:[#allocation2 + $0x172] sm:$0xff] }
 0x1a4   : > { %v1406_v7 = vpop.permute.xlu1 %1405  ;;  %1911 = vrot.lane.b32.xlu0 %v1873_v36, %s8932_s30  ;;  %v1859_v36 = vld [vmem:[#allocation2 + $0x152] sm:$0xff] }
 0x1a5   : > { %1443 = vst.msk [vmem:[#allocation3 + $0x58] sm:$0xff] %vm1431_vm9, %v1406_v7  ;;  %v1879_v45 = vpack.c.bf16 %v1860_v48, %v1859_v36  ;;  %v1865_v48 = vld [vmem:[#allocation2 + $0x19a] sm:$0xff] }
 0x1a6   : > { %1909 = vrot.lane.b32.xlu1 %v1872_v8, %s8932_s30  ;;  %v1412_v49 = vpop.permute.xlu0 %1411  ;;  %v1857_v8 = vld [vmem:[#allocation2 + $0x13a] sm:$0xff] }
 0x1a7   : > { %1446 = vst.msk [vmem:[#allocation3 + $0x70] sm:$0xff] %vm1431_vm9, %v1412_v49 }
 0x1a8   : > { %v1410_v47 = vpop.permute.xlu1 %1409  ;;  %1915 = vrot.lane.b32.xlu0 %v1875_v60, %s8932_s30  ;;  %v1878_v60 = vpack.c.bf16 %v1858_v13, %v1857_v8  ;;  %v1996_v8 = vpack.c.bf16 %v1965_v40, %v1964_v61  ;;  %v1968_v13 = vld [vmem:[#allocation2 + $0x63] sm:$0xff] }
 0x1a9   : > { %1445 = vst.msk [vmem:[#allocation3 + $0x68] sm:$0xff] %vm1431_vm9, %v1410_v47 }
 0x1aa   : > { %1913 = vrot.lane.b32.xlu1 %v1874_v56, %s8932_s30  ;;  %v1513_v7 = vpop.permute.xlu0 %1512 }
 0x1ab   : > { %1561 = vst.msk [vmem:[#allocation3] sm:$0xff] %vm1560_vm10, %v1513_v7 }
 0x1ac   : > { %v1414_v49 = vpop.permute.xlu1 %1413  ;;  %1919 = vrot.lane.b32.xlu0 %v1877_v54, %s8932_s30  ;;  %v1880_v54 = vpack.c.bf16 %v1862_v53, %v1861_v38  ;;  %v1967_v38 = vld [vmem:[#allocation2 + $0x53] sm:$0xff] }
 0x1ad   : > { %1447 = vst.msk [vmem:[#allocation3 + $0x78] sm:$0xff] %vm1431_vm9, %v1414_v49  ;;  %v1969_v49 = vld [vmem:[#allocation2 + $0x6b] sm:$0xff]  ;;  %vm3368_vm9 = vcmask 786144  }
 0x1ae   : > { %1917 = vrot.lane.b32.xlu1 %v1876_v12, %s8932_s30  ;;  %v1517_v47 = vpop.permute.xlu0 %1516  ;;  %v1866_v12 = vld [vmem:[#allocation2 + $0x1a2] sm:$0xff] }
 0x1af   : > { %1563 = vst.msk [vmem:[#allocation3 + $0x10] sm:$0xff] %vm1560_vm10, %v1517_v47 }
 0x1b0   : > { %v1515_v56 = vpop.permute.xlu1 %1514  ;;  %1923 = vrot.lane.b32.xlu0 %v1879_v45, %s8932_s30  ;;  %v1882_v45 = vpack.c.bf16 %v1866_v12, %v1865_v48 }
 0x1b1   : > { %1562 = vst.msk [vmem:[#allocation3 + $0x8] sm:$0xff] %vm1560_vm10, %v1515_v56  ;;  %v9915_v56 = vpack.c.bf16 %v1969_v49, %v1968_v13 }
 0x1b2   : > { %1921 = vrot.lane.b32.xlu1 %v1878_v60, %s8932_s30  ;;  %v1521_v36 = vpop.permute.xlu0 %1520  ;;  %v1966_v60 = vld [vmem:[#allocation2 + $0x4b] sm:$0xff] }
 0x1b3   : > { %1565 = vst.msk [vmem:[#allocation3 + $0x20] sm:$0xff] %vm1560_vm10, %v1521_v36 }
 0x1b4   : > { %v1519_v7 = vpop.permute.xlu1 %1518  ;;  %1927 = vrot.lane.b32.xlu0 %v9596_v46, %s8932_s30  ;;  %v9919_v46 = vpack.c.bf16 %v1967_v38, %v1966_v60 }
 0x1b5   : > { %1564 = vst.msk [vmem:[#allocation3 + $0x18] sm:$0xff] %vm1560_vm10, %v1519_v7 }
 0x1b6   : > { %1925 = vrot.lane.b32.xlu1 %v1880_v54, %s8932_s30  ;;  %v1525_v47 = vpop.permute.xlu0 %1524 }
 0x1b7   : > { %1567 = vst.msk [vmem:[#allocation3 + $0x30] sm:$0xff] %vm1560_vm10, %v1525_v47  ;;  %v2124_v47 = vld [vmem:[#allocation2 + $0x1a4] sm:$0xff] }
 0x1b8   : > { %v1523_v53 = vpop.permute.xlu1 %1522  ;;  %2028 = vrot.lane.b32.xlu0 %v1996_v8, %s8933_s6  ;;  %v1995_v8 = vld [vmem:[#allocation2 + $0x1a3] sm:$0xff] }
 0x1b9   : > { %1566 = vst.msk [vmem:[#allocation3 + $0x28] sm:$0xff] %vm1560_vm10, %v1523_v53 }
 0x1ba   : > { %1929 = vrot.lane.b32.xlu1 %v1882_v45, %s8932_s30  ;;  %v1529_v61 = vpop.permute.xlu0 %1528 }
 0x1bb   : > { %1569 = vst.msk [vmem:[#allocation3 + $0x40] sm:$0xff] %vm1560_vm10, %v1529_v61  ;;  %v2250_v61 = vld [vmem:[#allocation2 + $0x188] sm:$0xff] }
 0x1bc   : > { %v1527_v40 = vpop.permute.xlu1 %1526  ;;  %2032 = vrot.lane.b32.xlu0 %v9915_v56, %s8933_s6 }
 0x1bd   : > { %1568 = vst.msk [vmem:[#allocation3 + $0x38] sm:$0xff] %vm1560_vm10, %v1527_v40 }
 0x1be   : > { %2030 = vrot.lane.b32.xlu1 %v9919_v46, %s8933_s6  ;;  %v1533_v54 = vpop.permute.xlu0 %1532 }
 0x1bf   : > { %1571 = vst.msk [vmem:[#allocation3 + $0x50] sm:$0xff] %vm1560_vm10, %v1533_v54  ;;  %v2253_v54 = vld [vmem:[#allocation2 + $0x1b0] sm:$0xff] }
 0x1c0   : > { %v1531_v36 = vpop.permute.xlu1 %1530  ;;  %2036 = vrot.lane.b32.xlu0 %v9620_v18, %s8933_s6 }
 0x1c1   : > { %1570 = vst.msk [vmem:[#allocation3 + $0x48] sm:$0xff] %vm1560_vm10, %v1531_v36 }
 0x1c2   : > { %2034 = vrot.lane.b32.xlu1 %v9607_v0, %s8933_s6  ;;  %v1537_v48 = vpop.permute.xlu0 %1536 }
 0x1c3   : > { %1573 = vst.msk [vmem:[#allocation3 + $0x60] sm:$0xff] %vm1560_vm10, %v1537_v48 }
 0x1c4   : > { %v1535_v12 = vpop.permute.xlu1 %1534  ;;  %2040 = vrot.lane.b32.xlu0 %v9630_v20, %s8933_s6 }
 0x1c5   : > { %1572 = vst.msk [vmem:[#allocation3 + $0x58] sm:$0xff] %vm1560_vm10, %v1535_v12 }
 0x1c6   : > { %2038 = vrot.lane.b32.xlu1 %v9615_v33, %s8933_s6  ;;  %v1541_v7 = vpop.permute.xlu0 %1540 }
 0x1c7   : > { %1575 = vst.msk [vmem:[#allocation3 + $0x70] sm:$0xff] %vm1560_vm10, %v1541_v7 }
 0x1c8   : > { %v1539_v18 = vpop.permute.xlu1 %1538  ;;  %2044 = vrot.lane.b32.xlu0 %v9640_v14, %s8933_s6 }
 0x1c9   : > { %1574 = vst.msk [vmem:[#allocation3 + $0x68] sm:$0xff] %vm1560_vm10, %v1539_v18 }
 0x1ca   : > { %2042 = vrot.lane.b32.xlu1 %v9625_v62, %s8933_s6  ;;  %v1642_v0 = vpop.permute.xlu0 %1641 }
 0x1cb   : > { %1690 = vst.msk [vmem:[#allocation3] sm:$0xff] %vm1689_vm11, %v1642_v0  ;;  %v2740_v0 = vld [vmem:[#allocation2 + $0x54] sm:$0xff] }
 0x1cc   : > { %v1543_v20 = vpop.permute.xlu1 %1542  ;;  %2048 = vrot.lane.b32.xlu0 %v9650_v19, %s8933_s6  ;;  %v1994_v19 = vld [vmem:[#allocation2 + $0x19b] sm:$0xff] }
 0x1cd   : > { %1576 = vst.msk [vmem:[#allocation3 + $0x78] sm:$0xff] %vm1560_vm10, %v1543_v20  ;;  %v8798_v20 = vld [vmem:[%s12380_s1 + $0x8] sm:$0xff]   ;;  %vm3497_vm10 = vcmask 818944  }
 0x1ce   : > { %2046 = vrot.lane.b32.xlu1 %v9635_v57, %s8933_s6  ;;  %v1646_v33 = vpop.permute.xlu0 %1645  ;;  %v2011_v57 = vpack.c.bf16 %v1995_v8, %v1994_v19  ;;  %v2741_v19 = vld [vmem:[#allocation2 + $0x64] sm:$0xff]  ;;  %v2742_v8 = vld [vmem:[#allocation2 + $0x6c] sm:$0xff] }
 0x1cf   : > { %1692 = vst.msk [vmem:[#allocation3 + $0x10] sm:$0xff] %vm1689_vm11, %v1646_v33 }
 0x1d0   : > { %v1644_v14 = vpop.permute.xlu1 %1643  ;;  %2052 = vrot.lane.b32.xlu0 %v9660_v28, %s8933_s6 }
 0x1d1   : > { %1691 = vst.msk [vmem:[#allocation3 + $0x8] sm:$0xff] %vm1689_vm11, %v1644_v14  ;;  %v2869_v14 = vld [vmem:[#allocation2 + $0x60] sm:$0xff] }
 0x1d2   : > { %2050 = vrot.lane.b32.xlu1 %v9645_v27, %s8933_s6  ;;  %v1650_v62 = vpop.permute.xlu0 %1649 }
 0x1d3   : > { %1694 = vst.msk [vmem:[#allocation3 + $0x20] sm:$0xff] %vm1689_vm11, %v1650_v62  ;;  %v2870_v62 = vld [vmem:[#allocation2 + $0x68] sm:$0xff] }
 0x1d4   : > { %v1648_v13 = vpop.permute.xlu1 %1647  ;;  %2056 = vrot.lane.b32.xlu0 %v9668_v5, %s8933_s6 }
 0x1d5   : > { %1693 = vst.msk [vmem:[#allocation3 + $0x18] sm:$0xff] %vm1689_vm11, %v1648_v13  ;;  %v8799_v13 = vld [vmem:[%s12380_s1 + $0x10] sm:$0xff]  }
 0x1d6   : > { %2054 = vrot.lane.b32.xlu1 %v9655_v32, %s8933_s6  ;;  %v1654_v28 = vpop.permute.xlu0 %1653 }
 0x1d7   : > { %1696 = vst.msk [vmem:[#allocation3 + $0x30] sm:$0xff] %vm1689_vm11, %v1654_v28  ;;  %v2998_v28 = vld [vmem:[#allocation2 + $0x61] sm:$0xff] }
 0x1d8   : > { %v1652_v49 = vpop.permute.xlu1 %1651  ;;  %2157 = vrot.lane.b32.xlu0 %v9677_v59, %s8934_s7 }
 0x1d9   : > { %1695 = vst.msk [vmem:[#allocation3 + $0x28] sm:$0xff] %vm1689_vm11, %v1652_v49  ;;  %v2999_v49 = vld [vmem:[#allocation2 + $0x69] sm:$0xff] }
 0x1da   : > { %2058 = vrot.lane.b32.xlu1 %v2011_v57, %s8933_s6  ;;  %v1658_v27 = vpop.permute.xlu0 %1657  ;;  %v2901_v57 = vpack.c.bf16 %v2870_v62, %v2869_v14  ;;  %s8943_s6 = smov 92   ;;  %v3132_v14 = vld [vmem:[#allocation2 + $0x9a] sm:$0xff] }
 0x1db   : > { %1698 = vst.msk [vmem:[#allocation3 + $0x40] sm:$0xff] %vm1689_vm11, %v1658_v27  ;;  %v2772_v27 = vpack.c.bf16 %v2742_v8, %v2741_v19  ;;  %v3004_v19 = vld [vmem:[#allocation2 + $0xa9] sm:$0xff]  ;;  %v3005_v8 = vld [vmem:[#allocation2 + $0xb1] sm:$0xff] }
 0x1dc   : > { %v1656_v5 = vpop.permute.xlu1 %1655  ;;  %2161 = vrot.lane.b32.xlu0 %v9687_v52, %s8934_s7 }
 0x1dd   : > { %1697 = vst.msk [vmem:[#allocation3 + $0x38] sm:$0xff] %vm1689_vm11, %v1656_v5 }
 0x1de   : > { %2159 = vrot.lane.b32.xlu1 %v9672_v41, %s8934_s7  ;;  %v1662_v32 = vpop.permute.xlu0 %1661 }
 0x1df   : > { %1700 = vst.msk [vmem:[#allocation3 + $0x50] sm:$0xff] %vm1689_vm11, %v1662_v32  ;;  %v2871_v32 = vld [vmem:[#allocation2 + $0x78] sm:$0xff] }
 0x1e0   : > { %v1660_v59 = vpop.permute.xlu1 %1659  ;;  %2165 = vrot.lane.b32.xlu0 %v9697_v17, %s8934_s7 }
 0x1e1   : > { %1699 = vst.msk [vmem:[#allocation3 + $0x48] sm:$0xff] %vm1689_vm11, %v1660_v59  ;;  %v2872_v59 = vld [vmem:[#allocation2 + $0x80] sm:$0xff] }
 0x1e2   : > { %2163 = vrot.lane.b32.xlu1 %v9682_v21, %s8934_s7  ;;  %v1666_v45 = vpop.permute.xlu0 %1665 }
 0x1e3   : > { %1702 = vst.msk [vmem:[#allocation3 + $0x60] sm:$0xff] %vm1689_vm11, %v1666_v45  ;;  %v8800_v45 = vld [vmem:[%s12380_s1 + $0x18] sm:$0xff]  }
 0x1e4   : > { %v1664_v52 = vpop.permute.xlu1 %1663  ;;  %2169 = vrot.lane.b32.xlu0 %v9707_v6, %s8934_s7 }
 0x1e5   : > { %1701 = vst.msk [vmem:[#allocation3 + $0x58] sm:$0xff] %vm1689_vm11, %v1664_v52 }
 0x1e6   : > { %2167 = vrot.lane.b32.xlu1 %v9692_v15, %s8934_s7  ;;  %v1670_v41 = vpop.permute.xlu0 %1669 }
 0x1e7   : > { %1704 = vst.msk [vmem:[#allocation3 + $0x70] sm:$0xff] %vm1689_vm11, %v1670_v41  ;;  %v3030_v41 = vpack.c.bf16 %v2999_v49, %v2998_v28  ;;  %v3133_v49 = vld [vmem:[#allocation2 + $0xaa] sm:$0xff] }
 0x1e8   : > { %v1668_v17 = vpop.permute.xlu1 %1667  ;;  %2173 = vrot.lane.b32.xlu0 %v9717_v39, %s8934_s7 }
 0x1e9   : > { %1703 = vst.msk [vmem:[#allocation3 + $0x68] sm:$0xff] %vm1689_vm11, %v1668_v17  ;;  %v2902_v17 = vpack.c.bf16 %v2872_v59, %v2871_v32 }
 0x1ea   : > { %2171 = vrot.lane.b32.xlu1 %v9702_v44, %s8934_s7  ;;  %v1771_v21 = vpop.permute.xlu0 %1770 }
 0x1eb   : > { %1819 = vst.msk [vmem:[#allocation3] sm:$0xff] %vm1818_vm12, %v1771_v21 }
 0x1ec   : > { %v1672_v6 = vpop.permute.xlu1 %1671  ;;  %2177 = vrot.lane.b32.xlu0 %v9727_v24, %s8934_s7  ;;  %v2123_v24 = vld [vmem:[#allocation2 + $0x19c] sm:$0xff] }
 0x1ed   : > { %1705 = vst.msk [vmem:[#allocation3 + $0x78] sm:$0xff] %vm1689_vm11, %v1672_v6  ;;  %v3000_v6 = vld [vmem:[#allocation2 + $0x79] sm:$0xff]  ;;  %vm3589_vm11 = vcmask 818176  }
 0x1ee   : > { %2175 = vrot.lane.b32.xlu1 %v9712_v29, %s8934_s7  ;;  %v1775_v15 = vpop.permute.xlu0 %1774  ;;  %v2140_v29 = vpack.c.bf16 %v2124_v47, %v2123_v24 }
 0x1ef   : > { %1821 = vst.msk [vmem:[#allocation3 + $0x10] sm:$0xff] %vm1818_vm12, %v1775_v15  ;;  %v3001_v15 = vld [vmem:[#allocation2 + $0x81] sm:$0xff] }
 0x1f0   : > { %v1773_v39 = vpop.permute.xlu1 %1772  ;;  %2181 = vrot.lane.b32.xlu0 %v9737_v2, %s8934_s7  ;;  %v3031_v24 = vpack.c.bf16 %v3001_v15, %v3000_v6  ;;  %v3391_v6 = vld [vmem:[#allocation2 + $0xac] sm:$0xff]  ;;  %v3392_v15 = vld [vmem:[#allocation2 + $0xb4] sm:$0xff] }
 0x1f1   : > { %1820 = vst.msk [vmem:[#allocation3 + $0x8] sm:$0xff] %vm1818_vm12, %v1773_v39  ;;  %v8801_v39 = vld [vmem:[%s12380_s1 + $0x20] sm:$0xff]  }
 0x1f2   : > { %2179 = vrot.lane.b32.xlu1 %v9722_v16, %s8934_s7  ;;  %v1779_v44 = vpop.permute.xlu0 %1778 }
 0x1f3   : > { %1823 = vst.msk [vmem:[#allocation3 + $0x20] sm:$0xff] %vm1818_vm12, %v1779_v44 }
 0x1f4   : > { %v1777_v60 = vpop.permute.xlu1 %1776  ;;  %2185 = vrot.lane.b32.xlu0 %v9745_v10, %s8934_s7 }
 0x1f5   : > { %1822 = vst.msk [vmem:[#allocation3 + $0x18] sm:$0xff] %vm1818_vm12, %v1777_v60  ;;  %v8802_v60 = vld [vmem:[%s12380_s1 + $0x28] sm:$0xff]  }
 0x1f6   : > { %2183 = vrot.lane.b32.xlu1 %v9732_v58, %s8934_s7  ;;  %v1783_v2 = vpop.permute.xlu0 %1782 }
 0x1f7   : > { %1825 = vst.msk [vmem:[#allocation3 + $0x30] sm:$0xff] %vm1818_vm12, %v1783_v2 }
 0x1f8   : > { %v1781_v38 = vpop.permute.xlu1 %1780  ;;  %2287 = vrot.lane.b32.xlu0 %v9754_v63, %s8935_s8 }
 0x1f9   : > { %1824 = vst.msk [vmem:[#allocation3 + $0x28] sm:$0xff] %vm1818_vm12, %v1781_v38  ;;  %v3258_v38 = vld [vmem:[#allocation2 + $0x7b] sm:$0xff] }
 0x1fa   : > { %2187 = vrot.lane.b32.xlu1 %v2140_v29, %s8934_s7  ;;  %v1787_v16 = vpop.permute.xlu0 %1786  ;;  %s8940_s7 = smov 80  }
 0x1fb   : > { %1827 = vst.msk [vmem:[#allocation3 + $0x40] sm:$0xff] %vm1818_vm12, %v1787_v16  ;;  %v3259_v16 = vld [vmem:[#allocation2 + $0x83] sm:$0xff] }
 0x1fc   : > { %v1785_v10 = vpop.permute.xlu1 %1784  ;;  %2291 = vrot.lane.b32.xlu0 %v9764_v22, %s8935_s8 }
 0x1fd   : > { %1826 = vst.msk [vmem:[#allocation3 + $0x38] sm:$0xff] %vm1818_vm12, %v1785_v10  ;;  %v8803_v10 = vld [vmem:[%s12380_s1 + $0x30] ss:$0 sps:$4 sm:$0x33]  }
 0x1fe   : > { %2289 = vrot.lane.b32.xlu1 %v9749_v30, %s8935_s8  ;;  %v1791_v58 = vpop.permute.xlu0 %1790 }
 0x1ff   : > { %1829 = vst.msk [vmem:[#allocation3 + $0x50] sm:$0xff] %vm1818_vm12, %v1791_v58 }
 0x200   : > { %v1789_v63 = vpop.permute.xlu1 %1788  ;;  %2295 = vrot.lane.b32.xlu0 %v9774_v31, %s8935_s8 }
 0x201   : > { %1828 = vst.msk [vmem:[#allocation3 + $0x48] sm:$0xff] %vm1818_vm12, %v1789_v63  ;;  %v12424_v63 = vld [vmem:[#allocation13_spill] sm:$0xff] }
 0x202   : > { %2293 = vrot.lane.b32.xlu1 %v9759_v3, %s8935_s8  ;;  %v1795_v53 = vpop.permute.xlu0 %1794 }
 0x203   : > { %1831 = vst.msk [vmem:[#allocation3 + $0x60] sm:$0xff] %vm1818_vm12, %v1795_v53  ;;  %v3289_v53 = vpack.c.bf16 %v3259_v16, %v3258_v38  ;;  %v2491_v16 = vld [vmem:[#allocation2 + $0xc2] sm:$0xff] }
 0x204   : > { %v1793_v22 = vpop.permute.xlu1 %1792  ;;  %2299 = vrot.lane.b32.xlu0 %v9784_v43, %s8935_s8 }
 0x205   : > { %1830 = vst.msk [vmem:[#allocation3 + $0x58] sm:$0xff] %vm1818_vm12, %v1793_v22 }
 0x206   : > { %2297 = vrot.lane.b32.xlu1 %v9769_v51, %s8935_s8  ;;  %v1799_v30 = vpop.permute.xlu0 %1798 }
 0x207   : > { %1833 = vst.msk [vmem:[#allocation3 + $0x70] sm:$0xff] %vm1818_vm12, %v1799_v30  ;;  %v3387_v30 = vld [vmem:[#allocation2 + $0x7c] sm:$0xff] }
 0x208   : > { %v1797_v31 = vpop.permute.xlu1 %1796  ;;  %2303 = vrot.lane.b32.xlu0 %v9794_v34, %s8935_s8  ;;  %v2249_v34 = vld [vmem:[#allocation2 + $0x180] sm:$0xff] }
 0x209   : > { %1832 = vst.msk [vmem:[#allocation3 + $0x68] sm:$0xff] %vm1818_vm12, %v1797_v31  ;;  %v3388_v31 = vld [vmem:[#allocation2 + $0x84] sm:$0xff] }
 0x20a   : > { %2301 = vrot.lane.b32.xlu1 %v9779_v4, %s8935_s8  ;;  %v1900_v3 = vpop.permute.xlu0 %1899  ;;  %v2268_v4 = vpack.c.bf16 %v2250_v61, %v2249_v34  ;;  %v2616_v61 = vld [vmem:[#allocation2 + $0x93] sm:$0xff] }
 0x20b   : > { %1948 = vst.msk [vmem:[#allocation3] sm:$0xff] %vm1947_vm13, %v1900_v3 }
 0x20c   : > { %v1801_v43 = vpop.permute.xlu1 %1800  ;;  %2307 = vrot.lane.b32.xlu0 %v9804_v25, %s8935_s8 }
 0x20d   : > { %1834 = vst.msk [vmem:[#allocation3 + $0x78] sm:$0xff] %vm1818_vm12, %v1801_v43  ;;  %vm3835_vm12 = vcmask 261120  }
 0x20e   : > { %2305 = vrot.lane.b32.xlu1 %v9789_v23, %s8935_s8  ;;  %v1904_v51 = vpop.permute.xlu0 %1903  ;;  %v2254_v23 = vld [vmem:[#allocation2 + $0x1b8] sm:$0xff] }
 0x20f   : > { %1950 = vst.msk [vmem:[#allocation3 + $0x10] sm:$0xff] %vm1947_vm13, %v1904_v51 }
 0x210   : > { %v1902_v40 = vpop.permute.xlu1 %1901  ;;  %2311 = vrot.lane.b32.xlu0 %v9812_v55, %s8935_s8  ;;  %v2270_v55 = vpack.c.bf16 %v2254_v23, %v2253_v54  ;;  %v2874_v54 = vld [vmem:[#allocation2 + $0x98] sm:$0xff]  ;;  %v12425_v23 = vld [vmem:[#allocation11_spill] sm:$0xff] }
 0x211   : > { %1949 = vst.msk [vmem:[#allocation3 + $0x8] sm:$0xff] %vm1947_vm13, %v1902_v40  ;;  %v2617_v40 = vld [vmem:[#allocation2 + $0x9b] sm:$0xff] }
 0x212   : > { %2309 = vrot.lane.b32.xlu1 %v9799_v9, %s8935_s8  ;;  %v1908_v25 = vpop.permute.xlu0 %1907 }
 0x213   : > { %1952 = vst.msk [vmem:[#allocation3 + $0x20] sm:$0xff] %vm1947_vm13, %v1908_v25  ;;  %v2873_v25 = vld [vmem:[#allocation2 + $0x90] sm:$0xff] }
 0x214   : > { %v1906_v36 = vpop.permute.xlu1 %1905  ;;  %2315 = vrot.lane.b32.xlu0 %v9820_v35, %s8935_s8 }
 0x215   : > { %1951 = vst.msk [vmem:[#allocation3 + $0x18] sm:$0xff] %vm1947_vm13, %v1906_v36  ;;  %v2645_v36 = vpack.c.bf16 %v2617_v40, %v2616_v61 }
 0x216   : > { %2313 = vrot.lane.b32.xlu1 %v2268_v4, %s8935_s8  ;;  %v1912_v48 = vpop.permute.xlu0 %1911 }
 0x217   : > { %1954 = vst.msk [vmem:[#allocation3 + $0x30] sm:$0xff] %vm1947_vm13, %v1912_v48  ;;  %v2745_v48 = vld [vmem:[#allocation2 + $0x94] sm:$0xff] }
 0x218   : > { %v1910_v12 = vpop.permute.xlu1 %1909  ;;  %2416 = vrot.lane.b32.xlu0 %v9829_v26, %s8936_s9  ;;  %v8797_v26 = vld [vmem:[%s12380_s1] sm:$0xff]  }
 0x219   : > { %1953 = vst.msk [vmem:[#allocation3 + $0x28] sm:$0xff] %vm1947_vm13, %v1910_v12  ;;  %8649 = vmatprep.subr.bf16.mxu0 %v8797_v26  ;;  %v2746_v12 = vld [vmem:[#allocation2 + $0x9c] sm:$0xff] }
 0x21a   : > { %2317 = vrot.lane.b32.xlu1 %v2270_v55, %s8935_s8  ;;  %v1916_v9 = vpop.permute.xlu0 %1915  ;;  %8650 = vmatpush3.bf16.msra.mxu0 %v8797_v26  ;;  %s8944_s8 = smov 96   ;;  %v3003_v26 = vld [vmem:[#allocation2 + $0x99] sm:$0xff] }
 0x21b   : > { %1956 = vst.msk [vmem:[#allocation3 + $0x40] sm:$0xff] %vm1947_vm13, %v1916_v9  ;;  %8651 = vmatprep.subr.bf16.mxu0 %v8798_v20 }
 0x21c   : > { %v1914_v35 = vpop.permute.xlu1 %1913  ;;  %2420 = vrot.lane.b32.xlu0 %v9839_v42, %s8936_s9  ;;  %v2739_v42 = vld [vmem:[#allocation2 + $0x4c] sm:$0xff] }
 0x21d   : > { %1955 = vst.msk [vmem:[#allocation3 + $0x38] sm:$0xff] %vm1947_vm13, %v1914_v35  ;;  %v2903_v35 = vpack.c.bf16 %v2874_v54, %v2873_v25  ;;  %v2879_v54 = vld [vmem:[#allocation2 + $0xd8] sm:$0xff] }
 0x21e   : > { %2418 = vrot.lane.b32.xlu1 %v9824_v1, %s8936_s9  ;;  %v1920_v7 = vpop.permute.xlu0 %1919  ;;  %8652 = vmatpush3.bf16.msra.mxu0 %v8798_v20 }
 0x21f   : > { %1958 = vst.msk [vmem:[#allocation3 + $0x50] sm:$0xff] %vm1947_vm13, %v1920_v7  ;;  %8653 = vmatprep.subr.bf16.mxu0 %v8799_v13  ;;  %v3002_v7 = vld [vmem:[#allocation2 + $0x91] sm:$0xff] }
 0x220   : > { %v1918_v18 = vpop.permute.xlu1 %1917  ;;  %2545 = vrot.lane.b32.xlu0 %v9874_v11, %s8937_s13  ;;  %v2771_v11 = vpack.c.bf16 %v2740_v0, %v2739_v42  ;;  %v2875_v0 = vld [vmem:[#allocation2 + $0xa8] sm:$0xff] }
 0x221   : > { %1957 = vst.msk [vmem:[#allocation3 + $0x48] sm:$0xff] %vm1947_vm13, %v1918_v18  ;;  %v2774_v18 = vpack.c.bf16 %v2746_v12, %v2745_v48  ;;  %v3008_v12 = vld [vmem:[#allocation2 + $0xd9] sm:$0xff] }
 0x222   : > { %2422 = vrot.lane.b32.xlu1 %v9834_v37, %s8936_s9  ;;  %v1924_v1 = vpop.permute.xlu0 %1923  ;;  %8654 = vmatpush3.bf16.msra.mxu0 %v8799_v13 }
 0x223   : > { %1960 = vst.msk [vmem:[#allocation3 + $0x60] sm:$0xff] %vm1947_vm13, %v1924_v1  ;;  %8655 = vmatprep.subr.bf16.mxu0 %v8800_v45  ;;  %v2876_v1 = vld [vmem:[#allocation2 + $0xb0] sm:$0xff] }
 0x224   : > { %v1922_v33 = vpop.permute.xlu1 %1921  ;;  %2674 = vrot.lane.b32.xlu0 %v9919_v46, %s8938_s16  ;;  %v2904_v62 = vpack.c.bf16 %v2876_v1, %v2875_v0 }
 0x225   : > { %1959 = vst.msk [vmem:[#allocation3 + $0x58] sm:$0xff] %vm1947_vm13, %v1922_v33  ;;  %v3032_v33 = vpack.c.bf16 %v3003_v26, %v3002_v7 }
 0x226   : > { %2547 = vrot.lane.b32.xlu1 %v9870_v50, %s8937_s13  ;;  %v1928_v37 = vpop.permute.xlu0 %1927  ;;  %8656 = vmatpush3.bf16.msra.mxu0 %v8800_v45  ;;  %v3262_v45 = vld [vmem:[#allocation2 + $0xab] sm:$0xff] }
 0x227   : > { %1962 = vst.msk [vmem:[#allocation3 + $0x70] sm:$0xff] %vm1947_vm13, %v1928_v37  ;;  %8657 = vmatprep.subr.bf16.mxu0 %v8801_v39 }
 0x228   : > { %v1926_v46 = vpop.permute.xlu1 %1925  ;;  %2803 = vrot.lane.b32.xlu0 %v2771_v11, %s8939_s26  ;;  %v3131_v11 = vld [vmem:[#allocation2 + $0x92] sm:$0xff] }
 0x229   : > { %1961 = vst.msk [vmem:[#allocation3 + $0x68] sm:$0xff] %vm1947_vm13, %v1926_v46  ;;  %v3161_v46 = vpack.c.bf16 %v3132_v14, %v3131_v11  ;;  %v3267_v11 = vld [vmem:[#allocation2 + $0xe3] sm:$0xff] }
 0x22a   : > { %2676 = vrot.lane.b32.xlu1 %v9915_v56, %s8938_s16  ;;  %v2029_v5 = vpop.permute.xlu0 %2028  ;;  %8658 = vmatpush3.bf16.msra.mxu0 %v8801_v39 }
 0x22b   : > { %2077 = vst.msk [vmem:[#allocation3] sm:$0xff] %vm2076_vm14, %v2029_v5  ;;  %8659 = vmatprep.subr.bf16.mxu0 %v8802_v60 }
 0x22c   : > { %v1930_v52 = vpop.permute.xlu1 %1929  ;;  %2933 = vrot.lane.b32.xlu0 %v2901_v57, %s8940_s7  ;;  %v3033_v57 = vpack.c.bf16 %v3005_v8, %v3004_v19  ;;  %v3395_v19 = vld [vmem:[#allocation2 + $0xdc] sm:$0xff]  ;;  %v3396_v8 = vld [vmem:[#allocation2 + $0xe4] sm:$0xff] }
 0x22d   : > { %1963 = vst.msk [vmem:[#allocation3 + $0x78] sm:$0xff] %vm1947_vm13, %v1930_v52  ;;  %v3263_v52 = vld [vmem:[#allocation2 + $0xb3] sm:$0xff]  ;;  %vm3838_vm13 = vcmask 257024  }
 0x22e   : > { %2805 = vrot.lane.b32.xlu1 %v2772_v27, %s8939_s26  ;;  %v2033_v21 = vpop.permute.xlu0 %2032  ;;  %8660 = vmatpush3.bf16.msra.mxu0 %v8802_v60  ;;  %v2363_v60 = vld [vmem:[#allocation2 + $0xc9] sm:$0xff] }
 0x22f   : > { %2079 = vst.msk [vmem:[#allocation3 + $0x10] sm:$0xff] %vm2076_vm14, %v2033_v21  ;;  %8731 = vmatprep.subr.msk.bf16.mxu0 %vm3638_vm15, %v8803_v10 }
 0x230   : > { %v2031_v44 = vpop.permute.xlu1 %2030  ;;  %3062 = vrot.lane.b32.xlu0 %v3030_v41, %s8941_s12 }
 0x231   : > { %2078 = vst.msk [vmem:[#allocation3 + $0x8] sm:$0xff] %vm2076_vm14, %v2031_v44  ;;  %v3420_v44 = vpack.c.bf16 %v3392_v15, %v3391_v6  ;;  %v2625_v6 = vld [vmem:[#allocation2 + $0xfb] sm:$0xff] }
 0x232   : > { %2935 = vrot.lane.b32.xlu1 %v2902_v17, %s8940_s7  ;;  %v2037_v47 = vpop.permute.xlu0 %2036  ;;  %v3291_v17 = vpack.c.bf16 %v3263_v52, %v3262_v45  ;;  %v2496_v45 = vld [vmem:[#allocation2 + $0xfa] sm:$0xff] }
 0x233   : > { %2081 = vst.msk [vmem:[#allocation3 + $0x20] sm:$0xff] %vm2076_vm14, %v2037_v47  ;;  %v2362_v47 = vld [vmem:[#allocation2 + $0xc1] sm:$0xff] }
 0x234   : > { %v2035_v29 = vpop.permute.xlu1 %2034  ;;  %3191 = vrot.lane.b32.xlu0 %v9870_v50, %s8942_s23  ;;  %v3640_v50 = vsel %vm3638_vm15, %v8803_v10, 0  ;;  %v2492_v10 = vld [vmem:[#allocation2 + $0xca] sm:$0xff]  ;;  %vm4235_vm15 = vcmask 785920  }
 0x235   : > { %2080 = vst.msk [vmem:[#allocation3 + $0x18] sm:$0xff] %vm2076_vm14, %v2035_v29  ;;  %8662 = vmatpush3.bf16.msra.mxu0 %v3640_v50  ;;  %v2518_v50 = vpack.c.bf16 %v2492_v10, %v2491_v16 }
 0x236   : > { %3064 = vrot.lane.b32.xlu1 %v3031_v24, %s8941_s12  ;;  %v2041_v2 = vpop.permute.xlu0 %2040 }
 0x237   : > { %2083 = vst.msk [vmem:[#allocation3 + $0x30] sm:$0xff] %vm2076_vm14, %v2041_v2  ;;  %v2389_v2 = vpack.c.bf16 %v2363_v60, %v2362_v47  ;;  %v2753_v60 = vld [vmem:[#allocation2 + $0xf4] sm:$0xff] }
 0x238   : > { %v2039_v58 = vpop.permute.xlu1 %2038  ;;  %3320 = vrot.lane.b32.xlu0 %v9915_v56, %s8943_s6  ;;  %v3418_v56 = vpack.c.bf16 %v3388_v31, %v3387_v30  ;;  %v2877_v31 = vld [vmem:[#allocation2 + $0xc0] sm:$0xff] }
 0x239   : > { %2082 = vst.msk [vmem:[#allocation3 + $0x28] sm:$0xff] %vm2076_vm14, %v2039_v58 }
 0x23a   : > { %3193 = vrot.lane.b32.xlu1 %v12424_v63, %s8942_s23  ;;  %v2045_v22 = vpop.permute.xlu0 %2044 }
 0x23b   : > { %2085 = vst.msk [vmem:[#allocation3 + $0x40] sm:$0xff] %vm2076_vm14, %v2045_v22  ;;  %v2621_v22 = vld [vmem:[#allocation2 + $0xcb] sm:$0xff] }
 0x23c   : > { %v2043_v3 = vpop.permute.xlu1 %2042  ;;  %3449 = vrot.lane.b32.xlu0 %v2772_v27, %s8944_s8  ;;  %v3134_v27 = vld [vmem:[#allocation2 + $0xb2] sm:$0xff] }
 0x23d   : > { %2084 = vst.msk [vmem:[#allocation3 + $0x38] sm:$0xff] %vm2076_vm14, %v2043_v3  ;;  %v3162_v32 = vpack.c.bf16 %v3134_v27, %v3133_v49  ;;  %v2878_v3 = vld [vmem:[#allocation2 + $0xc8] sm:$0xff]  ;;  %v2367_v49 = vld [vmem:[#allocation2 + $0xf9] sm:$0xff] }
 0x23e   : > { %3322 = vrot.lane.b32.xlu1 %v3289_v53, %s8943_s6  ;;  %v2049_v43 = vpop.permute.xlu0 %2048  ;;  %v2905_v40 = vpack.c.bf16 %v2878_v3, %v2877_v31  ;;  %v3013_v31 = vld [vmem:[#allocation2 + $0x111] sm:$0xff] }
 0x23f   : > { %2087 = vst.msk [vmem:[#allocation3 + $0x50] sm:$0xff] %vm2076_vm14, %v2049_v43 }
 0x240   : > { %v2047_v51 = vpop.permute.xlu1 %2046  ;;  %2549 = vrot.lane.b32.xlu0 %v12424_v63, %s8937_s13 }
 0x241   : > { %2086 = vst.msk [vmem:[#allocation3 + $0x48] sm:$0xff] %vm2076_vm14, %v2047_v51  ;;  %v2749_v51 = vld [vmem:[#allocation2 + $0xc4] sm:$0xff] }
 0x242   : > { %3451 = vrot.lane.b32.xlu1 %v3418_v56, %s8944_s8  ;;  %v2053_v34 = vpop.permute.xlu0 %2052 }
 0x243   : > { %2089 = vst.msk [vmem:[#allocation3 + $0x60] sm:$0xff] %vm2076_vm14, %v2053_v34  ;;  %v2750_v34 = vld [vmem:[#allocation2 + $0xcc] sm:$0xff] }
 0x244   : > { %v2051_v4 = vpop.permute.xlu1 %2050  ;;  %2678 = vrot.lane.b32.xlu0 %v3289_v53, %s8938_s16  ;;  %v2620_v53 = vld [vmem:[#allocation2 + $0xc3] sm:$0xff] }
 0x245   : > { %2088 = vst.msk [vmem:[#allocation3 + $0x58] sm:$0xff] %vm2076_vm14, %v2051_v4  ;;  %v2776_v4 = vpack.c.bf16 %v2750_v34, %v2749_v51  ;;  %v3141_v51 = vld [vmem:[#allocation2 + $0x10a] sm:$0xff]  ;;  %v3142_v34 = vld [vmem:[#allocation2 + $0x112] sm:$0xff] }
 0x246   : > { %2551 = vrot.lane.b32.xlu1 %v12425_v23, %s8937_s13  ;;  %v2057_v55 = vpop.permute.xlu0 %2056  ;;  %v2880_v23 = vld [vmem:[#allocation2 + $0xe0] sm:$0xff] }
 0x247   : > { %2091 = vst.msk [vmem:[#allocation3 + $0x70] sm:$0xff] %vm2076_vm14, %v2057_v55  ;;  %v2906_v55 = vpack.c.bf16 %v2880_v23, %v2879_v54  ;;  %v3271_v54 = vld [vmem:[#allocation2 + $0x113] sm:$0xff] }
 0x248   : > { %v2055_v9 = vpop.permute.xlu1 %2054  ;;  %2807 = vrot.lane.b32.xlu0 %v3418_v56, %s8939_s26  ;;  %v2647_v56 = vpack.c.bf16 %v2621_v22, %v2620_v53 }
 0x249   : > { %2090 = vst.msk [vmem:[#allocation3 + $0x68] sm:$0xff] %vm2076_vm14, %v2055_v9  ;;  %v3009_v9 = vld [vmem:[#allocation2 + $0xe1] sm:$0xff] }
 0x24a   : > { %2680 = vrot.lane.b32.xlu1 %v2645_v36, %s8938_s16  ;;  %v2158_v42 = vpop.permute.xlu0 %2157  ;;  %v3035_v7 = vpack.c.bf16 %v3009_v9, %v3008_v12  ;;  %v3400_v12 = vld [vmem:[#allocation2 + $0x114] sm:$0xff] }
 0x24b   : > { %2206 = vst.msk [vmem:[#allocation3] sm:$0xff] %vm2205_vm0, %v2158_v42  ;;  %v3138_v42 = vld [vmem:[#allocation2 + $0xe2] sm:$0xff] }
 0x24c   : > { %v2059_v20 = vpop.permute.xlu1 %2058  ;;  %2937 = vrot.lane.b32.xlu0 %v2903_v35, %s8940_s7 }
 0x24d   : > { %2092 = vst.msk [vmem:[#allocation3 + $0x78] sm:$0xff] %vm2076_vm14, %v2059_v20  ;;  %vm4106_vm14 = vcmask 523520  }
 0x24e   : > { %2809 = vrot.lane.b32.xlu1 %v2774_v18, %s8939_s26  ;;  %v2162_v37 = vpop.permute.xlu0 %2161 }
 0x24f   : > { %2208 = vst.msk [vmem:[#allocation3 + $0x10] sm:$0xff] %vm2205_vm0, %v2162_v37 }
 0x250   : > { %v2160_v13 = vpop.permute.xlu1 %2159  ;;  %3066 = vrot.lane.b32.xlu0 %v3032_v33, %s8941_s12  ;;  %v3266_v33 = vld [vmem:[#allocation2 + $0xdb] sm:$0xff] }
 0x251   : > { %2207 = vst.msk [vmem:[#allocation3 + $0x8] sm:$0xff] %vm2205_vm0, %v2160_v13 }
 0x252   : > { %2939 = vrot.lane.b32.xlu1 %v2904_v62, %s8940_s7  ;;  %v2166_v28 = vpop.permute.xlu0 %2165  ;;  %v3293_v62 = vpack.c.bf16 %v3267_v11, %v3266_v33  ;;  %v2500_v33 = vld [vmem:[#allocation2 + $0x12a] sm:$0xff] }
 0x253   : > { %2210 = vst.msk [vmem:[#allocation3 + $0x20] sm:$0xff] %vm2205_vm0, %v2166_v28  ;;  %v2366_v28 = vld [vmem:[#allocation2 + $0xf1] sm:$0xff] }
 0x254   : > { %v2164_v5 = vpop.permute.xlu1 %2163  ;;  %3195 = vrot.lane.b32.xlu0 %v3161_v46, %s8942_s23  ;;  %v3422_v46 = vpack.c.bf16 %v3396_v8, %v3395_v19  ;;  %v2629_v19 = vld [vmem:[#allocation2 + $0x12b] sm:$0xff] }
 0x255   : > { %2209 = vst.msk [vmem:[#allocation3 + $0x18] sm:$0xff] %vm2205_vm0, %v2164_v5 }
 0x256   : > { %3068 = vrot.lane.b32.xlu1 %v3033_v57, %s8941_s12  ;;  %v2170_v59 = vpop.permute.xlu0 %2169 }
 0x257   : > { %2212 = vst.msk [vmem:[#allocation3 + $0x30] sm:$0xff] %vm2205_vm0, %v2170_v59  ;;  %v2495_v59 = vld [vmem:[#allocation2 + $0xf2] sm:$0xff] }
 0x258   : > { %v2168_v41 = vpop.permute.xlu1 %2167  ;;  %3324 = vrot.lane.b32.xlu0 %v2645_v36, %s8943_s6 }
 0x259   : > { %2211 = vst.msk [vmem:[#allocation3 + $0x28] sm:$0xff] %vm2205_vm0, %v2168_v41 }
 0x25a   : > { %3197 = vrot.lane.b32.xlu1 %v3162_v32, %s8942_s23  ;;  %v2174_v21 = vpop.permute.xlu0 %2173 }
 0x25b   : > { %2214 = vst.msk [vmem:[#allocation3 + $0x40] sm:$0xff] %vm2205_vm0, %v2174_v21  ;;  %v2624_v21 = vld [vmem:[#allocation2 + $0xf3] sm:$0xff] }
 0x25c   : > { %v2172_v39 = vpop.permute.xlu1 %2171  ;;  %3453 = vrot.lane.b32.xlu0 %v2774_v18, %s8944_s8  ;;  %v3137_v18 = vld [vmem:[#allocation2 + $0xda] sm:$0xff]  ;;  %v2649_v47 = vpack.c.bf16 %v2625_v6, %v2624_v21 }
 0x25d   : > { %2213 = vst.msk [vmem:[#allocation3 + $0x38] sm:$0xff] %vm2205_vm0, %v2172_v39  ;;  %v3164_v1 = vpack.c.bf16 %v3138_v42, %v3137_v18  ;;  %v2881_v39 = vld [vmem:[#allocation2 + $0xf0] sm:$0xff] }
 0x25e   : > { %3326 = vrot.lane.b32.xlu1 %v3291_v17, %s8943_s6  ;;  %v2178_v24 = vpop.permute.xlu0 %2177  ;;  %v2371_v18 = vld [vmem:[#allocation2 + $0x129] sm:$0xff] }
 0x25f   : > { %2216 = vst.msk [vmem:[#allocation3 + $0x50] sm:$0xff] %vm2205_vm0, %v2178_v24 }
 0x260   : > { %v2176_v29 = vpop.permute.xlu1 %2175  ;;  %2424 = vrot.lane.b32.xlu0 %v3033_v57, %s8936_s9 }
 0x261   : > { %2215 = vst.msk [vmem:[#allocation3 + $0x48] sm:$0xff] %vm2205_vm0, %v2176_v29  ;;  %v2754_v29 = vld [vmem:[#allocation2 + $0xfc] sm:$0xff] }
 0x262   : > { %3455 = vrot.lane.b32.xlu1 %v3420_v44, %s8944_s8  ;;  %v2182_v38 = vpop.permute.xlu0 %2181  ;;  %v2778_v10 = vpack.c.bf16 %v2754_v29, %v2753_v60 }
 0x263   : > { %2218 = vst.msk [vmem:[#allocation3 + $0x60] sm:$0xff] %vm2205_vm0, %v2182_v38 }
 0x264   : > { %v2180_v58 = vpop.permute.xlu1 %2179  ;;  %2553 = vrot.lane.b32.xlu0 %v3162_v32, %s8937_s13  ;;  %v2391_v32 = vpack.c.bf16 %v2367_v49, %v2366_v28  ;;  %v2757_v49 = vld [vmem:[#allocation2 + $0x124] sm:$0xff] }
 0x265   : > { %2217 = vst.msk [vmem:[#allocation3 + $0x58] sm:$0xff] %vm2205_vm0, %v2180_v58  ;;  %v2883_v58 = vld [vmem:[#allocation2 + $0x108] sm:$0xff] }
 0x266   : > { %2426 = vrot.lane.b32.xlu1 %v2389_v2, %s8936_s9  ;;  %v2186_v63 = vpop.permute.xlu0 %2185 }
 0x267   : > { %2220 = vst.msk [vmem:[#allocation3 + $0x70] sm:$0xff] %vm2205_vm0, %v2186_v63 }
 0x268   : > { %v2184_v30 = vpop.permute.xlu1 %2183  ;;  %2682 = vrot.lane.b32.xlu0 %v3291_v17, %s8938_s16  ;;  %v2520_v17 = vpack.c.bf16 %v2496_v45, %v2495_v59 }
 0x269   : > { %2219 = vst.msk [vmem:[#allocation3 + $0x68] sm:$0xff] %vm2205_vm0, %v2184_v30  ;;  %v3012_v30 = vld [vmem:[#allocation2 + $0x109] sm:$0xff] }
 0x26a   : > { %2555 = vrot.lane.b32.xlu1 %v2518_v50, %s8937_s13  ;;  %v2288_v43 = vpop.permute.xlu0 %2287 }
 0x26b   : > { %2336 = vst.msk [vmem:[#allocation3] sm:$0xff] %vm2335_vm1, %v2288_v43  ;;  %v3037_v43 = vpack.c.bf16 %v3013_v31, %v3012_v30  ;;  %v3403_v31 = vld [vmem:[#allocation2 + $0x13c] sm:$0xff] }
 0x26c   : > { %v2188_v61 = vpop.permute.xlu1 %2187  ;;  %2811 = vrot.lane.b32.xlu0 %v3420_v44, %s8939_s26  ;;  %v2882_v44 = vld [vmem:[#allocation2 + $0xf8] sm:$0xff] }
 0x26d   : > { %2221 = vst.msk [vmem:[#allocation3 + $0x78] sm:$0xff] %vm2205_vm0, %v2188_v61  ;;  %v2907_v38 = vpack.c.bf16 %v2882_v44, %v2881_v39  ;;  %v3016_v39 = vld [vmem:[#allocation2 + $0x139] sm:$0xff]  ;;  %v3017_v44 = vld [vmem:[#allocation2 + $0x141] sm:$0xff]  ;;  %vm4364_vm0 = vcmask 1048320  }
 0x26e   : > { %2684 = vrot.lane.b32.xlu1 %v2647_v56, %s8938_s16  ;;  %v2292_v25 = vpop.permute.xlu0 %2291  ;;  %v3039_v29 = vpack.c.bf16 %v3017_v44, %v3016_v39 }
 0x26f   : > { %2338 = vst.msk [vmem:[#allocation3 + $0x10] sm:$0xff] %vm2335_vm1, %v2292_v25  ;;  %v3270_v25 = vld [vmem:[#allocation2 + $0x10b] sm:$0xff] }
 0x270   : > { %v2290_v36 = vpop.permute.xlu1 %2289  ;;  %2941 = vrot.lane.b32.xlu0 %v2905_v40, %s8940_s7 }
 0x271   : > { %2337 = vst.msk [vmem:[#allocation3 + $0x8] sm:$0xff] %vm2335_vm1, %v2290_v36 }
 0x272   : > { %2813 = vrot.lane.b32.xlu1 %v2776_v4, %s8939_s26  ;;  %v2296_v48 = vpop.permute.xlu0 %2295 }
 0x273   : > { %2340 = vst.msk [vmem:[#allocation3 + $0x20] sm:$0xff] %vm2335_vm1, %v2296_v48  ;;  %v3399_v48 = vld [vmem:[#allocation2 + $0x10c] sm:$0xff] }
 0x274   : > { %v2294_v35 = vpop.permute.xlu1 %2293  ;;  %3070 = vrot.lane.b32.xlu0 %v2389_v2, %s8941_s12 }
 0x275   : > { %2339 = vst.msk [vmem:[#allocation3 + $0x18] sm:$0xff] %vm2335_vm1, %v2294_v35 }
 0x276   : > { %2943 = vrot.lane.b32.xlu1 %v2906_v55, %s8940_s7  ;;  %v2300_v26 = vpop.permute.xlu0 %2299  ;;  %v3295_v55 = vpack.c.bf16 %v3271_v54, %v3270_v25  ;;  %v2503_v54 = vld [vmem:[#allocation2 + $0x152] sm:$0xff] }
 0x277   : > { %2342 = vst.msk [vmem:[#allocation3 + $0x30] sm:$0xff] %vm2335_vm1, %v2300_v26  ;;  %v2370_v26 = vld [vmem:[#allocation2 + $0x121] sm:$0xff] }
 0x278   : > { %v2298_v0 = vpop.permute.xlu1 %2297  ;;  %3199 = vrot.lane.b32.xlu0 %v2518_v50, %s8942_s23  ;;  %v2884_v50 = vld [vmem:[#allocation2 + $0x110] sm:$0xff] }
 0x279   : > { %2341 = vst.msk [vmem:[#allocation3 + $0x28] sm:$0xff] %vm2335_vm1, %v2298_v0  ;;  %v2908_v22 = vpack.c.bf16 %v2884_v50, %v2883_v58  ;;  %v3274_v50 = vld [vmem:[#allocation2 + $0x13b] sm:$0xff] }
 0x27a   : > { %3072 = vrot.lane.b32.xlu1 %v3035_v7, %s8941_s12  ;;  %v2304_v20 = vpop.permute.xlu0 %2303 }
 0x27b   : > { %2344 = vst.msk [vmem:[#allocation3 + $0x40] sm:$0xff] %vm2335_vm1, %v2304_v20  ;;  %v2499_v20 = vld [vmem:[#allocation2 + $0x122] sm:$0xff] }
 0x27c   : > { %v2302_v14 = vpop.permute.xlu1 %2301  ;;  %3328 = vrot.lane.b32.xlu0 %v2647_v56, %s8943_s6 }
 0x27d   : > { %2343 = vst.msk [vmem:[#allocation3 + $0x38] sm:$0xff] %vm2335_vm1, %v2302_v14 }
 0x27e   : > { %3201 = vrot.lane.b32.xlu1 %v3164_v1, %s8942_s23  ;;  %v2308_v37 = vpop.permute.xlu0 %2307 }
 0x27f   : > { %2346 = vst.msk [vmem:[#allocation3 + $0x50] sm:$0xff] %vm2335_vm1, %v2308_v37  ;;  %v2628_v37 = vld [vmem:[#allocation2 + $0x123] sm:$0xff] }
 0x280   : > { %v2306_v13 = vpop.permute.xlu1 %2305  ;;  %3457 = vrot.lane.b32.xlu0 %v2776_v4, %s8944_s8  ;;  %v3166_v4 = vpack.c.bf16 %v3142_v34, %v3141_v51  ;;  %v2651_v28 = vpack.c.bf16 %v2629_v19, %v2628_v37  ;;  %v2374_v34 = vld [vmem:[#allocation2 + $0x151] sm:$0xff]  ;;  %v2891_v37 = vld [vmem:[#allocation2 + $0x168] sm:$0xff] }
 0x281   : > { %2345 = vst.msk [vmem:[#allocation3 + $0x48] sm:$0xff] %vm2335_vm1, %v2306_v13  ;;  %v2885_v13 = vld [vmem:[#allocation2 + $0x120] sm:$0xff]  ;;  %v2892_v19 = vld [vmem:[#allocation2 + $0x170] sm:$0xff] }
 0x282   : > { %3330 = vrot.lane.b32.xlu1 %v3293_v62, %s8943_s6  ;;  %v2312_v57 = vpop.permute.xlu0 %2311 }
 0x283   : > { %2348 = vst.msk [vmem:[#allocation3 + $0x60] sm:$0xff] %vm2335_vm1, %v2312_v57 }
 0x284   : > { %v2310_v27 = vpop.permute.xlu1 %2309  ;;  %2428 = vrot.lane.b32.xlu0 %v3035_v7, %s8936_s9  ;;  %v3424_v7 = vpack.c.bf16 %v3400_v12, %v3399_v48  ;;  %v2632_v12 = vld [vmem:[#allocation2 + $0x153] sm:$0xff] }
 0x285   : > { %2347 = vst.msk [vmem:[#allocation3 + $0x58] sm:$0xff] %vm2335_vm1, %v2310_v27  ;;  %v2758_v27 = vld [vmem:[#allocation2 + $0x12c] sm:$0xff] }
 0x286   : > { %3459 = vrot.lane.b32.xlu1 %v3422_v46, %s8944_s8  ;;  %v2316_v5 = vpop.permute.xlu0 %2315 }
 0x287   : > { %2350 = vst.msk [vmem:[#allocation3 + $0x70] sm:$0xff] %vm2335_vm1, %v2316_v5 }
 0x288   : > { %v2314_v52 = vpop.permute.xlu1 %2313  ;;  %2557 = vrot.lane.b32.xlu0 %v3164_v1, %s8937_s13  ;;  %v2393_v1 = vpack.c.bf16 %v2371_v18, %v2370_v26  ;;  %v2890_v26 = vld [vmem:[#allocation2 + $0x158] sm:$0xff] }
 0x289   : > { %2349 = vst.msk [vmem:[#allocation3 + $0x68] sm:$0xff] %vm2335_vm1, %v2314_v52  ;;  %v2780_v52 = vpack.c.bf16 %v2758_v27, %v2757_v49  ;;  %v3021_v49 = vld [vmem:[#allocation2 + $0x171] sm:$0xff] }
 0x28a   : > { %v2417_v41 = vpop.permute.xlu0 %2416  ;;  %2430 = vrot.lane.b32.xlu1 %v2391_v32, %s8936_s9 }
 0x28b   : > { %2465 = vst.msk [vmem:[#allocation3] sm:$0xff] %vm2464_vm2, %v2417_v41  ;;  %v2887_v41 = vld [vmem:[#allocation2 + $0x138] sm:$0xff] }
 0x28c   : > { %v2318_v15 = vpop.permute.xlu1 %2317  ;;  %2686 = vrot.lane.b32.xlu0 %v3293_v62, %s8938_s16  ;;  %v2522_v62 = vpack.c.bf16 %v2500_v33, %v2499_v20  ;;  %v2762_v20 = vld [vmem:[#allocation2 + $0x15c] sm:$0xff] }
 0x28d   : > { %2351 = vst.msk [vmem:[#allocation3 + $0x78] sm:$0xff] %vm2335_vm1, %v2318_v15 }
 0x28e   : > { %v2421_v24 = vpop.permute.xlu0 %2420  ;;  %2559 = vrot.lane.b32.xlu1 %v2520_v17, %s8937_s13 }
 0x28f   : > { %2467 = vst.msk [vmem:[#allocation3 + $0x10] sm:$0xff] %vm2464_vm2, %v2421_v24 }
 0x290   : > { %v2419_v2 = vpop.permute.xlu1 %2418  ;;  %2815 = vrot.lane.b32.xlu0 %v3422_v46, %s8939_s26  ;;  %v2886_v46 = vld [vmem:[#allocation2 + $0x128] sm:$0xff] }
 0x291   : > { %2466 = vst.msk [vmem:[#allocation3 + $0x8] sm:$0xff] %vm2464_vm2, %v2419_v2  ;;  %v3145_v2 = vld [vmem:[#allocation2 + $0x13a] sm:$0xff] }
 0x292   : > { %v2546_v16 = vpop.permute.xlu0 %2545  ;;  %2688 = vrot.lane.b32.xlu1 %v2649_v47, %s8938_s16 }
 0x293   : > { %2594 = vst.msk [vmem:[#allocation3] sm:$0xff] %vm2593_vm3, %v2546_v16 }
 0x294   : > { %v2423_v63 = vpop.permute.xlu1 %2422  ;;  %2945 = vrot.lane.b32.xlu0 %v2907_v38, %s8940_s7  ;;  %v3146_v38 = vld [vmem:[#allocation2 + $0x142] sm:$0xff] }
 0x295   : > { %2468 = vst.msk [vmem:[#allocation3 + $0x18] sm:$0xff] %vm2464_vm2, %v2423_v63  ;;  %v3168_v58 = vpack.c.bf16 %v3146_v38, %v3145_v2  ;;  %v3275_v63 = vld [vmem:[#allocation2 + $0x143] sm:$0xff] }
 0x296   : > { %v2675_v53 = vpop.permute.xlu0 %2674  ;;  %2817 = vrot.lane.b32.xlu1 %v2778_v10, %s8939_s26  ;;  %v3297_v30 = vpack.c.bf16 %v3275_v63, %v3274_v50  ;;  %v2378_v38 = vld [vmem:[#allocation2 + $0x181] sm:$0xff] }
 0x297   : > { %2723 = vst.msk [vmem:[#allocation3] sm:$0xff] %vm2722_vm4, %v2675_v53  ;;  %v2507_v63 = vld [vmem:[#allocation2 + $0x182] sm:$0xff] }
 0x298   : > { %v2548_v3 = vpop.permute.xlu1 %2547  ;;  %3074 = vrot.lane.b32.xlu0 %v2391_v32, %s8941_s12  ;;  %v2909_v32 = vpack.c.bf16 %v2886_v46, %v2885_v13 }
 0x299   : > { %2595 = vst.msk [vmem:[#allocation3 + $0x8] sm:$0xff] %vm2593_vm3, %v2548_v3  ;;  %v3404_v3 = vld [vmem:[#allocation2 + $0x144] sm:$0xff] }
 0x29a   : > { %v2804_v56 = vpop.permute.xlu0 %2803  ;;  %2947 = vrot.lane.b32.xlu1 %v2908_v22, %s8940_s7  ;;  %v3426_v51 = vpack.c.bf16 %v3404_v3, %v3403_v31  ;;  %v2636_v3 = vld [vmem:[#allocation2 + $0x183] sm:$0xff] }
 0x29b   : > { %2852 = vst.msk [vmem:[#allocation3] sm:$0xff] %vm2851_vm5, %v2804_v56 }
 0x29c   : > { %v2677_v61 = vpop.permute.xlu1 %2676  ;;  %3203 = vrot.lane.b32.xlu0 %v2520_v17, %s8942_s23  ;;  %v2888_v17 = vld [vmem:[#allocation2 + $0x140] sm:$0xff] }
 0x29d   : > { %2724 = vst.msk [vmem:[#allocation3 + $0x8] sm:$0xff] %vm2722_vm4, %v2677_v61  ;;  %v2910_v15 = vpack.c.bf16 %v2888_v17, %v2887_v41  ;;  %v2375_v61 = vld [vmem:[#allocation2 + $0x159] sm:$0xff] }
 0x29e   : > { %v2934_v40 = vpop.permute.xlu0 %2933  ;;  %3076 = vrot.lane.b32.xlu1 %v3037_v43, %s8941_s12  ;;  %v2395_v25 = vpack.c.bf16 %v2375_v61, %v2374_v34  ;;  %v2894_v34 = vld [vmem:[#allocation2 + $0x188] sm:$0xff] }
 0x29f   : > { %2982 = vst.msk [vmem:[#allocation3] sm:$0xff] %vm2981_vm6, %v2934_v40 }
 0x2a0   : > { %v2806_v23 = vpop.permute.xlu1 %2805  ;;  %3332 = vrot.lane.b32.xlu0 %v2649_v47, %s8943_s6 }
 0x2a1   : > { %2853 = vst.msk [vmem:[#allocation3 + $0x8] sm:$0xff] %vm2851_vm5, %v2806_v23  ;;  %v2504_v23 = vld [vmem:[#allocation2 + $0x15a] sm:$0xff] }
 0x2a2   : > { %v3063_v36 = vpop.permute.xlu0 %3062  ;;  %3205 = vrot.lane.b32.xlu1 %v3166_v4, %s8942_s23  ;;  %v2524_v48 = vpack.c.bf16 %v2504_v23, %v2503_v54  ;;  %v2766_v54 = vld [vmem:[#allocation2 + $0x18c] sm:$0xff] }
 0x2a3   : > { %3111 = vst.msk [vmem:[#allocation3] sm:$0xff] %vm3110_vm7, %v3063_v36 }
 0x2a4   : > { %v2936_v9 = vpop.permute.xlu1 %2935  ;;  %3461 = vrot.lane.b32.xlu0 %v2778_v10, %s8944_s8 }
 0x2a5   : > { %2983 = vst.msk [vmem:[#allocation3 + $0x8] sm:$0xff] %vm2981_vm6, %v2936_v9  ;;  %v2633_v9 = vld [vmem:[#allocation2 + $0x15b] sm:$0xff] }
 0x2a6   : > { %v3192_v35 = vpop.permute.xlu0 %3191  ;;  %3334 = vrot.lane.b32.xlu1 %v3295_v55, %s8943_s6 }
 0x2a7   : > { %3240 = vst.msk [vmem:[#allocation3] sm:$0xff] %vm3239_vm8, %v3192_v35 }
 0x2a8   : > { %v3065_v42 = vpop.permute.xlu1 %3064  ;;  %2432 = vrot.lane.b32.xlu0 %v3037_v43, %s8936_s9 }
 0x2a9   : > { %3112 = vst.msk [vmem:[#allocation3 + $0x8] sm:$0xff] %vm3110_vm7, %v3065_v42 }
 0x2aa   : > { %v3321_v0 = vpop.permute.xlu0 %3320  ;;  %3463 = vrot.lane.b32.xlu1 %v3424_v7, %s8944_s8 }
 0x2ab   : > { %3369 = vst.msk [vmem:[#allocation3] sm:$0xff] %vm3368_vm9, %v3321_v0  ;;  %v2653_v0 = vpack.c.bf16 %v2633_v9, %v2632_v12  ;;  %v2895_v12 = vld [vmem:[#allocation2 + $0x198] sm:$0xff]  ;;  %v2896_v9 = vld [vmem:[#allocation2 + $0x1a0] sm:$0xff] }
 0x2ac   : > { %v3194_v11 = vpop.permute.xlu1 %3193  ;;  %2561 = vrot.lane.b32.xlu0 %v3166_v4, %s8937_s13 }
 0x2ad   : > { %3241 = vst.msk [vmem:[#allocation3 + $0x8] sm:$0xff] %vm3239_vm8, %v3194_v11 }
 0x2ae   : > { %v3450_v14 = vpop.permute.xlu0 %3449  ;;  %2434 = vrot.lane.b32.xlu1 %v2393_v1, %s8936_s9 }
 0x2af   : > { %3498 = vst.msk [vmem:[#allocation3] sm:$0xff] %vm3497_vm10, %v3450_v14 }
 0x2b0   : > { %v3323_v8 = vpop.permute.xlu1 %3322  ;;  %2690 = vrot.lane.b32.xlu0 %v3295_v55, %s8938_s16 }
 0x2b1   : > { %3370 = vst.msk [vmem:[#allocation3 + $0x8] sm:$0xff] %vm3368_vm9, %v3323_v8 }
 0x2b2   : > { %v2550_v57 = vpop.permute.xlu0 %2549  ;;  %2563 = vrot.lane.b32.xlu1 %v2522_v62, %s8937_s13 }
 0x2b3   : > { %2596 = vst.msk [vmem:[#allocation3 + $0x10] sm:$0xff] %vm2593_vm3, %v2550_v57  ;;  %v2912_v57 = vpack.c.bf16 %v2892_v19, %v2891_v37 }
 0x2b4   : > { %v3452_v5 = vpop.permute.xlu1 %3451  ;;  %2819 = vrot.lane.b32.xlu0 %v3424_v7, %s8939_s26  ;;  %v2889_v7 = vld [vmem:[#allocation2 + $0x150] sm:$0xff] }
 0x2b5   : > { %3499 = vst.msk [vmem:[#allocation3 + $0x8] sm:$0xff] %vm3497_vm10, %v3452_v5  ;;  %v2911_v11 = vpack.c.bf16 %v2890_v26, %v2889_v7 }
 0x2b6   : > { %v2679_v59 = vpop.permute.xlu0 %2678  ;;  %v3514_v45 = vld [vmem:[#allocation3] sm:$0xff]  ;;  %2692 = vrot.lane.b32.xlu1 %v2651_v28, %s8938_s16 }
 0x2b7   : > { %2725 = vst.msk [vmem:[#allocation3 + $0x10] sm:$0xff] %vm2722_vm4, %v2679_v59  ;;  %8663 = vmatprep.mubr.msk.bf16.mxu0 %vm3589_vm11, %v3514_v45  ;;  %v3149_v59 = vld [vmem:[#allocation2 + $0x16a] sm:$0xff]  ;;  %v3150_v45 = vld [vmem:[#allocation2 + $0x172] sm:$0xff] }
 0x2b8   : > { %v2552_v21 = vpop.permute.xlu1 %2551  ;;  %2949 = vrot.lane.b32.xlu0 %v2909_v32, %s8940_s7  ;;  %v3170_v17 = vpack.c.bf16 %v3150_v45, %v3149_v59  ;;  %v10360_v45 = vld [vmem:[#allocation2 + $0x1b1] sm:$0xff] }
 0x2b9   : > { %2597 = vst.msk [vmem:[#allocation3 + $0x18] sm:$0xff] %vm2593_vm3, %v2552_v21  ;;  %v3278_v21 = vld [vmem:[#allocation2 + $0x16b] sm:$0xff] }
 0x2ba   : > { %v2808_v6 = vpop.permute.xlu0 %2807  ;;  %2821 = vrot.lane.b32.xlu1 %v2780_v52, %s8939_s26 }
 0x2bb   : > { %2854 = vst.msk [vmem:[#allocation3 + $0x10] sm:$0xff] %vm2851_vm5, %v2808_v6  ;;  %v3279_v6 = vld [vmem:[#allocation2 + $0x173] sm:$0xff] }
 0x2bc   : > { %v2681_v24 = vpop.permute.xlu1 %2680  ;;  %v3515_v47 = vld [vmem:[#allocation3 + $0x8] sm:$0xff]  ;;  %3078 = vrot.lane.b32.xlu0 %v2393_v1, %s8941_s12  ;;  %v2761_v1 = vld [vmem:[#allocation2 + $0x154] sm:$0xff]  ;;  %v3299_v44 = vpack.c.bf16 %v3279_v6, %v3278_v21 }
 0x2bd   : > { %2726 = vst.msk [vmem:[#allocation3 + $0x18] sm:$0xff] %vm2722_vm4, %v2681_v24  ;;  %8664 = vmatmul.mubr.msk.bf16.vlgmr.msra.gmra.mrb[0].mxu0 %vm3589_vm11, %v3515_v47  ;;  %v3407_v24 = vld [vmem:[#allocation2 + $0x16c] sm:$0xff]  ;;  %v3408_v47 = vld [vmem:[#allocation2 + $0x174] sm:$0xff] }
 0x2be   : > { %v2938_v60 = vpop.permute.xlu0 %2937  ;;  %2951 = vrot.lane.b32.xlu1 %v2910_v15, %s8940_s7  ;;  %v3428_v2 = vpack.c.bf16 %v3408_v47, %v3407_v24 }
 0x2bf   : > { %2984 = vst.msk [vmem:[#allocation3 + $0x10] sm:$0xff] %vm2981_vm6, %v2938_v60 }
 0x2c0   : > { %v2810_v16 = vpop.permute.xlu1 %2809  ;;  %3207 = vrot.lane.b32.xlu0 %v2522_v62, %s8942_s23  ;;  %v2782_v62 = vpack.c.bf16 %v2762_v20, %v2761_v1 }
 0x2c1   : > { %2855 = vst.msk [vmem:[#allocation3 + $0x18] sm:$0xff] %vm2851_vm5, %v2810_v16  ;;  %v2379_v16 = vld [vmem:[#allocation2 + $0x189] sm:$0xff] }
 0x2c2   : > { %v3067_v10 = vpop.permute.xlu0 %3066  ;;  %3080 = vrot.lane.b32.xlu1 %v3039_v29, %s8941_s12  ;;  %v2397_v50 = vpack.c.bf16 %v2379_v16, %v2378_v38  ;;  %v2897_v38 = vld [vmem:[#allocation2 + $0x1b0] sm:$0xff]  ;;  %v2898_v16 = vld [vmem:[#allocation2 + $0x1b8] sm:$0xff] }
 0x2c3   : > { %3113 = vst.msk [vmem:[#allocation3 + $0x10] sm:$0xff] %vm3110_vm7, %v3067_v10 }
 0x2c4   : > { %v2940_v53 = vpop.permute.xlu1 %2939  ;;  %3336 = vrot.lane.b32.xlu0 %v2651_v28, %s8943_s6  ;;  %v3020_v28 = vld [vmem:[#allocation2 + $0x169] sm:$0xff] }
 0x2c5   : > { %2985 = vst.msk [vmem:[#allocation3 + $0x18] sm:$0xff] %vm2981_vm6, %v2940_v53  ;;  %v3041_v32 = vpack.c.bf16 %v3021_v49, %v3020_v28  ;;  %v2508_v53 = vld [vmem:[#allocation2 + $0x18a] sm:$0xff]  ;;  %v3411_v49 = vld [vmem:[#allocation2 + $0x19c] sm:$0xff] }
 0x2c6   : > { %v3196_v22 = vpop.permute.xlu0 %3195  ;;  %3209 = vrot.lane.b32.xlu1 %v3168_v58, %s8942_s23  ;;  %v2526_v31 = vpack.c.bf16 %v2508_v53, %v2507_v63  ;;  %v2769_v63 = vld [vmem:[#allocation2 + $0x1b4] sm:$0xff]  ;;  %v2770_v53 = vld [vmem:[#allocation2 + $0x1bc] sm:$0xff] }
 0x2c7   : > { %3242 = vst.msk [vmem:[#allocation3 + $0x10] sm:$0xff] %vm3239_vm8, %v3196_v22 }
 0x2c8   : > { %v3069_v56 = vpop.permute.xlu1 %3068  ;;  %3465 = vrot.lane.b32.xlu0 %v2780_v52, %s8944_s8 }
 0x2c9   : > { %3114 = vst.msk [vmem:[#allocation3 + $0x18] sm:$0xff] %vm3110_vm7, %v3069_v56  ;;  %v2637_v56 = vld [vmem:[#allocation2 + $0x18b] sm:$0xff] }
 0x2ca   : > { %v3325_v43 = vpop.permute.xlu0 %3324  ;;  %3338 = vrot.lane.b32.xlu1 %v3297_v30, %s8943_s6 }
 0x2cb   : > { %3371 = vst.msk [vmem:[#allocation3 + $0x10] sm:$0xff] %vm3368_vm9, %v3325_v43 }
 0x2cc   : > { %v3198_v40 = vpop.permute.xlu1 %3197  ;;  %2436 = vrot.lane.b32.xlu0 %v3039_v29, %s8936_s9 }
 0x2cd   : > { %3243 = vst.msk [vmem:[#allocation3 + $0x18] sm:$0xff] %vm3239_vm8, %v3198_v40 }
 0x2ce   : > { %v3454_v4 = vpop.permute.xlu0 %3453  ;;  %3467 = vrot.lane.b32.xlu1 %v3426_v51, %s8944_s8 }
 0x2cf   : > { %3500 = vst.msk [vmem:[#allocation3 + $0x10] sm:$0xff] %vm3497_vm10, %v3454_v4  ;;  %v2655_v4 = vpack.c.bf16 %v2637_v56, %v2636_v3  ;;  %v2786_v3 = vpack.c.bf16 %v2770_v53, %v2769_v63  ;;  %v2899_v56 = vld [vmem:[#allocation2 + $0x1c8] sm:$0xff] }
 0x2d0   : > { %v3327_v36 = vpop.permute.xlu1 %3326  ;;  %2565 = vrot.lane.b32.xlu0 %v3168_v58, %s8937_s13 }
 0x2d1   : > { %3372 = vst.msk [vmem:[#allocation3 + $0x18] sm:$0xff] %vm3368_vm9, %v3327_v36 }
 0x2d2   : > { %v2425_v55 = vpop.permute.xlu0 %2424  ;;  %2438 = vrot.lane.b32.xlu1 %v2395_v25, %s8936_s9 }
 0x2d3   : > { %2469 = vst.msk [vmem:[#allocation3 + $0x20] sm:$0xff] %vm2464_vm2, %v2425_v55 }
 0x2d4   : > { %v3456_v35 = vpop.permute.xlu1 %3455  ;;  %2694 = vrot.lane.b32.xlu0 %v3297_v30, %s8938_s16 }
 0x2d5   : > { %3501 = vst.msk [vmem:[#allocation3 + $0x18] sm:$0xff] %vm3497_vm10, %v3456_v35 }
 0x2d6   : > { %v2554_v18 = vpop.permute.xlu0 %2553  ;;  %v3516_v42 = vld [vmem:[#allocation3 + $0x10] sm:$0xff]  ;;  %2567 = vrot.lane.b32.xlu1 %v2524_v48, %s8937_s13 }
 0x2d7   : > { %2598 = vst.msk [vmem:[#allocation3 + $0x20] sm:$0xff] %vm2593_vm3, %v2554_v18  ;;  %8667 = vmatprep.mubr.msk.bf16.mxu0 %vm3589_vm11, %v3516_v42  ;;  %v2914_v18 = vpack.c.bf16 %v2896_v9, %v2895_v12  ;;  %v3024_v42 = vld [vmem:[#allocation2 + $0x199] sm:$0xff] }
 0x2d8   : > { %v2427_v33 = vpop.permute.xlu1 %2426  ;;  %2823 = vrot.lane.b32.xlu0 %v3426_v51, %s8939_s26  ;;  %v2893_v51 = vld [vmem:[#allocation2 + $0x180] sm:$0xff] }
 0x2d9   : > { %2470 = vst.msk [vmem:[#allocation3 + $0x28] sm:$0xff] %vm2464_vm2, %v2427_v33  ;;  %v2913_v36 = vpack.c.bf16 %v2894_v34, %v2893_v51 }
 0x2da   : > { %v2683_v14 = vpop.permute.xlu0 %2682  ;;  %2696 = vrot.lane.b32.xlu1 %v2653_v0, %s8938_s16 }
 0x2db   : > { %2727 = vst.msk [vmem:[#allocation3 + $0x20] sm:$0xff] %vm2722_vm4, %v2683_v14  ;;  %v3154_v14 = vld [vmem:[#allocation2 + $0x1a2] sm:$0xff] }
 0x2dc   : > { %v2556_v8 = vpop.permute.xlu1 %2555  ;;  %v3517_v13 = vld [vmem:[#allocation3 + $0x18] sm:$0xff]  ;;  %2953 = vrot.lane.b32.xlu0 %v2911_v11, %s8940_s7 }
 0x2dd   : > { %2599 = vst.msk [vmem:[#allocation3 + $0x28] sm:$0xff] %vm2593_vm3, %v2556_v8  ;;  %8668 = vmatmul.mubr.msk.bf16.gmra.mrb[4].mxu0 %vm3589_vm11, %v3517_v13  ;;  %v3153_v11 = vld [vmem:[#allocation2 + $0x19a] sm:$0xff]  ;;  %v3283_v13 = vld [vmem:[#allocation2 + $0x1a3] sm:$0xff] }
 0x2de   : > { %v2812_v46 = vpop.permute.xlu0 %2811  ;;  %2825 = vrot.lane.b32.xlu1 %v2782_v62, %s8939_s26  ;;  %v10343_v19 = vpack.c.bf16 %v3154_v14, %v3153_v11  ;;  %v3282_v8 = vld [vmem:[#allocation2 + $0x19b] sm:$0xff] }
 0x2df   : > { %2856 = vst.msk [vmem:[#allocation3 + $0x20] sm:$0xff] %vm2851_vm5, %v2812_v46  ;;  %v10350_v28 = vpack.c.bf16 %v3283_v13, %v3282_v8  ;;  %v3416_v11 = vld [vmem:[#allocation2 + $0x1d4] sm:$0xff] }
 0x2e0   : > { %v2685_v27 = vpop.permute.xlu1 %2684  ;;  %3082 = vrot.lane.b32.xlu0 %v2395_v25, %s8941_s12  ;;  %v2765_v25 = vld [vmem:[#allocation2 + $0x184] sm:$0xff] }
 0x2e1   : > { %2728 = vst.msk [vmem:[#allocation3 + $0x28] sm:$0xff] %vm2722_vm4, %v2685_v27  ;;  %v3412_v27 = vld [vmem:[#allocation2 + $0x1a4] sm:$0xff] }
 0x2e2   : > { %v2942_v5 = vpop.permute.xlu0 %2941  ;;  %2955 = vrot.lane.b32.xlu1 %v2912_v57, %s8940_s7  ;;  %v10357_v59 = vpack.c.bf16 %v3412_v27, %v3411_v49 }
 0x2e3   : > { %2986 = vst.msk [vmem:[#allocation3 + $0x20] sm:$0xff] %vm2981_vm6, %v2942_v5 }
 0x2e4   : > { %v2814_v52 = vpop.permute.xlu1 %2813  ;;  %3211 = vrot.lane.b32.xlu0 %v2524_v48, %s8942_s23  ;;  %v2784_v48 = vpack.c.bf16 %v2766_v54, %v2765_v25  ;;  %v3029_v25 = vld [vmem:[#allocation2 + $0x1d1] sm:$0xff] }
 0x2e5   : > { %2857 = vst.msk [vmem:[#allocation3 + $0x28] sm:$0xff] %vm2851_vm5, %v2814_v52  ;;  %v10362_v52 = vld [vmem:[#allocation2 + $0x1b9] sm:$0xff] }
 0x2e6   : > { %v3071_v41 = vpop.permute.xlu0 %3070  ;;  %3084 = vrot.lane.b32.xlu1 %v3041_v32, %s8941_s12  ;;  %v2399_v6 = vpack.c.bf16 %v10362_v52, %v10360_v45 }
 0x2e7   : > { %3115 = vst.msk [vmem:[#allocation3 + $0x20] sm:$0xff] %vm3110_vm7, %v3071_v41  ;;  %v12426_v41 = vmov 0.0  }
 0x2e8   : > { %v2944_v15 = vpop.permute.xlu1 %2943  ;;  %3340 = vrot.lane.b32.xlu0 %v2653_v0, %s8943_s6  ;;  %v3025_v0 = vld [vmem:[#allocation2 + $0x1a1] sm:$0xff]  ;;  %3846 = vst.msk [vmem:[#allocation4 + $0x48] sm:$0xff] %vm3835_vm12, %v12426_v41  ;;  %3847 = vst.msk [vmem:[#allocation4 + $0x50] sm:$0xff] %vm3835_vm12, %v12426_v41 }
 0x2e9   : > { %2987 = vst.msk [vmem:[#allocation3 + $0x28] sm:$0xff] %vm2981_vm6, %v2944_v15  ;;  %v10336_v33 = vpack.c.bf16 %v3025_v0, %v3024_v42  ;;  %v2511_v15 = vld [vmem:[#allocation2 + $0x1b2] sm:$0xff] }
 0x2ea   : > { %v3200_v39 = vpop.permute.xlu0 %3199  ;;  %3213 = vrot.lane.b32.xlu1 %v3170_v17, %s8942_s23  ;;  %3836 = vst.msk [vmem:[#allocation4] sm:$0xff] %vm3835_vm12, %v12426_v41  ;;  %3837 = vst.msk [vmem:[#allocation4 + $0x8] sm:$0xff] %vm3835_vm12, %v12426_v41 }
 0x2eb   : > { %3244 = vst.msk [vmem:[#allocation3 + $0x20] sm:$0xff] %vm3239_vm8, %v3200_v39  ;;  %v2512_v39 = vld [vmem:[#allocation2 + $0x1ba] sm:$0xff] }
 0x2ec   : > { %v3073_v60 = vpop.permute.xlu1 %3072  ;;  %3469 = vrot.lane.b32.xlu0 %v2782_v62, %s8944_s8  ;;  %3840 = vst.msk [vmem:[#allocation4 + $0x18] sm:$0xff] %vm3835_vm12, %v12426_v41  ;;  %3841 = vst.msk [vmem:[#allocation4 + $0x20] sm:$0xff] %vm3835_vm12, %v12426_v41  ;;  %v2528_v47 = vpack.c.bf16 %v2512_v39, %v2511_v15 }
 0x2ed   : > { %3116 = vst.msk [vmem:[#allocation3 + $0x28] sm:$0xff] %vm3110_vm7, %v3073_v60  ;;  %v2640_v60 = vld [vmem:[#allocation2 + $0x1b3] sm:$0xff] }
 0x2ee   : > { %v3329_v29 = vpop.permute.xlu0 %3328  ;;  %3342 = vrot.lane.b32.xlu1 %v3299_v44, %s8943_s6  ;;  %3843 = vst.msk [vmem:[#allocation4 + $0x30] sm:$0xff] %vm3835_vm12, %v12426_v41  ;;  %3844 = vst.msk [vmem:[#allocation4 + $0x38] sm:$0xff] %vm3835_vm12, %v12426_v41 }
 0x2ef   : > { %3373 = vst.msk [vmem:[#allocation3 + $0x20] sm:$0xff] %vm3368_vm9, %v3329_v29  ;;  %v2641_v29 = vld [vmem:[#allocation2 + $0x1bb] sm:$0xff] }
 0x2f0   : > { %v3202_v10 = vpop.permute.xlu1 %3201  ;;  %2440 = vrot.lane.b32.xlu0 %v3041_v32, %s8936_s9  ;;  %3849 = vst.msk [vmem:[#allocation4 + $0x60] sm:$0xff] %vm3835_vm12, %v12426_v41  ;;  %3850 = vst.msk [vmem:[#allocation4 + $0x68] sm:$0xff] %vm3835_vm12, %v12426_v41 }
 0x2f1   : > { %3245 = vst.msk [vmem:[#allocation3 + $0x28] sm:$0xff] %vm3239_vm8, %v3202_v10  ;;  %v3994_v42 = vld [vmem:[#allocation4 + $0x1] sm:$0xff] }
 0x2f2   : > { %v3458_v58 = vpop.permute.xlu0 %3457  ;;  %3471 = vrot.lane.b32.xlu1 %v3428_v2, %s8944_s8  ;;  %3852 = vst.msk [vmem:[#allocation4 + $0x78] sm:$0xff] %vm3835_vm12, %v12426_v41  ;;  %3853 = vst.msk [vmem:[#allocation4 + $0x80] sm:$0xff] %vm3835_vm12, %v12426_v41 }
 0x2f3   : > { %3502 = vst.msk [vmem:[#allocation3 + $0x20] sm:$0xff] %vm3497_vm10, %v3458_v58  ;;  %v3996_v8 = vld [vmem:[#allocation4 + $0x19] sm:$0xff] }
 0x2f4   : > { %v3331_v22 = vpop.permute.xlu1 %3330  ;;  %2569 = vrot.lane.b32.xlu0 %v3170_v17, %s8937_s13  ;;  %3855 = vst.msk [vmem:[#allocation4 + $0x90] sm:$0xff] %vm3835_vm12, %v12426_v41  ;;  %3856 = vst.msk [vmem:[#allocation4 + $0x98] sm:$0xff] %vm3835_vm12, %v12426_v41  ;;  %v4446_v53 = vld [vmem:[#allocation4 + $0x18] sm:$0xff] }
 0x2f5   : > { %3374 = vst.msk [vmem:[#allocation3 + $0x28] sm:$0xff] %vm3368_vm9, %v3331_v22 }
 0x2f6   : > { %v2429_v30 = vpop.permute.xlu0 %2428  ;;  %2442 = vrot.lane.b32.xlu1 %v2397_v50, %s8936_s9  ;;  %3858 = vst.msk [vmem:[#allocation4 + $0xa8] sm:$0xff] %vm3835_vm12, %v12426_v41  ;;  %3859 = vst.msk [vmem:[#allocation4 + $0xb0] sm:$0xff] %vm3835_vm12, %v12426_v41 }
 0x2f7   : > { %2471 = vst.msk [vmem:[#allocation3 + $0x30] sm:$0xff] %vm2464_vm2, %v2429_v30  ;;  %v2915_v30 = vpack.c.bf16 %v2898_v16, %v2897_v38 }
 0x2f8   : > { %v3460_v43 = vpop.permute.xlu1 %3459  ;;  %2698 = vrot.lane.b32.xlu0 %v3299_v44, %s8938_s16  ;;  %3861 = vst.msk [vmem:[#allocation4 + $0xc0] sm:$0xff] %vm3835_vm12, %v12426_v41  ;;  %3862 = vst.msk [vmem:[#allocation4 + $0xc8] sm:$0xff] %vm3835_vm12, %v12426_v41 }
 0x2f9   : > { %3503 = vst.msk [vmem:[#allocation3 + $0x28] sm:$0xff] %vm3497_vm10, %v3460_v43  ;;  %v2900_v43 = vld [vmem:[#allocation2 + $0x1d0] sm:$0xff] }
 0x2fa   : > { %v3518_v61 = vld [vmem:[#allocation3 + $0x20] sm:$0xff]  ;;  %v2558_v40 = vpop.permute.xlu0 %2557  ;;  %2571 = vrot.lane.b32.xlu1 %v2526_v31, %s8937_s13  ;;  %3864 = vst.msk [vmem:[#allocation4 + $0xd8] sm:$0xff] %vm3835_vm12, %v12426_v41  ;;  %3865 = vst.msk [vmem:[#allocation4 + $0xe0] sm:$0xff] %vm3835_vm12, %v12426_v41 }
 0x2fb   : > { %8671 = vmatprep.mubr.msk.bf16.mxu0 %vm3589_vm11, %v3518_v61  ;;  %2600 = vst.msk [vmem:[#allocation3 + $0x30] sm:$0xff] %vm2593_vm3, %v2558_v40  ;;  %v2916_v40 = vpack.c.bf16 %v2900_v43, %v2899_v56 }
 0x2fc   : > { %v2431_v23 = vpop.permute.xlu1 %2430  ;;  %2827 = vrot.lane.b32.xlu0 %v3428_v2, %s8939_s26  ;;  %3867 = vst.msk [vmem:[#allocation4 + $0xf0] sm:$0xff] %vm3835_vm12, %v12426_v41  ;;  %3868 = vst.msk [vmem:[#allocation4 + $0xf8] sm:$0xff] %vm3835_vm12, %v12426_v41 }
 0x2fd   : > { %2472 = vst.msk [vmem:[#allocation3 + $0x38] sm:$0xff] %vm2464_vm2, %v2431_v23 }
 0x2fe   : > { %v2687_v55 = vpop.permute.xlu0 %2686  ;;  %2700 = vrot.lane.b32.xlu1 %v2655_v4, %s8938_s16  ;;  %3870 = vst.msk [vmem:[#allocation4 + $0x108] sm:$0xff] %vm3835_vm12, %v12426_v41  ;;  %3871 = vst.msk [vmem:[#allocation4 + $0x110] sm:$0xff] %vm3835_vm12, %v12426_v41 }
 0x2ff   : > { %2729 = vst.msk [vmem:[#allocation3 + $0x30] sm:$0xff] %vm2722_vm4, %v2687_v55  ;;  %v3157_v55 = vld [vmem:[#allocation2 + $0x1ca] sm:$0xff] }
 0x300   : > { %v3519_v35 = vld [vmem:[#allocation3 + $0x28] sm:$0xff]  ;;  %v2560_v7 = vpop.permute.xlu1 %2559  ;;  %2957 = vrot.lane.b32.xlu0 %v2913_v36, %s8940_s7  ;;  %3873 = vst.msk [vmem:[#allocation4 + $0x120] sm:$0xff] %vm3835_vm12, %v12426_v41  ;;  %3874 = vst.msk [vmem:[#allocation4 + $0x128] sm:$0xff] %vm3835_vm12, %v12426_v41 }
 0x301   : > { %8672 = vmatmul.mubr.msk.bf16.gmra.mrb[8].mxu0 %vm3589_vm11, %v3519_v35  ;;  %2601 = vst.msk [vmem:[#allocation3 + $0x38] sm:$0xff] %vm2593_vm3, %v2560_v7  ;;  %v3286_v7 = vld [vmem:[#allocation2 + $0x1cb] sm:$0xff] }
 0x302   : > { %v2816_v26 = vpop.permute.xlu0 %2815  ;;  %2829 = vrot.lane.b32.xlu1 %v2784_v48, %s8939_s26  ;;  %3876 = vst.msk [vmem:[#allocation4 + $0x138] sm:$0xff] %vm3835_vm12, %v12426_v41  ;;  %3877 = vst.msk [vmem:[#allocation4 + $0x140] sm:$0xff] %vm3835_vm12, %v12426_v41 }
 0x303   : > { %2858 = vst.msk [vmem:[#allocation3 + $0x30] sm:$0xff] %vm2851_vm5, %v2816_v26  ;;  %v3287_v26 = vld [vmem:[#allocation2 + $0x1d3] sm:$0xff] }
 0x304   : > { %v2689_v1 = vpop.permute.xlu1 %2688  ;;  %3086 = vrot.lane.b32.xlu0 %v2397_v50, %s8941_s12  ;;  %3879 = vst.msk [vmem:[#allocation4 + $0x150] sm:$0xff] %vm3835_vm12, %v12426_v41  ;;  %3880 = vst.msk [vmem:[#allocation4 + $0x158] sm:$0xff] %vm3835_vm12, %v12426_v41  ;;  %v2657_v50 = vpack.c.bf16 %v2641_v29, %v2640_v60 }
 0x305   : > { %2730 = vst.msk [vmem:[#allocation3 + $0x38] sm:$0xff] %vm2722_vm4, %v2689_v1 }
 0x306   : > { %v2946_v20 = vpop.permute.xlu0 %2945  ;;  %2959 = vrot.lane.b32.xlu1 %v2914_v18, %s8940_s7  ;;  %3882 = vst.msk [vmem:[#allocation4 + $0x168] sm:$0xff] %vm3835_vm12, %v12426_v41  ;;  %3883 = vst.msk [vmem:[#allocation4 + $0x170] sm:$0xff] %vm3835_vm12, %v12426_v41 }
 0x307   : > { %2988 = vst.msk [vmem:[#allocation3 + $0x30] sm:$0xff] %vm2981_vm6, %v2946_v20  ;;  %v3303_v20 = vpack.c.bf16 %v3287_v26, %v3286_v7 }
 0x308   : > { %v2818_v62 = vpop.permute.xlu1 %2817  ;;  %3215 = vrot.lane.b32.xlu0 %v2526_v31, %s8942_s23  ;;  %3885 = vst.msk [vmem:[#allocation4 + $0x180] sm:$0xff] %vm3835_vm12, %v12426_v41  ;;  %3886 = vst.msk [vmem:[#allocation4 + $0x188] sm:$0xff] %vm3835_vm12, %v12426_v41 }
 0x309   : > { %2859 = vst.msk [vmem:[#allocation3 + $0x38] sm:$0xff] %vm2851_vm5, %v2818_v62 }
 0x30a   : > { %v3075_v37 = vpop.permute.xlu0 %3074  ;;  %3088 = vrot.lane.b32.xlu1 %v10336_v33, %s8941_s12  ;;  %3888 = vst.msk [vmem:[#allocation4 + $0x198] sm:$0xff] %vm3835_vm12, %v12426_v41  ;;  %3889 = vst.msk [vmem:[#allocation4 + $0x1a0] sm:$0xff] %vm3835_vm12, %v12426_v41 }
 0x30b   : > { %3117 = vst.msk [vmem:[#allocation3 + $0x30] sm:$0xff] %vm3110_vm7, %v3075_v37 }
 0x30c   : > { %v2948_v46 = vpop.permute.xlu1 %2947  ;;  %3344 = vrot.lane.b32.xlu0 %v2655_v4, %s8943_s6  ;;  %3891 = vst.msk [vmem:[#allocation4 + $0x1b0] sm:$0xff] %vm3835_vm12, %v12426_v41  ;;  %3892 = vst.msk [vmem:[#allocation4 + $0x1b8] sm:$0xff] %vm3835_vm12, %v12426_v41  ;;  %v3028_v4 = vld [vmem:[#allocation2 + $0x1c9] sm:$0xff] }
 0x30d   : > { %2989 = vst.msk [vmem:[#allocation3 + $0x38] sm:$0xff] %vm2981_vm6, %v2948_v46  ;;  %v3045_v36 = vpack.c.bf16 %v3029_v25, %v3028_v4 }
 0x30e   : > { %v3204_v57 = vpop.permute.xlu0 %3203  ;;  %3217 = vrot.lane.b32.xlu1 %v10343_v19, %s8942_s23  ;;  %3894 = vst.msk [vmem:[#allocation4 + $0x1c8] sm:$0xff] %vm3835_vm12, %v12426_v41  ;;  %3895 = vst.msk [vmem:[#allocation4 + $0x1d0] sm:$0xff] %vm3835_vm12, %v12426_v41 }
 0x30f   : > { %3246 = vst.msk [vmem:[#allocation3 + $0x30] sm:$0xff] %vm3239_vm8, %v3204_v57 }
 0x310   : > { %v3077_v5 = vpop.permute.xlu1 %3076  ;;  %3473 = vrot.lane.b32.xlu0 %v2784_v48, %s8944_s8  ;;  %3848 = vst.msk [vmem:[#allocation4 + $0x58] sm:$0xf] %vm3838_vm13, %v12426_v41  ;;  %3839 = vst.msk [vmem:[#allocation4 + $0x10] sm:$0xf] %vm3838_vm13, %v12426_v41  ;;  %v3158_v48 = vld [vmem:[#allocation2 + $0x1d2] sm:$0xff] }
 0x311   : > { %3118 = vst.msk [vmem:[#allocation3 + $0x38] sm:$0xff] %vm3110_vm7, %v3077_v5  ;;  %v3174_v35 = vpack.c.bf16 %v3158_v48, %v3157_v55 }
 0x312   : > { %v3333_v32 = vpop.permute.xlu0 %3332  ;;  %3346 = vrot.lane.b32.xlu1 %v10350_v28, %s8943_s6  ;;  %3842 = vst.msk [vmem:[#allocation4 + $0x28] sm:$0xf] %vm3838_vm13, %v12426_v41  ;;  %3845 = vst.msk [vmem:[#allocation4 + $0x40] sm:$0xf] %vm3838_vm13, %v12426_v41 }
 0x313   : > { %3375 = vst.msk [vmem:[#allocation3 + $0x30] sm:$0xff] %vm3368_vm9, %v3333_v32 }
 0x314   : > { %3851 = vst.msk [vmem:[#allocation4 + $0x70] sm:$0xf] %vm3838_vm13, %v12426_v41  ;;  %3854 = vst.msk [vmem:[#allocation4 + $0x88] sm:$0xf] %vm3838_vm13, %v12426_v41  ;;  %v3206_v17 = vpop.permute.xlu1 %3205  ;;  %2444 = vrot.lane.b32.xlu0 %v10336_v33, %s8936_s9  ;;  %v3415_v33 = vld [vmem:[#allocation2 + $0x1cc] sm:$0xff] }
 0x315   : > { %3857 = vst.msk [vmem:[#allocation4 + $0xa0] sm:$0xf] %vm3838_vm13, %v12426_v41  ;;  %3860 = vst.msk [vmem:[#allocation4 + $0xb8] sm:$0xf] %vm3838_vm13, %v12426_v41 }
 0x316   : > { %3863 = vst.msk [vmem:[#allocation4 + $0xd0] sm:$0xf] %vm3838_vm13, %v12426_v41  ;;  %3866 = vst.msk [vmem:[#allocation4 + $0xe8] sm:$0xf] %vm3838_vm13, %v12426_v41  ;;  %v3462_v21 = vpop.permute.xlu0 %3461  ;;  %3475 = vrot.lane.b32.xlu1 %v10357_v59, %s8944_s8 }
 0x317   : > { %3869 = vst.msk [vmem:[#allocation4 + $0x100] sm:$0xf] %vm3838_vm13, %v12426_v41  ;;  %3872 = vst.msk [vmem:[#allocation4 + $0x118] sm:$0xf] %vm3838_vm13, %v12426_v41  ;;  %v3995_v0 = vld [vmem:[#allocation4 + $0x9] sm:$0xff] }
 0x318   : > { %3875 = vst.msk [vmem:[#allocation4 + $0x130] sm:$0xf] %vm3838_vm13, %v12426_v41  ;;  %3878 = vst.msk [vmem:[#allocation4 + $0x148] sm:$0xf] %vm3838_vm13, %v12426_v41  ;;  %v3335_v44 = vpop.permute.xlu1 %3334  ;;  %2573 = vrot.lane.b32.xlu0 %v10343_v19, %s8937_s13  ;;  %v4026_v62 = vpack.c.bf16 %v3995_v0, %v3994_v42  ;;  %v3432_v19 = vpack.c.bf16 %v3416_v11, %v3415_v33  ;;  %v10590_v42 = vld [vmem:[%s12381_s2] ss:$0 sm:$0xff] }
 0x319   : > { %3881 = vst.msk [vmem:[#allocation4 + $0x160] sm:$0xf] %vm3838_vm13, %v12426_v41  ;;  %3884 = vst.msk [vmem:[#allocation4 + $0x178] sm:$0xf] %vm3838_vm13, %v12426_v41  ;;  %v3997_v13 = vld [vmem:[#allocation4 + $0x21] sm:$0xff] }
 0x31a   : > { %3887 = vst.msk [vmem:[#allocation4 + $0x190] sm:$0xf] %vm3838_vm13, %v12426_v41  ;;  %3890 = vst.msk [vmem:[#allocation4 + $0x1a8] sm:$0xf] %vm3838_vm13, %v12426_v41  ;;  %v2433_v24 = vpop.permute.xlu0 %2432  ;;  %2446 = vrot.lane.b32.xlu1 %v2399_v6, %s8936_s9 }
 0x31b   : > { %3893 = vst.msk [vmem:[#allocation4 + $0x1c0] sm:$0xf] %vm3838_vm13, %v12426_v41  ;;  %3896 = vst.msk [vmem:[#allocation4 + $0x1d8] sm:$0xf] %vm3838_vm13, %v12426_v41 }
 0x31c   : > { %3247 = vst.msk [vmem:[#allocation3 + $0x38] sm:$0xff] %vm3239_vm8, %v3206_v17  ;;  %v3464_v2 = vpop.permute.xlu1 %3463  ;;  %2702 = vrot.lane.b32.xlu0 %v10350_v28, %s8938_s16  ;;  %v10532_v28 = vpack.c.bf16 %v3997_v13, %v3996_v8 }
 0x31d   : > { %3504 = vst.msk [vmem:[#allocation3 + $0x30] sm:$0xff] %vm3497_vm10, %v3462_v21 }
 0x31e   : > { %3376 = vst.msk [vmem:[#allocation3 + $0x38] sm:$0xff] %vm3368_vm9, %v3335_v44  ;;  %v2562_v10 = vpop.permute.xlu0 %2561  ;;  %2575 = vrot.lane.b32.xlu1 %v2528_v47, %s8937_s13  ;;  %s8271_s13 = sshll.u32 %s8998_s22, 10 }
 0x31f   : > { %2473 = vst.msk [vmem:[#allocation3 + $0x40] sm:$0xff] %vm2464_vm2, %v2433_v24  ;;  %s12329_s10 = scalar_lea.hbm %s12384_s5, %s8271_s13 }
 0x320   : > { %3505 = vst.msk [vmem:[#allocation3 + $0x38] sm:$0xff] %vm3497_vm10, %v3464_v2  ;;  %v2435_v22 = vpop.permute.xlu1 %2434  ;;  %2831 = vrot.lane.b32.xlu0 %v10357_v59, %s8939_s26 }
 0x321   : > { %2602 = vst.msk [vmem:[#allocation3 + $0x40] sm:$0xff] %vm2593_vm3, %v2562_v10 }
 0x322   : > { %2474 = vst.msk [vmem:[#allocation3 + $0x48] sm:$0xff] %vm2464_vm2, %v2435_v22  ;;  %v2691_v31 = vpop.permute.xlu0 %2690  ;;  %2704 = vrot.lane.b32.xlu1 %v2657_v50, %s8938_s16  ;;  %v4447_v22 = vld [vmem:[#allocation4 + $0x20] sm:$0xff] }
 0x323   : > { %2731 = vst.msk [vmem:[#allocation3 + $0x40] sm:$0xff] %vm2722_vm4, %v2691_v31  ;;  %v10562_v31 = vpack.c.bf16 %v4447_v22, %v4446_v53 }
 0x324   : > { %v3520_v58 = vld [vmem:[#allocation3 + $0x30] sm:$0xff]  ;;  %v2564_v51 = vpop.permute.xlu1 %2563  ;;  %2961 = vrot.lane.b32.xlu0 %v2915_v30, %s8940_s7 }
 0x325   : > { %8675 = vmatprep.mubr.msk.bf16.mxu0 %vm3589_vm11, %v3520_v58  ;;  %2603 = vst.msk [vmem:[#allocation3 + $0x48] sm:$0xff] %vm2593_vm3, %v2564_v51 }
 0x326   : > { %v2820_v61 = vpop.permute.xlu0 %2819  ;;  %2833 = vrot.lane.b32.xlu1 %v2786_v3, %s8939_s26  ;;  %3979 = vst.msk [vmem:[#allocation5 + $0x38] sm:$0xff] %vm3835_vm12, %v10562_v31 }
 0x327   : > { %v3521_v34 = vld [vmem:[#allocation3 + $0x38] sm:$0xff]  ;;  %2860 = vst.msk [vmem:[#allocation3 + $0x40] sm:$0xff] %vm2851_vm5, %v2820_v61 }
 0x328   : > { %8676 = vmatmul.mubr.msk.bf16.gmra.mrb[12].mxu0 %vm3589_vm11, %v3521_v34  ;;  %v2693_v54 = vpop.permute.xlu1 %2692  ;;  %3090 = vrot.lane.b32.xlu0 %v2399_v6, %s8941_s12 }
 0x329   : > { %2732 = vst.msk [vmem:[#allocation3 + $0x48] sm:$0xff] %vm2722_vm4, %v2693_v54 }
 0x32a   : > { %v2950_v23 = vpop.permute.xlu0 %2949  ;;  %2963 = vrot.lane.b32.xlu1 %v2916_v40, %s8940_s7 }
 0x32b   : > { %2990 = vst.msk [vmem:[#allocation3 + $0x40] sm:$0xff] %vm2981_vm6, %v2950_v23 }
 0x32c   : > { %v2822_v12 = vpop.permute.xlu1 %2821  ;;  %3219 = vrot.lane.b32.xlu0 %v2528_v47, %s8942_s23 }
 0x32d   : > { %2861 = vst.msk [vmem:[#allocation3 + $0x48] sm:$0xff] %vm2851_vm5, %v2822_v12 }
 0x32e   : > { %v3079_v9 = vpop.permute.xlu0 %3078  ;;  %3092 = vrot.lane.b32.xlu1 %v3045_v36, %s8941_s12 }
 0x32f   : > { %3119 = vst.msk [vmem:[#allocation3 + $0x40] sm:$0xff] %vm3110_vm7, %v3079_v9 }
 0x330   : > { %v2952_v18 = vpop.permute.xlu1 %2951  ;;  %3348 = vrot.lane.b32.xlu0 %v2657_v50, %s8943_s6 }
 0x331   : > { %2991 = vst.msk [vmem:[#allocation3 + $0x48] sm:$0xff] %vm2981_vm6, %v2952_v18 }
 0x332   : > { %v3208_v1 = vpop.permute.xlu0 %3207  ;;  %3221 = vrot.lane.b32.xlu1 %v3174_v35, %s8942_s23  ;;  %s8862_s23 = scalar_lea.vmem %s8861_s15, 2048 }
 0x333   : > { %3248 = vst.msk [vmem:[#allocation3 + $0x40] sm:$0xff] %vm3239_vm8, %v3208_v1  ;;  %v3930_v1 = vld [vmem:[#allocation4] sm:$0xff] }
 0x334   : > { %v3081_v14 = vpop.permute.xlu1 %3080  ;;  %3477 = vrot.lane.b32.xlu0 %v2786_v3, %s8944_s8 }
 0x335   : > { %3120 = vst.msk [vmem:[#allocation3 + $0x48] sm:$0xff] %vm3110_vm7, %v3081_v14 }
 0x336   : > { %v3337_v37 = vpop.permute.xlu0 %3336  ;;  %3350 = vrot.lane.b32.xlu1 %v3303_v20, %s8943_s6  ;;  %v3931_v20 = vld [vmem:[#allocation4 + $0x8] sm:$0xff] }
 0x337   : > { %3377 = vst.msk [vmem:[#allocation3 + $0x40] sm:$0xff] %vm3368_vm9, %v3337_v37  ;;  %v3962_v33 = vpack.c.bf16 %v3931_v20, %v3930_v1 }
 0x338   : > { %v3210_v46 = vpop.permute.xlu1 %3209  ;;  %4058 = vrot.lane.b32.xlu0 %v4026_v62, %s8928_s17 }
 0x339   : > { %3249 = vst.msk [vmem:[#allocation3 + $0x48] sm:$0xff] %vm3239_vm8, %v3210_v46 }
 0x33a   : > { %v3466_v57 = vpop.permute.xlu0 %3465  ;;  %3479 = vrot.lane.b32.xlu1 %v3432_v19, %s8944_s8  ;;  %3978 = vst.msk [vmem:[#allocation5] sm:$0xff] %vm3835_vm12, %v3962_v33 }
 0x33b   : > { %3506 = vst.msk [vmem:[#allocation3 + $0x40] sm:$0xff] %vm3497_vm10, %v3466_v57 }
 0x33c   : > { %v3339_v49 = vpop.permute.xlu1 %3338 }
 0x33d   : > { %3378 = vst.msk [vmem:[#allocation3 + $0x48] sm:$0xff] %vm3368_vm9, %v3339_v49 }
 0x33e   : > { %v2437_v27 = vpop.permute.xlu0 %2436  ;;  %4060 = vrot.lane.b32.xlu1 %v10532_v28, %s8928_s17 }
 0x33f   : > { %2475 = vst.msk [vmem:[#allocation3 + $0x50] sm:$0xff] %vm2464_vm2, %v2437_v27 }
 0x340   : > { %v3468_v5 = vpop.permute.xlu1 %3467 }
 0x341   : > { %3507 = vst.msk [vmem:[#allocation3 + $0x48] sm:$0xff] %vm3497_vm10, %v3468_v5 }
 0x342   : > { %v3522_v32 = vld [vmem:[#allocation3 + $0x40] sm:$0xff]  ;;  %v2566_v59 = vpop.permute.xlu0 %2565 }
 0x343   : > { %8679 = vmatprep.mubr.msk.bf16.mxu0 %vm3589_vm11, %v3522_v32  ;;  %2604 = vst.msk [vmem:[#allocation3 + $0x50] sm:$0xff] %vm2593_vm3, %v2566_v59 }
 0x344   : > { %v2439_v45 = vpop.permute.xlu1 %2438 }
 0x345   : > { %2476 = vst.msk [vmem:[#allocation3 + $0x58] sm:$0xff] %vm2464_vm2, %v2439_v45 }
 0x346   : > { %v2695_v52 = vpop.permute.xlu0 %2694 }
 0x347   : > { %2733 = vst.msk [vmem:[#allocation3 + $0x50] sm:$0xff] %vm2722_vm4, %v2695_v52 }
 0x348   : > { %v3523_v41 = vld [vmem:[#allocation3 + $0x48] sm:$0xff]  ;;  %v2568_v17 = vpop.permute.xlu1 %2567 }
 0x349   : > { %8680 = vmatmul.mubr.msk.bf16.gmra.mrb[16].mxu0 %vm3589_vm11, %v3523_v41  ;;  %2605 = vst.msk [vmem:[#allocation3 + $0x58] sm:$0xff] %vm2593_vm3, %v2568_v17 }
 0x34a   : > { %v2824_v21 = vpop.permute.xlu0 %2823 }
 0x34b   : > { %2862 = vst.msk [vmem:[#allocation3 + $0x50] sm:$0xff] %vm2851_vm5, %v2824_v21 }
 0x34c   : > { %v2697_v6 = vpop.permute.xlu1 %2696 }
 0x34d   : > { %2734 = vst.msk [vmem:[#allocation3 + $0x58] sm:$0xff] %vm2722_vm4, %v2697_v6 }
 0x34e   : > { %v2954_v15 = vpop.permute.xlu0 %2953 }
 0x34f   : > { %2992 = vst.msk [vmem:[#allocation3 + $0x50] sm:$0xff] %vm2981_vm6, %v2954_v15 }
 0x350   : > { %v2826_v39 = vpop.permute.xlu1 %2825 }
 0x351   : > { %2863 = vst.msk [vmem:[#allocation3 + $0x58] sm:$0xff] %vm2851_vm5, %v2826_v39 }
 0x352   : > { %v3083_v44 = vpop.permute.xlu0 %3082 }
 0x353   : > { %3121 = vst.msk [vmem:[#allocation3 + $0x50] sm:$0xff] %vm3110_vm7, %v3083_v44 }
 0x354   : > { %v2956_v24 = vpop.permute.xlu1 %2955 }
 0x355   : > { %2993 = vst.msk [vmem:[#allocation3 + $0x58] sm:$0xff] %vm2981_vm6, %v2956_v24 }
 0x356   : > { %v3212_v47 = vpop.permute.xlu0 %3211 }
 0x357   : > { %3250 = vst.msk [vmem:[#allocation3 + $0x50] sm:$0xff] %vm3239_vm8, %v3212_v47 }
 0x358   : > { %v3085_v60 = vpop.permute.xlu1 %3084 }
 0x359   : > { %3122 = vst.msk [vmem:[#allocation3 + $0x58] sm:$0xff] %vm3110_vm7, %v3085_v60 }
 0x35a   : > { %v3341_v29 = vpop.permute.xlu0 %3340 }
 0x35b   : > { %3379 = vst.msk [vmem:[#allocation3 + $0x50] sm:$0xff] %vm3368_vm9, %v3341_v29 }
 0x35c   : > { %v3214_v2 = vpop.permute.xlu1 %3213 }
 0x35d   : > { %3251 = vst.msk [vmem:[#allocation3 + $0x58] sm:$0xff] %vm3239_vm8, %v3214_v2 }
 0x35e   : > { %v3470_v38 = vpop.permute.xlu0 %3469 }
 0x35f   : > { %3508 = vst.msk [vmem:[#allocation3 + $0x50] sm:$0xff] %vm3497_vm10, %v3470_v38 }
 0x360   : > { %v3343_v16 = vpop.permute.xlu1 %3342 }
 0x361   : > { %3380 = vst.msk [vmem:[#allocation3 + $0x58] sm:$0xff] %vm3368_vm9, %v3343_v16 }
 0x362   : > { %v2441_v10 = vpop.permute.xlu0 %2440 }
 0x363   : > { %2477 = vst.msk [vmem:[#allocation3 + $0x60] sm:$0xff] %vm2464_vm2, %v2441_v10 }
 0x364   : > { %v3472_v58 = vpop.permute.xlu1 %3471 }
 0x365   : > { %3509 = vst.msk [vmem:[#allocation3 + $0x58] sm:$0xff] %vm3497_vm10, %v3472_v58 }
 0x366   : > { %v3524_v50 = vld [vmem:[#allocation3 + $0x50] sm:$0xff]  ;;  %v2570_v63 = vpop.permute.xlu0 %2569 }
 0x367   : > { %8683 = vmatprep.mubr.msk.bf16.mxu0 %vm3589_vm11, %v3524_v50  ;;  %2606 = vst.msk [vmem:[#allocation3 + $0x60] sm:$0xff] %vm2593_vm3, %v2570_v63 }
 0x368   : > { %v2443_v30 = vpop.permute.xlu1 %2442 }
 0x369   : > { %2478 = vst.msk [vmem:[#allocation3 + $0x68] sm:$0xff] %vm2464_vm2, %v2443_v30 }
 0x36a   : > { %v2699_v3 = vpop.permute.xlu0 %2698 }
 0x36b   : > { %2735 = vst.msk [vmem:[#allocation3 + $0x60] sm:$0xff] %vm2722_vm4, %v2699_v3 }
 0x36c   : > { %v3525_v56 = vld [vmem:[#allocation3 + $0x58] sm:$0xff]  ;;  %v2572_v43 = vpop.permute.xlu1 %2571 }
 0x36d   : > { %8684 = vmatmul.mubr.msk.bf16.gmra.mrb[20].mxu0 %vm3589_vm11, %v3525_v56  ;;  %2607 = vst.msk [vmem:[#allocation3 + $0x68] sm:$0xff] %vm2593_vm3, %v2572_v43 }
 0x36e   : > { %v2828_v51 = vpop.permute.xlu0 %2827 }
 0x36f   : > { %2864 = vst.msk [vmem:[#allocation3 + $0x60] sm:$0xff] %vm2851_vm5, %v2828_v51 }
 0x370   : > { %v2701_v34 = vpop.permute.xlu1 %2700 }
 0x371   : > { %2736 = vst.msk [vmem:[#allocation3 + $0x68] sm:$0xff] %vm2722_vm4, %v2701_v34 }
 0x372   : > { %v2958_v61 = vpop.permute.xlu0 %2957 }
 0x373   : > { %2994 = vst.msk [vmem:[#allocation3 + $0x60] sm:$0xff] %vm2981_vm6, %v2958_v61 }
 0x374   : > { %v2830_v40 = vpop.permute.xlu1 %2829 }
 0x375   : > { %2865 = vst.msk [vmem:[#allocation3 + $0x68] sm:$0xff] %vm2851_vm5, %v2830_v40 }
 0x376   : > { %v3087_v4 = vpop.permute.xlu0 %3086 }
 0x377   : > { %3123 = vst.msk [vmem:[#allocation3 + $0x60] sm:$0xff] %vm3110_vm7, %v3087_v4 }
 0x378   : > { %v2960_v25 = vpop.permute.xlu1 %2959 }
 0x379   : > { %2995 = vst.msk [vmem:[#allocation3 + $0x68] sm:$0xff] %vm2981_vm6, %v2960_v25 }
 0x37a   : > { %v3216_v54 = vpop.permute.xlu0 %3215 }
 0x37b   : > { %3252 = vst.msk [vmem:[#allocation3 + $0x60] sm:$0xff] %vm3239_vm8, %v3216_v54 }
 0x37c   : > { %v3089_v23 = vpop.permute.xlu1 %3088 }
 0x37d   : > { %3124 = vst.msk [vmem:[#allocation3 + $0x68] sm:$0xff] %vm3110_vm7, %v3089_v23 }
 0x37e   : > { %v3345_v36 = vpop.permute.xlu0 %3344 }
 0x37f   : > { %3381 = vst.msk [vmem:[#allocation3 + $0x60] sm:$0xff] %vm3368_vm9, %v3345_v36 }
 0x380   : > { %v3218_v55 = vpop.permute.xlu1 %3217 }
 0x381   : > { %3253 = vst.msk [vmem:[#allocation3 + $0x68] sm:$0xff] %vm3239_vm8, %v3218_v55 }
 0x382   : > { %v3474_v48 = vpop.permute.xlu0 %3473 }
 0x383   : > { %3510 = vst.msk [vmem:[#allocation3 + $0x60] sm:$0xff] %vm3497_vm10, %v3474_v48 }
 0x384   : > { %v3347_v12 = vpop.permute.xlu1 %3346 }
 0x385   : > { %3382 = vst.msk [vmem:[#allocation3 + $0x68] sm:$0xff] %vm3368_vm9, %v3347_v12 }
 0x386   : > { %v2445_v9 = vpop.permute.xlu0 %2444 }
 0x387   : > { %2479 = vst.msk [vmem:[#allocation3 + $0x70] sm:$0xff] %vm2464_vm2, %v2445_v9 }
 0x388   : > { %v3476_v35 = vpop.permute.xlu1 %3475 }
 0x389   : > { %3511 = vst.msk [vmem:[#allocation3 + $0x68] sm:$0xff] %vm3497_vm10, %v3476_v35 }
 0x38a   : > { %v3526_v7 = vld [vmem:[#allocation3 + $0x60] sm:$0xff]  ;;  %v2574_v26 = vpop.permute.xlu0 %2573 }
 0x38b   : > { %8687 = vmatprep.mubr.msk.bf16.mxu0 %vm3589_vm11, %v3526_v7  ;;  %2608 = vst.msk [vmem:[#allocation3 + $0x70] sm:$0xff] %vm2593_vm3, %v2574_v26 }
 0x38c   : > { %v2447_v18 = vpop.permute.xlu1 %2446 }
 0x38d   : > { %2480 = vst.msk [vmem:[#allocation3 + $0x78] sm:$0xff] %vm2464_vm2, %v2447_v18 }
 0x38e   : > { %v2703_v0 = vpop.permute.xlu0 %2702 }
 0x38f   : > { %2737 = vst.msk [vmem:[#allocation3 + $0x70] sm:$0xff] %vm2722_vm4, %v2703_v0 }
 0x390   : > { %v8665_v11 = vpop.f32.mrb[0].mxu0  ;;  %v3527_v14 = vld [vmem:[#allocation3 + $0x68] sm:$0xff]  ;;  %v2576_v62 = vpop.permute.xlu1 %2575 }
 0x391   : > { %v3685_v37 = vadd.f32 %v8665_v11, %v10590_v42  ;;  %v3676_v19 = vpop.f32.mrb[1].mxu0  ;;  %8688 = vmatmul.mubr.msk.bf16.gmra.mrb[24].mxu0 %vm3589_vm11, %v3527_v14  ;;  %2609 = vst.msk [vmem:[#allocation3 + $0x78] sm:$0xff] %vm2593_vm3, %v2576_v62 }
 0x392   : > { %v3677_v8 = vadd.f32 %v10590_v42, %v3676_v19  ;;  %v8666_v13 = vpop.f32.mrb[2].mxu0  ;;  %v2832_v46 = vpop.permute.xlu0 %2831 }
 0x393   : > { %v3805_v57 = vmax.f32 %v3685_v37, 0.0  ;;  %v3688_v49 = vadd.f32 %v8666_v13, %v10590_v42  ;;  %v3679_v27 = vpop.f32.mrb[3].mxu0  ;;  %2866 = vst.msk [vmem:[#allocation3 + $0x70] sm:$0xff] %vm2851_vm5, %v2832_v46 }
 0x394   : > { %v3803_v5 = vmax.f32 %v3677_v8, 0.0  ;;  %v3680_v32 = vadd.f32 %v10590_v42, %v3679_v27  ;;  %v2705_v59 = vpop.permute.xlu1 %2704 }
 0x395   : > { %3900 = vst.msk [vmem:[#allocation4 + $0x4a] sm:$0xff] %vm3835_vm12, %v3805_v57  ;;  %v3806_v45 = vmax.f32 %v3688_v49, 0.0 }
 0x396   : > { %2738 = vst.msk [vmem:[#allocation3 + $0x78] sm:$0xff] %vm2722_vm4, %v2705_v59  ;;  %v3804_v52 = vmax.f32 %v3680_v32, 0.0  ;;  %v2962_v41 = vpop.permute.xlu0 %2961 }
 0x397   : > { %3898 = vst.msk [vmem:[#allocation4 + $0x32] sm:$0xff] %vm3835_vm12, %v3803_v5  ;;  %3901 = vst.msk [vmem:[#allocation4 + $0x52] sm:$0xff] %vm3835_vm12, %v3806_v45 }
 0x398   : > { %2996 = vst.msk [vmem:[#allocation3 + $0x70] sm:$0xff] %vm2981_vm6, %v2962_v41  ;;  %v2834_v17 = vpop.permute.xlu1 %2833 }
 0x399   : > { %3899 = vst.msk [vmem:[#allocation4 + $0x3a] sm:$0xff] %vm3835_vm12, %v3804_v52 }
 0x39a   : > { %2867 = vst.msk [vmem:[#allocation3 + $0x78] sm:$0xff] %vm2851_vm5, %v2834_v17  ;;  %v3091_v21 = vpop.permute.xlu0 %3090 }
 0x39b   : > { %3125 = vst.msk [vmem:[#allocation3 + $0x70] sm:$0xff] %vm3110_vm7, %v3091_v21 }
 0x39c   : > { %v2964_v6 = vpop.permute.xlu1 %2963  ;;  %v4000_v15 = vld [vmem:[#allocation4 + $0x49] sm:$0xff] }
 0x39d   : > { %2997 = vst.msk [vmem:[#allocation3 + $0x78] sm:$0xff] %vm2981_vm6, %v2964_v6  ;;  %v4450_v39 = vld [vmem:[#allocation4 + $0x48] sm:$0xff] }
 0x39e   : > { %v4001_v44 = vld [vmem:[#allocation4 + $0x51] sm:$0xff]  ;;  %v3220_v47 = vpop.permute.xlu0 %3219  ;;  %v5727_v26 = vld [vmem:[#allocation4 + $0x49] sm:$0xff] }
 0x39f   : > { %v3998_v24 = vld [vmem:[#allocation4 + $0x31] sm:$0xff]  ;;  %v10610_v29 = vpack.c.bf16 %v4001_v44, %v4000_v15  ;;  %3254 = vst.msk [vmem:[#allocation3 + $0x70] sm:$0xff] %vm3239_vm8, %v3220_v47 }
 0x3a0   : > { %v4451_v60 = vld [vmem:[#allocation4 + $0x50] sm:$0xff]  ;;  %v3999_v2 = vld [vmem:[#allocation4 + $0x39] sm:$0xff]  ;;  %v3093_v50 = vpop.permute.xlu1 %3092 }
 0x3a1   : > { %v4448_v38 = vld [vmem:[#allocation4 + $0x30] sm:$0xff]  ;;  %v4449_v16 = vld [vmem:[#allocation4 + $0x38] sm:$0xff]  ;;  %v10613_v10 = vpack.c.bf16 %v4451_v60, %v4450_v39  ;;  %v10615_v58 = vpack.c.bf16 %v3999_v2, %v3998_v24  ;;  %4064 = vrot.lane.b32.xlu1 %v10610_v29, %s8928_s17  ;;  %3126 = vst.msk [vmem:[#allocation3 + $0x78] sm:$0xff] %vm3110_vm7, %v3093_v50 }
 0x3a2   : > { %v10617_v63 = vpack.c.bf16 %v4449_v16, %v4448_v38  ;;  %v5470_v53 = vld [vmem:[#allocation4 + $0x34] sm:$0xff]  ;;  %v5471_v22 = vld [vmem:[#allocation4 + $0x3c] sm:$0xff]  ;;  %v3349_v30 = vpop.permute.xlu0 %3348  ;;  %v5472_v56 = vld [vmem:[#allocation4 + $0x4c] sm:$0xff] }
 0x3a3   : > { %3981 = vst.msk [vmem:[#allocation5 + $0xa8] sm:$0xff] %vm3835_vm12, %v10613_v10  ;;  %4062 = vrot.lane.b32.xlu0 %v10615_v58, %s8928_s17  ;;  %v10628_v3 = vpack.c.bf16 %v5471_v22, %v5470_v53  ;;  %v5473_v43 = vld [vmem:[#allocation4 + $0x54] sm:$0xff]  ;;  %v5280_v23 = vld [vmem:[#allocation4 + $0x4a] sm:$0xff]  ;;  %v4894_v50 = vld [vmem:[#allocation4 + $0x1c] sm:$0xff] }
 0x3a4   : > { %3980 = vst.msk [vmem:[#allocation5 + $0x70] sm:$0xff] %vm3835_vm12, %v10617_v63  ;;  %v10631_v51 = vpack.c.bf16 %v5473_v43, %v5472_v56  ;;  %v5278_v34 = vld [vmem:[#allocation4 + $0x32] sm:$0xff]  ;;  %v5279_v61 = vld [vmem:[#allocation4 + $0x3a] sm:$0xff]  ;;  %v3222_v40 = vpop.permute.xlu1 %3221  ;;  %v4895_v53 = vld [vmem:[#allocation4 + $0x24] sm:$0xff] }
 0x3a5   : > { %3383 = vst.msk [vmem:[#allocation3 + $0x70] sm:$0xff] %vm3368_vm9, %v3349_v30  ;;  %v5310_v4 = vpack.c.bf16 %v5279_v61, %v5278_v34  ;;  %v4832_v25 = vld [vmem:[#allocation4 + $0x33] sm:$0xff]  ;;  %v4833_v54 = vld [vmem:[#allocation4 + $0x3b] sm:$0xff]  ;;  %v4834_v48 = vld [vmem:[#allocation4 + $0x4b] sm:$0xff]  ;;  %v10682_v30 = vpack.c.bf16 %v4895_v53, %v4894_v50 }
 0x3a6   : > { %4431 = vst.msk [vmem:[#allocation5 + $0x78] sm:$0xff] %vm3835_vm12, %v10628_v3  ;;  %4432 = vst.msk [vmem:[#allocation5 + $0xb0] sm:$0xff] %vm3835_vm12, %v10631_v51  ;;  %v4863_v36 = vpack.c.bf16 %v4833_v54, %v4832_v25  ;;  %v5281_v55 = vld [vmem:[#allocation4 + $0x52] sm:$0xff]  ;;  %v3478_v9 = vpop.permute.xlu0 %3477 }
 0x3a7   : > { %3255 = vst.msk [vmem:[#allocation3 + $0x78] sm:$0xff] %vm3239_vm8, %v3222_v40  ;;  %v4835_v12 = vld [vmem:[#allocation4 + $0x53] sm:$0xff]  ;;  %v10639_v35 = vpack.c.bf16 %v5281_v55, %v5280_v23 }
 0x3a8   : > { %5326 = vst.msk [vmem:[#allocation5 + $0x18] sm:$0xff] %vm3835_vm12, %v5310_v4  ;;  %v10641_v7 = vpack.c.bf16 %v4835_v12, %v4834_v48  ;;  %4879 = vst.msk [vmem:[#allocation5 + $0x48] sm:$0xff] %vm3835_vm12, %v4863_v36  ;;  %v5728_v18 = vld [vmem:[#allocation4 + $0x51] sm:$0xff]  ;;  %v3351_v0 = vpop.permute.xlu1 %3350 }
 0x3a9   : > { %3512 = vst.msk [vmem:[#allocation3 + $0x70] sm:$0xff] %vm3497_vm10, %v3478_v9  ;;  %v5759_v1 = vpack.c.bf16 %v5728_v18, %v5727_v26  ;;  %v8804_v18 = vld [vmem:[%s12382_s3 + $0x40] sm:$0xff]  }
 0x3aa   : > { %5327 = vst.msk [vmem:[#allocation5 + $0x50] sm:$0xff] %vm3835_vm12, %v10639_v35  ;;  %4880 = vst.msk [vmem:[#allocation5 + $0x80] sm:$0xff] %vm3835_vm12, %v10641_v7  ;;  %v4059_v20 = vpop.permute.xlu0 %4058  ;;  %8295 = vmatprep.subr.bf16.mxu1 %v8804_v18  ;;  %v8813_v18 = vld [vmem:[%s12382_s3 + $0x20] sm:$0xff]  }
 0x3ab   : > { %3384 = vst.msk [vmem:[#allocation3 + $0x78] sm:$0xff] %vm3368_vm9, %v3351_v0 }
 0x3ac   : > { %5775 = vst.msk [vmem:[#allocation5 + $0x20] sm:$0xff] %vm3835_vm12, %v5759_v1  ;;  %v3480_v33 = vpop.permute.xlu1 %3479  ;;  %4430 = vst.msk [vmem:[#allocation5 + $0x40] sm:$0xff] %vm3835_vm12, %v10682_v30 }
 0x3ad   : > { %4107 = vst.msk [vmem:[#allocation5] sm:$0xff] %vm4106_vm14, %v4059_v20 }
 0x3ae   : > { %3513 = vst.msk [vmem:[#allocation3 + $0x78] sm:$0xff] %vm3497_vm10, %v3480_v33 }
 0x3b0   : > { %v3528_v11 = vld [vmem:[#allocation3 + $0x70] sm:$0xff]  ;;  %v8669_v14 = vpop.f32.mrb[4].mxu0  ;;  %v4061_v62 = vpop.permute.xlu1 %4060 }
 0x3b1   : > { %8691 = vmatprep.mubr.msk.bf16.mxu0 %vm3589_vm11, %v3528_v11  ;;  %v3701_v37 = vadd.f32 %v8669_v14, %v10590_v42  ;;  %v3692_v19 = vpop.f32.mrb[5].mxu0  ;;  %4108 = vst.msk [vmem:[#allocation5 + $0x38] sm:$0xff] %vm4106_vm14, %v4061_v62 }
 0x3b2   : > { %v3693_v8 = vadd.f32 %v10590_v42, %v3692_v19  ;;  %v8670_v13 = vpop.f32.mrb[6].mxu0 }
 0x3b3   : > { %v3809_v46 = vmax.f32 %v3701_v37, 0.0  ;;  %v3704_v57 = vadd.f32 %v8670_v13, %v10590_v42  ;;  %v3695_v49 = vpop.f32.mrb[7].mxu0  ;;  %v8805_v13 = vld [vmem:[%s12382_s3] sm:$0xff]  }
 0x3b4   : > { %v3807_v27 = vmax.f32 %v3693_v8, 0.0  ;;  %v3696_v5 = vadd.f32 %v10590_v42, %v3695_v49  ;;  %8296 = vmatpush3.bf16.msra.mxu1 %v8805_v13 }
 0x3b5   : > { %v3529_v32 = vld [vmem:[#allocation3 + $0x78] sm:$0xff]  ;;  %3904 = vst.msk [vmem:[#allocation4 + $0x7a] sm:$0xff] %vm3835_vm12, %v3809_v46  ;;  %v3810_v59 = vmax.f32 %v3704_v57, 0.0 }
 0x3b6   : > { %8692 = vmatmul.mubr.msk.bf16.gmra.mrb[28].mxu0 %vm3589_vm11, %v3529_v32  ;;  %3902 = vst.msk [vmem:[#allocation4 + $0x62] sm:$0xff] %vm3835_vm12, %v3807_v27  ;;  %v3808_v45 = vmax.f32 %v3696_v5, 0.0  ;;  %v8806_v5 = vld [vmem:[%s12382_s3 + $0x48] sm:$0xff]  }
 0x3b7   : > { %3905 = vst.msk [vmem:[#allocation4 + $0x82] sm:$0xff] %vm3835_vm12, %v3810_v59  ;;  %8297 = vmatprep.subr.bf16.mxu1 %v8806_v5  ;;  %v8814_v5 = vld [vmem:[%s12382_s3 + $0x68] sm:$0xff]  }
 0x3b8   : > { %3903 = vst.msk [vmem:[#allocation4 + $0x6a] sm:$0xff] %vm3835_vm12, %v3808_v45 }
 0x3bc   : > { %v4004_v52 = vld [vmem:[#allocation4 + $0x79] sm:$0xff] }
 0x3bd   : > { %v4454_v41 = vld [vmem:[#allocation4 + $0x78] sm:$0xff]  ;;  %v4002_v21 = vld [vmem:[#allocation4 + $0x61] sm:$0xff] }
 0x3be   : > { %v4005_v17 = vld [vmem:[#allocation4 + $0x81] sm:$0xff]  ;;  %v6178_v14 = vld [vmem:[#allocation4 + $0x78] sm:$0xff] }
 0x3bf   : > { %v4455_v6 = vld [vmem:[#allocation4 + $0x80] sm:$0xff]  ;;  %v10664_v15 = vpack.c.bf16 %v4005_v17, %v4004_v52  ;;  %v4003_v39 = vld [vmem:[#allocation4 + $0x69] sm:$0xff] }
 0x3c0   : > { %v4452_v44 = vld [vmem:[#allocation4 + $0x60] sm:$0xff]  ;;  %v4453_v24 = vld [vmem:[#allocation4 + $0x68] sm:$0xff]  ;;  %v10666_v47 = vpack.c.bf16 %v4455_v6, %v4454_v41  ;;  %v10668_v60 = vpack.c.bf16 %v4003_v39, %v4002_v21  ;;  %v8808_v17 = vld [vmem:[%s12382_s3 + $0x50] sm:$0xff]  }
 0x3c1   : > { %v10670_v2 = vpack.c.bf16 %v4453_v24, %v4452_v44  ;;  %4068 = vrot.lane.b32.xlu1 %v10664_v15, %s8928_s17  ;;  %v5474_v38 = vld [vmem:[#allocation4 + $0x64] sm:$0xff]  ;;  %v5475_v16 = vld [vmem:[#allocation4 + $0x6c] sm:$0xff]  ;;  %v4391_v56 = vld [vmem:[#allocation4 + $0x7c] sm:$0xff] }
 0x3c2   : > { %3983 = vst.msk [vmem:[#allocation5 + $0x118] sm:$0xff] %vm3835_vm12, %v10666_v47  ;;  %4066 = vrot.lane.b32.xlu0 %v10668_v60, %s8928_s17  ;;  %v10680_v22 = vpack.c.bf16 %v5475_v16, %v5474_v38  ;;  %v4392_v43 = vld [vmem:[#allocation4 + $0x84] sm:$0xff]  ;;  %v5284_v36 = vld [vmem:[#allocation4 + $0x7a] sm:$0xff]  ;;  %v6625_v27 = vld [vmem:[#allocation4 + $0x6c] sm:$0xff] }
 0x3c3   : > { %3982 = vst.msk [vmem:[#allocation5 + $0xe0] sm:$0xff] %vm3835_vm12, %v10670_v2  ;;  %v10686_v34 = vpack.c.bf16 %v4392_v43, %v4391_v56  ;;  %v5282_v61 = vld [vmem:[#allocation4 + $0x62] sm:$0xff]  ;;  %v5283_v40 = vld [vmem:[#allocation4 + $0x6a] sm:$0xff]  ;;  %v5731_v19 = vld [vmem:[#allocation4 + $0x79] sm:$0xff] }
 0x3c4   : > { %4433 = vst.msk [vmem:[#allocation5 + $0xe8] sm:$0xff] %vm3835_vm12, %v10680_v22  ;;  %v10692_v4 = vpack.c.bf16 %v5283_v40, %v5282_v61  ;;  %v4836_v25 = vld [vmem:[#allocation4 + $0x63] sm:$0xff]  ;;  %v4837_v54 = vld [vmem:[#allocation4 + $0x6b] sm:$0xff]  ;;  %v4838_v12 = vld [vmem:[#allocation4 + $0x7b] sm:$0xff] }
 0x3c5   : > { %4434 = vst.msk [vmem:[#allocation5 + $0x120] sm:$0xff] %vm3835_vm12, %v10686_v34  ;;  %v10694_v23 = vpack.c.bf16 %v4837_v54, %v4836_v25  ;;  %v5285_v55 = vld [vmem:[#allocation4 + $0x82] sm:$0xff]  ;;  %v8809_v44 = vld [vmem:[%s12382_s3 + $0x10] sm:$0xff]   ;;  %v8810_v40 = vld [vmem:[%s12382_s3 + $0x58] sm:$0xff]  }
 0x3c6   : > { %5328 = vst.msk [vmem:[#allocation5 + $0x88] sm:$0xff] %vm3835_vm12, %v10692_v4  ;;  %v10698_v48 = vpack.c.bf16 %v5285_v55, %v5284_v36  ;;  %v4839_v9 = vld [vmem:[#allocation4 + $0x83] sm:$0xff]  ;;  %v8811_v25 = vld [vmem:[%s12382_s3 + $0x18] sm:$0xff]   ;;  %v4382_v55 = vld [vmem:[#allocation4 + $0xc] sm:$0xff] }
 0x3c7   : > { %4881 = vst.msk [vmem:[#allocation5 + $0xb8] sm:$0xff] %vm3835_vm12, %v10694_v23  ;;  %v10702_v26 = vpack.c.bf16 %v4839_v9, %v4838_v12  ;;  %v6176_v0 = vld [vmem:[#allocation4 + $0x60] sm:$0xff]  ;;  %v6177_v1 = vld [vmem:[#allocation4 + $0x68] sm:$0xff] }
 0x3c8   : > { %5329 = vst.msk [vmem:[#allocation5 + $0xc0] sm:$0xff] %vm3835_vm12, %v10698_v48  ;;  %v6208_v20 = vpack.c.bf16 %v6177_v1, %v6176_v0  ;;  %v5729_v33 = vld [vmem:[#allocation4 + $0x61] sm:$0xff]  ;;  %v5730_v11 = vld [vmem:[#allocation4 + $0x69] sm:$0xff] }
 0x3c9   : > { %4882 = vst.msk [vmem:[#allocation5 + $0xf0] sm:$0xff] %vm3835_vm12, %v10702_v26  ;;  %v5760_v62 = vpack.c.bf16 %v5730_v11, %v5729_v33  ;;  %v6179_v37 = vld [vmem:[#allocation4 + $0x80] sm:$0xff]  ;;  %v8807_v41 = vld [vmem:[%s12382_s3 + $0x8] sm:$0xff]  }
 0x3ca   : > { %v5732_v8 = vld [vmem:[#allocation4 + $0x81] sm:$0xff]  ;;  %6224 = vst.msk [vmem:[#allocation5 + $0x28] sm:$0xff] %vm3835_vm12, %v6208_v20  ;;  %v6209_v46 = vpack.c.bf16 %v6179_v37, %v6178_v14  ;;  %8298 = vmatpush3.bf16.msra.mxu1 %v8807_v41 }
 0x3cb   : > { %v5761_v57 = vpack.c.bf16 %v5732_v8, %v5731_v19  ;;  %v6624_v49 = vld [vmem:[#allocation4 + $0x64] sm:$0xff]  ;;  %5776 = vst.msk [vmem:[#allocation5 + $0x58] sm:$0xff] %vm3835_vm12, %v5760_v62  ;;  %v6626_v59 = vld [vmem:[#allocation4 + $0x7c] sm:$0xff]  ;;  %8299 = vmatprep.subr.bf16.mxu1 %v8808_v17 }
 0x3cc   : > { %v6656_v32 = vpack.c.bf16 %v6625_v27, %v6624_v49  ;;  %v6627_v45 = vld [vmem:[#allocation4 + $0x84] sm:$0xff]  ;;  %6225 = vst.msk [vmem:[#allocation5 + $0x60] sm:$0xff] %vm3835_vm12, %v6209_v46  ;;  %v4702_v46 = vld [vmem:[#allocation4 + $0x1a] sm:$0xff] }
 0x3cd   : > { %5777 = vst.msk [vmem:[#allocation5 + $0x90] sm:$0xff] %vm3835_vm12, %v5761_v57  ;;  %v6657_v52 = vpack.c.bf16 %v6627_v45, %v6626_v59  ;;  %v4381_v36 = vld [vmem:[#allocation4 + $0x4] sm:$0xff]  ;;  %v8816_v45 = vld [vmem:[%s12382_s3 + $0x70] sm:$0xff]  }
 0x3ce   : > { %6672 = vst.msk [vmem:[#allocation5 + $0x30] sm:$0xff] %vm3835_vm12, %v6656_v32  ;;  %8300 = vmatpush3.bf16.msra.mxu1 %v8809_v44  ;;  %v4413_v12 = vpack.c.bf16 %v4382_v55, %v4381_v36  ;;  %v8812_v9 = vld [vmem:[%s12382_s3 + $0x60] sm:$0xff]   ;;  %v8815_v32 = vld [vmem:[%s12382_s3 + $0x28] sm:$0xff]  }
 0x3cf   : > { %6673 = vst.msk [vmem:[#allocation5 + $0x68] sm:$0xff] %vm3835_vm12, %v6657_v52  ;;  %8301 = vmatprep.subr.bf16.mxu1 %v8810_v40  ;;  %v4703_v57 = vld [vmem:[#allocation4 + $0x22] sm:$0xff]  ;;  %v4124_v59 = vld [vmem:[#allocation4 + $0xa] sm:$0xff] }
 0x3d0   : > { %4429 = vst.msk [vmem:[#allocation5 + $0x8] sm:$0xff] %vm3835_vm12, %v4413_v12  ;;  %v4123_v27 = vld [vmem:[#allocation4 + $0x2] sm:$0xff] }
 0x3d2   : > { %8302 = vmatpush3.bf16.msra.mxu1 %v8811_v25 }
 0x3d3   : > { %8303 = vmatprep.subr.bf16.mxu1 %v8812_v9 }
 0x3d4   : > { %v8673_v21 = vpop.f32.mrb[8].mxu0 }
 0x3d5   : > { %v3717_v6 = vadd.f32 %v8673_v21, %v10590_v42  ;;  %v3708_v39 = vpop.f32.mrb[9].mxu0 }
 0x3d6   : > { %v3709_v24 = vadd.f32 %v10590_v42, %v3708_v39  ;;  %v8674_v38 = vpop.f32.mrb[10].mxu0  ;;  %8304 = vmatpush3.bf16.msra.mxu1 %v8813_v18 }
 0x3d7   : > { %v3813_v16 = vmax.f32 %v3717_v6, 0.0  ;;  %v3720_v50 = vadd.f32 %v8674_v38, %v10590_v42  ;;  %v3711_v53 = vpop.f32.mrb[11].mxu0  ;;  %8305 = vmatprep.subr.bf16.mxu1 %v8814_v5  ;;  %v8817_v6 = vld [vmem:[%s12382_s3 + $0x30] sm:$0xff]   ;;  %v8818_v38 = vld [vmem:[%s12382_s3 + $0x78] sm:$0xff]  }
 0x3d8   : > { %v3811_v56 = vmax.f32 %v3709_v24, 0.0  ;;  %v3712_v43 = vadd.f32 %v10590_v42, %v3711_v53  ;;  %v4734_v24 = vpack.c.bf16 %v4703_v57, %v4702_v46  ;;  %v4253_v53 = vld [vmem:[#allocation4 + $0xb] sm:$0xff] }
 0x3d9   : > { %3908 = vst.msk [vmem:[#allocation4 + $0xaa] sm:$0xff] %vm3835_vm12, %v3813_v16  ;;  %v3814_v61 = vmax.f32 %v3720_v50, 0.0  ;;  %v4155_v16 = vpack.c.bf16 %v4124_v59, %v4123_v27  ;;  %v4252_v50 = vld [vmem:[#allocation4 + $0x3] sm:$0xff] }
 0x3da   : > { %3906 = vst.msk [vmem:[#allocation4 + $0x92] sm:$0xff] %vm3835_vm12, %v3811_v56  ;;  %v3812_v54 = vmax.f32 %v3712_v43, 0.0  ;;  %8306 = vmatpush3.bf16.msra.mxu1 %v8815_v32  ;;  %v4284_v25 = vpack.c.bf16 %v4253_v53, %v4252_v50  ;;  %v4704_v53 = vld [vmem:[#allocation4 + $0x32] sm:$0xff] }
 0x3db   : > { %3909 = vst.msk [vmem:[#allocation4 + $0xb2] sm:$0xff] %vm3835_vm12, %v3814_v61  ;;  %8307 = vmatprep.subr.bf16.mxu1 %v8816_v45 }
 0x3dc   : > { %3907 = vst.msk [vmem:[#allocation4 + $0x9a] sm:$0xff] %vm3835_vm12, %v3812_v54 }
 0x3de   : > { %8308 = vmatpush3.bf16.msra.mxu1 %v8817_v6  ;;  %v4705_v6 = vld [vmem:[#allocation4 + $0x3a] sm:$0xff] }
 0x3df   : > { %8309 = vmatprep.subr.bf16.mxu1 %v8818_v38 }
 0x3e0   : > { %v4008_v0 = vld [vmem:[#allocation4 + $0xa9] sm:$0xff] }
 0x3e1   : > { %v4458_v1 = vld [vmem:[#allocation4 + $0xa8] sm:$0xff]  ;;  %v4006_v33 = vld [vmem:[#allocation4 + $0x91] sm:$0xff] }
 0x3e2   : > { %v4009_v20 = vld [vmem:[#allocation4 + $0xb1] sm:$0xff]  ;;  %v6182_v46 = vld [vmem:[#allocation4 + $0xa8] sm:$0xff] }
 0x3e3   : > { %v4459_v11 = vld [vmem:[#allocation4 + $0xb0] sm:$0xff]  ;;  %v10753_v14 = vpack.c.bf16 %v4009_v20, %v4008_v0  ;;  %v4007_v62 = vld [vmem:[#allocation4 + $0x99] sm:$0xff]  ;;  %v4255_v20 = vld [vmem:[#allocation4 + $0x23] sm:$0xff] }
 0x3e4   : > { %v4456_v37 = vld [vmem:[#allocation4 + $0x90] sm:$0xff]  ;;  %v4457_v19 = vld [vmem:[#allocation4 + $0x98] sm:$0xff]  ;;  %v10755_v8 = vpack.c.bf16 %v4459_v11, %v4458_v1  ;;  %v10757_v13 = vpack.c.bf16 %v4007_v62, %v4006_v33 }
 0x3e5   : > { %v10759_v49 = vpack.c.bf16 %v4457_v19, %v4456_v37  ;;  %4072 = vrot.lane.b32.xlu1 %v10753_v14, %s8928_s17  ;;  %v4393_v52 = vld [vmem:[#allocation4 + $0x94] sm:$0xff]  ;;  %v4394_v41 = vld [vmem:[#allocation4 + $0x9c] sm:$0xff]  ;;  %v4395_v17 = vld [vmem:[#allocation4 + $0xac] sm:$0xff] }
 0x3e6   : > { %3985 = vst.msk [vmem:[#allocation5 + $0x188] sm:$0xff] %vm3835_vm12, %v10755_v8  ;;  %4070 = vrot.lane.b32.xlu0 %v10757_v13, %s8928_s17  ;;  %v4396_v21 = vld [vmem:[#allocation4 + $0xb4] sm:$0xff]  ;;  %v10781_v39 = vpack.c.bf16 %v4394_v41, %v4393_v52  ;;  %v5288_v36 = vld [vmem:[#allocation4 + $0xaa] sm:$0xff]  ;;  %v6629_v41 = vld [vmem:[#allocation4 + $0x9c] sm:$0xff] }
 0x3e7   : > { %3984 = vst.msk [vmem:[#allocation5 + $0x150] sm:$0xff] %vm3835_vm12, %v10759_v49  ;;  %v10783_v44 = vpack.c.bf16 %v4396_v21, %v4395_v17  ;;  %v5286_v56 = vld [vmem:[#allocation4 + $0x92] sm:$0xff]  ;;  %v5287_v43 = vld [vmem:[#allocation4 + $0x9a] sm:$0xff]  ;;  %v5735_v5 = vld [vmem:[#allocation4 + $0xa9] sm:$0xff] }
 0x3e8   : > { %4435 = vst.msk [vmem:[#allocation5 + $0x158] sm:$0xff] %vm3835_vm12, %v10781_v39  ;;  %v4840_v61 = vld [vmem:[#allocation4 + $0x93] sm:$0xff]  ;;  %v4841_v40 = vld [vmem:[#allocation4 + $0x9b] sm:$0xff]  ;;  %v4842_v9 = vld [vmem:[#allocation4 + $0xab] sm:$0xff] }
 0x3e9   : > { %4638 = vrot.lane.b32.xlu1 %v10532_v28, %s8936_s9  ;;  %4436 = vst.msk [vmem:[#allocation5 + $0x190] sm:$0xff] %vm3835_vm12, %v10783_v44  ;;  %v8819_v28 = vld [vmem:[%s12382_s3 + $0x38] sm:$0xff]   ;;  %v10803_v54 = vpack.c.bf16 %v4841_v40, %v4840_v61  ;;  %v6180_v33 = vld [vmem:[#allocation4 + $0x90] sm:$0xff] }
 0x3ea   : > { %4510 = vrot.lane.b32.xlu0 %v10562_v31, %s8928_s17  ;;  %v10800_v31 = vpack.c.bf16 %v5287_v43, %v5286_v56  ;;  %v5289_v55 = vld [vmem:[#allocation4 + $0xb2] sm:$0xff]  ;;  %v4254_v0 = vld [vmem:[#allocation4 + $0x1b] sm:$0xff]  ;;  %8310 = vmatpush3.bf16.msra.mxu1 %v8819_v28  ;;  %v4735_v28 = vpack.c.bf16 %v4705_v6, %v4704_v53 }
 0x3eb   : > { %v10807_v12 = vpack.c.bf16 %v5289_v55, %v5288_v36  ;;  %v4843_v18 = vld [vmem:[#allocation4 + $0xb3] sm:$0xff]  ;;  %4883 = vst.msk [vmem:[#allocation5 + $0x128] sm:$0xff] %vm3835_vm12, %v10803_v54  ;;  %v4285_v21 = vpack.c.bf16 %v4255_v20, %v4254_v0 }
 0x3ec   : > { %5330 = vst.msk [vmem:[#allocation5 + $0xf8] sm:$0xff] %vm3835_vm12, %v10800_v31  ;;  %v10811_v1 = vpack.c.bf16 %v4843_v18, %v4842_v9  ;;  %v6181_v11 = vld [vmem:[#allocation4 + $0x98] sm:$0xff]  ;;  %v6183_v27 = vld [vmem:[#allocation4 + $0xb0] sm:$0xff] }
 0x3ed   : > { %4766 = vrot.lane.b32.xlu1 %v4734_v24, %s8944_s8  ;;  %5331 = vst.msk [vmem:[#allocation5 + $0x130] sm:$0xff] %vm3835_vm12, %v10807_v12  ;;  %v6210_v62 = vpack.c.bf16 %v6181_v11, %v6180_v33  ;;  %v5733_v37 = vld [vmem:[#allocation4 + $0x91] sm:$0xff]  ;;  %v5734_v19 = vld [vmem:[#allocation4 + $0x99] sm:$0xff]  ;;  %v6211_v59 = vpack.c.bf16 %v6183_v27, %v6182_v46  ;;  %v4708_v27 = vld [vmem:[#allocation4 + $0x62] sm:$0xff] }
 0x3ee   : > { %4187 = vrot.lane.b32.xlu0 %v4155_v16, %s8936_s9  ;;  %4884 = vst.msk [vmem:[#allocation5 + $0x160] sm:$0xff] %vm3835_vm12, %v10811_v1  ;;  %v5762_v57 = vpack.c.bf16 %v5734_v19, %v5733_v37  ;;  %v5736_v32 = vld [vmem:[#allocation4 + $0xb1] sm:$0xff]  ;;  %v4257_v19 = vld [vmem:[#allocation4 + $0x3b] sm:$0xff] }
 0x3ef   : > { %6226 = vst.msk [vmem:[#allocation5 + $0x98] sm:$0xff] %vm3835_vm12, %v6210_v62  ;;  %v5763_v45 = vpack.c.bf16 %v5736_v32, %v5735_v5  ;;  %v6628_v52 = vld [vmem:[#allocation4 + $0x94] sm:$0xff]  ;;  %v6630_v17 = vld [vmem:[#allocation4 + $0xac] sm:$0xff]  ;;  %6227 = vst.msk [vmem:[#allocation5 + $0xd0] sm:$0xff] %vm3835_vm12, %v6211_v59 }
 0x3f0   : > { %5778 = vst.msk [vmem:[#allocation5 + $0xc8] sm:$0xff] %vm3835_vm12, %v5762_v57  ;;  %v6658_v38 = vpack.c.bf16 %v6629_v41, %v6628_v52  ;;  %v6631_v16 = vld [vmem:[#allocation4 + $0xb4] sm:$0xff]  ;;  %v4706_v33 = vld [vmem:[#allocation4 + $0x4a] sm:$0xff] }
 0x3f1   : > { %4512 = vrot.lane.b32.xlu1 %v10617_v63, %s8928_s17  ;;  %5779 = vst.msk [vmem:[#allocation5 + $0x100] sm:$0xff] %vm3835_vm12, %v5763_v45  ;;  %v6659_v50 = vpack.c.bf16 %v6631_v16, %v6630_v17  ;;  %v4707_v9 = vld [vmem:[#allocation4 + $0x52] sm:$0xff]  ;;  %v4709_v5 = vld [vmem:[#allocation4 + $0x6a] sm:$0xff] }
 0x3f2   : > { %4316 = vrot.lane.b32.xlu0 %v4284_v25, %s8944_s8  ;;  %6674 = vst.msk [vmem:[#allocation5 + $0xa0] sm:$0xff] %vm3835_vm12, %v6658_v38  ;;  %v4736_v62 = vpack.c.bf16 %v4707_v9, %v4706_v33  ;;  %v4256_v37 = vld [vmem:[#allocation4 + $0x33] sm:$0xff]  ;;  %v4258_v46 = vld [vmem:[#allocation4 + $0x4b] sm:$0xff]  ;;  %v4737_v53 = vpack.c.bf16 %v4709_v5, %v4708_v27 }
 0x3f3   : > { %6675 = vst.msk [vmem:[#allocation5 + $0xd8] sm:$0xff] %vm3835_vm12, %v6659_v50  ;;  %v4259_v57 = vld [vmem:[#allocation4 + $0x53] sm:$0xff] }
 0x3f5   : > { %4189 = vrot.lane.b32.xlu1 %v4734_v24, %s8936_s9 }
 0x3f6   : > { %4640 = vrot.lane.b32.xlu0 %v10615_v58, %s8936_s9 }
 0x3f9   : > { %4318 = vrot.lane.b32.xlu1 %v4285_v21, %s8944_s8  ;;  %v10856_v21 = vpack.c.bf16 %v4259_v57, %v4258_v46 }
 0x3fa   : > { %4768 = vrot.lane.b32.xlu0 %v4735_v28, %s8944_s8 }
 0x3fb   : > { %v8677_v56 = vpop.f32.mrb[12].mxu0 }
 0x3fc   : > { %v3733_v24 = vadd.f32 %v8677_v56, %v10590_v42  ;;  %v3724_v43 = vpop.f32.mrb[13].mxu0 }
 0x3fd   : > { %v3725_v61 = vadd.f32 %v10590_v42, %v3724_v43  ;;  %v8678_v40 = vpop.f32.mrb[14].mxu0  ;;  %4642 = vrot.lane.b32.xlu1 %v10610_v29, %s8936_s9  ;;  %v10845_v29 = vpack.c.bf16 %v4257_v19, %v4256_v37  ;;  %v4260_v37 = vld [vmem:[#allocation4 + $0x63] sm:$0xff]  ;;  %v4261_v19 = vld [vmem:[#allocation4 + $0x6b] sm:$0xff] }
 0x3fe   : > { %v3817_v25 = vmax.f32 %v3733_v24, 0.0  ;;  %v3736_v36 = vadd.f32 %v8678_v40, %v10590_v42  ;;  %v3727_v55 = vpop.f32.mrb[15].mxu0  ;;  %4514 = vrot.lane.b32.xlu0 %v10613_v10, %s8928_s17  ;;  %v4711_v24 = vld [vmem:[#allocation4 + $0x82] sm:$0xff] }
 0x3ff   : > { %v3815_v18 = vmax.f32 %v3725_v61, 0.0  ;;  %v3728_v0 = vadd.f32 %v10590_v42, %v3727_v55 }
 0x400   : > { %3912 = vst.msk [vmem:[#allocation4 + $0xda] sm:$0xff] %vm3835_vm12, %v3817_v25  ;;  %v3818_v20 = vmax.f32 %v3736_v36, 0.0 }
 0x401   : > { %3910 = vst.msk [vmem:[#allocation4 + $0xc2] sm:$0xff] %vm3835_vm12, %v3815_v18  ;;  %v3816_v11 = vmax.f32 %v3728_v0, 0.0  ;;  %4770 = vrot.lane.b32.xlu1 %v4736_v62, %s8944_s8  ;;  %v4710_v18 = vld [vmem:[#allocation4 + $0x7a] sm:$0xff] }
 0x402   : > { %3913 = vst.msk [vmem:[#allocation4 + $0xe2] sm:$0xff] %vm3835_vm12, %v3818_v20  ;;  %4191 = vrot.lane.b32.xlu0 %v4735_v28, %s8936_s9 }
 0x403   : > { %3911 = vst.msk [vmem:[#allocation4 + $0xca] sm:$0xff] %vm3835_vm12, %v3816_v11 }
 0x405   : > { %4516 = vrot.lane.b32.xlu1 %v10670_v2, %s8928_s17 }
 0x406   : > { %4320 = vrot.lane.b32.xlu0 %v10845_v29, %s8944_s8 }
 0x407   : > { %v3948_v17 = vld [vmem:[#allocation4 + $0xd8] sm:$0xff] }
 0x408   : > { %v3946_v32 = vld [vmem:[#allocation4 + $0xc0] sm:$0xff] }
 0x409   : > { %4193 = vrot.lane.b32.xlu1 %v4736_v62, %s8936_s9  ;;  %v3949_v38 = vld [vmem:[#allocation4 + $0xe0] sm:$0xff]  ;;  %v4738_v62 = vpack.c.bf16 %v4711_v24, %v4710_v18 }
 0x40a   : > { %v3947_v59 = vld [vmem:[#allocation4 + $0xc8] sm:$0xff]  ;;  %4644 = vrot.lane.b32.xlu0 %v10668_v60, %s8936_s9  ;;  %v4399_v16 = vld [vmem:[#allocation4 + $0xdc] sm:$0xff]  ;;  %v10862_v28 = vpack.c.bf16 %v3949_v38, %v3948_v17 }
 0x40b   : > { %v10854_v45 = vpack.c.bf16 %v3947_v59, %v3946_v32  ;;  %v4397_v52 = vld [vmem:[#allocation4 + $0xc4] sm:$0xff]  ;;  %v4398_v41 = vld [vmem:[#allocation4 + $0xcc] sm:$0xff]  ;;  %v5292_v36 = vld [vmem:[#allocation4 + $0xda] sm:$0xff] }
 0x40c   : > { %v10858_v6 = vpack.c.bf16 %v4398_v41, %v4397_v52  ;;  %v4400_v50 = vld [vmem:[#allocation4 + $0xe4] sm:$0xff]  ;;  %3987 = vst.msk [vmem:[#allocation5 + $0x1f8] sm:$0xff] %vm3835_vm12, %v10862_v28  ;;  %v4846_v20 = vld [vmem:[#allocation4 + $0xdb] sm:$0xff] }
 0x40d   : > { %3986 = vst.msk [vmem:[#allocation5 + $0x1c0] sm:$0xff] %vm3835_vm12, %v10854_v45  ;;  %v10864_v56 = vpack.c.bf16 %v4400_v50, %v4399_v16  ;;  %4322 = vrot.lane.b32.xlu1 %v10856_v21, %s8944_s8  ;;  %v5290_v60 = vld [vmem:[#allocation4 + $0xc2] sm:$0xff]  ;;  %v5291_v43 = vld [vmem:[#allocation4 + $0xca] sm:$0xff]  ;;  %v6186_v52 = vld [vmem:[#allocation4 + $0xd8] sm:$0xff] }
 0x40e   : > { %4437 = vst.msk [vmem:[#allocation5 + $0x1c8] sm:$0xff] %vm3835_vm12, %v10858_v6  ;;  %4772 = vrot.lane.b32.xlu0 %v4737_v53, %s8944_s8  ;;  %v10875_v61 = vpack.c.bf16 %v5291_v43, %v5290_v60  ;;  %v4844_v40 = vld [vmem:[#allocation4 + $0xc3] sm:$0xff]  ;;  %v4845_v25 = vld [vmem:[#allocation4 + $0xcb] sm:$0xff]  ;;  %v5739_v16 = vld [vmem:[#allocation4 + $0xd9] sm:$0xff] }
 0x40f   : > { %4438 = vst.msk [vmem:[#allocation5 + $0x200] sm:$0xff] %vm3835_vm12, %v10864_v56  ;;  %v10879_v55 = vpack.c.bf16 %v4845_v25, %v4844_v40  ;;  %v5293_v9 = vld [vmem:[#allocation4 + $0xe2] sm:$0xff]  ;;  %v6633_v43 = vld [vmem:[#allocation4 + $0xcc] sm:$0xff] }
 0x410   : > { %5332 = vst.msk [vmem:[#allocation5 + $0x168] sm:$0xff] %vm3835_vm12, %v10875_v61  ;;  %v10885_v0 = vpack.c.bf16 %v5293_v9, %v5292_v36  ;;  %v4847_v33 = vld [vmem:[#allocation4 + $0xe3] sm:$0xff]  ;;  %v10900_v36 = vpack.c.bf16 %v4261_v19, %v4260_v37 }
 0x411   : > { %4646 = vrot.lane.b32.xlu1 %v10664_v15, %s8936_s9  ;;  %4885 = vst.msk [vmem:[#allocation5 + $0x198] sm:$0xff] %vm3835_vm12, %v10879_v55  ;;  %v10889_v15 = vpack.c.bf16 %v4847_v33, %v4846_v20  ;;  %v6184_v57 = vld [vmem:[#allocation4 + $0xc0] sm:$0xff]  ;;  %v6185_v27 = vld [vmem:[#allocation4 + $0xc8] sm:$0xff] }
 0x412   : > { %4518 = vrot.lane.b32.xlu0 %v10666_v47, %s8928_s17  ;;  %5333 = vst.msk [vmem:[#allocation5 + $0x1a0] sm:$0xff] %vm3835_vm12, %v10885_v0  ;;  %v5737_v5 = vld [vmem:[#allocation4 + $0xc1] sm:$0xff]  ;;  %v6212_v32 = vpack.c.bf16 %v6185_v27, %v6184_v57  ;;  %v5738_v59 = vld [vmem:[#allocation4 + $0xc9] sm:$0xff] }
 0x413   : > { %v4065_v11 = vpop.permute.xlu1 %4064  ;;  %4886 = vst.msk [vmem:[#allocation5 + $0x1d0] sm:$0xff] %vm3835_vm12, %v10889_v15  ;;  %v6187_v41 = vld [vmem:[#allocation4 + $0xe0] sm:$0xff]  ;;  %v5764_v17 = vpack.c.bf16 %v5738_v59, %v5737_v5  ;;  %v4712_v5 = vld [vmem:[#allocation4 + $0x92] sm:$0xff] }
 0x414   : > { %4110 = vst.msk [vmem:[#allocation5 + $0xa8] sm:$0xff] %vm4106_vm14, %v4065_v11  ;;  %v6213_v38 = vpack.c.bf16 %v6187_v41, %v6186_v52  ;;  %v5740_v50 = vld [vmem:[#allocation4 + $0xe1] sm:$0xff] }
 0x415   : > { %v4063_v46 = vpop.permute.xlu0 %4062  ;;  %4774 = vrot.lane.b32.xlu1 %v4738_v62, %s8944_s8  ;;  %v6632_v60 = vld [vmem:[#allocation4 + $0xc4] sm:$0xff]  ;;  %6228 = vst.msk [vmem:[#allocation5 + $0x108] sm:$0xff] %vm3835_vm12, %v6212_v32  ;;  %v5765_v24 = vpack.c.bf16 %v5740_v50, %v5739_v16  ;;  %v6634_v40 = vld [vmem:[#allocation4 + $0xdc] sm:$0xff]  ;;  %5780 = vst.msk [vmem:[#allocation5 + $0x138] sm:$0xff] %vm3835_vm12, %v5764_v17 }
 0x416   : > { %4109 = vst.msk [vmem:[#allocation5 + $0x70] sm:$0xff] %vm4106_vm14, %v4063_v46  ;;  %4195 = vrot.lane.b32.xlu0 %v4737_v53, %s8936_s9  ;;  %v6635_v25 = vld [vmem:[#allocation4 + $0xe4] sm:$0xff]  ;;  %v6660_v9 = vpack.c.bf16 %v6633_v43, %v6632_v60  ;;  %v4262_v53 = vld [vmem:[#allocation4 + $0x7b] sm:$0xff]  ;;  %v4715_v16 = vld [vmem:[#allocation4 + $0xb2] sm:$0xff] }
 0x417   : > { %6229 = vst.msk [vmem:[#allocation5 + $0x140] sm:$0xff] %vm3835_vm12, %v6213_v38  ;;  %v6661_v18 = vpack.c.bf16 %v6635_v25, %v6634_v40  ;;  %5781 = vst.msk [vmem:[#allocation5 + $0x170] sm:$0xff] %vm3835_vm12, %v5765_v24  ;;  %v4263_v20 = vld [vmem:[#allocation4 + $0x83] sm:$0xff]  ;;  %v4713_v11 = vld [vmem:[#allocation4 + $0x9a] sm:$0xff] }
 0x418   : > { %6676 = vst.msk [vmem:[#allocation5 + $0x110] sm:$0xff] %vm3835_vm12, %v6660_v9  ;;  %v10916_v27 = vpack.c.bf16 %v4263_v20, %v4262_v53  ;;  %v4739_v41 = vpack.c.bf16 %v4713_v11, %v4712_v5  ;;  %v4460_v60 = vld [vmem:[#allocation4 + $0xc0] sm:$0xff]  ;;  %v4461_v24 = vld [vmem:[#allocation4 + $0xc8] sm:$0xff]  ;;  %v4264_v43 = vld [vmem:[#allocation4 + $0x93] sm:$0xff] }
 0x419   : > { %4520 = vrot.lane.b32.xlu1 %v10759_v49, %s8928_s17  ;;  %6677 = vst.msk [vmem:[#allocation5 + $0x148] sm:$0xff] %vm3835_vm12, %v6661_v18  ;;  %v4265_v40 = vld [vmem:[#allocation4 + $0x9b] sm:$0xff]  ;;  %v4485_v25 = vpack.c.bf16 %v4461_v24, %v4460_v60  ;;  %v4266_v20 = vld [vmem:[#allocation4 + $0xab] sm:$0xff] }
 0x41a   : > { %4324 = vrot.lane.b32.xlu0 %v10900_v36, %s8944_s8  ;;  %v10933_v9 = vpack.c.bf16 %v4265_v40, %v4264_v43  ;;  %v4588_v18 = vld [vmem:[#allocation4 + $0xc1] sm:$0xff] }
 0x41b   : > { %v8821_v53 = vld [vmem:[%s12382_s3 + $0x80] sm:$0xff]   ;;  %v8822_v11 = vld [vmem:[%s12382_s3 + $0xc8] sm:$0xff]  }
 0x41c   : > { %v8681_v33 = vpop.f32.mrb[16].mxu0 }
 0x41d   : > { %4197 = vrot.lane.b32.xlu1 %v4738_v62, %s8936_s9  ;;  %v3749_v37 = vadd.f32 %v8681_v33, %v10590_v42  ;;  %v3740_v19 = vpop.f32.mrb[17].mxu0  ;;  %v4267_v33 = vld [vmem:[#allocation4 + $0xb3] sm:$0xff] }
 0x41e   : > { %4648 = vrot.lane.b32.xlu0 %v10757_v13, %s8936_s9  ;;  %v3741_v46 = vadd.f32 %v10590_v42, %v3740_v19  ;;  %v8682_v57 = vpop.f32.mrb[18].mxu0  ;;  %v4291_v43 = vpack.c.bf16 %v4267_v33, %v4266_v20  ;;  %v8826_v20 = vld [vmem:[%s12382_s3 + $0xd8] sm:$0xff]  }
 0x41f   : > { %v3821_v32 = vmax.f32 %v3749_v37, 0.0  ;;  %v3752_v59 = vadd.f32 %v8682_v57, %v10590_v42  ;;  %v3743_v52 = vpop.f32.mrb[19].mxu0  ;;  %v8823_v37 = vld [vmem:[%s12382_s3 + $0x88] sm:$0xff]  }
 0x420   : > { %v3819_v17 = vmax.f32 %v3741_v46, 0.0  ;;  %v3744_v62 = vadd.f32 %v10590_v42, %v3743_v52  ;;  %v4714_v42 = vld [vmem:[#allocation4 + $0xaa] sm:$0xff]  ;;  %v4716_v46 = vld [vmem:[#allocation4 + $0xc2] sm:$0xff] }
 0x421   : > { %4326 = vrot.lane.b32.xlu1 %v10916_v27, %s8944_s8  ;;  %3916 = vst.msk [vmem:[#allocation4 + $0x10a] sm:$0xff] %vm3835_vm12, %v3821_v32  ;;  %v3822_v13 = vmax.f32 %v3752_v59, 0.0  ;;  %v4740_v50 = vpack.c.bf16 %v4715_v16, %v4714_v42  ;;  %v8824_v16 = vld [vmem:[%s12382_s3 + $0xd0] sm:$0xff]  }
 0x422   : > { %4776 = vrot.lane.b32.xlu0 %v4739_v41, %s8944_s8  ;;  %3914 = vst.msk [vmem:[#allocation4 + $0xf2] sm:$0xff] %vm3835_vm12, %v3819_v17  ;;  %v3820_v38 = vmax.f32 %v3744_v62, 0.0 }
 0x423   : > { %3917 = vst.msk [vmem:[#allocation4 + $0x112] sm:$0xff] %vm3835_vm12, %v3822_v13 }
 0x424   : > { %3915 = vst.msk [vmem:[#allocation4 + $0xfa] sm:$0xff] %vm3835_vm12, %v3820_v38  ;;  %v4717_v38 = vld [vmem:[#allocation4 + $0xca] sm:$0xff] }
 0x425   : > { %4650 = vrot.lane.b32.xlu1 %v10753_v14, %s8936_s9  ;;  %v4589_v14 = vld [vmem:[#allocation4 + $0xc9] sm:$0xff] }
 0x426   : > { %4522 = vrot.lane.b32.xlu0 %v10755_v8, %s8928_s17  ;;  %v8820_v8 = vld [vmem:[%s12382_s3 + $0xc0] sm:$0xff]   ;;  %v4613_v59 = vpack.c.bf16 %v4589_v14, %v4588_v18  ;;  %v4462_v18 = vld [vmem:[#allocation4 + $0xd8] sm:$0xff]  ;;  %v8825_v14 = vld [vmem:[%s12382_s3 + $0x90] sm:$0xff]  }
 0x427   : > { %8407 = vmatprep.subr.bf16.mxu0 %v8820_v8 }
 0x428   : > { %8408 = vmatpush3.bf16.msra.mxu0 %v8821_v53  ;;  %v3952_v17 = vld [vmem:[#allocation4 + $0x108] sm:$0xff]  ;;  %v4463_v53 = vld [vmem:[#allocation4 + $0xe0] sm:$0xff] }
 0x429   : > { %4778 = vrot.lane.b32.xlu1 %v4740_v50, %s8944_s8  ;;  %v3950_v19 = vld [vmem:[#allocation4 + $0xf0] sm:$0xff]  ;;  %8409 = vmatprep.subr.bf16.mxu0 %v8822_v11  ;;  %v4830_v11 = vld [vmem:[#allocation4 + $0x1b] sm:$0xff] }
 0x42a   : > { %4199 = vrot.lane.b32.xlu0 %v4739_v41, %s8936_s9  ;;  %v3953_v62 = vld [vmem:[#allocation4 + $0x110] sm:$0xff] }
 0x42b   : > { %v3951_v57 = vld [vmem:[#allocation4 + $0xf8] sm:$0xff]  ;;  %v4403_v13 = vld [vmem:[#allocation4 + $0x10c] sm:$0xff]  ;;  %v10958_v42 = vpack.c.bf16 %v3953_v62, %v3952_v17  ;;  %v4486_v17 = vpack.c.bf16 %v4463_v53, %v4462_v18  ;;  %v4719_v53 = vld [vmem:[#allocation4 + $0xe2] sm:$0xff] }
 0x42c   : > { %v4401_v5 = vld [vmem:[#allocation4 + $0xf4] sm:$0xff]  ;;  %v4402_v32 = vld [vmem:[#allocation4 + $0xfc] sm:$0xff]  ;;  %v10950_v52 = vpack.c.bf16 %v3951_v57, %v3950_v19  ;;  %8410 = vmatpush3.bf16.msra.mxu0 %v8823_v37 }
 0x42d   : > { %4524 = vrot.lane.b32.xlu1 %v4485_v25, %s8928_s17  ;;  %v10952_v41 = vpack.c.bf16 %v4402_v32, %v4401_v5  ;;  %v4404_v60 = vld [vmem:[#allocation4 + $0x114] sm:$0xff]  ;;  %3989 = vst.msk [vmem:[#allocation5 + $0x268] sm:$0xff] %vm3835_vm12, %v10958_v42  ;;  %v4741_v25 = vpack.c.bf16 %v4717_v38, %v4716_v46  ;;  %8411 = vmatprep.subr.bf16.mxu0 %v8824_v16  ;;  %v4831_v37 = vld [vmem:[#allocation4 + $0x23] sm:$0xff] }
 0x42e   : > { %4328 = vrot.lane.b32.xlu0 %v10933_v9, %s8944_s8  ;;  %3988 = vst.msk [vmem:[#allocation5 + $0x230] sm:$0xff] %vm3835_vm12, %v10950_v52  ;;  %v10965_v24 = vpack.c.bf16 %v4404_v60, %v4403_v13  ;;  %v5294_v8 = vld [vmem:[#allocation4 + $0xf2] sm:$0xff]  ;;  %v5295_v33 = vld [vmem:[#allocation4 + $0xfa] sm:$0xff]  ;;  %v4862_v57 = vpack.c.bf16 %v4831_v37, %v4830_v11  ;;  %v5296_v38 = vld [vmem:[#allocation4 + $0x10a] sm:$0xff] }
 0x42f   : > { %4439 = vst.msk [vmem:[#allocation5 + $0x238] sm:$0xff] %vm3835_vm12, %v10952_v41  ;;  %v10981_v19 = vpack.c.bf16 %v5295_v33, %v5294_v8  ;;  %v4590_v46 = vld [vmem:[#allocation4 + $0xd9] sm:$0xff]  ;;  %v4591_v60 = vld [vmem:[#allocation4 + $0xe1] sm:$0xff]  ;;  %v4269_v8 = vld [vmem:[#allocation4 + $0xcb] sm:$0xff] }
 0x430   : > { %4440 = vst.msk [vmem:[#allocation5 + $0x270] sm:$0xff] %vm3835_vm12, %v10965_v24  ;;  %v4848_v5 = vld [vmem:[#allocation4 + $0xf3] sm:$0xff]  ;;  %v4849_v32 = vld [vmem:[#allocation4 + $0xfb] sm:$0xff]  ;;  %8412 = vmatpush3.bf16.msra.mxu0 %v8825_v14  ;;  %4878 = vst.msk [vmem:[#allocation5 + $0x10] sm:$0xff] %vm3835_vm12, %v4862_v57  ;;  %v11007_v11 = vpack.c.bf16 %v4591_v60, %v4590_v46 }
 0x431   : > { %4201 = vrot.lane.b32.xlu1 %v4740_v50, %s8936_s9  ;;  %12427 = vst [vmem:[#allocation15_spill] sm:$0xff] %v10981_v19  ;;  %v8827_v62 = vld [vmem:[%s12382_s3 + $0x98] sm:$0xff]   ;;  %5334 = vst.msk [vmem:[#allocation5 + $0x1d8] sm:$0xff] %vm3835_vm12, %v10981_v19  ;;  %v10988_v13 = vpack.c.bf16 %v4849_v32, %v4848_v5  ;;  %8413 = vmatprep.subr.bf16.mxu0 %v8826_v20  ;;  %v4268_v14 = vld [vmem:[#allocation4 + $0xc3] sm:$0xff] }
 0x432   : > { %4652 = vrot.lane.b32.xlu0 %v4613_v59, %s8936_s9  ;;  %v5297_v16 = vld [vmem:[#allocation4 + $0x112] sm:$0xff]  ;;  %v8829_v20 = vld [vmem:[%s12382_s3 + $0xa0] sm:$0xff]   ;;  %v8830_v32 = vld [vmem:[%s12382_s3 + $0xe8] sm:$0xff]  }
 0x433   : > { %v4069_v50 = vpop.permute.xlu1 %4068  ;;  %12428 = vst [vmem:[#allocation12_spill] sm:$0xff] %v10988_v13  ;;  %4887 = vst.msk [vmem:[#allocation5 + $0x208] sm:$0xff] %vm3835_vm12, %v10988_v13  ;;  %v4851_v18 = vld [vmem:[#allocation4 + $0x113] sm:$0xff]  ;;  %v5743_v60 = vld [vmem:[#allocation4 + $0x109] sm:$0xff] }
 0x434   : > { %4112 = vst.msk [vmem:[#allocation5 + $0x118] sm:$0xff] %vm4106_vm14, %v4069_v50  ;;  %v4067_v40 = vpop.permute.xlu0 %4066  ;;  %v8828_v50 = vld [vmem:[%s12382_s3 + $0xe0] sm:$0xff]   ;;  %8414 = vmatpush3.bf16.msra.mxu0 %v8827_v62  ;;  %v6188_v37 = vld [vmem:[#allocation4 + $0xf0] sm:$0xff]  ;;  %v6189_v57 = vld [vmem:[#allocation4 + $0xf8] sm:$0xff] }
 0x435   : > { %4111 = vst.msk [vmem:[#allocation5 + $0xe0] sm:$0xff] %vm4106_vm14, %v4067_v40  ;;  %4330 = vrot.lane.b32.xlu1 %v4291_v43, %s8944_s8  ;;  %v10995_v43 = vpack.c.bf16 %v5297_v16, %v5296_v38  ;;  %v4850_v40 = vld [vmem:[#allocation4 + $0x10b] sm:$0xff]  ;;  %8415 = vmatprep.subr.bf16.mxu0 %v8828_v50  ;;  %v5742_v38 = vld [vmem:[#allocation4 + $0xf9] sm:$0xff] }
 0x436   : > { %4780 = vrot.lane.b32.xlu0 %v4741_v25, %s8944_s8  ;;  %v11005_v33 = vpack.c.bf16 %v4851_v18, %v4850_v40  ;;  %v5741_v5 = vld [vmem:[#allocation4 + $0xf1] sm:$0xff]  ;;  %v6190_v16 = vld [vmem:[#allocation4 + $0x108] sm:$0xff]  ;;  %v4292_v40 = vpack.c.bf16 %v4269_v8, %v4268_v14  ;;  %v11028_v8 = vld [vmem:[%s12381_s2] ss:$0 sm:$0xff] }
 0x437   : > { %12429 = vst [vmem:[#allocation14_spill] sm:$0xff] %v10995_v43  ;;  %5335 = vst.msk [vmem:[#allocation5 + $0x210] sm:$0xff] %vm3835_vm12, %v10995_v43  ;;  %v5766_v46 = vpack.c.bf16 %v5742_v38, %v5741_v5  ;;  %v6191_v62 = vld [vmem:[#allocation4 + $0x110] sm:$0xff]  ;;  %v6637_v43 = vld [vmem:[#allocation4 + $0xfc] sm:$0xff] }
 0x438   : > { %4888 = vst.msk [vmem:[#allocation5 + $0x240] sm:$0xff] %vm3835_vm12, %v11005_v33  ;;  %v5744_v50 = vld [vmem:[#allocation4 + $0x111] sm:$0xff]  ;;  %8416 = vmatpush3.bf16.msra.mxu0 %v8829_v20 }
 0x439   : > { %4074 = vrot.lane.b32.xlu1 %v4613_v59, %s8928_s17  ;;  %v4718_v59 = vld [vmem:[#allocation4 + $0xda] sm:$0xff]  ;;  %5782 = vst.msk [vmem:[#allocation5 + $0x1a8] sm:$0xff] %vm3835_vm12, %v5766_v46  ;;  %v6638_v38 = vld [vmem:[#allocation4 + $0x10c] sm:$0xff]  ;;  %8417 = vmatprep.subr.bf16.mxu0 %v8830_v32 }
 0x43a   : > { %4526 = vrot.lane.b32.xlu0 %v4486_v17, %s8928_s17  ;;  %v6214_v17 = vpack.c.bf16 %v6189_v57, %v6188_v37  ;;  %v6636_v18 = vld [vmem:[#allocation4 + $0xf4] sm:$0xff]  ;;  %v11018_v13 = vpack.c.bf16 %v4719_v53, %v4718_v59  ;;  %v8831_v37 = vld [vmem:[%s12382_s3 + $0xa8] sm:$0xff]   ;;  %v5767_v57 = vpack.c.bf16 %v5744_v50, %v5743_v60 }
 0x43b   : > { %v6662_v5 = vpack.c.bf16 %v6637_v43, %v6636_v18  ;;  %v6639_v14 = vld [vmem:[#allocation4 + $0x114] sm:$0xff] }
 0x43c   : > { %6230 = vst.msk [vmem:[#allocation5 + $0x178] sm:$0xff] %vm3835_vm12, %v6214_v17  ;;  %v8832_v20 = vld [vmem:[%s12382_s3 + $0xf0] sm:$0xff]   ;;  %v6663_v43 = vpack.c.bf16 %v6639_v14, %v6638_v38  ;;  %5783 = vst.msk [vmem:[#allocation5 + $0x1e0] sm:$0xff] %vm3835_vm12, %v5767_v57  ;;  %8418 = vmatpush3.bf16.msra.mxu0 %v8831_v37  ;;  %v8834_v50 = vld [vmem:[%s12382_s3 + $0xf8] sm:$0xff]  }
 0x43d   : > { %4203 = vrot.lane.b32.xlu1 %v4741_v25, %s8936_s9  ;;  %v6215_v25 = vpack.c.bf16 %v6191_v62, %v6190_v16  ;;  %6678 = vst.msk [vmem:[#allocation5 + $0x180] sm:$0xff] %vm3835_vm12, %v6662_v5  ;;  %8419 = vmatprep.subr.bf16.mxu0 %v8832_v20  ;;  %v4465_v37 = vld [vmem:[#allocation4 + $0xf8] sm:$0xff] }
 0x43e   : > { %4654 = vrot.lane.b32.xlu0 %v11007_v11, %s8936_s9  ;;  %6679 = vst.msk [vmem:[#allocation5 + $0x1b8] sm:$0xff] %vm3835_vm12, %v6663_v43  ;;  %v4592_v5 = vld [vmem:[#allocation4 + $0xf1] sm:$0xff]  ;;  %v4593_v38 = vld [vmem:[#allocation4 + $0xf9] sm:$0xff] }
 0x43f   : > { %6231 = vst.msk [vmem:[#allocation5 + $0x1b0] sm:$0xff] %vm3835_vm12, %v6215_v25 }
 0x440   : > { %v8685_v19 = vpop.f32.mrb[20].mxu0 }
 0x441   : > { %4332 = vrot.lane.b32.xlu1 %v4292_v40, %s8944_s8  ;;  %v3765_v59 = vadd.f32 %v11028_v8, %v8685_v19  ;;  %v3756_v53 = vpop.f32.mrb[21].mxu0  ;;  %v8833_v40 = vld [vmem:[%s12382_s3 + $0xb0] sm:$0xff]  }
 0x442   : > { %4782 = vrot.lane.b32.xlu0 %v11018_v13, %s8944_s8  ;;  %v3757_v17 = vadd.f32 %v11028_v8, %v3756_v53  ;;  %v8686_v16 = vpop.f32.mrb[22].mxu0  ;;  %8420 = vmatpush3.bf16.msra.mxu0 %v8833_v40  ;;  %v4720_v40 = vld [vmem:[#allocation4 + $0xf2] sm:$0xff] }
 0x443   : > { %v3825_v19 = vmax.f32 %v3765_v59, 0.0  ;;  %v3768_v32 = vadd.f32 %v11028_v8, %v8686_v16  ;;  %v3759_v46 = vpop.f32.mrb[23].mxu0  ;;  %8421 = vmatprep.subr.bf16.mxu0 %v8834_v50 }
 0x444   : > { %v3823_v62 = vmax.f32 %v3757_v17, 0.0  ;;  %v3760_v60 = vadd.f32 %v11028_v8, %v3759_v46  ;;  %v4270_v46 = vld [vmem:[#allocation4 + $0xdb] sm:$0xff] }
 0x445   : > { %4958 = vrot.lane.b32.xlu1 %v10682_v30, %s8928_s17  ;;  %3920 = vst.msk [vmem:[#allocation4 + $0x13a] sm:$0xff] %vm3835_vm12, %v3825_v19  ;;  %v3826_v25 = vmax.f32 %v3768_v32, 0.0  ;;  %v8835_v30 = vld [vmem:[%s12382_s3 + $0xb8] sm:$0xff]   ;;  %v11075_v32 = vpack.c.bf16 %v4593_v38, %v4592_v5 }
 0x446   : > { %5406 = vrot.lane.b32.xlu0 %v10845_v29, %s8928_s17  ;;  %3918 = vst.msk [vmem:[#allocation4 + $0x122] sm:$0xff] %vm3835_vm12, %v3823_v62  ;;  %v3824_v18 = vmax.f32 %v3760_v60, 0.0  ;;  %8422 = vmatpush3.bf16.msra.mxu0 %v8835_v30  ;;  %v4464_v29 = vld [vmem:[#allocation4 + $0xf0] sm:$0xff]  ;;  %v4271_v62 = vld [vmem:[#allocation4 + $0xe3] sm:$0xff] }
 0x447   : > { %3921 = vst.msk [vmem:[#allocation4 + $0x142] sm:$0xff] %vm3835_vm12, %v3826_v25  ;;  %v4487_v57 = vpack.c.bf16 %v4465_v37, %v4464_v29  ;;  %v4721_v25 = vld [vmem:[#allocation4 + $0xfa] sm:$0xff]  ;;  %v4293_v30 = vpack.c.bf16 %v4271_v62, %v4270_v46 }
 0x448   : > { %3919 = vst.msk [vmem:[#allocation4 + $0x12a] sm:$0xff] %vm3835_vm12, %v3824_v18  ;;  %v11094_v37 = vpack.c.bf16 %v4721_v25, %v4720_v40 }
 0x449   : > { %5086 = vrot.lane.b32.xlu1 %v10617_v63, %s8936_s9 }
 0x44a   : > { %5534 = vrot.lane.b32.xlu0 %v10628_v3, %s8936_s9 }
 0x44d   : > { %5214 = vrot.lane.b32.xlu1 %v10615_v58, %s8944_s8  ;;  %v3954_v63 = vld [vmem:[#allocation4 + $0x120] sm:$0xff]  ;;  %v3956_v58 = vld [vmem:[#allocation4 + $0x138] sm:$0xff] }
 0x44e   : > { %5663 = vrot.lane.b32.xlu0 %v10613_v10, %s8944_s8  ;;  %v3957_v17 = vld [vmem:[#allocation4 + $0x140] sm:$0xff] }
 0x44f   : > { %v3955_v14 = vld [vmem:[#allocation4 + $0x128] sm:$0xff]  ;;  %v4407_v16 = vld [vmem:[#allocation4 + $0x13c] sm:$0xff] }
 0x450   : > { %v11071_v59 = vpack.c.bf16 %v3955_v14, %v3954_v63  ;;  %v4405_v53 = vld [vmem:[#allocation4 + $0x124] sm:$0xff]  ;;  %v4406_v20 = vld [vmem:[#allocation4 + $0x12c] sm:$0xff]  ;;  %v5300_v63 = vld [vmem:[#allocation4 + $0x13a] sm:$0xff] }
 0x451   : > { %4076 = vrot.lane.b32.xlu1 %v11007_v11, %s8928_s17  ;;  %v11073_v43 = vpack.c.bf16 %v4406_v20, %v4405_v53  ;;  %v4408_v19 = vld [vmem:[#allocation4 + $0x144] sm:$0xff]  ;;  %v11079_v11 = vpack.c.bf16 %v3957_v17, %v3956_v58  ;;  %v6514_v58 = vld [vmem:[#allocation4 + $0x13b] sm:$0xff] }
 0x452   : > { %4528 = vrot.lane.b32.xlu0 %v4487_v57, %s8928_s17  ;;  %3990 = vst.msk [vmem:[#allocation5 + $0x2a0] sm:$0xff] %vm3835_vm12, %v11071_v59  ;;  %v11081_v60 = vpack.c.bf16 %v4408_v19, %v4407_v16  ;;  %v5298_v50 = vld [vmem:[#allocation4 + $0x122] sm:$0xff]  ;;  %v5299_v29 = vld [vmem:[#allocation4 + $0x12a] sm:$0xff] }
 0x453   : > { %4441 = vst.msk [vmem:[#allocation5 + $0x2a8] sm:$0xff] %vm3835_vm12, %v11073_v43  ;;  %3991 = vst.msk [vmem:[#allocation5 + $0x2d8] sm:$0xff] %vm3835_vm12, %v11079_v11  ;;  %v11096_v57 = vpack.c.bf16 %v5299_v29, %v5298_v50  ;;  %v4852_v5 = vld [vmem:[#allocation4 + $0x123] sm:$0xff]  ;;  %v4853_v38 = vld [vmem:[#allocation4 + $0x12b] sm:$0xff] }
 0x454   : > { %4442 = vst.msk [vmem:[#allocation5 + $0x2e0] sm:$0xff] %vm3835_vm12, %v11081_v60  ;;  %v11100_v14 = vpack.c.bf16 %v4853_v38, %v4852_v5  ;;  %v5301_v53 = vld [vmem:[#allocation4 + $0x142] sm:$0xff]  ;;  %v5747_v38 = vld [vmem:[#allocation4 + $0x139] sm:$0xff] }
 0x455   : > { %4205 = vrot.lane.b32.xlu1 %v11018_v13, %s8936_s9  ;;  %5336 = vst.msk [vmem:[#allocation5 + $0x248] sm:$0xff] %vm3835_vm12, %v11096_v57  ;;  %v11106_v20 = vpack.c.bf16 %v5301_v53, %v5300_v63  ;;  %v6515_v16 = vld [vmem:[#allocation4 + $0x143] sm:$0xff] }
 0x456   : > { %4656 = vrot.lane.b32.xlu0 %v11075_v32, %s8936_s9  ;;  %12430 = vst [vmem:[#allocation13_spill] sm:$0xff] %v11100_v14  ;;  %4889 = vst.msk [vmem:[#allocation5 + $0x278] sm:$0xff] %vm3835_vm12, %v11100_v14  ;;  %v11112_v46 = vpack.c.bf16 %v6515_v16, %v6514_v58  ;;  %v6192_v62 = vld [vmem:[#allocation4 + $0x120] sm:$0xff]  ;;  %v6193_v40 = vld [vmem:[#allocation4 + $0x128] sm:$0xff] }
 0x457   : > { %v4073_v18 = vpop.permute.xlu1 %4072  ;;  %12431 = vst [vmem:[#allocation11_spill] sm:$0xff] %v11106_v20  ;;  %5337 = vst.msk [vmem:[#allocation5 + $0x280] sm:$0xff] %vm3835_vm12, %v11106_v20  ;;  %v5745_v25 = vld [vmem:[#allocation4 + $0x121] sm:$0xff]  ;;  %v6216_v50 = vpack.c.bf16 %v6193_v40, %v6192_v62  ;;  %v6641_v16 = vld [vmem:[#allocation4 + $0x12c] sm:$0xff] }
 0x458   : > { %4114 = vst.msk [vmem:[#allocation5 + $0x188] sm:$0xff] %vm4106_vm14, %v4073_v18  ;;  %v4071_v13 = vpop.permute.xlu0 %4070  ;;  %12432 = vst [vmem:[#allocation16_spill] sm:$0xff] %v11112_v46  ;;  %v5746_v18 = vld [vmem:[#allocation4 + $0x129] sm:$0xff]  ;;  %v6195_v29 = vld [vmem:[#allocation4 + $0x140] sm:$0xff] }
 0x459   : > { %4113 = vst.msk [vmem:[#allocation5 + $0x150] sm:$0xff] %vm4106_vm14, %v4071_v13  ;;  %4334 = vrot.lane.b32.xlu1 %v4293_v30, %s8944_s8  ;;  %v6194_v30 = vld [vmem:[#allocation4 + $0x138] sm:$0xff]  ;;  %v5768_v13 = vpack.c.bf16 %v5746_v18, %v5745_v25  ;;  %v5748_v63 = vld [vmem:[#allocation4 + $0x141] sm:$0xff] }
 0x45a   : > { %4784 = vrot.lane.b32.xlu0 %v11094_v37, %s8944_s8  ;;  %4890 = vst.msk [vmem:[#allocation5 + $0x2b0] sm:$0xff] %vm3835_vm12, %v11112_v46  ;;  %v6217_v5 = vpack.c.bf16 %v6195_v29, %v6194_v30  ;;  %v6640_v53 = vld [vmem:[#allocation4 + $0x124] sm:$0xff]  ;;  %6232 = vst.msk [vmem:[#allocation5 + $0x1e8] sm:$0xff] %vm3835_vm12, %v6216_v50  ;;  %v5153_v40 = vld [vmem:[#allocation4 + $0x51] sm:$0xff] }
 0x45b   : > { %v4639_v17 = vpop.permute.xlu1 %4638  ;;  %v6643_v62 = vld [vmem:[#allocation4 + $0x144] sm:$0xff]  ;;  %5784 = vst.msk [vmem:[#allocation5 + $0x218] sm:$0xff] %vm3835_vm12, %v5768_v13 }
 0x45c   : > { %v4511_v19 = vpop.permute.xlu0 %4510  ;;  %6233 = vst.msk [vmem:[#allocation5 + $0x220] sm:$0xff] %vm3835_vm12, %v6217_v5  ;;  %v5152_v50 = vld [vmem:[#allocation4 + $0x49] sm:$0xff]  ;;  %v4596_v46 = vld [vmem:[#allocation4 + $0x121] sm:$0xff] }
 0x45d   : > { %4558 = vst.msk [vmem:[#allocation5 + $0x8] sm:$0xff] %vm4106_vm14, %v4511_v19  ;;  %4960 = vrot.lane.b32.xlu1 %v10628_v3, %s8928_s17  ;;  %v5769_v3 = vpack.c.bf16 %v5748_v63, %v5747_v38  ;;  %v6642_v19 = vld [vmem:[#allocation4 + $0x13c] sm:$0xff]  ;;  %v5183_v30 = vpack.c.bf16 %v5153_v40, %v5152_v50  ;;  %v4467_v5 = vld [vmem:[#allocation4 + $0x110] sm:$0xff] }
 0x45e   : > { %5408 = vrot.lane.b32.xlu0 %v10856_v21, %s8928_s17  ;;  %4686 = vst.msk [vmem:[#allocation5 + $0x8] sm:$0xff] %vm4235_vm15, %v4639_v17  ;;  %v6664_v17 = vpack.c.bf16 %v6641_v16, %v6640_v53  ;;  %v6665_v25 = vpack.c.bf16 %v6643_v62, %v6642_v19 }
 0x45f   : > { %v4767_v58 = vpop.permute.xlu1 %4766  ;;  %5785 = vst.msk [vmem:[#allocation5 + $0x250] sm:$0xff] %vm3835_vm12, %v5769_v3 }
 0x460   : > { %4814 = vst.msk [vmem:[#allocation5 + $0x8] sm:$0xff] %vm4364_vm0, %v4767_v58  ;;  %v4188_v21 = vpop.permute.xlu0 %4187 }
 0x461   : > { %4236 = vst.msk [vmem:[#allocation5] sm:$0xff] %vm4235_vm15, %v4188_v21  ;;  %5088 = vrot.lane.b32.xlu1 %v10613_v10, %s8936_s9  ;;  %v4466_v10 = vld [vmem:[#allocation4 + $0x108] sm:$0xff] }
 0x462   : > { %5536 = vrot.lane.b32.xlu0 %v10631_v51, %s8936_s9  ;;  %6680 = vst.msk [vmem:[#allocation5 + $0x1f0] sm:$0xff] %vm3835_vm12, %v6664_v17  ;;  %6681 = vst.msk [vmem:[#allocation5 + $0x228] sm:$0xff] %vm3835_vm12, %v6665_v25  ;;  %v4488_v17 = vpack.c.bf16 %v4467_v5, %v4466_v10 }
 0x463   : > { %v4513_v18 = vpop.permute.xlu1 %4512 }
 0x464   : > { %4559 = vst.msk [vmem:[#allocation5 + $0x40] sm:$0xff] %vm4106_vm14, %v4513_v18  ;;  %v4317_v29 = vpop.permute.xlu0 %4316  ;;  %v8689_v13 = vpop.f32.mrb[24].mxu0  ;;  %v4594_v18 = vld [vmem:[#allocation4 + $0x109] sm:$0xff] }
 0x465   : > { %4365 = vst.msk [vmem:[#allocation5] sm:$0xff] %vm4364_vm0, %v4317_v29  ;;  %5216 = vrot.lane.b32.xlu1 %v5183_v30, %s8944_s8  ;;  %v3781_v38 = vadd.f32 %v11028_v8, %v8689_v13  ;;  %v3772_v63 = vpop.f32.mrb[25].mxu0  ;;  %v4595_v30 = vld [vmem:[#allocation4 + $0x111] sm:$0xff] }
 0x466   : > { %5665 = vrot.lane.b32.xlu0 %v10670_v2, %s8944_s8  ;;  %v3773_v53 = vadd.f32 %v11028_v8, %v3772_v63  ;;  %v8690_v58 = vpop.f32.mrb[26].mxu0  ;;  %v11152_v63 = vpack.c.bf16 %v4595_v30, %v4594_v18 }
 0x467   : > { %v4190_v3 = vpop.permute.xlu1 %4189  ;;  %v6689_v16 = vld [vmem:[#allocation5 + $0x8] sm:$0xff]  ;;  %v3829_v19 = vmax.f32 %v3781_v38, 0.0  ;;  %v3784_v62 = vadd.f32 %v11028_v8, %v8690_v58  ;;  %v3775_v21 = vpop.f32.mrb[27].mxu0 }
 0x468   : > { %4237 = vst.msk [vmem:[#allocation5 + $0x38] sm:$0xff] %vm4235_vm15, %v4190_v3  ;;  %v4641_v40 = vpop.permute.xlu0 %4640  ;;  %7287 = vmatprep.mubr.bf16.mxu1 %v6689_v16  ;;  %v3827_v25 = vmax.f32 %v3773_v53, 0.0  ;;  %v3776_v50 = vadd.f32 %v11028_v8, %v3775_v21  ;;  %v4273_v53 = vld [vmem:[#allocation4 + $0xfb] sm:$0xff]  ;;  %v4722_v58 = vld [vmem:[#allocation4 + $0x10a] sm:$0xff]  ;;  %v4723_v3 = vld [vmem:[#allocation4 + $0x112] sm:$0xff] }
 0x469   : > { %4687 = vst.msk [vmem:[#allocation5 + $0x40] sm:$0xff] %vm4235_vm15, %v4641_v40  ;;  %4078 = vrot.lane.b32.xlu1 %v11075_v32, %s8928_s17  ;;  %v3830_v29 = vmax.f32 %v3784_v62, 0.0  ;;  %v4272_v32 = vld [vmem:[#allocation4 + $0xf3] sm:$0xff]  ;;  %v11160_v21 = vpack.c.bf16 %v4723_v3, %v4722_v58 }
 0x46a   : > { %3924 = vst.msk [vmem:[#allocation4 + $0x16a] sm:$0xff] %vm3835_vm12, %v3829_v19  ;;  %4530 = vrot.lane.b32.xlu0 %v4488_v17, %s8928_s17  ;;  %3922 = vst.msk [vmem:[#allocation4 + $0x152] sm:$0xff] %vm3835_vm12, %v3827_v25  ;;  %v3828_v13 = vmax.f32 %v3776_v50, 0.0  ;;  %v4294_v19 = vpack.c.bf16 %v4273_v53, %v4272_v32  ;;  %v5155_v53 = vld [vmem:[#allocation4 + $0x69] sm:$0xff] }
 0x46b   : > { %v4319_v10 = vpop.permute.xlu1 %4318  ;;  %3925 = vst.msk [vmem:[#allocation4 + $0x172] sm:$0xff] %vm3835_vm12, %v3830_v29 }
 0x46c   : > { %4366 = vst.msk [vmem:[#allocation5 + $0x38] sm:$0xff] %vm4364_vm0, %v4319_v10  ;;  %v4769_v5 = vpop.permute.xlu0 %4768  ;;  %v6688_v38 = vld [vmem:[#allocation5] sm:$0xff] }
 0x46d   : > { %3923 = vst.msk [vmem:[#allocation4 + $0x15a] sm:$0xff] %vm3835_vm12, %v3828_v13  ;;  %4207 = vrot.lane.b32.xlu1 %v11094_v37, %s8936_s9  ;;  %7288 = vmatmul.mubr.bf16.vlgmr.msra.gmra.mrb[0].mxu1 %v6688_v38 }
 0x46e   : > { %4815 = vst.msk [vmem:[#allocation5 + $0x40] sm:$0xff] %vm4364_vm0, %v4769_v5  ;;  %4658 = vrot.lane.b32.xlu0 %v11152_v63, %s8936_s9 }
 0x46f   : > { %v4643_v16 = vpop.permute.xlu1 %4642 }
 0x470   : > { %v4515_v62 = vpop.permute.xlu0 %4514 }
 0x471   : > { %4560 = vst.msk [vmem:[#allocation5 + $0x78] sm:$0xff] %vm4106_vm14, %v4515_v62  ;;  %4336 = vrot.lane.b32.xlu1 %v4294_v19, %s8944_s8  ;;  %v3958_v50 = vld [vmem:[#allocation4 + $0x150] sm:$0xff]  ;;  %v3960_v5 = vld [vmem:[#allocation4 + $0x168] sm:$0xff] }
 0x472   : > { %4688 = vst.msk [vmem:[#allocation5 + $0x78] sm:$0xff] %vm4235_vm15, %v4643_v16  ;;  %4786 = vrot.lane.b32.xlu0 %v11160_v21, %s8944_s8  ;;  %v3961_v38 = vld [vmem:[#allocation4 + $0x170] sm:$0xff]  ;;  %v5154_v19 = vld [vmem:[#allocation4 + $0x61] sm:$0xff] }
 0x473   : > { %v4771_v37 = vpop.permute.xlu1 %4770  ;;  %v6695_v40 = vld [vmem:[#allocation5 + $0x38] sm:$0xff]  ;;  %v4411_v3 = vld [vmem:[#allocation4 + $0x16c] sm:$0xff] }
 0x474   : > { %4816 = vst.msk [vmem:[#allocation5 + $0x78] sm:$0xff] %vm4364_vm0, %v4771_v37  ;;  %v4192_v17 = vpop.permute.xlu0 %4191  ;;  %v3959_v18 = vld [vmem:[#allocation4 + $0x158] sm:$0xff] }
 0x475   : > { %v6696_v25 = vld [vmem:[#allocation5 + $0x40] sm:$0xff]  ;;  %4238 = vst.msk [vmem:[#allocation5 + $0x70] sm:$0xff] %vm4235_vm15, %v4192_v17  ;;  %4962 = vrot.lane.b32.xlu1 %v10631_v51, %s8928_s17  ;;  %v4409_v30 = vld [vmem:[#allocation4 + $0x154] sm:$0xff]  ;;  %v11173_v13 = vpack.c.bf16 %v3959_v18, %v3958_v50  ;;  %v11178_v51 = vpack.c.bf16 %v3961_v38, %v3960_v5  ;;  %v6390_v38 = vld [vmem:[#allocation4 + $0x16a] sm:$0xff] }
 0x476   : > { %7295 = vmatprep.mubr.bf16.mxu1 %v6696_v25  ;;  %5410 = vrot.lane.b32.xlu0 %v10900_v36, %s8928_s17  ;;  %v4410_v10 = vld [vmem:[#allocation4 + $0x15c] sm:$0xff]  ;;  %v4412_v36 = vld [vmem:[#allocation4 + $0x174] sm:$0xff] }
 0x477   : > { %7296 = vmatmul.mubr.bf16.gmra.mrb[4].mxu1 %v6695_v40  ;;  %v4517_v29 = vpop.permute.xlu1 %4516  ;;  %v11176_v58 = vpack.c.bf16 %v4410_v10, %v4409_v30  ;;  %3992 = vst.msk [vmem:[#allocation5 + $0x310] sm:$0xff] %vm3835_vm12, %v11173_v13  ;;  %v11185_v16 = vpack.c.bf16 %v4412_v36, %v4411_v3  ;;  %3993 = vst.msk [vmem:[#allocation5 + $0x348] sm:$0xff] %vm3835_vm12, %v11178_v51  ;;  %v5184_v40 = vpack.c.bf16 %v5155_v53, %v5154_v19  ;;  %v4468_v17 = vld [vmem:[#allocation4 + $0x120] sm:$0xff]  ;;  %v6388_v25 = vld [vmem:[#allocation4 + $0x152] sm:$0xff] }
 0x478   : > { %4561 = vst.msk [vmem:[#allocation5 + $0xb0] sm:$0xff] %vm4106_vm14, %v4517_v29  ;;  %v4321_v32 = vpop.permute.xlu0 %4320  ;;  %v6389_v18 = vld [vmem:[#allocation4 + $0x15a] sm:$0xff]  ;;  %v5943_v19 = vld [vmem:[#allocation4 + $0x16b] sm:$0xff] }
 0x479   : > { %4367 = vst.msk [vmem:[#allocation5 + $0x70] sm:$0xff] %vm4364_vm0, %v4321_v32  ;;  %5090 = vrot.lane.b32.xlu1 %v10670_v2, %s8936_s9  ;;  %v4469_v2 = vld [vmem:[#allocation4 + $0x128] sm:$0xff]  ;;  %v6516_v30 = vld [vmem:[#allocation4 + $0x153] sm:$0xff]  ;;  %v6517_v29 = vld [vmem:[#allocation4 + $0x15b] sm:$0xff]  ;;  %v11198_v10 = vpack.c.bf16 %v6389_v18, %v6388_v25 }
 0x47a   : > { %5538 = vrot.lane.b32.xlu0 %v10680_v22, %s8936_s9  ;;  %4443 = vst.msk [vmem:[#allocation5 + $0x318] sm:$0xff] %vm3835_vm12, %v11176_v58  ;;  %4444 = vst.msk [vmem:[#allocation5 + $0x350] sm:$0xff] %vm3835_vm12, %v11185_v16  ;;  %v11200_v5 = vpack.c.bf16 %v6517_v29, %v6516_v30  ;;  %v6391_v32 = vld [vmem:[#allocation4 + $0x172] sm:$0xff]  ;;  %v6070_v36 = vld [vmem:[#allocation4 + $0x15c] sm:$0xff]  ;;  %v4489_v20 = vpack.c.bf16 %v4469_v2, %v4468_v17 }
 0x47b   : > { %v4194_v62 = vpop.permute.xlu1 %4193  ;;  %v6703_v37 = vld [vmem:[#allocation5 + $0x78] sm:$0xff]  ;;  %v11204_v3 = vpack.c.bf16 %v6391_v32, %v6390_v38  ;;  %5338 = vst.msk [vmem:[#allocation5 + $0x2b8] sm:$0xff] %vm3835_vm12, %v11198_v10  ;;  %v6071_v18 = vld [vmem:[#allocation4 + $0x16c] sm:$0xff] }
 0x47c   : > { %4239 = vst.msk [vmem:[#allocation5 + $0xa8] sm:$0xff] %vm4235_vm15, %v4194_v62  ;;  %7303 = vmatprep.mubr.bf16.mxu1 %v6703_v37  ;;  %v4645_v50 = vpop.permute.xlu0 %4644  ;;  %v6069_v53 = vld [vmem:[#allocation4 + $0x154] sm:$0xff] }
 0x47d   : > { %4689 = vst.msk [vmem:[#allocation5 + $0xb0] sm:$0xff] %vm4235_vm15, %v4645_v50  ;;  %5218 = vrot.lane.b32.xlu1 %v5184_v40, %s8944_s8  ;;  %12433 = vst [vmem:[#allocation17_spill] sm:$0xff] %v11204_v3  ;;  %v5944_v62 = vld [vmem:[#allocation4 + $0x173] sm:$0xff]  ;;  %v4597_v50 = vld [vmem:[#allocation4 + $0x129] sm:$0xff]  ;;  %v11208_v40 = vpack.c.bf16 %v6070_v36, %v6069_v53 }
 0x47e   : > { %5667 = vrot.lane.b32.xlu0 %v10666_v47, %s8944_s8  ;;  %v11210_v25 = vpack.c.bf16 %v5944_v62, %v5943_v19  ;;  %4891 = vst.msk [vmem:[#allocation5 + $0x2e8] sm:$0xff] %vm3835_vm12, %v11200_v5  ;;  %v6072_v30 = vld [vmem:[#allocation4 + $0x174] sm:$0xff]  ;;  %5339 = vst.msk [vmem:[#allocation5 + $0x2f0] sm:$0xff] %vm3835_vm12, %v11204_v3 }
 0x47f   : > { %v4323_v37 = vpop.permute.xlu1 %4322  ;;  %v6196_v29 = vld [vmem:[#allocation4 + $0x150] sm:$0xff]  ;;  %v11217_v14 = vpack.c.bf16 %v6072_v30, %v6071_v18  ;;  %v6197_v53 = vld [vmem:[#allocation4 + $0x158] sm:$0xff]  ;;  %6682 = vst.msk [vmem:[#allocation5 + $0x260] sm:$0xff] %vm3835_vm12, %v11208_v40 }
 0x480   : > { %12434 = vst [vmem:[#allocation18_spill] sm:$0xff] %v11210_v25  ;;  %4368 = vst.msk [vmem:[#allocation5 + $0xa8] sm:$0xff] %vm4364_vm0, %v4323_v37  ;;  %v4773_v38 = vpop.permute.xlu0 %4772  ;;  %v6702_v32 = vld [vmem:[#allocation5 + $0x70] sm:$0xff]  ;;  %v6218_v19 = vpack.c.bf16 %v6197_v53, %v6196_v29  ;;  %v5750_v62 = vld [vmem:[#allocation4 + $0x159] sm:$0xff]  ;;  %v11230_v53 = vpack.c.bf16 %v4597_v50, %v4596_v46 }
 0x481   : > { %v5749_v36 = vld [vmem:[#allocation4 + $0x151] sm:$0xff]  ;;  %4817 = vst.msk [vmem:[#allocation5 + $0xb0] sm:$0xff] %vm4364_vm0, %v4773_v38  ;;  %4080 = vrot.lane.b32.xlu1 %v11152_v63, %s8928_s17  ;;  %7304 = vmatmul.mubr.bf16.gmra.mrb[8].mxu1 %v6702_v32  ;;  %v6198_v37 = vld [vmem:[#allocation4 + $0x168] sm:$0xff] }
 0x482   : > { %4892 = vst.msk [vmem:[#allocation5 + $0x320] sm:$0xff] %vm3835_vm12, %v11210_v25  ;;  %v6199_v17 = vld [vmem:[#allocation4 + $0x170] sm:$0xff]  ;;  %4532 = vrot.lane.b32.xlu0 %v4489_v20, %s8928_s17  ;;  %v5770_v2 = vpack.c.bf16 %v5750_v62, %v5749_v36  ;;  %6683 = vst.msk [vmem:[#allocation5 + $0x298] sm:$0xff] %vm3835_vm12, %v11217_v14  ;;  %v4724_v20 = vld [vmem:[#allocation4 + $0x122] sm:$0xff] }
 0x483   : > { %v6219_v18 = vpack.c.bf16 %v6199_v17, %v6198_v37  ;;  %v5751_v30 = vld [vmem:[#allocation4 + $0x169] sm:$0xff]  ;;  %v5752_v38 = vld [vmem:[#allocation4 + $0x171] sm:$0xff]  ;;  %v4647_v63 = vpop.permute.xlu1 %4646  ;;  %6234 = vst.msk [vmem:[#allocation5 + $0x258] sm:$0xff] %vm3835_vm12, %v6218_v19 }
 0x484   : > { %v5771_v32 = vpack.c.bf16 %v5752_v38, %v5751_v30  ;;  %v4519_v29 = vpop.permute.xlu0 %4518  ;;  %v4274_v25 = vld [vmem:[#allocation4 + $0x10b] sm:$0xff]  ;;  %v4275_v3 = vld [vmem:[#allocation4 + $0x113] sm:$0xff]  ;;  %5786 = vst.msk [vmem:[#allocation5 + $0x288] sm:$0xff] %vm3835_vm12, %v5770_v2 }
 0x485   : > { %6235 = vst.msk [vmem:[#allocation5 + $0x290] sm:$0xff] %vm3835_vm12, %v6219_v18  ;;  %4209 = vrot.lane.b32.xlu1 %v11160_v21, %s8936_s9  ;;  %v4725_v36 = vld [vmem:[#allocation4 + $0x12a] sm:$0xff]  ;;  %v4295_v50 = vpack.c.bf16 %v4275_v3, %v4274_v25 }
 0x486   : > { %4562 = vst.msk [vmem:[#allocation5 + $0xe8] sm:$0xff] %vm4106_vm14, %v4519_v29  ;;  %4660 = vrot.lane.b32.xlu0 %v11230_v53, %s8936_s9  ;;  %v11242_v37 = vpack.c.bf16 %v4725_v36, %v4724_v20 }
 0x487   : > { %5787 = vst.msk [vmem:[#allocation5 + $0x2c0] sm:$0xff] %vm3835_vm12, %v5771_v32  ;;  %v4775_v46 = vpop.permute.xlu1 %4774  ;;  %v6709_v21 = vld [vmem:[#allocation5 + $0xa8] sm:$0xff] }
 0x488   : > { %4690 = vst.msk [vmem:[#allocation5 + $0xe8] sm:$0xff] %vm4235_vm15, %v4647_v63  ;;  %v4196_v19 = vpop.permute.xlu0 %4195  ;;  %v6710_v62 = vld [vmem:[#allocation5 + $0xb0] sm:$0xff] }
 0x489   : > { %4818 = vst.msk [vmem:[#allocation5 + $0xe8] sm:$0xff] %vm4364_vm0, %v4775_v46  ;;  %v8693_v17 = vpop.f32.mrb[28].mxu0  ;;  %4338 = vrot.lane.b32.xlu1 %v4295_v50, %s8944_s8  ;;  %7311 = vmatprep.mubr.bf16.mxu1 %v6710_v62 }
 0x48a   : > { %4240 = vst.msk [vmem:[#allocation5 + $0xe0] sm:$0xff] %vm4235_vm15, %v4196_v19  ;;  %v3797_v2 = vadd.f32 %v11028_v8, %v8693_v17  ;;  %v3788_v18 = vpop.f32.mrb[29].mxu0  ;;  %4788 = vrot.lane.b32.xlu0 %v11242_v37, %s8944_s8  ;;  %7312 = vmatmul.mubr.bf16.gmra.mrb[12].mxu1 %v6709_v21  ;;  %v5157_v17 = vld [vmem:[#allocation4 + $0x81] sm:$0xff] }
 0x48b   : > { %v3789_v3 = vadd.f32 %v11028_v8, %v3788_v18  ;;  %v8694_v25 = vpop.f32.mrb[30].mxu0  ;;  %v4521_v30 = vpop.permute.xlu1 %4520 }
 0x48c   : > { %v3833_v38 = vmax.f32 %v3797_v2, 0.0  ;;  %v3800_v63 = vadd.f32 %v11028_v8, %v8694_v25  ;;  %v3791_v32 = vpop.f32.mrb[31].mxu0  ;;  %4563 = vst.msk [vmem:[#allocation5 + $0x120] sm:$0xff] %vm4106_vm14, %v4521_v30  ;;  %v4325_v29 = vpop.permute.xlu0 %4324  ;;  %v4471_v25 = vld [vmem:[#allocation4 + $0x140] sm:$0xff] }
 0x48d   : > { %v3831_v20 = vmax.f32 %v3789_v3, 0.0  ;;  %v3792_v36 = vadd.f32 %v11028_v8, %v3791_v32  ;;  %4369 = vst.msk [vmem:[#allocation5 + $0xe0] sm:$0xff] %vm4364_vm0, %v4325_v29  ;;  %4964 = vrot.lane.b32.xlu1 %v10680_v22, %s8928_s17  ;;  %v5156_v22 = vld [vmem:[#allocation4 + $0x79] sm:$0xff]  ;;  %v4599_v32 = vld [vmem:[#allocation4 + $0x141] sm:$0xff] }
 0x48e   : > { %3928 = vst.msk [vmem:[#allocation4 + $0x19a] sm:$0xff] %vm3835_vm12, %v3833_v38  ;;  %v3834_v46 = vmax.f32 %v3800_v63, 0.0  ;;  %5412 = vrot.lane.b32.xlu0 %v10916_v27, %s8928_s17  ;;  %v5185_v21 = vpack.c.bf16 %v5157_v17, %v5156_v22  ;;  %v4470_v3 = vld [vmem:[#allocation4 + $0x138] sm:$0xff] }
 0x48f   : > { %3926 = vst.msk [vmem:[#allocation4 + $0x182] sm:$0xff] %vm3835_vm12, %v3831_v20  ;;  %v3832_v50 = vmax.f32 %v3792_v36, 0.0  ;;  %v4198_v19 = vpop.permute.xlu1 %4197  ;;  %v4490_v38 = vpack.c.bf16 %v4471_v25, %v4470_v3  ;;  %v4598_v63 = vld [vmem:[#allocation4 + $0x139] sm:$0xff]  ;;  %v4276_v36 = vld [vmem:[#allocation4 + $0x123] sm:$0xff] }
 0x490   : > { %v6717_v62 = vld [vmem:[#allocation5 + $0xe8] sm:$0xff]  ;;  %3929 = vst.msk [vmem:[#allocation4 + $0x1a2] sm:$0xff] %vm3835_vm12, %v3834_v46  ;;  %v4649_v8 = vpop.permute.xlu0 %4648 }
 0x491   : > { %4241 = vst.msk [vmem:[#allocation5 + $0x118] sm:$0xff] %vm4235_vm15, %v4198_v19  ;;  %7319 = vmatprep.mubr.bf16.mxu1 %v6717_v62  ;;  %4691 = vst.msk [vmem:[#allocation5 + $0x120] sm:$0xff] %vm4235_vm15, %v4649_v8  ;;  %5092 = vrot.lane.b32.xlu1 %v10666_v47, %s8936_s9  ;;  %v4277_v46 = vld [vmem:[#allocation4 + $0x12b] sm:$0xff]  ;;  %v11279_v8 = vpack.c.bf16 %v4599_v32, %v4598_v63 }
 0x492   : > { %3927 = vst.msk [vmem:[#allocation4 + $0x18a] sm:$0xff] %vm3835_vm12, %v3832_v50  ;;  %5540 = vrot.lane.b32.xlu0 %v10686_v34, %s8936_s9  ;;  %v4726_v50 = vld [vmem:[#allocation4 + $0x13a] sm:$0xff] }
 0x493   : > { %v4327_v27 = vpop.permute.xlu1 %4326 }
 0x494   : > { %4370 = vst.msk [vmem:[#allocation5 + $0x118] sm:$0xff] %vm4364_vm0, %v4327_v27  ;;  %v4777_v2 = vpop.permute.xlu0 %4776  ;;  %v6716_v18 = vld [vmem:[#allocation5 + $0xe0] sm:$0xff] }
 0x495   : > { %4819 = vst.msk [vmem:[#allocation5 + $0x120] sm:$0xff] %vm4364_vm0, %v4777_v2  ;;  %5220 = vrot.lane.b32.xlu1 %v5185_v21, %s8944_s8  ;;  %7320 = vmatmul.mubr.bf16.gmra.mrb[16].mxu1 %v6716_v18  ;;  %v6394_v27 = vld [vmem:[#allocation4 + $0x19a] sm:$0xff] }
 0x496   : > { %5669 = vrot.lane.b32.xlu0 %v10759_v49, %s8944_s8  ;;  %v4727_v49 = vld [vmem:[#allocation4 + $0x142] sm:$0xff] }
 0x497   : > { %v4651_v47 = vpop.permute.xlu1 %4650  ;;  %v6392_v17 = vld [vmem:[#allocation4 + $0x182] sm:$0xff] }
 0x498   : > { %v4523_v30 = vpop.permute.xlu0 %4522  ;;  %v6395_v21 = vld [vmem:[#allocation4 + $0x1a2] sm:$0xff] }
 0x499   : > { %4564 = vst.msk [vmem:[#allocation5 + $0x158] sm:$0xff] %vm4106_vm14, %v4523_v30  ;;  %4082 = vrot.lane.b32.xlu1 %v11230_v53, %s8928_s17  ;;  %v6393_v53 = vld [vmem:[#allocation4 + $0x18a] sm:$0xff]  ;;  %v11288_v18 = vpack.c.bf16 %v6395_v21, %v6394_v27  ;;  %v6200_v25 = vld [vmem:[#allocation4 + $0x180] sm:$0xff]  ;;  %v6202_v27 = vld [vmem:[#allocation4 + $0x198] sm:$0xff] }
 0x49a   : > { %4692 = vst.msk [vmem:[#allocation5 + $0x158] sm:$0xff] %vm4235_vm15, %v4651_v47  ;;  %4534 = vrot.lane.b32.xlu0 %v4490_v38, %s8928_s17  ;;  %v11284_v22 = vpack.c.bf16 %v6393_v53, %v6392_v17  ;;  %v4860_v2 = vld [vmem:[#allocation4 + $0x183] sm:$0xff]  ;;  %v4861_v3 = vld [vmem:[#allocation4 + $0x18b] sm:$0xff]  ;;  %v4296_v38 = vpack.c.bf16 %v4277_v46, %v4276_v36  ;;  %v11293_v17 = vpack.c.bf16 %v4727_v49, %v4726_v50  ;;  %v5755_v49 = vld [vmem:[#allocation4 + $0x199] sm:$0xff] }
 0x49b   : > { %v4779_v29 = vpop.permute.xlu1 %4778  ;;  %v6723_v20 = vld [vmem:[#allocation5 + $0x118] sm:$0xff]  ;;  %v6201_v47 = vld [vmem:[#allocation4 + $0x188] sm:$0xff]  ;;  %5341 = vst.msk [vmem:[#allocation5 + $0x360] sm:$0xff] %vm3835_vm12, %v11288_v18  ;;  %v6203_v36 = vld [vmem:[#allocation4 + $0x1a0] sm:$0xff] }
 0x49c   : > { %4820 = vst.msk [vmem:[#allocation5 + $0x158] sm:$0xff] %vm4364_vm0, %v4779_v29  ;;  %v4200_v19 = vpop.permute.xlu0 %4199  ;;  %v6724_v62 = vld [vmem:[#allocation5 + $0x120] sm:$0xff]  ;;  %v6220_v63 = vpack.c.bf16 %v6201_v47, %v6200_v25  ;;  %v6649_v29 = vld [vmem:[#allocation4 + $0x18c] sm:$0xff]  ;;  %v6221_v21 = vpack.c.bf16 %v6203_v36, %v6202_v27 }
 0x49d   : > { %4242 = vst.msk [vmem:[#allocation5 + $0x150] sm:$0xff] %vm4235_vm15, %v4200_v19  ;;  %4211 = vrot.lane.b32.xlu1 %v11242_v37, %s8936_s9  ;;  %7327 = vmatprep.mubr.bf16.mxu1 %v6724_v62  ;;  %v4877_v37 = vpack.c.bf16 %v4861_v3, %v4860_v2  ;;  %v6648_v32 = vld [vmem:[#allocation4 + $0x184] sm:$0xff]  ;;  %v6650_v2 = vld [vmem:[#allocation4 + $0x19c] sm:$0xff]  ;;  %v5608_v27 = vld [vmem:[#allocation4 + $0xb0] sm:$0xff] }
 0x49e   : > { %4662 = vrot.lane.b32.xlu0 %v11279_v8, %s8936_s9  ;;  %7328 = vmatmul.mubr.bf16.gmra.mrb[20].mxu1 %v6723_v20  ;;  %5340 = vst.msk [vmem:[#allocation5 + $0x328] sm:$0xff] %vm3835_vm12, %v11284_v22  ;;  %v5753_v19 = vld [vmem:[#allocation4 + $0x181] sm:$0xff]  ;;  %v6668_v20 = vpack.c.bf16 %v6649_v29, %v6648_v32  ;;  %v5754_v53 = vld [vmem:[#allocation4 + $0x189] sm:$0xff]  ;;  %6236 = vst.msk [vmem:[#allocation5 + $0x2c8] sm:$0xff] %vm3835_vm12, %v6220_v63 }
 0x49f   : > { %v4525_v30 = vpop.permute.xlu1 %4524  ;;  %4893 = vst.msk [vmem:[#allocation5 + $0x358] sm:$0xff] %vm3835_vm12, %v4877_v37  ;;  %v5772_v46 = vpack.c.bf16 %v5754_v53, %v5753_v19  ;;  %v6651_v50 = vld [vmem:[#allocation4 + $0x1a4] sm:$0xff]  ;;  %6237 = vst.msk [vmem:[#allocation5 + $0x300] sm:$0xff] %vm3835_vm12, %v6221_v21  ;;  %v5031_v63 = vld [vmem:[#allocation4 + $0x98] sm:$0xff] }
 0x4a0   : > { %4565 = vst.msk [vmem:[#allocation5 + $0x190] sm:$0xff] %vm4106_vm14, %v4525_v30  ;;  %v4329_v62 = vpop.permute.xlu0 %4328  ;;  %v6669_v3 = vpack.c.bf16 %v6651_v50, %v6650_v2  ;;  %v5756_v25 = vld [vmem:[#allocation4 + $0x1a1] sm:$0xff]  ;;  %v5030_v32 = vld [vmem:[#allocation4 + $0x90] sm:$0xff]  ;;  %v5159_v53 = vld [vmem:[#allocation4 + $0x99] sm:$0xff] }
 0x4a1   : > { %4371 = vst.msk [vmem:[#allocation5 + $0x150] sm:$0xff] %vm4364_vm0, %v4329_v62  ;;  %4340 = vrot.lane.b32.xlu1 %v4296_v38, %s8944_s8  ;;  %v5773_v38 = vpack.c.bf16 %v5756_v25, %v5755_v49  ;;  %v5058_v19 = vpack.c.bf16 %v5031_v63, %v5030_v32  ;;  %v4472_v50 = vld [vmem:[#allocation4 + $0x150] sm:$0xff]  ;;  %v4473_v49 = vld [vmem:[#allocation4 + $0x158] sm:$0xff] }
 0x4a2   : > { %4790 = vrot.lane.b32.xlu0 %v11293_v17, %s8944_s8  ;;  %6684 = vst.msk [vmem:[#allocation5 + $0x2d0] sm:$0xff] %vm3835_vm12, %v6668_v20  ;;  %5788 = vst.msk [vmem:[#allocation5 + $0x2f8] sm:$0xff] %vm3835_vm12, %v5772_v46  ;;  %v5607_v46 = vld [vmem:[#allocation4 + $0xa8] sm:$0xff]  ;;  %v4601_v63 = vld [vmem:[#allocation4 + $0x159] sm:$0xff] }
 0x4a3   : > { %v4202_v47 = vpop.permute.xlu1 %4201  ;;  %v6731_v30 = vld [vmem:[#allocation5 + $0x158] sm:$0xff]  ;;  %6685 = vst.msk [vmem:[#allocation5 + $0x308] sm:$0xff] %vm3835_vm12, %v6669_v3  ;;  %5789 = vst.msk [vmem:[#allocation5 + $0x330] sm:$0xff] %vm3835_vm12, %v5773_v38  ;;  %v5635_v2 = vpack.c.bf16 %v5608_v27, %v5607_v46  ;;  %v5352_v46 = vld [vmem:[#allocation4 + $0xab] sm:$0xff] }
 0x4a4   : > { %4243 = vst.msk [vmem:[#allocation5 + $0x188] sm:$0xff] %vm4235_vm15, %v4202_v47  ;;  %v4653_v37 = vpop.permute.xlu0 %4652  ;;  %7335 = vmatprep.mubr.bf16.mxu1 %v6731_v30  ;;  %v4491_v30 = vpack.c.bf16 %v4473_v49, %v4472_v50 }
 0x4a5   : > { %4693 = vst.msk [vmem:[#allocation5 + $0x190] sm:$0xff] %vm4235_vm15, %v4653_v37  ;;  %4966 = vrot.lane.b32.xlu1 %v10686_v34, %s8928_s17  ;;  %v5158_v34 = vld [vmem:[#allocation4 + $0x91] sm:$0xff] }
 0x4a6   : > { %5414 = vrot.lane.b32.xlu0 %v10933_v9, %s8928_s17  ;;  %v5186_v9 = vpack.c.bf16 %v5159_v53, %v5158_v34  ;;  %v4600_v37 = vld [vmem:[#allocation4 + $0x151] sm:$0xff]  ;;  %v4729_v53 = vld [vmem:[#allocation4 + $0x15a] sm:$0xff] }
 0x4a7   : > { %v4331_v29 = vpop.permute.xlu1 %4330 }
 0x4a8   : > { %4372 = vst.msk [vmem:[#allocation5 + $0x188] sm:$0xff] %vm4364_vm0, %v4331_v29  ;;  %v4781_v62 = vpop.permute.xlu0 %4780  ;;  %v6730_v20 = vld [vmem:[#allocation5 + $0x150] sm:$0xff] }
 0x4a9   : > { %4821 = vst.msk [vmem:[#allocation5 + $0x190] sm:$0xff] %vm4364_vm0, %v4781_v62  ;;  %5094 = vrot.lane.b32.xlu1 %v5058_v19, %s8936_s9  ;;  %7336 = vmatmul.mubr.bf16.gmra.mrb[24].mxu1 %v6730_v20  ;;  %v4619_v19 = vpack.c.bf16 %v4601_v63, %v4600_v37  ;;  %v4278_v62 = vld [vmem:[#allocation4 + $0x13b] sm:$0xff]  ;;  %v4279_v20 = vld [vmem:[#allocation4 + $0x143] sm:$0xff] }
 0x4aa   : > { %5542 = vrot.lane.b32.xlu0 %v10781_v39, %s8936_s9  ;;  %v4297_v34 = vpack.c.bf16 %v4279_v20, %v4278_v62  ;;  %v5160_v37 = vld [vmem:[#allocation4 + $0xa9] sm:$0xff] }
 0x4ab   : > { %v4075_v36 = vpop.permute.xlu1 %4074  ;;  %v4475_v62 = vld [vmem:[#allocation4 + $0x170] sm:$0xff] }
 0x4ac   : > { %4115 = vst.msk [vmem:[#allocation5 + $0x1c0] sm:$0xff] %vm4106_vm14, %v4075_v36  ;;  %v4527_v21 = vpop.permute.xlu0 %4526 }
 0x4ad   : > { %4566 = vst.msk [vmem:[#allocation5 + $0x1c8] sm:$0xff] %vm4106_vm14, %v4527_v21  ;;  %5222 = vrot.lane.b32.xlu1 %v5186_v9, %s8944_s8  ;;  %v5353_v21 = vld [vmem:[#allocation4 + $0xb3] sm:$0xff] }
 0x4ae   : > { %5671 = vrot.lane.b32.xlu0 %v5635_v2, %s8944_s8 }
 0x4af   : > { %v4204_v3 = vpop.permute.xlu1 %4203  ;;  %v6737_v38 = vld [vmem:[#allocation5 + $0x188] sm:$0xff] }
 0x4b0   : > { %4244 = vst.msk [vmem:[#allocation5 + $0x1c0] sm:$0xff] %vm4235_vm15, %v4204_v3  ;;  %v4655_v25 = vpop.permute.xlu0 %4654  ;;  %v6738_v47 = vld [vmem:[#allocation5 + $0x190] sm:$0xff]  ;;  %v5379_v3 = vpack.c.bf16 %v5353_v21, %v5352_v46 }
 0x4b1   : > { %4694 = vst.msk [vmem:[#allocation5 + $0x1c8] sm:$0xff] %vm4235_vm15, %v4655_v25  ;;  %4084 = vrot.lane.b32.xlu1 %v11279_v8, %s8928_s17  ;;  %7343 = vmatprep.mubr.bf16.mxu1 %v6738_v47  ;;  %v4728_v8 = vld [vmem:[#allocation4 + $0x152] sm:$0xff] }
 0x4b2   : > { %4536 = vrot.lane.b32.xlu0 %v4491_v30, %s8928_s17  ;;  %7344 = vmatmul.mubr.bf16.gmra.mrb[28].mxu1 %v6737_v38  ;;  %v4747_v9 = vpack.c.bf16 %v4729_v53, %v4728_v8  ;;  %v5161_v38 = vld [vmem:[#allocation4 + $0xb1] sm:$0xff] }
 0x4b3   : > { %v4333_v32 = vpop.permute.xlu1 %4332 }
 0x4b4   : > { %4373 = vst.msk [vmem:[#allocation5 + $0x1c0] sm:$0xff] %vm4364_vm0, %v4333_v32  ;;  %v4783_v29 = vpop.permute.xlu0 %4782 }
 0x4b5   : > { %4822 = vst.msk [vmem:[#allocation5 + $0x1c8] sm:$0xff] %vm4364_vm0, %v4783_v29  ;;  %4213 = vrot.lane.b32.xlu1 %v11293_v17, %s8936_s9  ;;  %v4474_v29 = vld [vmem:[#allocation4 + $0x168] sm:$0xff] }
 0x4b6   : > { %4664 = vrot.lane.b32.xlu0 %v4619_v19, %s8936_s9  ;;  %v4492_v53 = vpack.c.bf16 %v4475_v62, %v4474_v29 }
 0x4b7   : > { %v4959_v27 = vpop.permute.xlu1 %4958 }
 0x4b8   : > { %5006 = vst.msk [vmem:[#allocation5 + $0x10] sm:$0xff] %vm4106_vm14, %v4959_v27  ;;  %v5407_v36 = vpop.permute.xlu0 %5406 }
 0x4b9   : > { %5454 = vst.msk [vmem:[#allocation5 + $0x18] sm:$0xff] %vm4106_vm14, %v5407_v36  ;;  %4342 = vrot.lane.b32.xlu1 %v4297_v34, %s8944_s8  ;;  %v4602_v34 = vld [vmem:[#allocation4 + $0x169] sm:$0xff]  ;;  %v4603_v36 = vld [vmem:[#allocation4 + $0x171] sm:$0xff] }
 0x4ba   : > { %4792 = vrot.lane.b32.xlu0 %v4747_v9, %s8944_s8 }
 0x4bb   : > { %v5087_v50 = vpop.permute.xlu1 %5086  ;;  %v6744_v25 = vld [vmem:[#allocation5 + $0x1c0] sm:$0xff] }
 0x4bc   : > { %5134 = vst.msk [vmem:[#allocation5 + $0x10] sm:$0xff] %vm4235_vm15, %v5087_v50  ;;  %v5535_v17 = vpop.permute.xlu0 %5534  ;;  %v6745_v49 = vld [vmem:[#allocation5 + $0x1c8] sm:$0xff]  ;;  %v4620_v50 = vpack.c.bf16 %v4603_v36, %v4602_v34  ;;  %v4476_v36 = vld [vmem:[#allocation4 + $0x180] sm:$0xff] }
 0x4bd   : > { %5582 = vst.msk [vmem:[#allocation5 + $0x18] sm:$0xff] %vm4235_vm15, %v5535_v17  ;;  %4968 = vrot.lane.b32.xlu1 %v10781_v39, %s8928_s17  ;;  %7351 = vmatprep.mubr.bf16.mxu1 %v6745_v49  ;;  %v5187_v39 = vpack.c.bf16 %v5161_v38, %v5160_v37  ;;  %v4280_v17 = vld [vmem:[#allocation4 + $0x153] sm:$0xff]  ;;  %v4281_v49 = vld [vmem:[#allocation4 + $0x15b] sm:$0xff]  ;;  %v5354_v37 = vld [vmem:[#allocation4 + $0xc3] sm:$0xff] }
 0x4be   : > { %5416 = vrot.lane.b32.xlu0 %v5379_v3, %s8928_s17  ;;  %7352 = vmatmul.mubr.bf16.gmra.mrb[32].mxu1 %v6744_v25  ;;  %v4730_v3 = vld [vmem:[#allocation4 + $0x16a] sm:$0xff] }
 0x4bf   : > { %v5215_v47 = vpop.permute.xlu1 %5214 }
 0x4c0   : > { %5262 = vst.msk [vmem:[#allocation5 + $0x10] sm:$0xff] %vm4364_vm0, %v5215_v47  ;;  %v5664_v30 = vpop.permute.xlu0 %5663  ;;  %v4298_v47 = vpack.c.bf16 %v4281_v49, %v4280_v17 }
 0x4c1   : > { %5711 = vst.msk [vmem:[#allocation5 + $0x18] sm:$0xff] %vm4364_vm0, %v5664_v30  ;;  %5096 = vrot.lane.b32.xlu1 %v5635_v2, %s8936_s9 }
 0x4c2   : > { %5544 = vrot.lane.b32.xlu0 %v10783_v44, %s8936_s9 }
 0x4c3   : > { %v4077_v63 = vpop.permute.xlu1 %4076 }
 0x4c4   : > { %4116 = vst.msk [vmem:[#allocation5 + $0x1f8] sm:$0xff] %vm4106_vm14, %v4077_v63  ;;  %v4529_v32 = vpop.permute.xlu0 %4528  ;;  %v5355_v63 = vld [vmem:[#allocation4 + $0xcb] sm:$0xff] }
 0x4c5   : > { %4567 = vst.msk [vmem:[#allocation5 + $0x200] sm:$0xff] %vm4106_vm14, %v4529_v32  ;;  %5224 = vrot.lane.b32.xlu1 %v5187_v39, %s8944_s8  ;;  %v5380_v29 = vpack.c.bf16 %v5355_v63, %v5354_v37  ;;  %v8838_v63 = vld [vmem:[%s12382_s3 + $0x148] sm:$0xff]  }
 0x4c6   : > { %5673 = vrot.lane.b32.xlu0 %v10854_v45, %s8944_s8 }
 0x4c7   : > { %v4206_v20 = vpop.permute.xlu1 %4205  ;;  %v6690_v27 = vld [vmem:[#allocation5 + $0x10] sm:$0xff] }
 0x4c8   : > { %4245 = vst.msk [vmem:[#allocation5 + $0x1f8] sm:$0xff] %vm4235_vm15, %v4206_v20  ;;  %v4657_v2 = vpop.permute.xlu0 %4656  ;;  %v6691_v8 = vld [vmem:[#allocation5 + $0x18] sm:$0xff] }
 0x4c9   : > { %4695 = vst.msk [vmem:[#allocation5 + $0x200] sm:$0xff] %vm4235_vm15, %v4657_v2  ;;  %4086 = vrot.lane.b32.xlu1 %v4619_v19, %s8928_s17  ;;  %7448 = vmatprep.mubr.bf16.mxu0 %v6691_v8  ;;  %v4731_v19 = vld [vmem:[#allocation4 + $0x172] sm:$0xff]  ;;  %v5162_v8 = vld [vmem:[#allocation4 + $0xc1] sm:$0xff] }
 0x4ca   : > { %4538 = vrot.lane.b32.xlu0 %v4492_v53, %s8928_s17  ;;  %7449 = vmatmul.mubr.bf16.vlgmr.msra.gmra.mrb[32].mxu0 %v6690_v27  ;;  %v4748_v38 = vpack.c.bf16 %v4731_v19, %v4730_v3  ;;  %v5163_v53 = vld [vmem:[#allocation4 + $0xc9] sm:$0xff]  ;;  %v4604_v3 = vld [vmem:[#allocation4 + $0x181] sm:$0xff] }
 0x4cb   : > { %v4335_v46 = vpop.permute.xlu1 %4334  ;;  %v5188_v27 = vpack.c.bf16 %v5163_v53, %v5162_v8  ;;  %v4605_v19 = vld [vmem:[#allocation4 + $0x189] sm:$0xff] }
 0x4cc   : > { %4374 = vst.msk [vmem:[#allocation5 + $0x1f8] sm:$0xff] %vm4364_vm0, %v4335_v46  ;;  %v4785_v21 = vpop.permute.xlu0 %4784  ;;  %v4477_v46 = vld [vmem:[#allocation4 + $0x188] sm:$0xff] }
 0x4cd   : > { %4823 = vst.msk [vmem:[#allocation5 + $0x200] sm:$0xff] %vm4364_vm0, %v4785_v21  ;;  %4215 = vrot.lane.b32.xlu1 %v4747_v9, %s8936_s9  ;;  %v4493_v49 = vpack.c.bf16 %v4477_v46, %v4476_v36  ;;  %v5357_v36 = vld [vmem:[#allocation4 + $0xe3] sm:$0xff] }
 0x4ce   : > { %4666 = vrot.lane.b32.xlu0 %v4620_v50, %s8936_s9 }
 0x4cf   : > { %v4961_v25 = vpop.permute.xlu1 %4960 }
 0x4d0   : > { %5007 = vst.msk [vmem:[#allocation5 + $0x48] sm:$0xff] %vm4106_vm14, %v4961_v25  ;;  %v5409_v30 = vpop.permute.xlu0 %5408 }
 0x4d1   : > { %5455 = vst.msk [vmem:[#allocation5 + $0x50] sm:$0xff] %vm4106_vm14, %v5409_v30  ;;  %4344 = vrot.lane.b32.xlu1 %v4298_v47, %s8944_s8  ;;  %v8836_v47 = vld [vmem:[%s12382_s3 + $0x140] sm:$0xff]  }
 0x4d2   : > { %4794 = vrot.lane.b32.xlu0 %v4748_v38, %s8944_s8  ;;  %v8837_v30 = vld [vmem:[%s12382_s3 + $0x100] sm:$0xff]   ;;  %8519 = vmatprep.subr.bf16.mxu1 %v8836_v47 }
 0x4d3   : > { %v5089_v39 = vpop.permute.xlu1 %5088  ;;  %v6751_v62 = vld [vmem:[#allocation5 + $0x1f8] sm:$0xff]  ;;  %8520 = vmatpush3.bf16.msra.mxu1 %v8837_v30 }
 0x4d4   : > { %5135 = vst.msk [vmem:[#allocation5 + $0x48] sm:$0xff] %vm4235_vm15, %v5089_v39  ;;  %v5537_v9 = vpop.permute.xlu0 %5536  ;;  %v6752_v32 = vld [vmem:[#allocation5 + $0x200] sm:$0xff]  ;;  %v4621_v39 = vpack.c.bf16 %v4605_v19, %v4604_v3  ;;  %8521 = vmatprep.subr.bf16.mxu1 %v8838_v63  ;;  %v8843_v19 = vld [vmem:[%s12382_s3 + $0x118] sm:$0xff]  }
 0x4d5   : > { %5583 = vst.msk [vmem:[#allocation5 + $0x50] sm:$0xff] %vm4235_vm15, %v5537_v9  ;;  %4970 = vrot.lane.b32.xlu1 %v10783_v44, %s8928_s17  ;;  %7359 = vmatprep.mubr.bf16.mxu1 %v6752_v32  ;;  %v4282_v9 = vld [vmem:[#allocation4 + $0x16b] sm:$0xff]  ;;  %v4283_v32 = vld [vmem:[#allocation4 + $0x173] sm:$0xff]  ;;  %v8845_v63 = vld [vmem:[%s12382_s3 + $0x120] sm:$0xff]  }
 0x4d6   : > { %5418 = vrot.lane.b32.xlu0 %v5380_v29, %s8928_s17  ;;  %7360 = vmatmul.mubr.bf16.gmra.mrb[36].mxu1 %v6751_v62  ;;  %v8839_v29 = vld [vmem:[%s12382_s3 + $0x108] sm:$0xff]   ;;  %v4299_v53 = vpack.c.bf16 %v4283_v32, %v4282_v9 }
 0x4d7   : > { %v5217_v20 = vpop.permute.xlu1 %5216  ;;  %v4732_v62 = vld [vmem:[#allocation4 + $0x182] sm:$0xff]  ;;  %8522 = vmatpush3.bf16.msra.mxu1 %v8839_v29 }
 0x4d8   : > { %5263 = vst.msk [vmem:[#allocation5 + $0x48] sm:$0xff] %vm4364_vm0, %v5217_v20  ;;  %v5666_v2 = vpop.permute.xlu0 %5665  ;;  %v4733_v20 = vld [vmem:[#allocation4 + $0x18a] sm:$0xff] }
 0x4d9   : > { %5712 = vst.msk [vmem:[#allocation5 + $0x50] sm:$0xff] %vm4364_vm0, %v5666_v2  ;;  %5098 = vrot.lane.b32.xlu1 %v10854_v45, %s8936_s9  ;;  %v8840_v2 = vld [vmem:[%s12382_s3 + $0x150] sm:$0xff]  }
 0x4da   : > { %5546 = vrot.lane.b32.xlu0 %v10858_v6, %s8936_s9  ;;  %8523 = vmatprep.subr.bf16.mxu1 %v8840_v2  ;;  %v6241_v29 = vld [vmem:[#allocation4 + $0x69] sm:$0xff] }
 0x4db   : > { %v4079_v44 = vpop.permute.xlu1 %4078  ;;  %v8848_v2 = vld [vmem:[%s12382_s3 + $0x170] sm:$0xff]  }
 0x4dc   : > { %4117 = vst.msk [vmem:[#allocation5 + $0x230] sm:$0xff] %vm4106_vm14, %v4079_v44  ;;  %v4531_v34 = vpop.permute.xlu0 %4530 }
 0x4dd   : > { %4568 = vst.msk [vmem:[#allocation5 + $0x238] sm:$0xff] %vm4106_vm14, %v4531_v34  ;;  %5226 = vrot.lane.b32.xlu1 %v5188_v27, %s8944_s8  ;;  %v4749_v27 = vpack.c.bf16 %v4733_v20, %v4732_v62  ;;  %v5356_v34 = vld [vmem:[#allocation4 + $0xdb] sm:$0xff] }
 0x4de   : > { %5675 = vrot.lane.b32.xlu0 %v10862_v28, %s8944_s8  ;;  %v6240_v20 = vld [vmem:[#allocation4 + $0x61] sm:$0xff] }
 0x4df   : > { %v4208_v21 = vpop.permute.xlu1 %4207  ;;  %v6697_v25 = vld [vmem:[#allocation5 + $0x48] sm:$0xff] }
 0x4e0   : > { %4246 = vst.msk [vmem:[#allocation5 + $0x230] sm:$0xff] %vm4235_vm15, %v4208_v21  ;;  %v4659_v45 = vpop.permute.xlu0 %4658  ;;  %v6698_v17 = vld [vmem:[#allocation5 + $0x50] sm:$0xff] }
 0x4e1   : > { %4696 = vst.msk [vmem:[#allocation5 + $0x238] sm:$0xff] %vm4235_vm15, %v4659_v45  ;;  %4088 = vrot.lane.b32.xlu1 %v4620_v50, %s8928_s17  ;;  %7456 = vmatprep.mubr.bf16.mxu0 %v6698_v17  ;;  %v5381_v17 = vpack.c.bf16 %v5357_v36, %v5356_v34  ;;  %v8850_v34 = vld [vmem:[%s12382_s3 + $0x178] sm:$0xff]  }
 0x4e2   : > { %4540 = vrot.lane.b32.xlu0 %v4493_v49, %s8928_s17  ;;  %7457 = vmatmul.mubr.bf16.gmra.mrb[36].mxu0 %v6697_v25  ;;  %v8842_v49 = vld [vmem:[%s12382_s3 + $0x158] sm:$0xff]   ;;  %v8844_v25 = vld [vmem:[%s12382_s3 + $0x160] sm:$0xff]  }
 0x4e3   : > { %v4337_v37 = vpop.permute.xlu1 %4336 }
 0x4e4   : > { %4375 = vst.msk [vmem:[#allocation5 + $0x230] sm:$0xff] %vm4364_vm0, %v4337_v37  ;;  %v4787_v50 = vpop.permute.xlu0 %4786  ;;  %v5164_v37 = vld [vmem:[#allocation4 + $0xd9] sm:$0xff] }
 0x4e5   : > { %4824 = vst.msk [vmem:[#allocation5 + $0x238] sm:$0xff] %vm4364_vm0, %v4787_v50  ;;  %4217 = vrot.lane.b32.xlu1 %v4748_v38, %s8936_s9  ;;  %v8841_v38 = vld [vmem:[%s12382_s3 + $0x110] sm:$0xff]   ;;  %v8846_v50 = vld [vmem:[%s12382_s3 + $0x168] sm:$0xff]  }
 0x4e6   : > { %4668 = vrot.lane.b32.xlu0 %v4621_v39, %s8936_s9  ;;  %8524 = vmatpush3.bf16.msra.mxu1 %v8841_v38 }
 0x4e7   : > { %v4963_v8 = vpop.permute.xlu1 %4962  ;;  %8525 = vmatprep.subr.bf16.mxu1 %v8842_v49 }
 0x4e8   : > { %5008 = vst.msk [vmem:[#allocation5 + $0x80] sm:$0xff] %vm4106_vm14, %v4963_v8  ;;  %v5411_v44 = vpop.permute.xlu0 %5410 }
 0x4e9   : > { %5456 = vst.msk [vmem:[#allocation5 + $0x88] sm:$0xff] %vm4106_vm14, %v5411_v44  ;;  %4346 = vrot.lane.b32.xlu1 %v4299_v53, %s8944_s8  ;;  %v6272_v44 = vpack.c.bf16 %v6241_v29, %v6240_v20  ;;  %v6242_v20 = vld [vmem:[#allocation4 + $0x79] sm:$0xff] }
 0x4ea   : > { %4796 = vrot.lane.b32.xlu0 %v4749_v27, %s8944_s8  ;;  %8526 = vmatpush3.bf16.msra.mxu1 %v8843_v19  ;;  %v8849_v27 = vld [vmem:[%s12382_s3 + $0x130] sm:$0xff]  }
 0x4eb   : > { %v5091_v46 = vpop.permute.xlu1 %5090  ;;  %v6758_v3 = vld [vmem:[#allocation5 + $0x230] sm:$0xff]  ;;  %8527 = vmatprep.subr.bf16.mxu1 %v8844_v25  ;;  %v5359_v25 = vld [vmem:[#allocation4 + $0xfb] sm:$0xff] }
 0x4ec   : > { %5136 = vst.msk [vmem:[#allocation5 + $0x80] sm:$0xff] %vm4235_vm15, %v5091_v46  ;;  %v5539_v21 = vpop.permute.xlu0 %5538  ;;  %v6759_v45 = vld [vmem:[#allocation5 + $0x238] sm:$0xff] }
 0x4ed   : > { %5584 = vst.msk [vmem:[#allocation5 + $0x88] sm:$0xff] %vm4235_vm15, %v5539_v21  ;;  %4972 = vrot.lane.b32.xlu1 %v10858_v6, %s8928_s17  ;;  %7367 = vmatprep.mubr.bf16.mxu1 %v6759_v45  ;;  %v5165_v6 = vld [vmem:[#allocation4 + $0xe1] sm:$0xff]  ;;  %v6047_v21 = vld [vmem:[#allocation4 + $0x4c] sm:$0xff]  ;;  %v6048_v45 = vld [vmem:[#allocation4 + $0x54] sm:$0xff] }
 0x4ee   : > { %5420 = vrot.lane.b32.xlu0 %v5381_v17, %s8928_s17  ;;  %7368 = vmatmul.mubr.bf16.gmra.mrb[40].mxu1 %v6758_v3  ;;  %v5189_v9 = vpack.c.bf16 %v5165_v6, %v5164_v37  ;;  %v6079_v49 = vpack.c.bf16 %v6048_v45, %v6047_v21  ;;  %v5358_v19 = vld [vmem:[#allocation4 + $0xf3] sm:$0xff]  ;;  %v5360_v21 = vld [vmem:[#allocation4 + $0x10b] sm:$0xff] }
 0x4ef   : > { %v5219_v47 = vpop.permute.xlu1 %5218  ;;  %8528 = vmatpush3.bf16.msra.mxu1 %v8845_v63  ;;  %v5382_v37 = vpack.c.bf16 %v5359_v25, %v5358_v19  ;;  %v5361_v45 = vld [vmem:[#allocation4 + $0x113] sm:$0xff] }
 0x4f0   : > { %5264 = vst.msk [vmem:[#allocation5 + $0x80] sm:$0xff] %vm4364_vm0, %v5219_v47  ;;  %v5668_v30 = vpop.permute.xlu0 %5667  ;;  %8529 = vmatprep.subr.bf16.mxu1 %v8846_v50 }
 0x4f1   : > { %5713 = vst.msk [vmem:[#allocation5 + $0x88] sm:$0xff] %vm4364_vm0, %v5668_v30  ;;  %5100 = vrot.lane.b32.xlu1 %v10862_v28, %s8936_s9  ;;  %v8847_v28 = vld [vmem:[%s12382_s3 + $0x128] sm:$0xff]  }
 0x4f2   : > { %5548 = vrot.lane.b32.xlu0 %v10864_v56, %s8936_s9 }
 0x4f3   : > { %v4081_v39 = vpop.permute.xlu1 %4080  ;;  %8530 = vmatpush3.bf16.msra.mxu1 %v8847_v28  ;;  %v6243_v28 = vld [vmem:[#allocation4 + $0x81] sm:$0xff] }
 0x4f4   : > { %4118 = vst.msk [vmem:[#allocation5 + $0x268] sm:$0xff] %vm4106_vm14, %v4081_v39  ;;  %v4533_v32 = vpop.permute.xlu0 %4532  ;;  %8531 = vmatprep.subr.bf16.mxu1 %v8848_v2  ;;  %v5166_v39 = vld [vmem:[#allocation4 + $0xf1] sm:$0xff] }
 0x4f5   : > { %4569 = vst.msk [vmem:[#allocation5 + $0x270] sm:$0xff] %vm4106_vm14, %v4533_v32  ;;  %5228 = vrot.lane.b32.xlu1 %v5189_v9, %s8944_s8  ;;  %v5167_v9 = vld [vmem:[#allocation4 + $0xf9] sm:$0xff] }
 0x4f6   : > { %5677 = vrot.lane.b32.xlu0 %v10950_v52, %s8944_s8  ;;  %v5190_v32 = vpack.c.bf16 %v5167_v9, %v5166_v39 }
 0x4f7   : > { %v4210_v62 = vpop.permute.xlu1 %4209  ;;  %v6704_v38 = vld [vmem:[#allocation5 + $0x80] sm:$0xff]  ;;  %8532 = vmatpush3.bf16.msra.mxu1 %v8849_v27 }
 0x4f8   : > { %4247 = vst.msk [vmem:[#allocation5 + $0x268] sm:$0xff] %vm4235_vm15, %v4210_v62  ;;  %v4661_v8 = vpop.permute.xlu0 %4660  ;;  %v6705_v53 = vld [vmem:[#allocation5 + $0x88] sm:$0xff]  ;;  %8533 = vmatprep.subr.bf16.mxu1 %v8850_v34 }
 0x4f9   : > { %4697 = vst.msk [vmem:[#allocation5 + $0x270] sm:$0xff] %vm4235_vm15, %v4661_v8  ;;  %5855 = vrot.lane.b32.xlu1 %v10639_v35, %s8928_s17  ;;  %7464 = vmatprep.mubr.bf16.mxu0 %v6705_v53  ;;  %v8851_v35 = vld [vmem:[%s12382_s3 + $0x138] sm:$0xff]   ;;  %v6273_v8 = vpack.c.bf16 %v6243_v28, %v6242_v20  ;;  %v6050_v34 = vld [vmem:[#allocation4 + $0x6c] sm:$0xff] }
 0x4fa   : > { %6304 = vrot.lane.b32.xlu0 %v6272_v44, %s8928_s17  ;;  %7465 = vmatmul.mubr.bf16.gmra.mrb[40].mxu0 %v6704_v38  ;;  %v6049_v38 = vld [vmem:[#allocation4 + $0x64] sm:$0xff]  ;;  %v6051_v28 = vld [vmem:[#allocation4 + $0x7c] sm:$0xff] }
 0x4fb   : > { %v4339_v36 = vpop.permute.xlu1 %4338  ;;  %8534 = vmatpush3.bf16.msra.mxu1 %v8851_v35 }
 0x4fc   : > { %4376 = vst.msk [vmem:[#allocation5 + $0x268] sm:$0xff] %vm4364_vm0, %v4339_v36  ;;  %v4789_v46 = vpop.permute.xlu0 %4788  ;;  %v6080_v36 = vpack.c.bf16 %v6050_v34, %v6049_v38 }
 0x4fd   : > { %4825 = vst.msk [vmem:[#allocation5 + $0x270] sm:$0xff] %vm4364_vm0, %v4789_v46  ;;  %5983 = vrot.lane.b32.xlu1 %v10641_v7, %s8936_s9 }
 0x4fe   : > { %6432 = vrot.lane.b32.xlu0 %v10692_v4, %s8936_s9 }
 0x4ff   : > { %v4965_v17 = vpop.permute.xlu1 %4964 }
 0x500   : > { %5009 = vst.msk [vmem:[#allocation5 + $0xb8] sm:$0xff] %vm4106_vm14, %v4965_v17  ;;  %v5413_v3 = vpop.permute.xlu0 %5412 }
 0x501   : > { %5457 = vst.msk [vmem:[#allocation5 + $0xc0] sm:$0xff] %vm4106_vm14, %v5413_v3  ;;  %6111 = vrot.lane.b32.xlu1 %v6079_v49, %s8944_s8  ;;  %v5383_v49 = vpack.c.bf16 %v5361_v45, %v5360_v21 }
 0x502   : > { %6560 = vrot.lane.b32.xlu0 %v10694_v23, %s8944_s8 }
 0x503   : > { %v5093_v7 = vpop.permute.xlu1 %5092  ;;  %v6765_v6 = vld [vmem:[#allocation5 + $0x268] sm:$0xff] }
 0x504   : > { %5137 = vst.msk [vmem:[#allocation5 + $0xb8] sm:$0xff] %vm4235_vm15, %v5093_v7  ;;  %v5541_v47 = vpop.permute.xlu0 %5540  ;;  %v6766_v30 = vld [vmem:[#allocation5 + $0x270] sm:$0xff] }
 0x505   : > { %5585 = vst.msk [vmem:[#allocation5 + $0xc0] sm:$0xff] %vm4235_vm15, %v5541_v47  ;;  %4974 = vrot.lane.b32.xlu1 %v10864_v56, %s8928_s17  ;;  %7375 = vmatprep.mubr.bf16.mxu1 %v6766_v30  ;;  %v5168_v7 = vld [vmem:[#allocation4 + $0x109] sm:$0xff]  ;;  %v5169_v47 = vld [vmem:[#allocation4 + $0x111] sm:$0xff] }
 0x506   : > { %5422 = vrot.lane.b32.xlu0 %v5382_v37, %s8928_s17  ;;  %7376 = vmatmul.mubr.bf16.gmra.mrb[44].mxu1 %v6765_v6  ;;  %v5191_v30 = vpack.c.bf16 %v5169_v47, %v5168_v7  ;;  %v6245_v6 = vld [vmem:[#allocation4 + $0x99] sm:$0xff] }
 0x507   : > { %v5221_v63 = vpop.permute.xlu1 %5220 }
 0x508   : > { %5265 = vst.msk [vmem:[#allocation5 + $0xb8] sm:$0xff] %vm4364_vm0, %v5221_v63  ;;  %v5670_v50 = vpop.permute.xlu0 %5669 }
 0x509   : > { %5714 = vst.msk [vmem:[#allocation5 + $0xc0] sm:$0xff] %vm4364_vm0, %v5670_v50  ;;  %5102 = vrot.lane.b32.xlu1 %v10950_v52, %s8936_s9  ;;  %v6244_v50 = vld [vmem:[#allocation4 + $0x91] sm:$0xff] }
 0x50a   : > { %5550 = vrot.lane.b32.xlu0 %v10952_v41, %s8936_s9  ;;  %v6274_v9 = vpack.c.bf16 %v6245_v6, %v6244_v50  ;;  %v6053_v50 = vld [vmem:[#allocation4 + $0x94] sm:$0xff] }
 0x50b   : > { %v4083_v56 = vpop.permute.xlu1 %4082 }
 0x50c   : > { %4119 = vst.msk [vmem:[#allocation5 + $0x2a0] sm:$0xff] %vm4106_vm14, %v4083_v56  ;;  %v4535_v29 = vpop.permute.xlu0 %4534 }
 0x50d   : > { %4570 = vst.msk [vmem:[#allocation5 + $0x2a8] sm:$0xff] %vm4106_vm14, %v4535_v29  ;;  %5230 = vrot.lane.b32.xlu1 %v5190_v32, %s8944_s8 }
 0x50e   : > { %5679 = vrot.lane.b32.xlu0 %v10958_v42, %s8944_s8 }
 0x50f   : > { %v4212_v62 = vpop.permute.xlu1 %4211  ;;  %v6711_v53 = vld [vmem:[#allocation5 + $0xb8] sm:$0xff] }
 0x510   : > { %4248 = vst.msk [vmem:[#allocation5 + $0x2a0] sm:$0xff] %vm4235_vm15, %v4212_v62  ;;  %v4663_v52 = vpop.permute.xlu0 %4662  ;;  %v6712_v2 = vld [vmem:[#allocation5 + $0xc0] sm:$0xff] }
 0x511   : > { %4698 = vst.msk [vmem:[#allocation5 + $0x2a8] sm:$0xff] %vm4235_vm15, %v4663_v52  ;;  %5857 = vrot.lane.b32.xlu1 %v10692_v4, %s8928_s17  ;;  %7472 = vmatprep.mubr.bf16.mxu0 %v6712_v2  ;;  %v6052_v62 = vld [vmem:[#allocation4 + $0x84] sm:$0xff] }
 0x512   : > { %6306 = vrot.lane.b32.xlu0 %v6273_v8, %s8928_s17  ;;  %7473 = vmatmul.mubr.bf16.gmra.mrb[44].mxu0 %v6711_v53  ;;  %v6081_v20 = vpack.c.bf16 %v6052_v62, %v6051_v28  ;;  %v5362_v2 = vld [vmem:[#allocation4 + $0x123] sm:$0xff]  ;;  %v5363_v8 = vld [vmem:[#allocation4 + $0x12b] sm:$0xff] }
 0x513   : > { %v4341_v44 = vpop.permute.xlu1 %4340 }
 0x514   : > { %4377 = vst.msk [vmem:[#allocation5 + $0x2a0] sm:$0xff] %vm4364_vm0, %v4341_v44  ;;  %v4791_v27 = vpop.permute.xlu0 %4790 }
 0x515   : > { %4826 = vst.msk [vmem:[#allocation5 + $0x2a8] sm:$0xff] %vm4364_vm0, %v4791_v27  ;;  %5985 = vrot.lane.b32.xlu1 %v10694_v23, %s8936_s9  ;;  %v5384_v27 = vpack.c.bf16 %v5363_v8, %v5362_v2 }
 0x516   : > { %6434 = vrot.lane.b32.xlu0 %v10698_v48, %s8936_s9 }
 0x517   : > { %v4967_v4 = vpop.permute.xlu1 %4966 }
 0x518   : > { %5010 = vst.msk [vmem:[#allocation5 + $0xf0] sm:$0xff] %vm4106_vm14, %v4967_v4  ;;  %v5415_v46 = vpop.permute.xlu0 %5414 }
 0x519   : > { %5458 = vst.msk [vmem:[#allocation5 + $0xf8] sm:$0xff] %vm4106_vm14, %v5415_v46  ;;  %6113 = vrot.lane.b32.xlu1 %v6080_v36, %s8944_s8  ;;  %v5170_v36 = vld [vmem:[#allocation4 + $0x121] sm:$0xff]  ;;  %v5171_v46 = vld [vmem:[#allocation4 + $0x129] sm:$0xff] }
 0x51a   : > { %6562 = vrot.lane.b32.xlu0 %v10702_v26, %s8944_s8  ;;  %v5192_v21 = vpack.c.bf16 %v5171_v46, %v5170_v36 }
 0x51b   : > { %v5095_v35 = vpop.permute.xlu1 %5094  ;;  %v6772_v3 = vld [vmem:[#allocation5 + $0x2a0] sm:$0xff] }
 0x51c   : > { %5138 = vst.msk [vmem:[#allocation5 + $0xf0] sm:$0xff] %vm4235_vm15, %v5095_v35  ;;  %v5543_v23 = vpop.permute.xlu0 %5542  ;;  %v6773_v17 = vld [vmem:[#allocation5 + $0x2a8] sm:$0xff]  ;;  %v6247_v35 = vld [vmem:[#allocation4 + $0xb1] sm:$0xff] }
 0x51d   : > { %5586 = vst.msk [vmem:[#allocation5 + $0xf8] sm:$0xff] %vm4235_vm15, %v5543_v23  ;;  %4976 = vrot.lane.b32.xlu1 %v10952_v41, %s8928_s17  ;;  %7383 = vmatprep.mubr.bf16.mxu1 %v6773_v17  ;;  %v6246_v17 = vld [vmem:[#allocation4 + $0xa9] sm:$0xff] }
 0x51e   : > { %5424 = vrot.lane.b32.xlu0 %v5383_v49, %s8928_s17  ;;  %7384 = vmatmul.mubr.bf16.gmra.mrb[48].mxu1 %v6772_v3 }
 0x51f   : > { %v5223_v19 = vpop.permute.xlu1 %5222 }
 0x520   : > { %5266 = vst.msk [vmem:[#allocation5 + $0xf0] sm:$0xff] %vm4364_vm0, %v5223_v19  ;;  %v5672_v25 = vpop.permute.xlu0 %5671  ;;  %v6275_v19 = vpack.c.bf16 %v6247_v35, %v6246_v17 }
 0x521   : > { %5715 = vst.msk [vmem:[#allocation5 + $0xf8] sm:$0xff] %vm4364_vm0, %v5672_v25  ;;  %5104 = vrot.lane.b32.xlu1 %v10958_v42, %s8936_s9 }
 0x522   : > { %5552 = vrot.lane.b32.xlu0 %v10965_v24, %s8936_s9 }
 0x523   : > { %v4085_v41 = vpop.permute.xlu1 %4084 }
 0x524   : > { %4120 = vst.msk [vmem:[#allocation5 + $0x2d8] sm:$0xff] %vm4106_vm14, %v4085_v41  ;;  %v4537_v37 = vpop.permute.xlu0 %4536 }
 0x525   : > { %4571 = vst.msk [vmem:[#allocation5 + $0x2e0] sm:$0xff] %vm4106_vm14, %v4537_v37  ;;  %5232 = vrot.lane.b32.xlu1 %v5191_v30, %s8944_s8 }
 0x526   : > { %5681 = vrot.lane.b32.xlu0 %v11071_v59, %s8944_s8 }
 0x527   : > { %v4214_v63 = vpop.permute.xlu1 %4213  ;;  %v6718_v56 = vld [vmem:[#allocation5 + $0xf0] sm:$0xff] }
 0x528   : > { %4249 = vst.msk [vmem:[#allocation5 + $0x2d8] sm:$0xff] %vm4235_vm15, %v4214_v63  ;;  %v4665_v42 = vpop.permute.xlu0 %4664  ;;  %v6719_v39 = vld [vmem:[#allocation5 + $0xf8] sm:$0xff] }
 0x529   : > { %4699 = vst.msk [vmem:[#allocation5 + $0x2e0] sm:$0xff] %vm4235_vm15, %v4665_v42  ;;  %5859 = vrot.lane.b32.xlu1 %v10698_v48, %s8928_s17  ;;  %7480 = vmatprep.mubr.bf16.mxu0 %v6719_v39  ;;  %v6054_v42 = vld [vmem:[#allocation4 + $0x9c] sm:$0xff] }
 0x52a   : > { %6308 = vrot.lane.b32.xlu0 %v6274_v9, %s8928_s17  ;;  %7481 = vmatmul.mubr.bf16.gmra.mrb[48].mxu0 %v6718_v56  ;;  %v6082_v39 = vpack.c.bf16 %v6054_v42, %v6053_v50 }
 0x52b   : > { %v4343_v32 = vpop.permute.xlu1 %4342 }
 0x52c   : > { %4378 = vst.msk [vmem:[#allocation5 + $0x2d8] sm:$0xff] %vm4364_vm0, %v4343_v32  ;;  %v4793_v29 = vpop.permute.xlu0 %4792  ;;  %v5364_v32 = vld [vmem:[#allocation4 + $0x13b] sm:$0xff] }
 0x52d   : > { %4827 = vst.msk [vmem:[#allocation5 + $0x2e0] sm:$0xff] %vm4364_vm0, %v4793_v29  ;;  %5987 = vrot.lane.b32.xlu1 %v10702_v26, %s8936_s9  ;;  %v5365_v29 = vld [vmem:[#allocation4 + $0x143] sm:$0xff] }
 0x52e   : > { %6436 = vrot.lane.b32.xlu0 %v10800_v31, %s8936_s9  ;;  %v5385_v8 = vpack.c.bf16 %v5365_v29, %v5364_v32 }
 0x52f   : > { %v4969_v48 = vpop.permute.xlu1 %4968 }
 0x530   : > { %5011 = vst.msk [vmem:[#allocation5 + $0x128] sm:$0xff] %vm4106_vm14, %v4969_v48  ;;  %v5417_v52 = vpop.permute.xlu0 %5416 }
 0x531   : > { %5459 = vst.msk [vmem:[#allocation5 + $0x130] sm:$0xff] %vm4106_vm14, %v5417_v52  ;;  %6115 = vrot.lane.b32.xlu1 %v6081_v20, %s8944_s8 }
 0x532   : > { %6564 = vrot.lane.b32.xlu0 %v10803_v54, %s8944_s8 }
 0x533   : > { %v5097_v53 = vpop.permute.xlu1 %5096  ;;  %v6779_v38 = vld [vmem:[#allocation5 + $0x2d8] sm:$0xff] }
 0x534   : > { %5139 = vst.msk [vmem:[#allocation5 + $0x128] sm:$0xff] %vm4235_vm15, %v5097_v53  ;;  %v5545_v26 = vpop.permute.xlu0 %5544  ;;  %v6780_v44 = vld [vmem:[#allocation5 + $0x2e0] sm:$0xff] }
 0x535   : > { %5587 = vst.msk [vmem:[#allocation5 + $0x130] sm:$0xff] %vm4235_vm15, %v5545_v26  ;;  %4978 = vrot.lane.b32.xlu1 %v10965_v24, %s8928_s17  ;;  %7391 = vmatprep.mubr.bf16.mxu1 %v6780_v44 }
 0x536   : > { %5426 = vrot.lane.b32.xlu0 %v5384_v27, %s8928_s17  ;;  %7392 = vmatmul.mubr.bf16.gmra.mrb[52].mxu1 %v6779_v38  ;;  %v5172_v38 = vld [vmem:[#allocation4 + $0x139] sm:$0xff] }
 0x537   : > { %v5225_v34 = vpop.permute.xlu1 %5224 }
 0x538   : > { %5267 = vst.msk [vmem:[#allocation5 + $0x128] sm:$0xff] %vm4364_vm0, %v5225_v34  ;;  %v5674_v4 = vpop.permute.xlu0 %5673  ;;  %v5173_v34 = vld [vmem:[#allocation4 + $0x141] sm:$0xff] }
 0x539   : > { %5716 = vst.msk [vmem:[#allocation5 + $0x130] sm:$0xff] %vm4364_vm0, %v5674_v4  ;;  %5106 = vrot.lane.b32.xlu1 %v11071_v59, %s8936_s9  ;;  %v5193_v4 = vpack.c.bf16 %v5173_v34, %v5172_v38  ;;  %v5175_v38 = vld [vmem:[#allocation4 + $0x159] sm:$0xff] }
 0x53a   : > { %5554 = vrot.lane.b32.xlu0 %v11073_v43, %s8936_s9 }
 0x53b   : > { %v4087_v24 = vpop.permute.xlu1 %4086 }
 0x53c   : > { %4121 = vst.msk [vmem:[#allocation5 + $0x310] sm:$0xff] %vm4106_vm14, %v4087_v24  ;;  %v4539_v45 = vpop.permute.xlu0 %4538 }
 0x53d   : > { %4572 = vst.msk [vmem:[#allocation5 + $0x318] sm:$0xff] %vm4106_vm14, %v4539_v45  ;;  %5234 = vrot.lane.b32.xlu1 %v5192_v21, %s8944_s8  ;;  %v6248_v21 = vld [vmem:[#allocation4 + $0xc1] sm:$0xff]  ;;  %v6249_v45 = vld [vmem:[#allocation4 + $0xc9] sm:$0xff] }
 0x53e   : > { %5683 = vrot.lane.b32.xlu0 %v11079_v11, %s8944_s8 }
 0x53f   : > { %v4216_v23 = vpop.permute.xlu1 %4215  ;;  %v6725_v7 = vld [vmem:[#allocation5 + $0x128] sm:$0xff] }
 0x540   : > { %4250 = vst.msk [vmem:[#allocation5 + $0x310] sm:$0xff] %vm4235_vm15, %v4216_v23  ;;  %v8311_v59 = vpop.f32.mrb[0].mxu1  ;;  %v4667_v49 = vpop.permute.xlu0 %4666  ;;  %v6726_v3 = vld [vmem:[#allocation5 + $0x130] sm:$0xff] }
 0x541   : > { %4700 = vst.msk [vmem:[#allocation5 + $0x318] sm:$0xff] %vm4235_vm15, %v4667_v49  ;;  %5861 = vrot.lane.b32.xlu1 %v10800_v31, %s8928_s17  ;;  %v8312_v25 = vpop.f32.mrb[1].mxu1  ;;  %7488 = vmatprep.mubr.bf16.mxu0 %v6726_v3 }
 0x542   : > { %v11556_v47 = vadd.f32 %v8312_v25, %v8311_v59  ;;  %v8314_v41 = vpop.f32.mrb[2].mxu1  ;;  %6310 = vrot.lane.b32.xlu0 %v6275_v19, %s8928_s17  ;;  %7489 = vmatmul.mubr.bf16.gmra.mrb[52].mxu0 %v6725_v7  ;;  %v6276_v19 = vpack.c.bf16 %v6249_v45, %v6248_v21  ;;  %v6251_v45 = vld [vmem:[#allocation4 + $0xe1] sm:$0xff] }
 0x543   : > { %v4345_v30 = vpop.permute.xlu1 %4344  ;;  %v8315_v37 = vpop.f32.mrb[3].mxu1 }
 0x544   : > { %4379 = vst.msk [vmem:[#allocation5 + $0x310] sm:$0xff] %vm4364_vm0, %v4345_v30  ;;  %v11560_v6 = vadd.f32 %v8315_v37, %v8314_v41  ;;  %v4795_v63 = vpop.permute.xlu0 %4794  ;;  %v6055_v30 = vld [vmem:[#allocation4 + $0xac] sm:$0xff]  ;;  %v6056_v37 = vld [vmem:[#allocation4 + $0xb4] sm:$0xff] }
 0x545   : > { %4828 = vst.msk [vmem:[#allocation5 + $0x318] sm:$0xff] %vm4364_vm0, %v4795_v63  ;;  %5989 = vrot.lane.b32.xlu1 %v10803_v54, %s8936_s9 }
 0x546   : > { %6438 = vrot.lane.b32.xlu0 %v10807_v12, %s8936_s9 }
 0x547   : > { %v4971_v31 = vpop.permute.xlu1 %4970 }
 0x548   : > { %5012 = vst.msk [vmem:[#allocation5 + $0x160] sm:$0xff] %vm4106_vm14, %v4971_v31  ;;  %v5419_v9 = vpop.permute.xlu0 %5418 }
 0x549   : > { %5460 = vst.msk [vmem:[#allocation5 + $0x168] sm:$0xff] %vm4106_vm14, %v5419_v9  ;;  %6117 = vrot.lane.b32.xlu1 %v6082_v39, %s8944_s8  ;;  %v6083_v39 = vpack.c.bf16 %v6056_v37, %v6055_v30  ;;  %v8852_v9 = vld [vmem:[%s12382_s3 + $0x180] sm:$0xff]  }
 0x54a   : > { %v8317_v56 = vpop.f32.mrb[4].mxu1  ;;  %6566 = vrot.lane.b32.xlu0 %v10811_v1, %s8944_s8  ;;  %8695 = vmatprep.subr.bf16.mxu0 %v8852_v9 }
 0x54b   : > { %v8318_v28 = vpop.f32.mrb[5].mxu1  ;;  %v5099_v62 = vpop.permute.xlu1 %5098  ;;  %v6786_v26 = vld [vmem:[#allocation5 + $0x310] sm:$0xff]  ;;  %8696 = vmatpush3.bf16.msra.mxu0 %v8852_v9 }
 0x54c   : > { %v11572_v54 = vadd.f32 %v8318_v28, %v8317_v56  ;;  %v8320_v48 = vpop.f32.mrb[6].mxu1  ;;  %5140 = vst.msk [vmem:[#allocation5 + $0x160] sm:$0xff] %vm4235_vm15, %v5099_v62  ;;  %v5547_v52 = vpop.permute.xlu0 %5546  ;;  %v6787_v2 = vld [vmem:[#allocation5 + $0x318] sm:$0xff] }
 0x54d   : > { %v8321_v20 = vpop.f32.mrb[7].mxu1  ;;  %5588 = vst.msk [vmem:[#allocation5 + $0x168] sm:$0xff] %vm4235_vm15, %v5547_v52  ;;  %4980 = vrot.lane.b32.xlu1 %v11073_v43, %s8928_s17  ;;  %7399 = vmatprep.mubr.bf16.mxu1 %v6787_v2  ;;  %v5367_v28 = vld [vmem:[#allocation4 + $0x15b] sm:$0xff] }
 0x54e   : > { %v11575_v53 = vadd.f32 %v8321_v20, %v8320_v48  ;;  %5428 = vrot.lane.b32.xlu0 %v5385_v8, %s8928_s17  ;;  %7400 = vmatmul.mubr.bf16.gmra.mrb[56].mxu1 %v6786_v26 }
 0x54f   : > { %v5227_v44 = vpop.permute.xlu1 %5226 }
 0x550   : > { %5268 = vst.msk [vmem:[#allocation5 + $0x160] sm:$0xff] %vm4364_vm0, %v5227_v44  ;;  %v5676_v27 = vpop.permute.xlu0 %5675 }
 0x551   : > { %5717 = vst.msk [vmem:[#allocation5 + $0x168] sm:$0xff] %vm4364_vm0, %v5676_v27  ;;  %5108 = vrot.lane.b32.xlu1 %v11079_v11, %s8936_s9  ;;  %v5174_v27 = vld [vmem:[#allocation4 + $0x151] sm:$0xff] }
 0x552   : > { %5556 = vrot.lane.b32.xlu0 %v11081_v60, %s8936_s9 }
 0x553   : > { %v4089_v43 = vpop.permute.xlu1 %4088 }
 0x554   : > { %4122 = vst.msk [vmem:[#allocation5 + $0x348] sm:$0xff] %vm4106_vm14, %v4089_v43  ;;  %v8323_v36 = vpop.f32.mrb[8].mxu1  ;;  %v4541_v46 = vpop.permute.xlu0 %4540 }
 0x555   : > { %4573 = vst.msk [vmem:[#allocation5 + $0x350] sm:$0xff] %vm4106_vm14, %v4541_v46  ;;  %5236 = vrot.lane.b32.xlu1 %v5193_v4, %s8944_s8  ;;  %v8324_v24 = vpop.f32.mrb[9].mxu1  ;;  %v11632_v46 = vpack.c.bf16 %v5175_v38, %v5174_v27 }
 0x556   : > { %v11590_v35 = vadd.f32 %v8324_v24, %v8323_v36  ;;  %v8326_v23 = vpop.f32.mrb[10].mxu1  ;;  %5685 = vrot.lane.b32.xlu0 %v11173_v13, %s8944_s8 }
 0x557   : > { %v4218_v11 = vpop.permute.xlu1 %4217  ;;  %v8327_v17 = vpop.f32.mrb[11].mxu1  ;;  %v6732_v25 = vld [vmem:[#allocation5 + $0x160] sm:$0xff] }
 0x558   : > { %4251 = vst.msk [vmem:[#allocation5 + $0x348] sm:$0xff] %vm4235_vm15, %v4218_v11  ;;  %v11595_v59 = vadd.f32 %v8327_v17, %v8326_v23  ;;  %v4669_v49 = vpop.permute.xlu0 %4668  ;;  %v6733_v3 = vld [vmem:[#allocation5 + $0x168] sm:$0xff] }
 0x559   : > { %4701 = vst.msk [vmem:[#allocation5 + $0x350] sm:$0xff] %vm4235_vm15, %v4669_v49  ;;  %5863 = vrot.lane.b32.xlu1 %v10807_v12, %s8928_s17  ;;  %7496 = vmatprep.mubr.bf16.mxu0 %v6733_v3 }
 0x55a   : > { %6312 = vrot.lane.b32.xlu0 %v6276_v19, %s8928_s17  ;;  %7497 = vmatmul.mubr.bf16.gmra.mrb[56].mxu0 %v6732_v25 }
 0x55b   : > { %v4347_v7 = vpop.permute.xlu1 %4346 }
 0x55c   : > { %4380 = vst.msk [vmem:[#allocation5 + $0x348] sm:$0xff] %vm4364_vm0, %v4347_v7  ;;  %v4797_v41 = vpop.permute.xlu0 %4796 }
 0x55d   : > { %4829 = vst.msk [vmem:[#allocation5 + $0x350] sm:$0xff] %vm4364_vm0, %v4797_v41  ;;  %5991 = vrot.lane.b32.xlu1 %v10811_v1, %s8936_s9  ;;  %v8329_v63 = vpop.f32.mrb[12].mxu1  ;;  %v5366_v1 = vld [vmem:[#allocation4 + $0x153] sm:$0xff] }
 0x55e   : > { %v8330_v50 = vpop.f32.mrb[13].mxu1  ;;  %6440 = vrot.lane.b32.xlu0 %v10875_v61, %s8936_s9  ;;  %v5386_v52 = vpack.c.bf16 %v5367_v28, %v5366_v1 }
 0x55f   : > { %v11607_v12 = vadd.f32 %v8330_v50, %v8329_v63  ;;  %v4973_v42 = vpop.permute.xlu1 %4972  ;;  %v8332_v31 = vpop.f32.mrb[14].mxu1  ;;  %v6057_v50 = vld [vmem:[#allocation4 + $0xc4] sm:$0xff] }
 0x560   : > { %5013 = vst.msk [vmem:[#allocation5 + $0x198] sm:$0xff] %vm4106_vm14, %v4973_v42  ;;  %v8333_v56 = vpop.f32.mrb[15].mxu1  ;;  %v5421_v32 = vpop.permute.xlu0 %5420  ;;  %v6058_v42 = vld [vmem:[#allocation4 + $0xcc] sm:$0xff] }
 0x561   : > { %v11613_v29 = vadd.f32 %v8333_v56, %v8332_v31  ;;  %5461 = vst.msk [vmem:[#allocation5 + $0x1a0] sm:$0xff] %vm4106_vm14, %v5421_v32  ;;  %6119 = vrot.lane.b32.xlu1 %v6083_v39, %s8944_s8  ;;  %v6084_v39 = vpack.c.bf16 %v6058_v42, %v6057_v50  ;;  %v5368_v56 = vld [vmem:[#allocation4 + $0x16b] sm:$0xff]  ;;  %v5369_v32 = vld [vmem:[#allocation4 + $0x173] sm:$0xff] }
 0x562   : > { %6568 = vrot.lane.b32.xlu0 %v10879_v55, %s8944_s8 }
 0x563   : > { %v5101_v62 = vpop.permute.xlu1 %5100  ;;  %v6793_v2 = vld [vmem:[#allocation5 + $0x348] sm:$0xff] }
 0x564   : > { %5141 = vst.msk [vmem:[#allocation5 + $0x198] sm:$0xff] %vm4235_vm15, %v5101_v62  ;;  %v5549_v48 = vpop.permute.xlu0 %5548  ;;  %v6794_v20 = vld [vmem:[#allocation5 + $0x350] sm:$0xff] }
 0x565   : > { %5589 = vst.msk [vmem:[#allocation5 + $0x1a0] sm:$0xff] %vm4235_vm15, %v5549_v48  ;;  %4982 = vrot.lane.b32.xlu1 %v11081_v60, %s8928_s17  ;;  %7407 = vmatprep.mubr.bf16.mxu1 %v6794_v20  ;;  %v11663_v48 = vpack.c.bf16 %v5369_v32, %v5368_v56  ;;  %v6059_v32 = vld [vmem:[#allocation4 + $0xdc] sm:$0xff] }
 0x566   : > { %5430 = vrot.lane.b32.xlu0 %v5386_v52, %s8928_s17  ;;  %7408 = vmatmul.mubr.bf16.gmra.mrb[60].mxu1 %v6793_v2 }
 0x567   : > { %v5229_v8 = vpop.permute.xlu1 %5228 }
 0x568   : > { %5269 = vst.msk [vmem:[#allocation5 + $0x198] sm:$0xff] %vm4364_vm0, %v5229_v8  ;;  %v5678_v26 = vpop.permute.xlu0 %5677  ;;  %v8335_v44 = vpop.f32.mrb[16].mxu1 }
 0x569   : > { %5718 = vst.msk [vmem:[#allocation5 + $0x1a0] sm:$0xff] %vm4364_vm0, %v5678_v26  ;;  %5110 = vrot.lane.b32.xlu1 %v11173_v13, %s8936_s9  ;;  %v8336_v34 = vpop.f32.mrb[17].mxu1  ;;  %v6250_v13 = vld [vmem:[#allocation4 + $0xd9] sm:$0xff] }
 0x56a   : > { %v11628_v43 = vadd.f32 %v8336_v34, %v8335_v44  ;;  %5558 = vrot.lane.b32.xlu0 %v11176_v58, %s8936_s9  ;;  %v8338_v60 = vpop.f32.mrb[18].mxu1  ;;  %v6277_v49 = vpack.c.bf16 %v6251_v45, %v6250_v13  ;;  %v5176_v34 = vld [vmem:[#allocation4 + $0x169] sm:$0xff]  ;;  %v6268_v13 = vld [vmem:[#allocation4 + $0x1b1] sm:$0xff]  ;;  %v6269_v45 = vld [vmem:[#allocation4 + $0x1b9] sm:$0xff] }
 0x56b   : > { %v5856_v4 = vpop.permute.xlu1 %5855  ;;  %v8339_v36 = vpop.f32.mrb[19].mxu1 }
 0x56c   : > { %5903 = vst.msk [vmem:[#allocation5 + $0x20] sm:$0xff] %vm4106_vm14, %v5856_v4  ;;  %v11635_v24 = vadd.f32 %v8339_v36, %v8338_v60  ;;  %v6305_v21 = vpop.permute.xlu0 %6304  ;;  %v5177_v60 = vld [vmem:[#allocation4 + $0x171] sm:$0xff]  ;;  %v5626_v4 = vld [vmem:[#allocation4 + $0x188] sm:$0xff] }
 0x56d   : > { %6352 = vst.msk [vmem:[#allocation5 + $0x28] sm:$0xff] %vm4106_vm14, %v6305_v21  ;;  %5238 = vrot.lane.b32.xlu1 %v11632_v46, %s8944_s8  ;;  %v11680_v21 = vpack.c.bf16 %v5177_v60, %v5176_v34 }
 0x56e   : > { %5687 = vrot.lane.b32.xlu0 %v11178_v51, %s8944_s8 }
 0x56f   : > { %v5984_v23 = vpop.permute.xlu1 %5983  ;;  %v6739_v19 = vld [vmem:[#allocation5 + $0x198] sm:$0xff] }
 0x570   : > { %6031 = vst.msk [vmem:[#allocation5 + $0x20] sm:$0xff] %vm4235_vm15, %v5984_v23  ;;  %v6433_v11 = vpop.permute.xlu0 %6432  ;;  %v6740_v17 = vld [vmem:[#allocation5 + $0x1a0] sm:$0xff] }
 0x571   : > { %6480 = vst.msk [vmem:[#allocation5 + $0x28] sm:$0xff] %vm4235_vm15, %v6433_v11  ;;  %5865 = vrot.lane.b32.xlu1 %v10875_v61, %s8928_s17  ;;  %v8341_v3 = vpop.f32.mrb[20].mxu1  ;;  %7504 = vmatprep.mubr.bf16.mxu0 %v6740_v17  ;;  %v11685_v17 = vpack.c.bf16 %v6269_v45, %v6268_v13 }
 0x572   : > { %6314 = vrot.lane.b32.xlu0 %v6277_v49, %s8928_s17  ;;  %v8342_v25 = vpop.f32.mrb[21].mxu1  ;;  %7505 = vmatmul.mubr.bf16.gmra.mrb[60].mxu0 %v6739_v19  ;;  %v6252_v49 = vld [vmem:[#allocation4 + $0xf1] sm:$0xff] }
 0x573   : > { %v11647_v7 = vadd.f32 %v8342_v25, %v8341_v3  ;;  %v6112_v41 = vpop.permute.xlu1 %6111  ;;  %v8344_v30 = vpop.f32.mrb[22].mxu1  ;;  %v6253_v3 = vld [vmem:[#allocation4 + $0xf9] sm:$0xff]  ;;  %5790 = vst.msk [vmem:[#allocation5 + $0x368] sm:$0xff] %vm3835_vm12, %v11685_v17 }
 0x574   : > { %6159 = vst.msk [vmem:[#allocation5 + $0x20] sm:$0xff] %vm4364_vm0, %v6112_v41  ;;  %v6561_v37 = vpop.permute.xlu0 %6560  ;;  %v8345_v63 = vpop.f32.mrb[23].mxu1  ;;  %v6278_v42 = vpack.c.bf16 %v6253_v3, %v6252_v49 }
 0x575   : > { %6608 = vst.msk [vmem:[#allocation5 + $0x28] sm:$0xff] %vm4364_vm0, %v6561_v37  ;;  %v11651_v61 = vadd.f32 %v8345_v63, %v8344_v30  ;;  %5993 = vrot.lane.b32.xlu1 %v10879_v55, %s8936_s9 }
 0x576   : > { %6442 = vrot.lane.b32.xlu0 %v10885_v0, %s8936_s9 }
 0x577   : > { %v4975_v31 = vpop.permute.xlu1 %4974 }
 0x578   : > { %5014 = vst.msk [vmem:[#allocation5 + $0x1d0] sm:$0xff] %vm4106_vm14, %v4975_v31  ;;  %v5423_v9 = vpop.permute.xlu0 %5422 }
 0x579   : > { %5462 = vst.msk [vmem:[#allocation5 + $0x1d8] sm:$0xff] %vm4106_vm14, %v5423_v9  ;;  %6121 = vrot.lane.b32.xlu1 %v6084_v39, %s8944_s8 }
 0x57a   : > { %6570 = vrot.lane.b32.xlu0 %v10889_v15, %s8944_s8 }
 0x57b   : > { %v5103_v1 = vpop.permute.xlu1 %5102  ;;  %v6692_v52 = vld [vmem:[#allocation5 + $0x20] sm:$0xff] }
 0x57c   : > { %5142 = vst.msk [vmem:[#allocation5 + $0x1d0] sm:$0xff] %vm4235_vm15, %v5103_v1  ;;  %v5551_v55 = vpop.permute.xlu0 %5550  ;;  %v8347_v28 = vpop.f32.mrb[24].mxu1  ;;  %v6693_v62 = vld [vmem:[#allocation5 + $0x28] sm:$0xff] }
 0x57d   : > { %5590 = vst.msk [vmem:[#allocation5 + $0x1d8] sm:$0xff] %vm4235_vm15, %v5551_v55  ;;  %4984 = vrot.lane.b32.xlu1 %v11176_v58, %s8928_s17  ;;  %v8348_v20 = vpop.f32.mrb[25].mxu1  ;;  %7609 = vmatprep.mubr.bf16.mxu1 %v6693_v62  ;;  %v5625_v58 = vld [vmem:[#allocation4 + $0x180] sm:$0xff] }
 0x57e   : > { %v11668_v2 = vadd.f32 %v8348_v20, %v8347_v28  ;;  %5432 = vrot.lane.b32.xlu0 %v11663_v48, %s8928_s17  ;;  %v8350_v8 = vpop.f32.mrb[26].mxu1  ;;  %7610 = vmatmul.mubr.bf16.vlgmr.msra.gmra.mrb[64].mxu1 %v6692_v52  ;;  %v11683_v11 = vpack.c.bf16 %v5626_v4, %v5625_v58  ;;  %v6060_v1 = vld [vmem:[#allocation4 + $0xe4] sm:$0xff] }
 0x57f   : > { %v5231_v26 = vpop.permute.xlu1 %5230  ;;  %v8351_v44 = vpop.f32.mrb[27].mxu1  ;;  %v12435_v55 = vld [vmem:[#allocation15_spill] sm:$0xff]  ;;  %v6085_v28 = vpack.c.bf16 %v6060_v1, %v6059_v32 }
 0x580   : > { %5270 = vst.msk [vmem:[#allocation5 + $0x1d0] sm:$0xff] %vm4364_vm0, %v5231_v26  ;;  %v11673_v27 = vadd.f32 %v8351_v44, %v8350_v8  ;;  %v5680_v38 = vpop.permute.xlu0 %5679  ;;  %v5370_v52 = vld [vmem:[#allocation4 + $0x183] sm:$0xff]  ;;  %v5371_v8 = vld [vmem:[#allocation4 + $0x18b] sm:$0xff] }
 0x581   : > { %5719 = vst.msk [vmem:[#allocation5 + $0x1d8] sm:$0xff] %vm4364_vm0, %v5680_v38  ;;  %5112 = vrot.lane.b32.xlu1 %v11178_v51, %s8936_s9  ;;  %v12436_v26 = vld [vmem:[#allocation12_spill] sm:$0xff] }
 0x582   : > { %5560 = vrot.lane.b32.xlu0 %v11185_v16, %s8936_s9 }
 0x583   : > { %v5858_v36 = vpop.permute.xlu1 %5857 }
 0x584   : > { %5904 = vst.msk [vmem:[#allocation5 + $0x58] sm:$0xff] %vm4106_vm14, %v5858_v36  ;;  %v6307_v23 = vpop.permute.xlu0 %6306  ;;  %v11717_v36 = vpack.c.bf16 %v5371_v8, %v5370_v52 }
 0x585   : > { %6353 = vst.msk [vmem:[#allocation5 + $0x60] sm:$0xff] %vm4106_vm14, %v6307_v23  ;;  %5240 = vrot.lane.b32.xlu1 %v11680_v21, %s8944_s8  ;;  %v8353_v51 = vpop.f32.mrb[28].mxu1  ;;  %v5498_v23 = vld [vmem:[#allocation4 + $0x184] sm:$0xff] }
 0x586   : > { %5689 = vrot.lane.b32.xlu0 %v11683_v11, %s8944_s8  ;;  %v8354_v19 = vpop.f32.mrb[29].mxu1 }
 0x587   : > { %v11694_v25 = vadd.f32 %v8354_v19, %v8353_v51  ;;  %v5986_v41 = vpop.permute.xlu1 %5985  ;;  %v8356_v30 = vpop.f32.mrb[30].mxu1  ;;  %v6746_v39 = vld [vmem:[#allocation5 + $0x1d0] sm:$0xff] }
 0x588   : > { %6032 = vst.msk [vmem:[#allocation5 + $0x58] sm:$0xff] %vm4235_vm15, %v5986_v41  ;;  %v6435_v37 = vpop.permute.xlu0 %6434  ;;  %v8357_v63 = vpop.f32.mrb[31].mxu1  ;;  %v6747_v50 = vld [vmem:[#allocation5 + $0x1d8] sm:$0xff]  ;;  %v5499_v51 = vld [vmem:[#allocation4 + $0x18c] sm:$0xff]  ;;  %v5178_v41 = vld [vmem:[#allocation4 + $0x181] sm:$0xff] }
 0x589   : > { %6481 = vst.msk [vmem:[#allocation5 + $0x60] sm:$0xff] %vm4235_vm15, %v6435_v37  ;;  %v11698_v31 = vadd.f32 %v8357_v63, %v8356_v30  ;;  %5867 = vrot.lane.b32.xlu1 %v10885_v0, %s8928_s17  ;;  %7512 = vmatprep.mubr.bf16.mxu0 %v6747_v50  ;;  %v11727_v19 = vpack.c.bf16 %v5499_v51, %v5498_v23  ;;  %v5179_v30 = vld [vmem:[#allocation4 + $0x189] sm:$0xff]  ;;  %v5628_v37 = vld [vmem:[#allocation4 + $0x1a0] sm:$0xff]  ;;  %v6077_v63 = vld [vmem:[#allocation4 + $0x1b4] sm:$0xff] }
 0x58a   : > { %6316 = vrot.lane.b32.xlu0 %v6278_v42, %s8928_s17  ;;  %7513 = vmatmul.mubr.bf16.gmra.mrb[64].mxu0 %v6746_v39  ;;  %v6078_v50 = vld [vmem:[#allocation4 + $0x1bc] sm:$0xff]  ;;  %v11734_v39 = vpack.c.bf16 %v5179_v30, %v5178_v41 }
 0x58b   : > { %v6114_v9 = vpop.permute.xlu1 %6113  ;;  %v6062_v30 = vld [vmem:[#allocation4 + $0xfc] sm:$0xff] }
 0x58c   : > { %6160 = vst.msk [vmem:[#allocation5 + $0x58] sm:$0xff] %vm4364_vm0, %v6114_v9  ;;  %v6563_v56 = vpop.permute.xlu0 %6562  ;;  %v11736_v9 = vpack.c.bf16 %v6078_v50, %v6077_v63 }
 0x58d   : > { %6609 = vst.msk [vmem:[#allocation5 + $0x60] sm:$0xff] %vm4364_vm0, %v6563_v56  ;;  %5995 = vrot.lane.b32.xlu1 %v10889_v15, %s8936_s9  ;;  %v11741_v56 = vld [vmem:[%s12383_s4] ss:$0 sm:$0xff] }
 0x58e   : > { %6444 = vrot.lane.b32.xlu0 %v12435_v55, %s8936_s9  ;;  %6686 = vst.msk [vmem:[#allocation5 + $0x340] sm:$0xff] %vm3835_vm12, %v11736_v9  ;;  %v7290_v52 = vadd.f32 %v11556_v47, %v11741_v56 }
 0x58f   : > { %v4977_v0 = vpop.permute.xlu1 %4976 }
 0x590   : > { %5015 = vst.msk [vmem:[#allocation5 + $0x208] sm:$0xff] %vm4106_vm14, %v4977_v0  ;;  %v5425_v62 = vpop.permute.xlu0 %5424  ;;  %v6254_v0 = vld [vmem:[#allocation4 + $0x109] sm:$0xff] }
 0x591   : > { %5463 = vst.msk [vmem:[#allocation5 + $0x210] sm:$0xff] %vm4106_vm14, %v5425_v62  ;;  %6123 = vrot.lane.b32.xlu1 %v6085_v28, %s8944_s8  ;;  %v8359_v20 = vpop.f32.mrb[32].mxu1  ;;  %v6255_v28 = vld [vmem:[#allocation4 + $0x111] sm:$0xff]  ;;  %v8853_v62 = vld [vmem:[%s12382_s3 + $0x188] sm:$0xff]  }
 0x592   : > { %6572 = vrot.lane.b32.xlu0 %v12436_v26, %s8944_s8  ;;  %v8360_v44 = vpop.f32.mrb[33].mxu1  ;;  %8697 = vmatprep.subr.bf16.mxu0 %v8853_v62 }
 0x593   : > { %v11714_v15 = vadd.f32 %v8360_v44, %v8359_v20  ;;  %v5105_v38 = vpop.permute.xlu1 %5104  ;;  %v8362_v34 = vpop.f32.mrb[34].mxu1  ;;  %v6699_v45 = vld [vmem:[#allocation5 + $0x58] sm:$0xff]  ;;  %8698 = vmatpush3.bf16.msra.mxu0 %v8853_v62 }
 0x594   : > { %5143 = vst.msk [vmem:[#allocation5 + $0x208] sm:$0xff] %vm4235_vm15, %v5105_v38  ;;  %v5553_v60 = vpop.permute.xlu0 %5552  ;;  %v8363_v58 = vpop.f32.mrb[35].mxu1  ;;  %v6700_v4 = vld [vmem:[#allocation5 + $0x60] sm:$0xff] }
 0x595   : > { %5591 = vst.msk [vmem:[#allocation5 + $0x210] sm:$0xff] %vm4235_vm15, %v5553_v60  ;;  %v11720_v13 = vadd.f32 %v8363_v58, %v8362_v34  ;;  %4986 = vrot.lane.b32.xlu1 %v11185_v16, %s8928_s17  ;;  %7617 = vmatprep.mubr.bf16.mxu1 %v6700_v4  ;;  %v5627_v16 = vld [vmem:[#allocation4 + $0x198] sm:$0xff]  ;;  %v6279_v4 = vpack.c.bf16 %v6255_v28, %v6254_v0 }
 0x596   : > { %5434 = vrot.lane.b32.xlu0 %v11717_v36, %s8928_s17  ;;  %7618 = vmatmul.mubr.bf16.gmra.mrb[68].mxu1 %v6699_v45  ;;  %v11744_v32 = vpack.c.bf16 %v5628_v37, %v5627_v16  ;;  %v7293_v45 = vadd.f32 %v11560_v6, %v11741_v56  ;;  %v6061_v6 = vld [vmem:[#allocation4 + $0xf4] sm:$0xff] }
 0x597   : > { %v5233_v49 = vpop.permute.xlu1 %5232  ;;  %v6086_v37 = vpack.c.bf16 %v6062_v30, %v6061_v6 }
 0x598   : > { %5271 = vst.msk [vmem:[#allocation5 + $0x208] sm:$0xff] %vm4364_vm0, %v5233_v49  ;;  %v5682_v3 = vpop.permute.xlu0 %5681 }
 0x599   : > { %5720 = vst.msk [vmem:[#allocation5 + $0x210] sm:$0xff] %vm4364_vm0, %v5682_v3  ;;  %5114 = vrot.lane.b32.xlu1 %v11683_v11, %s8936_s9 }
 0x59a   : > { %5562 = vrot.lane.b32.xlu0 %v11727_v19, %s8936_s9 }
 0x59b   : > { %v5860_v42 = vpop.permute.xlu1 %5859 }
 0x59c   : > { %5905 = vst.msk [vmem:[#allocation5 + $0x90] sm:$0xff] %vm4106_vm14, %v5860_v42  ;;  %v6309_v11 = vpop.permute.xlu0 %6308  ;;  %v5372_v42 = vld [vmem:[#allocation4 + $0x19b] sm:$0xff] }
 0x59d   : > { %6354 = vst.msk [vmem:[#allocation5 + $0x98] sm:$0xff] %vm4106_vm14, %v6309_v11  ;;  %5242 = vrot.lane.b32.xlu1 %v11734_v39, %s8944_s8  ;;  %v8423_v1 = vpop.f32.mrb[32].mxu0  ;;  %v5373_v11 = vld [vmem:[#allocation4 + $0x1a3] sm:$0xff] }
 0x59e   : > { %v8424_v20 = vpop.f32.mrb[33].mxu0  ;;  %5691 = vrot.lane.b32.xlu0 %v11744_v32, %s8944_s8 }
 0x59f   : > { %v8425_v8 = vadd.f32 %v8424_v20, %v8423_v1  ;;  %v5988_v44 = vpop.permute.xlu1 %5987  ;;  %v8426_v38 = vpop.f32.mrb[34].mxu0  ;;  %v6753_v47 = vld [vmem:[#allocation5 + $0x208] sm:$0xff] }
 0x5a0   : > { %6033 = vst.msk [vmem:[#allocation5 + $0x90] sm:$0xff] %vm4235_vm15, %v5988_v44  ;;  %v8427_v34 = vpop.f32.mrb[35].mxu0  ;;  %v6437_v60 = vpop.permute.xlu0 %6436  ;;  %v6754_v58 = vld [vmem:[#allocation5 + $0x210] sm:$0xff] }
 0x5a1   : > { %v11761_v23 = vadd.f32 %v8425_v8, %v7290_v52  ;;  %v8428_v51 = vadd.f32 %v8427_v34, %v8426_v38  ;;  %6482 = vst.msk [vmem:[#allocation5 + $0x98] sm:$0xff] %vm4235_vm15, %v6437_v60  ;;  %5869 = vrot.lane.b32.xlu1 %v12435_v55, %s8928_s17  ;;  %7520 = vmatprep.mubr.bf16.mxu0 %v6754_v58  ;;  %v12437_v55 = vld [vmem:[#allocation14_spill] sm:$0xff]  ;;  %v5501_v60 = vld [vmem:[#allocation4 + $0x1a4] sm:$0xff] }
 0x5a2   : > { %6318 = vrot.lane.b32.xlu0 %v6279_v4, %s8928_s17  ;;  %7521 = vmatmul.mubr.bf16.gmra.mrb[68].mxu0 %v6753_v47  ;;  %v11783_v8 = vpack.c.bf16 %v5373_v11, %v5372_v42  ;;  %v5500_v34 = vld [vmem:[#allocation4 + $0x19c] sm:$0xff]  ;;  %v5629_v4 = vld [vmem:[#allocation4 + $0x1b0] sm:$0xff] }
 0x5a3   : > { %v11767_v49 = vadd.f32 %v8428_v51, %v7293_v45  ;;  %v6116_v3 = vpop.permute.xlu1 %6115  ;;  %v5630_v45 = vld [vmem:[#allocation4 + $0x1b8] sm:$0xff]  ;;  %v11793_v47 = vpack.c.bf16 %v5501_v60, %v5500_v34  ;;  %v6257_v42 = vld [vmem:[#allocation4 + $0x129] sm:$0xff]  ;;  %v7301_v34 = vadd.f32 %v11575_v53, %v11741_v56 }
 0x5a4   : > { %6161 = vst.msk [vmem:[#allocation5 + $0x90] sm:$0xff] %vm4364_vm0, %v6116_v3  ;;  %v6565_v41 = vpop.permute.xlu0 %6564  ;;  %v5180_v3 = vld [vmem:[#allocation4 + $0x199] sm:$0xff]  ;;  %v5646_v6 = vpack.c.bf16 %v5630_v45, %v5629_v4  ;;  %v6063_v53 = vld [vmem:[#allocation4 + $0x10c] sm:$0xff] }
 0x5a5   : > { %6610 = vst.msk [vmem:[#allocation5 + $0x98] sm:$0xff] %vm4364_vm0, %v6565_v41  ;;  %5997 = vrot.lane.b32.xlu1 %v12436_v26, %s8936_s9  ;;  %v5181_v41 = vld [vmem:[#allocation4 + $0x1a1] sm:$0xff] }
 0x5a6   : > { %6446 = vrot.lane.b32.xlu0 %v12437_v55, %s8936_s9 }
 0x5a7   : > { %v4979_v16 = vpop.permute.xlu1 %4978 }
 0x5a8   : > { %5016 = vst.msk [vmem:[#allocation5 + $0x240] sm:$0xff] %vm4106_vm14, %v4979_v16  ;;  %v5427_v63 = vpop.permute.xlu0 %5426  ;;  %v11800_v16 = vpack.c.bf16 %v5181_v41, %v5180_v3  ;;  %v6064_v3 = vld [vmem:[#allocation4 + $0x114] sm:$0xff] }
 0x5a9   : > { %5464 = vst.msk [vmem:[#allocation5 + $0x248] sm:$0xff] %vm4106_vm14, %v5427_v63  ;;  %6125 = vrot.lane.b32.xlu1 %v6086_v37, %s8944_s8  ;;  %v8365_v50 = vpop.f32.mrb[36].mxu1  ;;  %v6087_v41 = vpack.c.bf16 %v6064_v3, %v6063_v53 }
 0x5aa   : > { %6574 = vrot.lane.b32.xlu0 %v11005_v33, %s8944_s8  ;;  %v8366_v1 = vpop.f32.mrb[37].mxu1 }
 0x5ab   : > { %v11780_v26 = vadd.f32 %v8366_v1, %v8365_v50  ;;  %v5107_v0 = vpop.permute.xlu1 %5106  ;;  %v8368_v28 = vpop.f32.mrb[38].mxu1  ;;  %v6706_v38 = vld [vmem:[#allocation5 + $0x90] sm:$0xff]  ;;  %v6256_v50 = vld [vmem:[#allocation4 + $0x121] sm:$0xff] }
 0x5ac   : > { %5144 = vst.msk [vmem:[#allocation5 + $0x240] sm:$0xff] %vm4235_vm15, %v5107_v0  ;;  %v5555_v62 = vpop.permute.xlu0 %5554  ;;  %v8369_v20 = vpop.f32.mrb[39].mxu1  ;;  %v6707_v52 = vld [vmem:[#allocation5 + $0x98] sm:$0xff] }
 0x5ad   : > { %5592 = vst.msk [vmem:[#allocation5 + $0x248] sm:$0xff] %vm4235_vm15, %v5555_v62  ;;  %v11786_v44 = vadd.f32 %v8369_v20, %v8368_v28  ;;  %4988 = vrot.lane.b32.xlu1 %v11727_v19, %s8928_s17  ;;  %7625 = vmatprep.mubr.bf16.mxu1 %v6707_v52 }
 0x5ae   : > { %5436 = vrot.lane.b32.xlu0 %v11783_v8, %s8928_s17  ;;  %7626 = vmatmul.mubr.bf16.gmra.mrb[72].mxu1 %v6706_v38  ;;  %v6280_v38 = vpack.c.bf16 %v6257_v42, %v6256_v50  ;;  %v12438_v50 = vld [vmem:[#allocation13_spill] sm:$0xff] }
 0x5af   : > { %v5235_v58 = vpop.permute.xlu1 %5234 }
 0x5b0   : > { %5272 = vst.msk [vmem:[#allocation5 + $0x240] sm:$0xff] %vm4364_vm0, %v5235_v58  ;;  %v5684_v51 = vpop.permute.xlu0 %5683 }
 0x5b1   : > { %5721 = vst.msk [vmem:[#allocation5 + $0x248] sm:$0xff] %vm4364_vm0, %v5684_v51  ;;  %5116 = vrot.lane.b32.xlu1 %v11744_v32, %s8936_s9  ;;  %v7298_v32 = vadd.f32 %v11572_v54, %v11741_v56 }
 0x5b2   : > { %5564 = vrot.lane.b32.xlu0 %v11793_v47, %s8936_s9 }
 0x5b3   : > { %v5862_v30 = vpop.permute.xlu1 %5861 }
 0x5b4   : > { %5906 = vst.msk [vmem:[#allocation5 + $0xc8] sm:$0xff] %vm4106_vm14, %v5862_v30  ;;  %v6311_v37 = vpop.permute.xlu0 %6310 }
 0x5b5   : > { %6355 = vst.msk [vmem:[#allocation5 + $0xd0] sm:$0xff] %vm4106_vm14, %v6311_v37  ;;  %5244 = vrot.lane.b32.xlu1 %v11800_v16, %s8944_s8  ;;  %v8429_v63 = vpop.f32.mrb[36].mxu0  ;;  %v6258_v37 = vld [vmem:[#allocation4 + $0x139] sm:$0xff] }
 0x5b6   : > { %v8430_v11 = vpop.f32.mrb[37].mxu0  ;;  %5693 = vrot.lane.b32.xlu0 %v5646_v6, %s8944_s8 }
 0x5b7   : > { %v8431_v1 = vadd.f32 %v8430_v11, %v8429_v63  ;;  %v5990_v0 = vpop.permute.xlu1 %5989  ;;  %v8432_v28 = vpop.f32.mrb[38].mxu0  ;;  %v6760_v54 = vld [vmem:[#allocation5 + $0x240] sm:$0xff] }
 0x5b8   : > { %6034 = vst.msk [vmem:[#allocation5 + $0xc8] sm:$0xff] %vm4235_vm15, %v5990_v0  ;;  %v8433_v62 = vpop.f32.mrb[39].mxu0  ;;  %v6439_v20 = vpop.permute.xlu0 %6438  ;;  %v6761_v52 = vld [vmem:[#allocation5 + $0x248] sm:$0xff] }
 0x5b9   : > { %v11812_v60 = vadd.f32 %v8431_v1, %v7298_v32  ;;  %v8434_v58 = vadd.f32 %v8433_v62, %v8432_v28  ;;  %6483 = vst.msk [vmem:[#allocation5 + $0xd0] sm:$0xff] %vm4235_vm15, %v6439_v20  ;;  %5871 = vrot.lane.b32.xlu1 %v12437_v55, %s8928_s17  ;;  %7528 = vmatprep.mubr.bf16.mxu0 %v6761_v52  ;;  %v6259_v63 = vld [vmem:[#allocation4 + $0x141] sm:$0xff] }
 0x5ba   : > { %6320 = vrot.lane.b32.xlu0 %v6280_v38, %s8928_s17  ;;  %7529 = vmatmul.mubr.bf16.gmra.mrb[72].mxu0 %v6760_v54  ;;  %v6281_v62 = vpack.c.bf16 %v6259_v63, %v6258_v37  ;;  %v6066_v54 = vld [vmem:[#allocation4 + $0x12c] sm:$0xff] }
 0x5bb   : > { %v11818_v4 = vadd.f32 %v8434_v58, %v7301_v34  ;;  %v6118_v45 = vpop.permute.xlu1 %6117  ;;  %v6065_v58 = vld [vmem:[#allocation4 + $0x124] sm:$0xff] }
 0x5bc   : > { %6162 = vst.msk [vmem:[#allocation5 + $0xc8] sm:$0xff] %vm4364_vm0, %v6118_v45  ;;  %v6567_v51 = vpop.permute.xlu0 %6566  ;;  %v12439_v45 = vld [vmem:[#allocation11_spill] sm:$0xff] }
 0x5bd   : > { %6611 = vst.msk [vmem:[#allocation5 + $0xd0] sm:$0xff] %vm4364_vm0, %v6567_v51  ;;  %5999 = vrot.lane.b32.xlu1 %v11005_v33, %s8936_s9  ;;  %v6088_v51 = vpack.c.bf16 %v6066_v54, %v6065_v58 }
 0x5be   : > { %6448 = vrot.lane.b32.xlu0 %v11096_v57, %s8936_s9 }
 0x5bf   : > { %v4981_v55 = vpop.permute.xlu1 %4980 }
 0x5c0   : > { %5017 = vst.msk [vmem:[#allocation5 + $0x278] sm:$0xff] %vm4106_vm14, %v4981_v55  ;;  %v5429_v6 = vpop.permute.xlu0 %5428 }
 0x5c1   : > { %5465 = vst.msk [vmem:[#allocation5 + $0x280] sm:$0xff] %vm4106_vm14, %v5429_v6  ;;  %6127 = vrot.lane.b32.xlu1 %v6087_v41, %s8944_s8  ;;  %v8371_v30 = vpop.f32.mrb[40].mxu1  ;;  %v12440_v41 = vld [vmem:[#allocation16_spill] sm:$0xff]  ;;  %v7306_v6 = vadd.f32 %v11590_v35, %v11741_v56 }
 0x5c2   : > { %6576 = vrot.lane.b32.xlu0 %v12438_v50, %s8944_s8  ;;  %v8372_v42 = vpop.f32.mrb[41].mxu1 }
 0x5c3   : > { %v11831_v33 = vadd.f32 %v8372_v42, %v8371_v30  ;;  %v5109_v11 = vpop.permute.xlu1 %5108  ;;  %v8374_v32 = vpop.f32.mrb[42].mxu1  ;;  %v6713_v52 = vld [vmem:[#allocation5 + $0xc8] sm:$0xff] }
 0x5c4   : > { %5145 = vst.msk [vmem:[#allocation5 + $0x278] sm:$0xff] %vm4235_vm15, %v5109_v11  ;;  %v5557_v1 = vpop.permute.xlu0 %5556  ;;  %v8375_v0 = vpop.f32.mrb[43].mxu1  ;;  %v6714_v28 = vld [vmem:[#allocation5 + $0xd0] sm:$0xff] }
 0x5c5   : > { %5593 = vst.msk [vmem:[#allocation5 + $0x280] sm:$0xff] %vm4235_vm15, %v5557_v1  ;;  %v11835_v20 = vadd.f32 %v8375_v0, %v8374_v32  ;;  %5873 = vrot.lane.b32.xlu1 %v11096_v57, %s8928_s17  ;;  %7633 = vmatprep.mubr.bf16.mxu1 %v6714_v28  ;;  %v7309_v32 = vadd.f32 %v11595_v59, %v11741_v56 }
 0x5c6   : > { %6322 = vrot.lane.b32.xlu0 %v6281_v62, %s8928_s17  ;;  %7634 = vmatmul.mubr.bf16.gmra.mrb[76].mxu1 %v6713_v52  ;;  %v6067_v52 = vld [vmem:[#allocation4 + $0x13c] sm:$0xff] }
 0x5c7   : > { %v5237_v38 = vpop.permute.xlu1 %5236 }
 0x5c8   : > { %5273 = vst.msk [vmem:[#allocation5 + $0x278] sm:$0xff] %vm4364_vm0, %v5237_v38  ;;  %v5686_v34 = vpop.permute.xlu0 %5685  ;;  %v6068_v38 = vld [vmem:[#allocation4 + $0x144] sm:$0xff] }
 0x5c9   : > { %5722 = vst.msk [vmem:[#allocation5 + $0x280] sm:$0xff] %vm4364_vm0, %v5686_v34  ;;  %6001 = vrot.lane.b32.xlu1 %v12438_v50, %s8936_s9  ;;  %v6089_v58 = vpack.c.bf16 %v6068_v38, %v6067_v52  ;;  %v7317_v38 = vadd.f32 %v11613_v29, %v11741_v56 }
 0x5ca   : > { %6450 = vrot.lane.b32.xlu0 %v12439_v45, %s8936_s9 }
 0x5cb   : > { %v5864_v57 = vpop.permute.xlu1 %5863 }
 0x5cc   : > { %5907 = vst.msk [vmem:[#allocation5 + $0x100] sm:$0xff] %vm4106_vm14, %v5864_v57  ;;  %v6313_v53 = vpop.permute.xlu0 %6312 }
 0x5cd   : > { %6356 = vst.msk [vmem:[#allocation5 + $0x108] sm:$0xff] %vm4106_vm14, %v6313_v53  ;;  %6129 = vrot.lane.b32.xlu1 %v6088_v51, %s8944_s8  ;;  %v8435_v3 = vpop.f32.mrb[40].mxu0 }
 0x5ce   : > { %v8436_v55 = vpop.f32.mrb[41].mxu0  ;;  %6578 = vrot.lane.b32.xlu0 %v12440_v41, %s8944_s8 }
 0x5cf   : > { %v8437_v30 = vadd.f32 %v8436_v55, %v8435_v3  ;;  %v5992_v37 = vpop.permute.xlu1 %5991  ;;  %v8438_v63 = vpop.f32.mrb[42].mxu0  ;;  %v6767_v35 = vld [vmem:[#allocation5 + $0x278] sm:$0xff] }
 0x5d0   : > { %6035 = vst.msk [vmem:[#allocation5 + $0x100] sm:$0xff] %vm4235_vm15, %v5992_v37  ;;  %v8439_v50 = vpop.f32.mrb[43].mxu0  ;;  %v6441_v42 = vpop.permute.xlu0 %6440  ;;  %v6768_v11 = vld [vmem:[#allocation5 + $0x280] sm:$0xff] }
 0x5d1   : > { %v11856_v1 = vadd.f32 %v8437_v30, %v7306_v6  ;;  %v8440_v0 = vadd.f32 %v8439_v50, %v8438_v63  ;;  %6484 = vst.msk [vmem:[#allocation5 + $0x108] sm:$0xff] %vm4235_vm15, %v6441_v42  ;;  %5875 = vrot.lane.b32.xlu1 %v12439_v45, %s8928_s17  ;;  %7536 = vmatprep.mubr.bf16.mxu0 %v6768_v11  ;;  %v12441_v50 = vld [vmem:[#allocation17_spill] sm:$0xff] }
 0x5d2   : > { %6324 = vrot.lane.b32.xlu0 %v11632_v46, %s8928_s17  ;;  %7537 = vmatmul.mubr.bf16.gmra.mrb[76].mxu0 %v6767_v35 }
 0x5d3   : > { %v11863_v28 = vadd.f32 %v8440_v0, %v7309_v32  ;;  %v6120_v62 = vpop.permute.xlu1 %6119 }
 0x5d4   : > { %6163 = vst.msk [vmem:[#allocation5 + $0x100] sm:$0xff] %vm4364_vm0, %v6120_v62  ;;  %v6569_v59 = vpop.permute.xlu0 %6568 }
 0x5d5   : > { %6612 = vst.msk [vmem:[#allocation5 + $0x108] sm:$0xff] %vm4364_vm0, %v6569_v59  ;;  %6003 = vrot.lane.b32.xlu1 %v12440_v41, %s8936_s9 }
 0x5d6   : > { %6452 = vrot.lane.b32.xlu0 %v11198_v10, %s8936_s9 }
 0x5d7   : > { %v4983_v34 = vpop.permute.xlu1 %4982 }
 0x5d8   : > { %5018 = vst.msk [vmem:[#allocation5 + $0x2b0] sm:$0xff] %vm4106_vm14, %v4983_v34  ;;  %v5431_v46 = vpop.permute.xlu0 %5430 }
 0x5d9   : > { %5466 = vst.msk [vmem:[#allocation5 + $0x2b8] sm:$0xff] %vm4106_vm14, %v5431_v46  ;;  %6131 = vrot.lane.b32.xlu1 %v6089_v58, %s8944_s8  ;;  %v8377_v54 = vpop.f32.mrb[44].mxu1  ;;  %v12442_v46 = vld [vmem:[#allocation18_spill] sm:$0xff] }
 0x5da   : > { %6580 = vrot.lane.b32.xlu0 %v11200_v5, %s8944_s8  ;;  %v8378_v45 = vpop.f32.mrb[45].mxu1 }
 0x5db   : > { %v11876_v57 = vadd.f32 %v8378_v45, %v8377_v54  ;;  %v5111_v51 = vpop.permute.xlu1 %5110  ;;  %v8380_v53 = vpop.f32.mrb[46].mxu1  ;;  %v6720_v30 = vld [vmem:[#allocation5 + $0x100] sm:$0xff] }
 0x5dc   : > { %5146 = vst.msk [vmem:[#allocation5 + $0x2b0] sm:$0xff] %vm4235_vm15, %v5111_v51  ;;  %v5559_v3 = vpop.permute.xlu0 %5558  ;;  %v8381_v55 = vpop.f32.mrb[47].mxu1  ;;  %v6721_v41 = vld [vmem:[#allocation5 + $0x108] sm:$0xff] }
 0x5dd   : > { %5594 = vst.msk [vmem:[#allocation5 + $0x2b8] sm:$0xff] %vm4235_vm15, %v5559_v3  ;;  %v11880_v6 = vadd.f32 %v8381_v55, %v8380_v53  ;;  %5877 = vrot.lane.b32.xlu1 %v11198_v10, %s8928_s17  ;;  %7641 = vmatprep.mubr.bf16.mxu1 %v6721_v41 }
 0x5de   : > { %6326 = vrot.lane.b32.xlu0 %v11680_v21, %s8928_s17  ;;  %7642 = vmatmul.mubr.bf16.gmra.mrb[80].mxu1 %v6720_v30 }
 0x5df   : > { %v5239_v37 = vpop.permute.xlu1 %5238 }
 0x5e0   : > { %5274 = vst.msk [vmem:[#allocation5 + $0x2b0] sm:$0xff] %vm4364_vm0, %v5239_v37  ;;  %v5688_v63 = vpop.permute.xlu0 %5687 }
 0x5e1   : > { %5723 = vst.msk [vmem:[#allocation5 + $0x2b8] sm:$0xff] %vm4364_vm0, %v5688_v63  ;;  %6005 = vrot.lane.b32.xlu1 %v11200_v5, %s8936_s9  ;;  %v7314_v5 = vadd.f32 %v11607_v12, %v11741_v56  ;;  %v6204_v63 = vld [vmem:[#allocation4 + $0x1b0] sm:$0xff] }
 0x5e2   : > { %6454 = vrot.lane.b32.xlu0 %v12441_v50, %s8936_s9 }
 0x5e3   : > { %v5866_v42 = vpop.permute.xlu1 %5865 }
 0x5e4   : > { %5908 = vst.msk [vmem:[#allocation5 + $0x138] sm:$0xff] %vm4106_vm14, %v5866_v42  ;;  %v6315_v10 = vpop.permute.xlu0 %6314 }
 0x5e5   : > { %6357 = vst.msk [vmem:[#allocation5 + $0x140] sm:$0xff] %vm4106_vm14, %v6315_v10  ;;  %6133 = vrot.lane.b32.xlu1 %v11208_v40, %s8944_s8  ;;  %v8441_v21 = vpop.f32.mrb[44].mxu0 }
 0x5e6   : > { %v8442_v11 = vpop.f32.mrb[45].mxu0  ;;  %6582 = vrot.lane.b32.xlu0 %v11663_v48, %s8944_s8 }
 0x5e7   : > { %v8443_v32 = vadd.f32 %v8442_v11, %v8441_v21  ;;  %v5994_v0 = vpop.permute.xlu1 %5993  ;;  %v8444_v35 = vpop.f32.mrb[46].mxu0  ;;  %v6774_v12 = vld [vmem:[#allocation5 + $0x2b0] sm:$0xff] }
 0x5e8   : > { %6036 = vst.msk [vmem:[#allocation5 + $0x138] sm:$0xff] %vm4235_vm15, %v5994_v0  ;;  %v8445_v62 = vpop.f32.mrb[47].mxu0  ;;  %v6443_v59 = vpop.permute.xlu0 %6442  ;;  %v6775_v52 = vld [vmem:[#allocation5 + $0x2b8] sm:$0xff]  ;;  %v6207_v0 = vld [vmem:[#allocation4 + $0x1d0] sm:$0xff] }
 0x5e9   : > { %v11903_v40 = vadd.f32 %v8443_v32, %v7314_v5  ;;  %v8446_v34 = vadd.f32 %v8445_v62, %v8444_v35  ;;  %6485 = vst.msk [vmem:[#allocation5 + $0x140] sm:$0xff] %vm4235_vm15, %v6443_v59  ;;  %5879 = vrot.lane.b32.xlu1 %v12441_v50, %s8928_s17  ;;  %7544 = vmatprep.mubr.bf16.mxu0 %v6775_v52  ;;  %v6205_v50 = vld [vmem:[#allocation4 + $0x1b8] sm:$0xff]  ;;  %v6206_v32 = vld [vmem:[#allocation4 + $0x1c8] sm:$0xff] }
 0x5ea   : > { %6328 = vrot.lane.b32.xlu0 %v11734_v39, %s8928_s17  ;;  %7545 = vmatmul.mubr.bf16.gmra.mrb[80].mxu0 %v6774_v12  ;;  %v6222_v10 = vpack.c.bf16 %v6205_v50, %v6204_v63  ;;  %v7322_v62 = vadd.f32 %v11628_v43, %v11741_v56  ;;  %v6397_v12 = vld [vmem:[#allocation4 + $0x1ba] sm:$0xff] }
 0x5eb   : > { %v11910_v48 = vadd.f32 %v8446_v34, %v7317_v38  ;;  %v6122_v58 = vpop.permute.xlu1 %6121  ;;  %v6396_v34 = vld [vmem:[#allocation4 + $0x1b2] sm:$0xff] }
 0x5ec   : > { %6164 = vst.msk [vmem:[#allocation5 + $0x138] sm:$0xff] %vm4364_vm0, %v6122_v58  ;;  %v6571_v29 = vpop.permute.xlu0 %6570 }
 0x5ed   : > { %6613 = vst.msk [vmem:[#allocation5 + $0x140] sm:$0xff] %vm4364_vm0, %v6571_v29  ;;  %6007 = vrot.lane.b32.xlu1 %v12442_v46, %s8936_s9  ;;  %v7325_v46 = vadd.f32 %v11635_v24, %v11741_v56  ;;  %v6525_v24 = vld [vmem:[#allocation4 + $0x1bb] sm:$0xff] }
 0x5ee   : > { %6456 = vrot.lane.b32.xlu0 %v11284_v22, %s8936_s9  ;;  %6238 = vst.msk [vmem:[#allocation5 + $0x338] sm:$0xff] %vm3835_vm12, %v6222_v10  ;;  %v6655_v10 = vld [vmem:[#allocation4 + $0x1d4] sm:$0xff] }
 0x5ef   : > { %v4985_v54 = vpop.permute.xlu1 %4984 }
 0x5f0   : > { %5019 = vst.msk [vmem:[#allocation5 + $0x2e8] sm:$0xff] %vm4106_vm14, %v4985_v54  ;;  %v5433_v45 = vpop.permute.xlu0 %5432 }
 0x5f1   : > { %5467 = vst.msk [vmem:[#allocation5 + $0x2f0] sm:$0xff] %vm4106_vm14, %v5433_v45  ;;  %6135 = vrot.lane.b32.xlu1 %v11217_v14, %s8944_s8  ;;  %v8383_v39 = vpop.f32.mrb[48].mxu1 }
 0x5f2   : > { %6584 = vrot.lane.b32.xlu0 %v11717_v36, %s8944_s8  ;;  %v8384_v51 = vpop.f32.mrb[49].mxu1 }
 0x5f3   : > { %v11924_v53 = vadd.f32 %v8384_v51, %v8383_v39  ;;  %v5113_v3 = vpop.permute.xlu1 %5112  ;;  %v8386_v55 = vpop.f32.mrb[50].mxu1  ;;  %v6727_v14 = vld [vmem:[#allocation5 + $0x138] sm:$0xff]  ;;  %v6414_v39 = vpack.c.bf16 %v6397_v12, %v6396_v34  ;;  %v6526_v34 = vld [vmem:[#allocation4 + $0x1cb] sm:$0xff] }
 0x5f4   : > { %5147 = vst.msk [vmem:[#allocation5 + $0x2e8] sm:$0xff] %vm4235_vm15, %v5113_v3  ;;  %v5561_v41 = vpop.permute.xlu0 %5560  ;;  %v8387_v30 = vpop.f32.mrb[51].mxu1  ;;  %v6728_v37 = vld [vmem:[#allocation5 + $0x140] sm:$0xff]  ;;  %v6527_v12 = vld [vmem:[#allocation4 + $0x1d3] sm:$0xff] }
 0x5f5   : > { %5595 = vst.msk [vmem:[#allocation5 + $0x2f0] sm:$0xff] %vm4235_vm15, %v5561_v41  ;;  %v11928_v42 = vadd.f32 %v8387_v30, %v8386_v55  ;;  %5881 = vrot.lane.b32.xlu1 %v11284_v22, %s8928_s17  ;;  %7649 = vmatprep.mubr.bf16.mxu1 %v6728_v37  ;;  %v6524_v55 = vld [vmem:[#allocation4 + $0x1b3] sm:$0xff] }
 0x5f6   : > { %6330 = vrot.lane.b32.xlu0 %v11800_v16, %s8928_s17  ;;  %7650 = vmatmul.mubr.bf16.gmra.mrb[84].mxu1 %v6727_v14  ;;  %v6271_v37 = vld [vmem:[#allocation4 + $0x1d1] sm:$0xff] }
 0x5f7   : > { %v5241_v21 = vpop.permute.xlu1 %5240  ;;  %v6654_v14 = vld [vmem:[#allocation4 + $0x1cc] sm:$0xff] }
 0x5f8   : > { %5275 = vst.msk [vmem:[#allocation5 + $0x2e8] sm:$0xff] %vm4364_vm0, %v5241_v21  ;;  %v5690_v11 = vpop.permute.xlu0 %5689 }
 0x5f9   : > { %5724 = vst.msk [vmem:[#allocation5 + $0x2f0] sm:$0xff] %vm4364_vm0, %v5690_v11  ;;  %6009 = vrot.lane.b32.xlu1 %v11717_v36, %s8936_s9  ;;  %v6223_v36 = vpack.c.bf16 %v6207_v0, %v6206_v32  ;;  %v6671_v11 = vpack.c.bf16 %v6655_v10, %v6654_v14  ;;  %v6398_v32 = vld [vmem:[#allocation4 + $0x1ca] sm:$0xff]  ;;  %v6399_v0 = vld [vmem:[#allocation4 + $0x1d2] sm:$0xff] }
 0x5fa   : > { %6458 = vrot.lane.b32.xlu0 %v11288_v18, %s8936_s9 }
 0x5fb   : > { %v5868_v22 = vpop.permute.xlu1 %5867  ;;  %6239 = vst.msk [vmem:[#allocation5 + $0x370] sm:$0xff] %vm3835_vm12, %v6223_v36  ;;  %6687 = vst.msk [vmem:[#allocation5 + $0x378] sm:$0xff] %vm3835_vm12, %v6671_v11 }
 0x5fc   : > { %5909 = vst.msk [vmem:[#allocation5 + $0x170] sm:$0xff] %vm4106_vm14, %v5868_v22  ;;  %v6317_v5 = vpop.permute.xlu0 %6316 }
 0x5fd   : > { %6358 = vst.msk [vmem:[#allocation5 + $0x178] sm:$0xff] %vm4106_vm14, %v6317_v5  ;;  %6137 = vrot.lane.b32.xlu1 %v11727_v19, %s8944_s8  ;;  %v8447_v16 = vpop.f32.mrb[48].mxu0 }
 0x5fe   : > { %v8448_v35 = vpop.f32.mrb[49].mxu0  ;;  %6586 = vrot.lane.b32.xlu0 %v11783_v8, %s8944_s8 }
 0x5ff   : > { %v8449_v59 = vadd.f32 %v8448_v35, %v8447_v16  ;;  %v5996_v52 = vpop.permute.xlu1 %5995  ;;  %v8450_v38 = vpop.f32.mrb[50].mxu0  ;;  %v6781_v43 = vld [vmem:[#allocation5 + $0x2e8] sm:$0xff] }
 0x600   : > { %6037 = vst.msk [vmem:[#allocation5 + $0x170] sm:$0xff] %vm4235_vm15, %v5996_v52  ;;  %v8451_v58 = vpop.f32.mrb[51].mxu0  ;;  %v6445_v19 = vpop.permute.xlu0 %6444  ;;  %v6782_v29 = vld [vmem:[#allocation5 + $0x2f0] sm:$0xff]  ;;  %v6415_v52 = vpack.c.bf16 %v6399_v0, %v6398_v32 }
 0x601   : > { %v11953_v54 = vadd.f32 %v8449_v59, %v7322_v62  ;;  %v8452_v45 = vadd.f32 %v8451_v58, %v8450_v38  ;;  %6486 = vst.msk [vmem:[#allocation5 + $0x178] sm:$0xff] %vm4235_vm15, %v6445_v19  ;;  %5883 = vrot.lane.b32.xlu1 %v11288_v18, %s8928_s17  ;;  %7552 = vmatprep.mubr.bf16.mxu0 %v6782_v29 }
 0x602   : > { %6332 = vrot.lane.b32.xlu0 %v11685_v17, %s8928_s17  ;;  %7553 = vmatmul.mubr.bf16.gmra.mrb[84].mxu0 %v6781_v43  ;;  %v6542_v18 = vpack.c.bf16 %v6525_v24, %v6524_v55  ;;  %v6270_v17 = vld [vmem:[#allocation4 + $0x1c9] sm:$0xff]  ;;  %v6543_v19 = vpack.c.bf16 %v6527_v12, %v6526_v34 }
 0x603   : > { %v11960_v51 = vadd.f32 %v8452_v45, %v7325_v46  ;;  %v6124_v3 = vpop.permute.xlu1 %6123  ;;  %v6287_v21 = vpack.c.bf16 %v6271_v37, %v6270_v17  ;;  %v7333_v17 = vadd.f32 %v11651_v61, %v11741_v56 }
 0x604   : > { %6165 = vst.msk [vmem:[#allocation5 + $0x170] sm:$0xff] %vm4364_vm0, %v6124_v3  ;;  %v6573_v41 = vpop.permute.xlu0 %6572 }
 0x605   : > { %6614 = vst.msk [vmem:[#allocation5 + $0x178] sm:$0xff] %vm4364_vm0, %v6573_v41  ;;  %6011 = vrot.lane.b32.xlu1 %v11783_v8, %s8936_s9 }
 0x606   : > { %6460 = vrot.lane.b32.xlu0 %v6414_v39, %s8936_s9 }
 0x607   : > { %v4987_v30 = vpop.permute.xlu1 %4986 }
 0x608   : > { %5020 = vst.msk [vmem:[#allocation5 + $0x320] sm:$0xff] %vm4106_vm14, %v4987_v30  ;;  %v5435_v63 = vpop.permute.xlu0 %5434 }
 0x609   : > { %5468 = vst.msk [vmem:[#allocation5 + $0x328] sm:$0xff] %vm4106_vm14, %v5435_v63  ;;  %6139 = vrot.lane.b32.xlu1 %v11793_v47, %s8944_s8  ;;  %v8389_v50 = vpop.f32.mrb[52].mxu1 }
 0x60a   : > { %6588 = vrot.lane.b32.xlu0 %v6542_v18, %s8944_s8  ;;  %v8390_v8 = vpop.f32.mrb[53].mxu1 }
 0x60b   : > { %v11972_v22 = vadd.f32 %v8390_v8, %v8389_v50  ;;  %v5115_v5 = vpop.permute.xlu1 %5114  ;;  %v8392_v16 = vpop.f32.mrb[54].mxu1  ;;  %v6734_v59 = vld [vmem:[#allocation5 + $0x170] sm:$0xff] }
 0x60c   : > { %5148 = vst.msk [vmem:[#allocation5 + $0x320] sm:$0xff] %vm4235_vm15, %v5115_v5  ;;  %v5563_v35 = vpop.permute.xlu0 %5562  ;;  %v8393_v36 = vpop.f32.mrb[55].mxu1  ;;  %v6735_v62 = vld [vmem:[#allocation5 + $0x178] sm:$0xff] }
 0x60d   : > { %5596 = vst.msk [vmem:[#allocation5 + $0x328] sm:$0xff] %vm4235_vm15, %v5563_v35  ;;  %v11977_v47 = vadd.f32 %v8393_v36, %v8392_v16  ;;  %7657 = vmatprep.mubr.bf16.mxu1 %v6735_v62  ;;  %5885 = vrot.lane.b32.xlu1 %v6414_v39, %s8928_s17  ;;  %v7330_v39 = vadd.f32 %v11647_v7, %v11741_v56 }
 0x60e   : > { %6334 = vrot.lane.b32.xlu0 %v6287_v21, %s8928_s17  ;;  %7658 = vmatmul.mubr.bf16.gmra.mrb[88].mxu1 %v6734_v59 }
 0x60f   : > { %v5243_v38 = vpop.permute.xlu1 %5242 }
 0x610   : > { %5276 = vst.msk [vmem:[#allocation5 + $0x320] sm:$0xff] %vm4364_vm0, %v5243_v38  ;;  %v5692_v58 = vpop.permute.xlu0 %5691 }
 0x611   : > { %5725 = vst.msk [vmem:[#allocation5 + $0x328] sm:$0xff] %vm4364_vm0, %v5692_v58  ;;  %6013 = vrot.lane.b32.xlu1 %v6542_v18, %s8936_s9 }
 0x612   : > { %6462 = vrot.lane.b32.xlu0 %v6415_v52, %s8936_s9 }
 0x613   : > { %v5870_v29 = vpop.permute.xlu1 %5869 }
 0x614   : > { %5910 = vst.msk [vmem:[#allocation5 + $0x1a8] sm:$0xff] %vm4106_vm14, %v5870_v29  ;;  %v6319_v46 = vpop.permute.xlu0 %6318 }
 0x615   : > { %6359 = vst.msk [vmem:[#allocation5 + $0x1b0] sm:$0xff] %vm4106_vm14, %v6319_v46  ;;  %v8453_v45 = vpop.f32.mrb[52].mxu0  ;;  %6141 = vrot.lane.b32.xlu1 %v11736_v9, %s8944_s8 }
 0x616   : > { %v8454_v43 = vpop.f32.mrb[53].mxu0  ;;  %6590 = vrot.lane.b32.xlu0 %v6543_v19, %s8944_s8  ;;  %v7338_v19 = vadd.f32 %v11668_v2, %v11741_v56  ;;  %v6694_v2 = vld [vmem:[#allocation5 + $0x30] sm:$0xff]  ;;  %s215_s8 = sand.u32 1, %s8910_s19  }
 0x617   : > { %v8455_v3 = vadd.f32 %v8454_v43, %v8453_v45  ;;  %v5998_v55 = vpop.permute.xlu1 %5997  ;;  %v8456_v24 = vpop.f32.mrb[54].mxu0  ;;  %v6788_v63 = vld [vmem:[#allocation5 + $0x320] sm:$0xff]  ;;  %s8171_s30 = sshll.u32 %s215_s8, 6  ;;  %s12337_s12 = scalar_lea.sflag [#allocation9], %s215_s8 }
 0x618   : > { %6038 = vst.msk [vmem:[#allocation5 + $0x1a8] sm:$0xff] %vm4235_vm15, %v5998_v55  ;;  %v8457_v41 = vpop.f32.mrb[55].mxu0  ;;  %v6447_v18 = vpop.permute.xlu0 %6446  ;;  %v6789_v30 = vld [vmem:[#allocation5 + $0x328] sm:$0xff]  ;;  %v7341_v55 = vadd.f32 %v11673_v27, %v11741_v56  ;;  %s12256_s6 = scalar_lea.vmem [#allocation8], %s8171_s30 }
 0x619   : > { %v11995_v37 = vadd.f32 %v8455_v3, %v7330_v39  ;;  %v8458_v9 = vadd.f32 %v8457_v41, %v8456_v24  ;;  %6487 = vst.msk [vmem:[#allocation5 + $0x1b0] sm:$0xff] %vm4235_vm15, %v6447_v18  ;;  %7560 = vmatprep.mubr.bf16.mxu0 %v6789_v30  ;;  %s8105_s16 = sshll.u32 %s12256_s6, 4  ;;  %s12331_s16 = int_to_ptr.vmem [resolvable:$true] %s8105_s16 }
 0x61a   : > { %7561 = vmatmul.mubr.bf16.gmra.mrb[88].mxu0 %v6788_v63  ;;  %s8856_s22 = scalar_lea.vmem %s12331_s16, 1024  ;;  %p8863_p0 = scmp.lt.s32.totalorder %s12331_s16, %s8861_s15 }
 0x61b   : > { %v11998_v7 = vadd.f32 %v8458_v9, %v7333_v17  ;;  %v6126_v50 = vpop.permute.xlu1 %6125  ;;  %p8857_p11 = scmp.ne.s32.totalorder %s12331_s16, %s8856_s22  ;;  %p8864_p1 = scmp.lt.s32.totalorder %s8862_s23, %s8856_s22 }
 0x61c   : > { %6166 = vst.msk [vmem:[#allocation5 + $0x1a8] sm:$0xff] %vm4364_vm0, %v6126_v50  ;;  %v6575_v14 = vpop.permute.xlu0 %6574 }
 0x61d   : > { %6615 = vst.msk [vmem:[#allocation5 + $0x1b0] sm:$0xff] %vm4364_vm0, %v6575_v14  ;;  %v6701_v14 = vld [vmem:[#allocation5 + $0x68] sm:$0xff]  ;;  %p8858_p12 = pnand %p8857_p11, %p9015_p5  ;;  %p8865_p2 = por %p8864_p1, %p8863_p0 }
 0x61f   : > { %v4989_v10 = vpop.permute.xlu1 %4988  ;;  %p8859_p13 = pneg %p8858_p12 }
 0x620   : > { %5021 = vst.msk [vmem:[#allocation5 + $0x358] sm:$0xff] %vm4106_vm14, %v4989_v10  ;;  %v5437_v61 = vpop.permute.xlu0 %5436 }
 0x621   : > { %5469 = vst.msk [vmem:[#allocation5 + $0x360] sm:$0xff] %vm4106_vm14, %v5437_v61  ;;  %v8395_v8 = vpop.f32.mrb[56].mxu1  ;;  %v6708_v61 = vld [vmem:[#allocation5 + $0xa0] sm:$0xff]  ;;  %p8866_p3 = pnand %p8865_p2, %p8859_p13 }
 0x622   : > { %v8396_v21 = vpop.f32.mrb[57].mxu1 }
 0x623   : > { %v12004_v11 = vadd.f32 %v8396_v21, %v8395_v8  ;;  %v5117_v5 = vpop.permute.xlu1 %5116  ;;  %v8398_v16 = vpop.f32.mrb[58].mxu1  ;;  %v6741_v62 = vld [vmem:[#allocation5 + $0x1a8] sm:$0xff] }
 0x624   : > { %5149 = vst.msk [vmem:[#allocation5 + $0x358] sm:$0xff] %vm4235_vm15, %v5117_v5  ;;  %v5565_v32 = vpop.permute.xlu0 %5564  ;;  %v8399_v0 = vpop.f32.mrb[59].mxu1  ;;  %v6742_v35 = vld [vmem:[#allocation5 + $0x1b0] sm:$0xff] }
 0x625   : > { %5597 = vst.msk [vmem:[#allocation5 + $0x360] sm:$0xff] %vm4235_vm15, %v5565_v32  ;;  %v12008_v36 = vadd.f32 %v8399_v0, %v8398_v16  ;;  %7665 = vmatprep.mubr.bf16.mxu1 %v6742_v35 }
 0x626   : > { %7666 = vmatmul.mubr.bf16.gmra.mrb[92].mxu1 %v6741_v62 }
 0x627   : > { %v5245_v59 = vpop.permute.xlu1 %5244 }
 0x628   : > { %5277 = vst.msk [vmem:[#allocation5 + $0x358] sm:$0xff] %vm4364_vm0, %v5245_v59  ;;  %v5694_v52 = vpop.permute.xlu0 %5693 }
 0x629   : > { %5726 = vst.msk [vmem:[#allocation5 + $0x360] sm:$0xff] %vm4364_vm0, %v5694_v52 }
 0x62b   : > { %v5872_v38 = vpop.permute.xlu1 %5871 }
 0x62c   : > { %5911 = vst.msk [vmem:[#allocation5 + $0x1e0] sm:$0xff] %vm4106_vm14, %v5872_v38  ;;  %v6321_v34 = vpop.permute.xlu0 %6320  ;;  %v6715_v38 = vld [vmem:[#allocation5 + $0xd8] sm:$0xff] }
 0x62d   : > { %6360 = vst.msk [vmem:[#allocation5 + $0x1e8] sm:$0xff] %vm4106_vm14, %v6321_v34  ;;  %v8459_v12 = vpop.f32.mrb[56].mxu0  ;;  %v6722_v34 = vld [vmem:[#allocation5 + $0x110] sm:$0xff] }
 0x62e   : > { %v8460_v58 = vpop.f32.mrb[57].mxu0 }
 0x62f   : > { %v8461_v29 = vadd.f32 %v8460_v58, %v8459_v12  ;;  %v6000_v46 = vpop.permute.xlu1 %5999  ;;  %v8462_v45 = vpop.f32.mrb[58].mxu0  ;;  %v6795_v18 = vld [vmem:[#allocation5 + $0x358] sm:$0xff] }
 0x630   : > { %6039 = vst.msk [vmem:[#allocation5 + $0x1e0] sm:$0xff] %vm4235_vm15, %v6000_v46  ;;  %v8463_v43 = vpop.f32.mrb[59].mxu0  ;;  %v6449_v39 = vpop.permute.xlu0 %6448  ;;  %v6796_v3 = vld [vmem:[#allocation5 + $0x360] sm:$0xff]  ;;  %v7346_v46 = vadd.f32 %v11694_v25, %v11741_v56 }
 0x631   : > { %v12019_v24 = vadd.f32 %v8461_v29, %v7338_v19  ;;  %v8464_v41 = vadd.f32 %v8463_v43, %v8462_v45  ;;  %6488 = vst.msk [vmem:[#allocation5 + $0x1e8] sm:$0xff] %vm4235_vm15, %v6449_v39  ;;  %7568 = vmatprep.mubr.bf16.mxu0 %v6796_v3  ;;  %v6736_v25 = vld [vmem:[#allocation5 + $0x180] sm:$0xff] }
 0x632   : > { %7569 = vmatmul.mubr.bf16.gmra.mrb[92].mxu0 %v6795_v18  ;;  %v7349_v18 = vadd.f32 %v11698_v31, %v11741_v56 }
 0x633   : > { %v12022_v30 = vadd.f32 %v8464_v41, %v7341_v55  ;;  %v6128_v17 = vpop.permute.xlu1 %6127  ;;  %8699 = vmatprep.mubr.msk.bf16.mxu0 %vm3835_vm12, %v6694_v2 }
 0x634   : > { %6167 = vst.msk [vmem:[#allocation5 + $0x1e0] sm:$0xff] %vm4364_vm0, %v6128_v17  ;;  %v6577_v9 = vpop.permute.xlu0 %6576 }
 0x635   : > { %6616 = vst.msk [vmem:[#allocation5 + $0x1e8] sm:$0xff] %vm4364_vm0, %v6577_v9 }
 0x637   : > { %v5874_v27 = vpop.permute.xlu1 %5873 }
 0x638   : > { %5912 = vst.msk [vmem:[#allocation5 + $0x218] sm:$0xff] %vm4106_vm14, %v5874_v27  ;;  %v6323_v63 = vpop.permute.xlu0 %6322  ;;  %v6729_v27 = vld [vmem:[#allocation5 + $0x148] sm:$0xff] }
 0x639   : > { %6361 = vst.msk [vmem:[#allocation5 + $0x220] sm:$0xff] %vm4106_vm14, %v6323_v63  ;;  %v8401_v50 = vpop.f32.mrb[60].mxu1 }
 0x63a   : > { %v8402_v10 = vpop.f32.mrb[61].mxu1  ;;  %8700 = vmatmul.mubr.msk.bf16.vlgmr.msra.gmra.mrb[96].mxu0 %vm3835_vm12, %v6701_v14 }
 0x63b   : > { %v12030_v8 = vadd.f32 %v8402_v10, %v8401_v50  ;;  %v6002_v21 = vpop.permute.xlu1 %6001  ;;  %v8404_v5 = vpop.f32.mrb[62].mxu1  ;;  %8703 = vmatprep.mubr.msk.bf16.mxu0 %vm3835_vm12, %v6708_v61  ;;  %v6748_v62 = vld [vmem:[#allocation5 + $0x1e0] sm:$0xff]  ;;  %v6743_v61 = vld [vmem:[#allocation5 + $0x1b8] sm:$0xff] }
 0x63c   : > { %6040 = vst.msk [vmem:[#allocation5 + $0x218] sm:$0xff] %vm4235_vm15, %v6002_v21  ;;  %v6451_v16 = vpop.permute.xlu0 %6450  ;;  %v8405_v32 = vpop.f32.mrb[63].mxu1  ;;  %v6749_v0 = vld [vmem:[#allocation5 + $0x1e8] sm:$0xff] }
 0x63d   : > { %6489 = vst.msk [vmem:[#allocation5 + $0x220] sm:$0xff] %vm4235_vm15, %v6451_v16  ;;  %v12035_v35 = vadd.f32 %v8405_v32, %v8404_v5  ;;  %7673 = vmatprep.mubr.bf16.mxu1 %v6749_v0  ;;  %v6750_v5 = vld [vmem:[#allocation5 + $0x1f0] sm:$0xff] }
 0x63e   : > { %7674 = vmatmul.mubr.bf16.gmra.mrb[96].mxu1 %v6748_v62 }
 0x63f   : > { %v6130_v59 = vpop.permute.xlu1 %6129 }
 0x640   : > { %6168 = vst.msk [vmem:[#allocation5 + $0x218] sm:$0xff] %vm4364_vm0, %v6130_v59  ;;  %v6579_v52 = vpop.permute.xlu0 %6578 }
 0x641   : > { %6617 = vst.msk [vmem:[#allocation5 + $0x220] sm:$0xff] %vm4364_vm0, %v6579_v52 }
 0x642   : > { %8704 = vmatmul.mubr.msk.bf16.gmra.mrb[100].mxu0 %vm3835_vm12, %v6715_v38 }
 0x643   : > { %v5876_v12 = vpop.permute.xlu1 %5875  ;;  %8707 = vmatprep.mubr.msk.bf16.mxu0 %vm3835_vm12, %v6722_v34 }
 0x644   : > { %5913 = vst.msk [vmem:[#allocation5 + $0x250] sm:$0xff] %vm4106_vm14, %v5876_v12  ;;  %v6325_v58 = vpop.permute.xlu0 %6324 }
 0x645   : > { %6362 = vst.msk [vmem:[#allocation5 + $0x258] sm:$0xff] %vm4106_vm14, %v6325_v58  ;;  %v8465_v19 = vpop.f32.mrb[60].mxu0 }
 0x646   : > { %v8466_v29 = vpop.f32.mrb[61].mxu0 }
 0x647   : > { %v8467_v45 = vadd.f32 %v8466_v29, %v8465_v19  ;;  %v6004_v43 = vpop.permute.xlu1 %6003  ;;  %v8468_v39 = vpop.f32.mrb[62].mxu0  ;;  %v6755_v9 = vld [vmem:[#allocation5 + $0x218] sm:$0xff] }
 0x648   : > { %6041 = vst.msk [vmem:[#allocation5 + $0x250] sm:$0xff] %vm4235_vm15, %v6004_v43  ;;  %v8469_v3 = vpop.f32.mrb[63].mxu0  ;;  %v6453_v55 = vpop.permute.xlu0 %6452  ;;  %v6756_v41 = vld [vmem:[#allocation5 + $0x220] sm:$0xff] }
 0x649   : > { %v12048_v2 = vadd.f32 %v8467_v45, %v7346_v46  ;;  %v8470_v17 = vadd.f32 %v8469_v3, %v8468_v39  ;;  %6490 = vst.msk [vmem:[#allocation5 + $0x258] sm:$0xff] %vm4235_vm15, %v6453_v55  ;;  %7681 = vmatprep.mubr.bf16.mxu1 %v6756_v41  ;;  %v6757_v46 = vld [vmem:[#allocation5 + $0x228] sm:$0xff]  ;;  %v6764_v45 = vld [vmem:[#allocation5 + $0x260] sm:$0xff] }
 0x64a   : > { %7682 = vmatmul.mubr.bf16.gmra.mrb[100].mxu1 %v6755_v9  ;;  %8708 = vmatmul.mubr.msk.bf16.gmra.mrb[104].mxu0 %vm3835_vm12, %v6729_v27  ;;  %v12078_v3 = vld [vmem:[%s12383_s4] ss:$0 sm:$0xff] }
 0x64b   : > { %v12052_v63 = vadd.f32 %v8470_v17, %v7349_v18  ;;  %v6132_v50 = vpop.permute.xlu1 %6131  ;;  %8711 = vmatprep.mubr.msk.bf16.mxu0 %vm3835_vm12, %v6736_v25  ;;  %v7354_v55 = vadd.f32 %v12078_v3, %v11714_v15  ;;  %v6778_v15 = vld [vmem:[#allocation5 + $0x2d0] sm:$0xff] }
 0x64c   : > { %6169 = vst.msk [vmem:[#allocation5 + $0x250] sm:$0xff] %vm4364_vm0, %v6132_v50  ;;  %v6581_v31 = vpop.permute.xlu0 %6580  ;;  %v7357_v50 = vadd.f32 %v12078_v3, %v11720_v13 }
 0x64d   : > { %6618 = vst.msk [vmem:[#allocation5 + $0x258] sm:$0xff] %vm4364_vm0, %v6581_v31 }
 0x64f   : > { %v5878_v56 = vpop.permute.xlu1 %5877 }
 0x650   : > { %5914 = vst.msk [vmem:[#allocation5 + $0x288] sm:$0xff] %vm4106_vm14, %v5878_v56  ;;  %v6327_v14 = vpop.permute.xlu0 %6326 }
 0x651   : > { %6363 = vst.msk [vmem:[#allocation5 + $0x290] sm:$0xff] %vm4106_vm14, %v6327_v14  ;;  %v8535_v10 = vpop.f32.mrb[64].mxu1 }
 0x652   : > { %v8536_v21 = vpop.f32.mrb[65].mxu1  ;;  %8712 = vmatmul.mubr.msk.bf16.gmra.mrb[108].mxu0 %vm3835_vm12, %v6743_v61 }
 0x653   : > { %v8537_v16 = vadd.f32 %v8536_v21, %v8535_v10  ;;  %v6006_v32 = vpop.permute.xlu1 %6005  ;;  %v8538_v0 = vpop.f32.mrb[66].mxu1  ;;  %8715 = vmatprep.mubr.msk.bf16.mxu0 %vm3835_vm12, %v6750_v5  ;;  %v6762_v34 = vld [vmem:[#allocation5 + $0x250] sm:$0xff]  ;;  %v6771_v10 = vld [vmem:[#allocation5 + $0x298] sm:$0xff] }
 0x654   : > { %6042 = vst.msk [vmem:[#allocation5 + $0x288] sm:$0xff] %vm4235_vm15, %v6006_v32  ;;  %v6455_v62 = vpop.permute.xlu0 %6454  ;;  %v8539_v59 = vpop.f32.mrb[67].mxu1  ;;  %v6763_v52 = vld [vmem:[#allocation5 + $0x258] sm:$0xff]  ;;  %v6792_v32 = vld [vmem:[#allocation5 + $0x340] sm:$0xff] }
 0x655   : > { %6491 = vst.msk [vmem:[#allocation5 + $0x290] sm:$0xff] %vm4235_vm15, %v6455_v62  ;;  %v8540_v38 = vadd.f32 %v8539_v59, %v8538_v0  ;;  %7689 = vmatprep.mubr.bf16.mxu1 %v6763_v52  ;;  %v12064_v12 = vadd.f32 %v8537_v16, %v11761_v23  ;;  %v6785_v62 = vld [vmem:[#allocation5 + $0x308] sm:$0xff] }
 0x656   : > { %7690 = vmatmul.mubr.bf16.gmra.mrb[104].mxu1 %v6762_v34 }
 0x657   : > { %v6134_v58 = vpop.permute.xlu1 %6133  ;;  %v12067_v19 = vadd.f32 %v8540_v38, %v11767_v49 }
 0x658   : > { %6170 = vst.msk [vmem:[#allocation5 + $0x288] sm:$0xff] %vm4364_vm0, %v6134_v58  ;;  %v6583_v29 = vpop.permute.xlu0 %6582 }
 0x659   : > { %6619 = vst.msk [vmem:[#allocation5 + $0x290] sm:$0xff] %vm4364_vm0, %v6583_v29 }
 0x65a   : > { %8716 = vmatmul.mubr.msk.bf16.gmra.mrb[112].mxu0 %vm3835_vm12, %v6757_v46 }
 0x65b   : > { %v5880_v43 = vpop.permute.xlu1 %5879  ;;  %8719 = vmatprep.mubr.msk.bf16.mxu0 %vm3835_vm12, %v6764_v45 }
 0x65c   : > { %5915 = vst.msk [vmem:[#allocation5 + $0x2c0] sm:$0xff] %vm4106_vm14, %v5880_v43  ;;  %v6329_v23 = vpop.permute.xlu0 %6328 }
 0x65d   : > { %6364 = vst.msk [vmem:[#allocation5 + $0x2c8] sm:$0xff] %vm4106_vm14, %v6329_v23  ;;  %v8471_v39 = vpop.f32.mrb[64].mxu0 }
 0x65e   : > { %v8472_v49 = vpop.f32.mrb[65].mxu0 }
 0x65f   : > { %v8473_v41 = vadd.f32 %v8472_v49, %v8471_v39  ;;  %v6008_v18 = vpop.permute.xlu1 %6007  ;;  %v8474_v17 = vpop.f32.mrb[66].mxu0  ;;  %v6769_v14 = vld [vmem:[#allocation5 + $0x288] sm:$0xff]  ;;  %v6799_v49 = vld [vmem:[#allocation5 + $0x378] sm:$0xff] }
 0x660   : > { %6043 = vst.msk [vmem:[#allocation5 + $0x2c0] sm:$0xff] %vm4235_vm15, %v6008_v18  ;;  %v8475_v9 = vpop.f32.mrb[67].mxu0  ;;  %v6457_v27 = vpop.permute.xlu0 %6456  ;;  %v6770_v25 = vld [vmem:[#allocation5 + $0x290] sm:$0xff] }
 0x661   : > { %v12085_v31 = vadd.f32 %v8473_v41, %v7354_v55  ;;  %v8476_v56 = vadd.f32 %v8475_v9, %v8474_v17  ;;  %6492 = vst.msk [vmem:[#allocation5 + $0x2c8] sm:$0xff] %vm4235_vm15, %v6457_v27  ;;  %7697 = vmatprep.mubr.bf16.mxu1 %v6770_v25  ;;  %v7362_v27 = vadd.f32 %v12078_v3, %v11780_v26 }
 0x662   : > { %7698 = vmatmul.mubr.bf16.gmra.mrb[108].mxu1 %v6769_v14  ;;  %8720 = vmatmul.mubr.msk.bf16.gmra.mrb[116].mxu0 %vm3835_vm12, %v6771_v10 }
 0x663   : > { %v12089_v61 = vadd.f32 %v8476_v56, %v7357_v50  ;;  %v6136_v21 = vpop.permute.xlu1 %6135  ;;  %8723 = vmatprep.mubr.msk.bf16.mxu0 %vm3835_vm12, %v6778_v15  ;;  %v7365_v15 = vadd.f32 %v12078_v3, %v11786_v44 }
 0x664   : > { %6171 = vst.msk [vmem:[#allocation5 + $0x2c0] sm:$0xff] %vm4364_vm0, %v6136_v21  ;;  %v6585_v13 = vpop.permute.xlu0 %6584 }
 0x665   : > { %6620 = vst.msk [vmem:[#allocation5 + $0x2c8] sm:$0xff] %vm4364_vm0, %v6585_v13 }
 0x667   : > { %v5882_v5 = vpop.permute.xlu1 %5881 }
 0x668   : > { %5916 = vst.msk [vmem:[#allocation5 + $0x2f8] sm:$0xff] %vm4106_vm14, %v5882_v5  ;;  %v6331_v16 = vpop.permute.xlu0 %6330 }
 0x669   : > { %6365 = vst.msk [vmem:[#allocation5 + $0x300] sm:$0xff] %vm4106_vm14, %v6331_v16  ;;  %v8541_v0 = vpop.f32.mrb[68].mxu1 }
 0x66a   : > { %v8542_v59 = vpop.f32.mrb[69].mxu1  ;;  %8724 = vmatmul.mubr.msk.bf16.gmra.mrb[120].mxu0 %vm3835_vm12, %v6785_v62 }
 0x66b   : > { %v8543_v52 = vadd.f32 %v8542_v59, %v8541_v0  ;;  %v6010_v38 = vpop.permute.xlu1 %6009  ;;  %v8544_v34 = vpop.f32.mrb[70].mxu1  ;;  %8727 = vmatprep.mubr.msk.bf16.mxu0 %vm3835_vm12, %v6792_v32  ;;  %v6776_v43 = vld [vmem:[#allocation5 + $0x2c0] sm:$0xff] }
 0x66c   : > { %6044 = vst.msk [vmem:[#allocation5 + $0x2f8] sm:$0xff] %vm4235_vm15, %v6010_v38  ;;  %v6459_v58 = vpop.permute.xlu0 %6458  ;;  %v8545_v29 = vpop.f32.mrb[71].mxu1  ;;  %v6777_v46 = vld [vmem:[#allocation5 + $0x2c8] sm:$0xff] }
 0x66d   : > { %6493 = vst.msk [vmem:[#allocation5 + $0x300] sm:$0xff] %vm4235_vm15, %v6459_v58  ;;  %v8546_v45 = vadd.f32 %v8545_v29, %v8544_v34  ;;  %7705 = vmatprep.mubr.bf16.mxu1 %v6777_v46  ;;  %v12101_v23 = vadd.f32 %v8543_v52, %v11812_v60 }
 0x66e   : > { %7706 = vmatmul.mubr.bf16.gmra.mrb[112].mxu1 %v6776_v43 }
 0x66f   : > { %v6138_v39 = vpop.permute.xlu1 %6137  ;;  %v12104_v55 = vadd.f32 %v8546_v45, %v11818_v4 }
 0x670   : > { %6172 = vst.msk [vmem:[#allocation5 + $0x2f8] sm:$0xff] %vm4364_vm0, %v6138_v39  ;;  %v6587_v41 = vpop.permute.xlu0 %6586 }
 0x671   : > { %6621 = vst.msk [vmem:[#allocation5 + $0x300] sm:$0xff] %vm4364_vm0, %v6587_v41 }
 0x672   : > { %8728 = vmatmul.mubr.msk.bf16.gmra.mrb[124].mxu0 %vm3835_vm12, %v6799_v49 }
 0x673   : > { %v5884_v18 = vpop.permute.xlu1 %5883 }
 0x674   : > { %5917 = vst.msk [vmem:[#allocation5 + $0x330] sm:$0xff] %vm4106_vm14, %v5884_v18  ;;  %v6333_v17 = vpop.permute.xlu0 %6332 }
 0x675   : > { %6366 = vst.msk [vmem:[#allocation5 + $0x338] sm:$0xff] %vm4106_vm14, %v6333_v17  ;;  %v8477_v60 = vpop.f32.mrb[68].mxu0 }
 0x676   : > { %v8478_v9 = vpop.f32.mrb[69].mxu0 }
 0x677   : > { %v8479_v4 = vadd.f32 %v8478_v9, %v8477_v60  ;;  %v6012_v25 = vpop.permute.xlu1 %6011  ;;  %v8480_v50 = vpop.f32.mrb[70].mxu0  ;;  %v6783_v5 = vld [vmem:[#allocation5 + $0x2f8] sm:$0xff]  ;;  %v7370_v9 = vadd.f32 %v12078_v3, %v11831_v33 }
 0x678   : > { %6045 = vst.msk [vmem:[#allocation5 + $0x330] sm:$0xff] %vm4235_vm15, %v6012_v25  ;;  %v8481_v56 = vpop.f32.mrb[71].mxu0  ;;  %v6461_v14 = vpop.permute.xlu0 %6460  ;;  %v6784_v10 = vld [vmem:[#allocation5 + $0x300] sm:$0xff] }
 0x679   : > { %v12116_v21 = vadd.f32 %v8479_v4, %v7362_v27  ;;  %v8482_v13 = vadd.f32 %v8481_v56, %v8480_v50  ;;  %6494 = vst.msk [vmem:[#allocation5 + $0x338] sm:$0xff] %vm4235_vm15, %v6461_v14  ;;  %7713 = vmatprep.mubr.bf16.mxu1 %v6784_v10  ;;  %v7373_v56 = vadd.f32 %v12078_v3, %v11835_v20 }
 0x67a   : > { %7714 = vmatmul.mubr.bf16.gmra.mrb[116].mxu1 %v6783_v5 }
 0x67b   : > { %v12119_v26 = vadd.f32 %v8482_v13, %v7365_v15  ;;  %v6140_v16 = vpop.permute.xlu1 %6139 }
 0x67c   : > { %6173 = vst.msk [vmem:[#allocation5 + $0x330] sm:$0xff] %vm4364_vm0, %v6140_v16  ;;  %v6589_v32 = vpop.permute.xlu0 %6588 }
 0x67d   : > { %6622 = vst.msk [vmem:[#allocation5 + $0x338] sm:$0xff] %vm4364_vm0, %v6589_v32 }
 0x67f   : > { %v5886_v0 = vpop.permute.xlu1 %5885 }
 0x680   : > { %v6335_v62 = vpop.permute.xlu0 %6334  ;;  %5918 = vst.msk [vmem:[#allocation5 + $0x368] sm:$0xff] %vm4106_vm14, %v5886_v0 }
 0x681   : > { %6367 = vst.msk [vmem:[#allocation5 + $0x370] sm:$0xff] %vm4106_vm14, %v6335_v62  ;;  %v8547_v44 = vpop.f32.mrb[72].mxu1 }
 0x682   : > { %v8548_v59 = vpop.f32.mrb[73].mxu1 }
 0x683   : > { %v8549_v52 = vadd.f32 %v8548_v59, %v8547_v44  ;;  %v8550_v38 = vpop.f32.mrb[74].mxu1  ;;  %v6014_v34 = vpop.permute.xlu1 %6013  ;;  %v6790_v43 = vld [vmem:[#allocation5 + $0x330] sm:$0xff]  ;;  %v7378_v59 = vadd.f32 %v12078_v3, %v11876_v57 }
 0x684   : > { %v6463_v58 = vpop.permute.xlu0 %6462  ;;  %v8551_v29 = vpop.f32.mrb[75].mxu1  ;;  %6046 = vst.msk [vmem:[#allocation5 + $0x368] sm:$0xff] %vm4235_vm15, %v6014_v34  ;;  %v6791_v46 = vld [vmem:[#allocation5 + $0x338] sm:$0xff] }
 0x685   : > { %6495 = vst.msk [vmem:[#allocation5 + $0x370] sm:$0xff] %vm4235_vm15, %v6463_v58  ;;  %v8552_v45 = vadd.f32 %v8551_v29, %v8550_v38  ;;  %7721 = vmatprep.mubr.bf16.mxu1 %v6791_v46  ;;  %v12128_v39 = vadd.f32 %v8549_v52, %v11856_v1  ;;  %v7381_v58 = vadd.f32 %v12078_v3, %v11880_v6 }
 0x686   : > { %7722 = vmatmul.mubr.bf16.gmra.mrb[120].mxu1 %v6790_v43  ;;  %v7386_v6 = vadd.f32 %v12078_v3, %v11924_v53 }
 0x687   : > { %v6142_v49 = vpop.permute.xlu1 %6141  ;;  %v12131_v41 = vadd.f32 %v8552_v45, %v11863_v28 }
 0x688   : > { %v6591_v18 = vpop.permute.xlu0 %6590  ;;  %6174 = vst.msk [vmem:[#allocation5 + $0x368] sm:$0xff] %vm4364_vm0, %v6142_v49 }
 0x689   : > { %6623 = vst.msk [vmem:[#allocation5 + $0x370] sm:$0xff] %vm4364_vm0, %v6591_v18 }
 0x68d   : > { %v8483_v17 = vpop.f32.mrb[72].mxu0 }
 0x68e   : > { %v8484_v60 = vpop.f32.mrb[73].mxu0 }
 0x68f   : > { %v8485_v27 = vadd.f32 %v8484_v60, %v8483_v17  ;;  %v8486_v4 = vpop.f32.mrb[74].mxu0  ;;  %v6797_v25 = vld [vmem:[#allocation5 + $0x368] sm:$0xff] }
 0x690   : > { %v8487_v1 = vpop.f32.mrb[75].mxu0  ;;  %v6798_v50 = vld [vmem:[#allocation5 + $0x370] sm:$0xff] }
 0x691   : > { %v12139_v28 = vadd.f32 %v8485_v27, %v7370_v9  ;;  %v8488_v14 = vadd.f32 %v8487_v1, %v8486_v4  ;;  %7729 = vmatprep.mubr.bf16.mxu1 %v6798_v50  ;;  %v7389_v50 = vadd.f32 %v12078_v3, %v11928_v42  ;;  %v7394_v42 = vadd.f32 %v12078_v3, %v11972_v22 }
 0x692   : > { %7730 = vmatmul.mubr.bf16.gmra.mrb[124].mxu1 %v6797_v25 }
 0x693   : > { %v12141_v10 = vadd.f32 %v8488_v14, %v7373_v56 }
 0x699   : > { %v8553_v15 = vpop.f32.mrb[76].mxu1 }
 0x69a   : > { %v8554_v13 = vpop.f32.mrb[77].mxu1 }
 0x69b   : > { %v8555_v5 = vadd.f32 %v8554_v13, %v8553_v15  ;;  %v8556_v16 = vpop.f32.mrb[78].mxu1 }
 0x69c   : > { %v8557_v33 = vpop.f32.mrb[79].mxu1 }
 0x69d   : > { %v8558_v32 = vadd.f32 %v8557_v33, %v8556_v16  ;;  %v12144_v0 = vadd.f32 %v8555_v5, %v11903_v40 }
 0x69f   : > { %v12147_v62 = vadd.f32 %v8558_v32, %v11910_v48 }
 0x6a5   : > { %v8489_v20 = vpop.f32.mrb[76].mxu0 }
 0x6a6   : > { %v8490_v44 = vpop.f32.mrb[77].mxu0 }
 0x6a7   : > { %v8491_v52 = vadd.f32 %v8490_v44, %v8489_v20  ;;  %v8492_v38 = vpop.f32.mrb[78].mxu0 }
 0x6a8   : > { %v8493_v34 = vpop.f32.mrb[79].mxu0 }
 0x6a9   : > { %v12153_v29 = vadd.f32 %v8491_v52, %v7378_v59  ;;  %v8494_v46 = vadd.f32 %v8493_v34, %v8492_v38  ;;  %v7397_v34 = vadd.f32 %v12078_v3, %v11977_v47  ;;  %v7402_v47 = vadd.f32 %v12078_v3, %v12004_v11 }
 0x6ab   : > { %v12155_v45 = vadd.f32 %v8494_v46, %v7381_v58 }
 0x6b1   : > { %v8559_v40 = vpop.f32.mrb[80].mxu1 }
 0x6b2   : > { %v8560_v43 = vpop.f32.mrb[81].mxu1 }
 0x6b3   : > { %v8561_v48 = vadd.f32 %v8560_v43, %v8559_v40  ;;  %v8562_v49 = vpop.f32.mrb[82].mxu1 }
 0x6b4   : > { %v8563_v18 = vpop.f32.mrb[83].mxu1 }
 0x6b5   : > { %v8564_v17 = vadd.f32 %v8563_v18, %v8562_v49  ;;  %v12158_v60 = vadd.f32 %v8561_v48, %v11953_v54 }
 0x6b7   : > { %v12161_v57 = vadd.f32 %v8564_v17, %v11960_v51 }
 0x6bd   : > { %v8495_v9 = vpop.f32.mrb[80].mxu0 }
 0x6be   : > { %v8496_v27 = vpop.f32.mrb[81].mxu0 }
 0x6bf   : > { %v8497_v4 = vadd.f32 %v8496_v27, %v8495_v9  ;;  %v8498_v25 = vpop.f32.mrb[82].mxu0 }
 0x6c0   : > { %v8499_v1 = vpop.f32.mrb[83].mxu0 }
 0x6c1   : > { %v12167_v56 = vadd.f32 %v8497_v4, %v7386_v6  ;;  %v8500_v14 = vadd.f32 %v8499_v1, %v8498_v25  ;;  %v7405_v1 = vadd.f32 %v12078_v3, %v12008_v36  ;;  %v7410_v36 = vadd.f32 %v12078_v3, %v12030_v8 }
 0x6c3   : > { %v12169_v15 = vadd.f32 %v8500_v14, %v7389_v50 }
 0x6c9   : > { %v8565_v54 = vpop.f32.mrb[84].mxu1 }
 0x6ca   : > { %v8566_v13 = vpop.f32.mrb[85].mxu1 }
 0x6cb   : > { %v8567_v51 = vadd.f32 %v8566_v13, %v8565_v54  ;;  %v8568_v5 = vpop.f32.mrb[86].mxu1 }
 0x6cc   : > { %v8569_v16 = vpop.f32.mrb[87].mxu1 }
 0x6cd   : > { %v8570_v33 = vadd.f32 %v8569_v16, %v8568_v5  ;;  %v12172_v32 = vadd.f32 %v8567_v51, %v11995_v37 }
 0x6cf   : > { %v12175_v53 = vadd.f32 %v8570_v33, %v11998_v7 }
 0x6d5   : > { %v8501_v20 = vpop.f32.mrb[84].mxu0 }
 0x6d6   : > { %v8502_v44 = vpop.f32.mrb[85].mxu0 }
 0x6d7   : > { %v8503_v59 = vadd.f32 %v8502_v44, %v8501_v20  ;;  %v8504_v52 = vpop.f32.mrb[86].mxu0 }
 0x6d8   : > { %v8505_v38 = vpop.f32.mrb[87].mxu0 }
 0x6d9   : > { %v12181_v58 = vadd.f32 %v8503_v59, %v7394_v42  ;;  %v8506_v46 = vadd.f32 %v8505_v38, %v8504_v52  ;;  %v7413_v38 = vadd.f32 %v12078_v3, %v12035_v35 }
 0x6db   : > { %v12183_v40 = vadd.f32 %v8506_v46, %v7397_v34 }
 0x6e1   : > { %v8571_v37 = vpop.f32.mrb[88].mxu1 }
 0x6e2   : > { %v8572_v43 = vpop.f32.mrb[89].mxu1 }
 0x6e3   : > { %v8573_v7 = vadd.f32 %v8572_v43, %v8571_v37  ;;  %v8574_v48 = vpop.f32.mrb[90].mxu1 }
 0x6e4   : > { %v8575_v49 = vpop.f32.mrb[91].mxu1 }
 0x6e5   : > { %v8576_v18 = vadd.f32 %v8575_v49, %v8574_v48  ;;  %v12186_v17 = vadd.f32 %v8573_v7, %v12019_v24 }
 0x6e7   : > { %v12189_v22 = vadd.f32 %v8576_v18, %v12022_v30 }
 0x6ed   : > { %v8507_v9 = vpop.f32.mrb[88].mxu0 }
 0x6ee   : > { %v8508_v27 = vpop.f32.mrb[89].mxu0 }
 0x6ef   : > { %v8509_v6 = vadd.f32 %v8508_v27, %v8507_v9  ;;  %v8510_v4 = vpop.f32.mrb[90].mxu0 }
 0x6f0   : > { %v8511_v25 = vpop.f32.mrb[91].mxu0 }
 0x6f1   : > { %v12195_v50 = vadd.f32 %v8509_v6, %v7402_v47  ;;  %v8512_v14 = vadd.f32 %v8511_v25, %v8510_v4 }
 0x6f3   : > { %v12197_v54 = vadd.f32 %v8512_v14, %v7405_v1 }
 0x6f9   : > { %v8577_v24 = vpop.f32.mrb[92].mxu1 }
 0x6fa   : > { %v8578_v13 = vpop.f32.mrb[93].mxu1 }
 0x6fb   : > { %v8579_v30 = vadd.f32 %v8578_v13, %v8577_v24  ;;  %v8580_v51 = vpop.f32.mrb[94].mxu1 }
 0x6fc   : > { %v8581_v5 = vpop.f32.mrb[95].mxu1 }
 0x6fd   : > { %v8582_v16 = vadd.f32 %v8581_v5, %v8580_v51  ;;  %v12200_v33 = vadd.f32 %v8579_v30, %v12048_v2 }
 0x6ff   : > { %v12203_v11 = vadd.f32 %v8582_v16, %v12052_v63 }
 0x705   : > { %v8513_v20 = vpop.f32.mrb[92].mxu0 }
 0x706   : > { %v8514_v44 = vpop.f32.mrb[93].mxu0 }
 0x707   : > { %v8515_v42 = vadd.f32 %v8514_v44, %v8513_v20  ;;  %v8516_v59 = vpop.f32.mrb[94].mxu0 }
 0x708   : > { %v8517_v52 = vpop.f32.mrb[95].mxu0 }
 0x709   : > { %v12209_v34 = vadd.f32 %v8515_v42, %v7410_v36  ;;  %v8518_v46 = vadd.f32 %v8517_v52, %v8516_v59 }
 0x70b   : > { %v12211_v37 = vadd.f32 %v8518_v46, %v7413_v38 }
 0x70d   : > { %v8701_v2 = vpop.f32.mrb[96].mxu0 }
 0x70e   : > { %v7781_v63 = vadd.f32 %v8701_v2, %v12101_v23  ;;  %v7772_v43 = vpop.f32.mrb[97].mxu0 }
 0x70f   : > { %v7773_v7 = vadd.f32 %v7772_v43, %v12064_v12  ;;  %v8702_v48 = vpop.f32.mrb[98].mxu0 }
 0x710   : > { %v7901_v49 = vmax.f32 %v7781_v63, 0.0  ;;  %v7784_v8 = vadd.f32 %v8702_v48, %v12104_v55  ;;  %v7775_v18 = vpop.f32.mrb[99].mxu0 }
 0x711   : > { %v7899_v9 = vmax.f32 %v7773_v7, 0.0  ;;  %v7776_v27 = vadd.f32 %v7775_v18, %v12067_v19  ;;  %v8583_v35 = vpop.f32.mrb[96].mxu1 }
 0x712   : > { %7933 = vst.msk [vmem:[#allocation6 + $0x10] sm:$0xff] %vm3835_vm12, %v7901_v49  ;;  %v7902_v3 = vmax.f32 %v7784_v8, 0.0  ;;  %v8584_v47 = vpop.f32.mrb[97].mxu1 }
 0x713   : > { %7931 = vst.msk [vmem:[#allocation6] sm:$0xff] %vm3835_vm12, %v7899_v9  ;;  %v7900_v6 = vmax.f32 %v7776_v27, 0.0  ;;  %v8585_v23 = vadd.f32 %v8584_v47, %v8583_v35  ;;  %v8586_v4 = vpop.f32.mrb[98].mxu1 }
 0x714   : > { %7934 = vst.msk [vmem:[#allocation6 + $0x18] sm:$0xff] %vm3835_vm12, %v7902_v3  ;;  %v8587_v12 = vpop.f32.mrb[99].mxu1 }
 0x715   : > { %7932 = vst.msk [vmem:[#allocation6 + $0x8] sm:$0xff] %vm3835_vm12, %v7900_v6  ;;  %v8588_v55 = vadd.f32 %v8587_v12, %v8586_v4  ;;  %v8705_v25 = vpop.f32.mrb[100].mxu0  ;;  %v12222_v1 = vadd.f32 %v8585_v23, %v12085_v31 }
 0x716   : > { %v7797_v19 = vadd.f32 %v8705_v25, %v12144_v0  ;;  %v7788_v14 = vpop.f32.mrb[101].mxu0 }
 0x717   : > { %v7789_v24 = vadd.f32 %v7788_v14, %v12128_v39  ;;  %v8706_v13 = vpop.f32.mrb[102].mxu0  ;;  %v12227_v30 = vadd.f32 %v8588_v55, %v12089_v61 }
 0x718   : > { %v7905_v51 = vmax.f32 %v7797_v19, 0.0  ;;  %v7800_v5 = vadd.f32 %v8706_v13, %v12147_v62  ;;  %v7791_v16 = vpop.f32.mrb[103].mxu0 }
 0x719   : > { %v7903_v20 = vmax.f32 %v7789_v24, 0.0  ;;  %v7792_v44 = vadd.f32 %v7791_v16, %v12131_v41 }
 0x71a   : > { %7937 = vst.msk [vmem:[#allocation6 + $0x30] sm:$0xff] %vm3835_vm12, %v7905_v51  ;;  %v7906_v31 = vmax.f32 %v7800_v5, 0.0 }
 0x71b   : > { %v7965_v36 = vld [vmem:[#allocation6 + $0x10] ss:$2 sm:$0xff]  ;;  %v7997_v42 = vld [vmem:[#allocation6 + $0x11] ss:$2 sm:$0xff]  ;;  %7935 = vst.msk [vmem:[#allocation6 + $0x20] sm:$0xff] %vm3835_vm12, %v7903_v20  ;;  %v7904_v0 = vmax.f32 %v7792_v44, 0.0 }
 0x71c   : > { %v8027_v39 = vmax.f32 %v7965_v36, %v7997_v42  ;;  %v7963_v59 = vld [vmem:[#allocation6] ss:$2 sm:$0xff]  ;;  %v7995_v52 = vld [vmem:[#allocation6 + $0x1] ss:$2 sm:$0xff]  ;;  %7938 = vst.msk [vmem:[#allocation6 + $0x38] sm:$0xff] %vm3835_vm12, %v7906_v31 }
 0x71d   : > { %v8026_v61 = vmax.f32 %v7963_v59, %v7995_v52  ;;  %7936 = vst.msk [vmem:[#allocation6 + $0x28] sm:$0xff] %vm3835_vm12, %v7904_v0  ;;  %v8589_v62 = vpop.f32.mrb[100].mxu1  ;;  %v8709_v38 = vpop.f32.mrb[104].mxu0 }
 0x71e   : > { %8043 = vst.msk [vmem:[#allocation7 + $0x8] sm:$0xff] %vm3835_vm12, %v8027_v39  ;;  %v7813_v41 = vadd.f32 %v8709_v38, %v12172_v32  ;;  %v8590_v46 = vpop.f32.mrb[101].mxu1  ;;  %v7804_v2 = vpop.f32.mrb[105].mxu0 }
 0x71f   : > { %8042 = vst.msk [vmem:[#allocation7] sm:$0xff] %vm3835_vm12, %v8026_v61  ;;  %v8591_v63 = vadd.f32 %v8590_v46, %v8589_v62  ;;  %v7805_v43 = vadd.f32 %v7804_v2, %v12158_v60  ;;  %v8592_v7 = vpop.f32.mrb[102].mxu1  ;;  %v8710_v48 = vpop.f32.mrb[106].mxu0 }
 0x720   : > { %v7909_v49 = vmax.f32 %v7813_v41, 0.0  ;;  %v7816_v8 = vadd.f32 %v8710_v48, %v12175_v53  ;;  %v8593_v18 = vpop.f32.mrb[103].mxu1  ;;  %v7807_v9 = vpop.f32.mrb[107].mxu0 }
 0x721   : > { %v7907_v27 = vmax.f32 %v7805_v43, 0.0  ;;  %v8594_v35 = vadd.f32 %v8593_v18, %v8592_v7  ;;  %v7808_v32 = vadd.f32 %v7807_v9, %v12161_v57  ;;  %v7684_v3 = vadd.f32 %v8591_v63, %v12116_v21 }
 0x722   : > { %7941 = vst.msk [vmem:[#allocation6 + $0x50] sm:$0xff] %vm3835_vm12, %v7909_v49  ;;  %v7910_v47 = vmax.f32 %v7816_v8, 0.0 }
 0x723   : > { %v7969_v6 = vld [vmem:[#allocation6 + $0x30] ss:$2 sm:$0xff]  ;;  %v8001_v60 = vld [vmem:[#allocation6 + $0x31] ss:$2 sm:$0xff]  ;;  %7939 = vst.msk [vmem:[#allocation6 + $0x40] sm:$0xff] %vm3835_vm12, %v7907_v27  ;;  %v7908_v23 = vmax.f32 %v7808_v32, 0.0  ;;  %v7687_v4 = vadd.f32 %v8594_v35, %v12119_v26 }
 0x724   : > { %v8029_v53 = vmax.f32 %v7969_v6, %v8001_v60  ;;  %v7967_v12 = vld [vmem:[#allocation6 + $0x20] ss:$2 sm:$0xff]  ;;  %v7999_v55 = vld [vmem:[#allocation6 + $0x21] ss:$2 sm:$0xff]  ;;  %7942 = vst.msk [vmem:[#allocation6 + $0x58] sm:$0xff] %vm3835_vm12, %v7910_v47 }
 0x725   : > { %v8028_v57 = vmax.f32 %v7967_v12, %v7999_v55  ;;  %7940 = vst.msk [vmem:[#allocation6 + $0x48] sm:$0xff] %vm3835_vm12, %v7908_v23  ;;  %v8713_v21 = vpop.f32.mrb[108].mxu0  ;;  %v8067_v25 = vld [vmem:[#allocation7 + $0x8] sm:$0xff] }
 0x726   : > { %8045 = vst.msk [vmem:[#allocation7 + $0x18] sm:$0xff] %vm3835_vm12, %v8029_v53  ;;  %v7829_v19 = vadd.f32 %v8713_v21, %v12200_v33  ;;  %v7820_v14 = vpop.f32.mrb[109].mxu0  ;;  %v8058_v24 = vld [vmem:[#allocation7] sm:$0xff] }
 0x727   : > { %8044 = vst.msk [vmem:[#allocation7 + $0x10] sm:$0xff] %vm3835_vm12, %v8028_v57  ;;  %v7821_v26 = vadd.f32 %v7820_v14, %v12186_v17  ;;  %v8714_v13 = vpop.f32.mrb[110].mxu0  ;;  %v8075_v51 = vmax.f32 %v8058_v24, %v8067_v25 }
 0x728   : > { %v7913_v5 = vmax.f32 %v7829_v19, 0.0  ;;  %v7832_v16 = vadd.f32 %v8714_v13, %v12203_v11  ;;  %v7823_v20 = vpop.f32.mrb[111].mxu0 }
 0x729   : > { %v7911_v44 = vmax.f32 %v7821_v26, 0.0  ;;  %v7824_v31 = vadd.f32 %v7823_v20, %v12189_v22  ;;  %v8595_v36 = vpop.f32.mrb[104].mxu1  ;;  %8083 = vst.msk [vmem:[%s12256_s6] sm:$0xff] %vm3835_vm12, %v8075_v51 }
 0x72a   : > { %7945 = vst.msk [vmem:[#allocation6 + $0x70] sm:$0xff] %vm3835_vm12, %v7913_v5  ;;  %v7914_v33 = vmax.f32 %v7832_v16, 0.0  ;;  %v8596_v42 = vpop.f32.mrb[105].mxu1 }
 0x72b   : > { %v7973_v17 = vld [vmem:[#allocation6 + $0x50] ss:$2 sm:$0xff]  ;;  %v8005_v0 = vld [vmem:[#allocation6 + $0x51] ss:$2 sm:$0xff]  ;;  %7943 = vst.msk [vmem:[#allocation6 + $0x60] sm:$0xff] %vm3835_vm12, %v7911_v44  ;;  %v7912_v39 = vmax.f32 %v7824_v31, 0.0  ;;  %v8597_v11 = vadd.f32 %v8596_v42, %v8595_v36 }
 0x72c   : > { %v8598_v59 = vpop.f32.mrb[106].mxu1  ;;  %v8031_v52 = vmax.f32 %v7973_v17, %v8005_v0  ;;  %v7971_v61 = vld [vmem:[#allocation6 + $0x40] ss:$2 sm:$0xff]  ;;  %v8003_v22 = vld [vmem:[#allocation6 + $0x41] ss:$2 sm:$0xff]  ;;  %7946 = vst.msk [vmem:[#allocation6 + $0x78] sm:$0xff] %vm3835_vm12, %v7914_v33 }
 0x72d   : > { %v8599_v62 = vpop.f32.mrb[107].mxu1  ;;  %v8030_v38 = vmax.f32 %v7971_v61, %v8003_v22  ;;  %7944 = vst.msk [vmem:[#allocation6 + $0x68] sm:$0xff] %vm3835_vm12, %v7912_v39  ;;  %v8717_v46 = vpop.f32.mrb[112].mxu0  ;;  %v7692_v2 = vadd.f32 %v8597_v11, %v12139_v28  ;;  %v8068_v63 = vld [vmem:[#allocation7 + $0x18] sm:$0xff] }
 0x72e   : > { %v8600_v41 = vadd.f32 %v8599_v62, %v8598_v59  ;;  %8047 = vst.msk [vmem:[#allocation7 + $0x28] sm:$0xff] %vm3835_vm12, %v8031_v52  ;;  %v7845_v43 = vadd.f32 %v8717_v46, %v7684_v3  ;;  %v7836_v7 = vpop.f32.mrb[113].mxu0  ;;  %v8059_v48 = vld [vmem:[#allocation7 + $0x10] sm:$0xff] }
 0x72f   : > { %8046 = vst.msk [vmem:[#allocation7 + $0x20] sm:$0xff] %vm3835_vm12, %v8030_v38  ;;  %v7837_v49 = vadd.f32 %v7836_v7, %v12222_v1  ;;  %v8718_v8 = vpop.f32.mrb[114].mxu0  ;;  %v8076_v9 = vmax.f32 %v8059_v48, %v8068_v63 }
 0x730   : > { %v7695_v18 = vadd.f32 %v8600_v41, %v12141_v10  ;;  %v7917_v27 = vmax.f32 %v7845_v43, 0.0  ;;  %v7848_v35 = vadd.f32 %v8718_v8, %v7687_v4  ;;  %v7839_v32 = vpop.f32.mrb[115].mxu0 }
 0x731   : > { %v7915_v47 = vmax.f32 %v7837_v49, 0.0  ;;  %v7840_v28 = vadd.f32 %v7839_v32, %v12227_v30  ;;  %8084 = vst.msk [vmem:[%s12256_s6 + $0x8] sm:$0xff] %vm3835_vm12, %v8076_v9 }
 0x732   : > { %7949 = vst.msk [vmem:[#allocation6 + $0x90] sm:$0xff] %vm3835_vm12, %v7917_v27  ;;  %v7918_v3 = vmax.f32 %v7848_v35, 0.0 }
 0x733   : > { %v7977_v6 = vld [vmem:[#allocation6 + $0x70] ss:$2 sm:$0xff]  ;;  %v8009_v60 = vld [vmem:[#allocation6 + $0x71] ss:$2 sm:$0xff]  ;;  %7947 = vst.msk [vmem:[#allocation6 + $0x80] sm:$0xff] %vm3835_vm12, %v7915_v47  ;;  %v7916_v1 = vmax.f32 %v7840_v28, 0.0 }
 0x734   : > { %v8033_v23 = vmax.f32 %v7977_v6, %v8009_v60  ;;  %v7975_v53 = vld [vmem:[#allocation6 + $0x60] ss:$2 sm:$0xff]  ;;  %v8007_v10 = vld [vmem:[#allocation6 + $0x61] ss:$2 sm:$0xff]  ;;  %7950 = vst.msk [vmem:[#allocation6 + $0x98] sm:$0xff] %vm3835_vm12, %v7918_v3 }
 0x735   : > { %v8032_v4 = vmax.f32 %v7975_v53, %v8007_v10  ;;  %7948 = vst.msk [vmem:[#allocation6 + $0x88] sm:$0xff] %vm3835_vm12, %v7916_v1  ;;  %v8601_v12 = vpop.f32.mrb[108].mxu1  ;;  %v8721_v30 = vpop.f32.mrb[116].mxu0  ;;  %v8069_v55 = vld [vmem:[#allocation7 + $0x28] sm:$0xff] }
 0x736   : > { %8049 = vst.msk [vmem:[#allocation7 + $0x38] sm:$0xff] %vm3835_vm12, %v8033_v23  ;;  %v8602_v57 = vpop.f32.mrb[109].mxu1  ;;  %v7852_v21 = vpop.f32.mrb[117].mxu0  ;;  %v8060_v25 = vld [vmem:[#allocation7 + $0x20] sm:$0xff] }
 0x737   : > { %8048 = vst.msk [vmem:[#allocation7 + $0x30] sm:$0xff] %vm3835_vm12, %v8032_v4  ;;  %v8603_v19 = vadd.f32 %v8602_v57, %v8601_v12  ;;  %v7853_v14 = vadd.f32 %v7852_v21, %v7692_v2  ;;  %v8604_v24 = vpop.f32.mrb[110].mxu1  ;;  %v8722_v26 = vpop.f32.mrb[118].mxu0  ;;  %v8077_v13 = vmax.f32 %v8060_v25, %v8069_v55 }
 0x738   : > { %v8605_v51 = vpop.f32.mrb[111].mxu1  ;;  %v7855_v5 = vpop.f32.mrb[119].mxu0 }
 0x739   : > { %v7700_v16 = vadd.f32 %v8603_v19, %v12153_v29  ;;  %v7919_v20 = vmax.f32 %v7853_v14, 0.0  ;;  %v8606_v44 = vadd.f32 %v8605_v51, %v8604_v24  ;;  %v7856_v31 = vadd.f32 %v7855_v5, %v7695_v18  ;;  %8085 = vst.msk [vmem:[%s12256_s6 + $0x10] sm:$0xff] %vm3835_vm12, %v8077_v13 }
 0x73b   : > { %v7981_v36 = vld [vmem:[#allocation6 + $0x90] ss:$2 sm:$0xff]  ;;  %v8013_v33 = vld [vmem:[#allocation6 + $0x91] ss:$2 sm:$0xff]  ;;  %v7861_v42 = vadd.f32 %v8721_v30, %v7700_v16  ;;  %7951 = vst.msk [vmem:[#allocation6 + $0xa0] sm:$0xff] %vm3835_vm12, %v7919_v20  ;;  %v7703_v17 = vadd.f32 %v8606_v44, %v12155_v45  ;;  %v7920_v0 = vmax.f32 %v7856_v31, 0.0 }
 0x73c   : > { %v8035_v39 = vmax.f32 %v7981_v36, %v8013_v33  ;;  %v7979_v11 = vld [vmem:[#allocation6 + $0x80] ss:$2 sm:$0xff]  ;;  %v8011_v59 = vld [vmem:[#allocation6 + $0x81] ss:$2 sm:$0xff] }
 0x73d   : > { %v8034_v52 = vmax.f32 %v7979_v11, %v8011_v59  ;;  %v7921_v61 = vmax.f32 %v7861_v42, 0.0  ;;  %v7864_v29 = vadd.f32 %v8722_v26, %v7703_v17  ;;  %7952 = vst.msk [vmem:[#allocation6 + $0xa8] sm:$0xff] %vm3835_vm12, %v7920_v0  ;;  %v8725_v22 = vpop.f32.mrb[120].mxu0  ;;  %v8070_v62 = vld [vmem:[#allocation7 + $0x38] sm:$0xff] }
 0x73e   : > { %8051 = vst.msk [vmem:[#allocation7 + $0x48] sm:$0xff] %vm3835_vm12, %v8035_v39  ;;  %v7868_v38 = vpop.f32.mrb[121].mxu0  ;;  %v8061_v41 = vld [vmem:[#allocation7 + $0x30] sm:$0xff] }
 0x73f   : > { %8050 = vst.msk [vmem:[#allocation7 + $0x40] sm:$0xff] %vm3835_vm12, %v8034_v52  ;;  %7953 = vst.msk [vmem:[#allocation6 + $0xb0] sm:$0xff] %vm3835_vm12, %v7921_v61  ;;  %v7922_v45 = vmax.f32 %v7864_v29, 0.0  ;;  %v8726_v46 = vpop.f32.mrb[122].mxu0  ;;  %v8078_v2 = vmax.f32 %v8061_v41, %v8070_v62 }
 0x740   : > { %v7871_v63 = vpop.f32.mrb[123].mxu0 }
 0x741   : > { %7954 = vst.msk [vmem:[#allocation6 + $0xb8] sm:$0xff] %vm3835_vm12, %v7922_v45  ;;  %v8607_v43 = vpop.f32.mrb[112].mxu1  ;;  %8086 = vst.msk [vmem:[%s12256_s6 + $0x18] sm:$0xff] %vm3835_vm12, %v8078_v2 }
 0x742   : > { %v8608_v7 = vpop.f32.mrb[113].mxu1 }
 0x743   : > { %v8609_v48 = vadd.f32 %v8608_v7, %v8607_v43  ;;  %v8610_v49 = vpop.f32.mrb[114].mxu1 }
 0x744   : > { %v7983_v8 = vld [vmem:[#allocation6 + $0xa0] ss:$2 sm:$0xff]  ;;  %v8015_v18 = vld [vmem:[#allocation6 + $0xa1] ss:$2 sm:$0xff]  ;;  %v8611_v9 = vpop.f32.mrb[115].mxu1 }
 0x745   : > { %v8036_v27 = vmax.f32 %v7983_v8, %v8015_v18  ;;  %v7708_v35 = vadd.f32 %v8609_v48, %v12167_v56  ;;  %v8612_v32 = vadd.f32 %v8611_v9, %v8610_v49  ;;  %v12291_v47 = vpop.f32.mrb[124].mxu0  ;;  %v8071_v28 = vld [vmem:[#allocation7 + $0x48] sm:$0xff] }
 0x746   : > { %v7884_v3 = vpop.f32.mrb[125].mxu0  ;;  %v8062_v6 = vld [vmem:[#allocation7 + $0x40] sm:$0xff] }
 0x747   : > { %8052 = vst.msk [vmem:[#allocation7 + $0x50] sm:$0xff] %vm3835_vm12, %v8036_v27  ;;  %v7869_v60 = vadd.f32 %v7868_v38, %v7708_v35  ;;  %v7711_v1 = vadd.f32 %v8612_v32, %v12169_v15  ;;  %v12295_v23 = vpop.f32.mrb[126].mxu0  ;;  %v8079_v53 = vmax.f32 %v8062_v6, %v8071_v28 }
 0x748   : > { %v7985_v10 = vld [vmem:[#allocation6 + $0xb0] ss:$2 sm:$0xff]  ;;  %v8017_v4 = vld [vmem:[#allocation6 + $0xb1] ss:$2 sm:$0xff]  ;;  %v7887_v12 = vpop.f32.mrb[127].mxu0 }
 0x749   : > { %v8037_v30 = vmax.f32 %v7985_v10, %v8017_v4  ;;  %v7923_v56 = vmax.f32 %v7869_v60, 0.0  ;;  %v7872_v55 = vadd.f32 %v7871_v63, %v7711_v1  ;;  %8087 = vst.msk [vmem:[%s12256_s6 + $0x20] sm:$0xff] %vm3835_vm12, %v8079_v53 }
 0x74b   : > { %8053 = vst.msk [vmem:[#allocation7 + $0x58] sm:$0xff] %vm3835_vm12, %v8037_v30  ;;  %7955 = vst.msk [vmem:[#allocation6 + $0xc0] sm:$0xff] %vm3835_vm12, %v7923_v56  ;;  %v7924_v57 = vmax.f32 %v7872_v55, 0.0 }
 0x74d   : > { %7956 = vst.msk [vmem:[#allocation6 + $0xc8] sm:$0xff] %vm3835_vm12, %v7924_v57  ;;  %v8613_v21 = vpop.f32.mrb[116].mxu1 }
 0x74e   : > { %v8614_v15 = vpop.f32.mrb[117].mxu1  ;;  %v8063_v13 = vld [vmem:[#allocation7 + $0x50] sm:$0xff] }
 0x74f   : > { %v8615_v25 = vadd.f32 %v8614_v15, %v8613_v21  ;;  %v8616_v19 = vpop.f32.mrb[118].mxu1 }
 0x750   : > { %v8617_v14 = vpop.f32.mrb[119].mxu1 }
 0x751   : > { %v7716_v24 = vadd.f32 %v8615_v25, %v12181_v58  ;;  %v8618_v26 = vadd.f32 %v8617_v14, %v8616_v19 }
 0x752   : > { %v8072_v51 = vld [vmem:[#allocation7 + $0x58] sm:$0xff] }
 0x753   : > { %v7877_v5 = vadd.f32 %v8725_v22, %v7716_v24  ;;  %v7719_v16 = vadd.f32 %v8618_v26, %v12183_v40  ;;  %v8080_v20 = vmax.f32 %v8063_v13, %v8072_v51 }
 0x754   : > { %v7987_v44 = vld [vmem:[#allocation6 + $0xc0] ss:$2 sm:$0xff]  ;;  %v8019_v31 = vld [vmem:[#allocation6 + $0xc1] ss:$2 sm:$0xff] }
 0x755   : > { %v8038_v36 = vmax.f32 %v7987_v44, %v8019_v31  ;;  %v7925_v33 = vmax.f32 %v7877_v5, 0.0  ;;  %v7880_v42 = vadd.f32 %v8726_v46, %v7719_v16  ;;  %8088 = vst.msk [vmem:[%s12256_s6 + $0x28] sm:$0xff] %vm3835_vm12, %v8080_v20 }
 0x757   : > { %8054 = vst.msk [vmem:[#allocation7 + $0x60] sm:$0xff] %vm3835_vm12, %v8038_v36  ;;  %7957 = vst.msk [vmem:[#allocation6 + $0xd0] sm:$0xff] %vm3835_vm12, %v7925_v33  ;;  %v7926_v17 = vmax.f32 %v7880_v42, 0.0 }
 0x759   : > { %7958 = vst.msk [vmem:[#allocation6 + $0xd8] sm:$0xff] %vm3835_vm12, %v7926_v17  ;;  %v8619_v58 = vpop.f32.mrb[120].mxu1 }
 0x75a   : > { %v8620_v0 = vpop.f32.mrb[121].mxu1 }
 0x75b   : > { %v8621_v39 = vadd.f32 %v8620_v0, %v8619_v58  ;;  %v8622_v11 = vpop.f32.mrb[122].mxu1 }
 0x75c   : > { %v8623_v40 = vpop.f32.mrb[123].mxu1 }
 0x75d   : > { %v8624_v59 = vadd.f32 %v8623_v40, %v8622_v11  ;;  %v7724_v52 = vadd.f32 %v8621_v39, %v12195_v50 }
 0x75e   : > { %v8064_v49 = vld [vmem:[#allocation7 + $0x60] sm:$0xff] }
 0x75f   : > { %v7885_v61 = vadd.f32 %v7884_v3, %v7724_v52  ;;  %v7727_v29 = vadd.f32 %v8624_v59, %v12197_v54 }
 0x760   : > { %v7989_v22 = vld [vmem:[#allocation6 + $0xd0] ss:$2 sm:$0xff]  ;;  %v8021_v62 = vld [vmem:[#allocation6 + $0xd1] ss:$2 sm:$0xff] }
 0x761   : > { %v8039_v38 = vmax.f32 %v7989_v22, %v8021_v62  ;;  %v7927_v41 = vmax.f32 %v7885_v61, 0.0  ;;  %v7888_v45 = vadd.f32 %v7887_v12, %v7727_v29 }
 0x763   : > { %8055 = vst.msk [vmem:[#allocation7 + $0x68] sm:$0xff] %vm3835_vm12, %v8039_v38  ;;  %7959 = vst.msk [vmem:[#allocation6 + $0xe0] sm:$0xff] %vm3835_vm12, %v7927_v41  ;;  %v7928_v46 = vmax.f32 %v7888_v45, 0.0 }
 0x765   : > { %7960 = vst.msk [vmem:[#allocation6 + $0xe8] sm:$0xff] %vm3835_vm12, %v7928_v46  ;;  %v8625_v2 = vpop.f32.mrb[124].mxu1 }
 0x766   : > { %v8626_v63 = vpop.f32.mrb[125].mxu1 }
 0x767   : > { %v8627_v43 = vadd.f32 %v8626_v63, %v8625_v2  ;;  %v8628_v50 = vpop.f32.mrb[126].mxu1 }
 0x768   : > { %v8629_v7 = vpop.f32.mrb[127].mxu1 }
 0x769   : > { %v7732_v54 = vadd.f32 %v8627_v43, %v12209_v34  ;;  %v8630_v48 = vadd.f32 %v8629_v7, %v8628_v50 }
 0x76a   : > { %v8073_v8 = vld [vmem:[#allocation7 + $0x68] sm:$0xff] }
 0x76b   : > { %v7893_v18 = vadd.f32 %v12291_v47, %v7732_v54  ;;  %v7735_v9 = vadd.f32 %v8630_v48, %v12211_v37  ;;  %v8081_v27 = vmax.f32 %v8064_v49, %v8073_v8 }
 0x76c   : > { %v7991_v35 = vld [vmem:[#allocation6 + $0xe0] ss:$2 sm:$0xff]  ;;  %v8023_v32 = vld [vmem:[#allocation6 + $0xe1] ss:$2 sm:$0xff] }
 0x76d   : > { %v8040_v28 = vmax.f32 %v7991_v35, %v8023_v32  ;;  %v7929_v3 = vmax.f32 %v7893_v18, 0.0  ;;  %v7896_v6 = vadd.f32 %v12295_v23, %v7735_v9  ;;  %8089 = vst.msk [vmem:[%s12256_s6 + $0x30] sm:$0xff] %vm3835_vm12, %v8081_v27 }
 0x76f   : > { %8056 = vst.msk [vmem:[#allocation7 + $0x70] sm:$0xff] %vm3835_vm12, %v8040_v28  ;;  %7961 = vst.msk [vmem:[#allocation6 + $0xf0] sm:$0xff] %vm3835_vm12, %v7929_v3  ;;  %v7930_v34 = vmax.f32 %v7896_v6, 0.0 }
 0x771   : > { %7962 = vst.msk [vmem:[#allocation6 + $0xf8] sm:$0xff] %vm3835_vm12, %v7930_v34 }
 0x776   : > { %v8065_v1 = vld [vmem:[#allocation7 + $0x70] sm:$0xff] }
 0x778   : > { %v7993_v37 = vld [vmem:[#allocation6 + $0xf0] ss:$2 sm:$0xff]  ;;  %v8025_v47 = vld [vmem:[#allocation6 + $0xf1] ss:$2 sm:$0xff] }
 0x779   : > { %v8041_v60 = vmax.f32 %v7993_v37, %v8025_v47 }
 0x77b   : > { %8057 = vst.msk [vmem:[#allocation7 + $0x78] sm:$0xff] %vm3835_vm12, %v8041_v60 }
 0x782   : > { %v8074_v23 = vld [vmem:[#allocation7 + $0x78] sm:$0xff] }
 0x783   : > { %v8082_v53 = vmax.f32 %v8065_v1, %v8074_v23 }
 0x785   : > { %8090 = vst.msk [vmem:[%s12256_s6 + $0x38] sm:$0xff] %vm3835_vm12, %v8082_v53 }
 0x786   : > { %8869 = shalt.err (!%p8866_p3)
}
 0x787   : > { %s8870_s25 = scalar_lea.hbm %s12329_s10, 1024  ;;  %s8874_s8 = scalar_lea.hbm %s12384_s5, 2048 }
 0x788   : > { %p8871_p4 = scmp.ne.s32.totalorder %s12329_s10, %s8870_s25  ;;  %p8875_p9 = scmp.lt.u32.totalorder %s12329_s10, %s12384_s5 }
 0x789   : > { %p8876_p10 = scmp.lt.u32.totalorder %s8874_s8, %s8870_s25  ;;  %p8878_p12 = scmp.lt.u32.totalorder %s8870_s25, %s12329_s10 }
 0x78a   : > { %p8872_p7 = pnand %p8871_p4, %p9015_p5 }
 0x78b   : > { %p8877_p11 = por %p8876_p10, %p8875_p9 }
 0x78c   : > { %p8873_p8 = pneg %p8872_p7 }
 0x78d   : > { %p8879_p13 = por %p8878_p12, %p8877_p11 }
 0x78f   : > { %p8880_p0 = pnand %p8879_p13, %p8873_p8 }
 0x791   : > { %8883 = shalt.err (!%p8880_p0)
}
 0x792   : > { %s8946_s13 = smov 128  }
 0x793   : > { %8732 = dma.vmem_to_hbm [thread:$0]  (%p9015_p5), %s12331_s16, 1024, %s12329_s10, %s12337_s12, %s8946_s13, %s8946_s13, %s8922_s11  }
 0x794 PF: > { %p8738_p1 = scmp.ge.s32.totalorder %s8918_s21, 2  ;;  %s8120_s26 = sand.u32 1, %s8906_s18  }
 0x795   : > { %s8121_s7 = scalar_lea.sflag [#allocation9], %s8120_s26 }
 0x796   : > { %p8735_p2 = pnand %p8738_p1, %p9019_p6 }
 0x798   : > { %8901 = dma.done.wait (!%p8735_p2), %s8121_s7, 1024  }
 0x799   : > { %8903 = vsyncadd (!%p8735_p2), %s8121_s7, 4294966272  ;;  %p15_p3 = scmp.ge.s32.totalorder %s9002_s24, 4   ;;  %s12443_s18 = smov %s8910_s19 }
 0x79a   : > { %s12444_s19 = smov %s8914_s20  ;;  %s12445_s20 = smov %s9013_s27 }
 0x79b   : > { %s12446_s21 = smov %s9002_s24  ;;  %17 = sbr.rel (!%p15_p3) target bundleno = 3 (0x3), region = 115 }
 0x7a2   :  { %8126 = vsyncpa [#allocation9], 1 }
 0x7a3   :  { %8128 = vsyncpa [#allocation9 + $0x1], 1 }

</bundles_post_ra>
